<compile_context>
chip_gen: v7x
topology: tpu7x:2x2x1
jax: 0.10.0
libtpu: 0.0.40
codegen_flags: <defaults>
</compile_context>

<pallas_src>
import functools

import jax
import jax.numpy as jnp
from jax.experimental import pallas as pl
from jax.experimental.pallas import tpu as pltpu

LATENT = 20                       # latent dimension of the VAE
OUT_CH = 3                        # final ConvTranspose2d output channels
LANE = 128                        # TPU lane width used for lane-dense padding
CP3 = 32                          # convt3 output-channel padding (3 -> 32)
_VMEM_LIMIT = 32 * 1024 * 1024    # explicit scoped-VMEM limit


def _full_spec(shape):
    nd = len(shape)
    return pl.BlockSpec(tuple(shape), lambda i, _nd=nd: (0,) * _nd)


# ----------------------------------------------------------------------------
# Kernel 1: encoder + latent + reparameterize + decoder_fc/convt1 + convt2
# ----------------------------------------------------------------------------
def _vae_core_kernel(x_ref, w1_ref, b1_ref, w2_ref, b2_ref, w3_ref, b3_ref,
                     wlat_ref, blat_ref, eps_ref, wcomb_ref, bcomb_ref,
                     wt2_ref, bt2_ref, mu_ref, lv_ref, u_ref, *, batch):
    f32, bf16 = jnp.float32, jnp.bfloat16

    def mm(a, w_ref):
        return jnp.dot(a, w_ref[...], preferred_element_type=f32)

    # --- conv1 (k=2,s=2, 3->32) as block-diag matmul over the 16 pixel
    # positions of a conv3 cell; rows = (conv3 cell, batch). ---
    h1 = jnp.maximum(mm(x_ref[...], w1_ref) + b1_ref[...], 0.0).astype(bf16)

    # --- conv2 (k=2,s=2, 32->64) + BatchNorm2d(64) (training-mode batch stats
    # computed in-kernel) + ReLU.  Columns are 4 pixel groups x 64 channels. ---
    h2 = mm(h1, w2_ref) + b2_ref[...]                     # (16*B, 256) f32
    count = 4.0 * h2.shape[0]                             # = B * 8 * 8
    s1 = jnp.sum(h2, axis=0, keepdims=True)
    s2 = jnp.sum(h2 * h2, axis=0, keepdims=True)

    def fold(s):                                          # 4 pixel groups -> 64 ch
        return s[:, 0:64] + s[:, 64:128] + s[:, 128:192] + s[:, 192:256]

    mean = fold(s1) / count
    var = fold(s2) / count - mean * mean
    inv = jax.lax.rsqrt(var + 1e-5)
    mean4 = jnp.concatenate([mean] * 4, axis=1)
    inv4 = jnp.concatenate([inv] * 4, axis=1)
    h2 = jnp.maximum((h2 - mean4) * inv4, 0.0).astype(bf16)

    # --- conv3 (k=2,s=2, 64->128) + ReLU ---
    h3 = jnp.maximum(mm(h2, w3_ref) + b3_ref[...], 0.0).astype(bf16)  # (16*B,128)

    # --- flatten + fc_mu / fc_log_var: contract the 16 spatial rows per item ---
    acc = jnp.zeros((batch, 2 * LANE), f32)
    for pix in range(16):
        acc = acc + jnp.dot(h3[pix * batch:(pix + 1) * batch, :], wlat_ref[pix],
                            preferred_element_type=f32)
    lat = acc + blat_ref[...]
    mu = lat[:, 0:LANE]
    lv = lat[:, LANE:2 * LANE]
    mu_ref[...] = mu
    lv_ref[...] = lv

    # --- reparameterize (f32 elementwise) ---
    z = (mu + eps_ref[...] * jnp.exp(0.5 * lv)).astype(bf16)          # (B, 128)

    # --- decoder_fc + convt1 (weights pre-folded, no nonlinearity between) ---
    hp = [jnp.maximum(jnp.dot(z, wcomb_ref[pix], preferred_element_type=f32)
                      + bcomb_ref[pix], 0.0).astype(bf16)
          for pix in range(16)]                                        # (B, 256)
    h = jnp.concatenate(hp, axis=0)                                    # (16*B,256)

    # --- convt2 (per-pixel matmul, block-expanded) + ReLU ---
    u = jnp.maximum(mm(h, wt2_ref) + bt2_ref[...], 0.0)
    u_ref[...] = u.astype(u_ref.dtype)


def _vae_core_call(xp, params, eps_pad, batch):
    operands = [xp, params["w1e"], params["b1e"], params["w2e"], params["b2e"],
                params["w3m"], params["b3m"], params["wlat"], params["blat"],
                eps_pad, params["wcomb"], params["bcomb"], params["wt2e"],
                params["bt2"]]
    return pl.pallas_call(
        functools.partial(_vae_core_kernel, batch=batch),
        grid=(1,),
        in_specs=[_full_spec(a.shape) for a in operands],
        out_specs=(_full_spec((batch, LANE)),
                   _full_spec((batch, LANE)),
                   _full_spec((16 * batch, 512))),
        out_shape=(jax.ShapeDtypeStruct((batch, LANE), jnp.float32),
                   jax.ShapeDtypeStruct((batch, LANE), jnp.float32),
                   jax.ShapeDtypeStruct((16 * batch, 512), jnp.bfloat16)),
        compiler_params=pltpu.CompilerParams(
            dimension_semantics=("arbitrary",),
            vmem_limit_bytes=_VMEM_LIMIT),
    )(*operands)


# ----------------------------------------------------------------------------
# Kernel 2: ConvTranspose2d(32->3, k=3, s=2) + Sigmoid as parity matmuls
# ----------------------------------------------------------------------------
def _convt3_kernel(x_ref, wee0_ref, wee2_ref, weo0_ref, weo2_ref,
                   woe1_ref, woo1_ref, b_ref, o_ref):
    x = x_ref[0]                       # (18, 576) bf16: padded rows, lanes=W*C
    x_top = x[1:18, :]                 # input rows used by taps ky=0 and ky=1
    x_bot = x[0:17, :]                 # input rows used by tap  ky=2

    def mm(lhs, w_ref):
        return jnp.dot(lhs, w_ref[...], preferred_element_type=jnp.float32)

    bias = b_ref[...]
    ee = mm(x_top, wee0_ref) + mm(x_bot, wee2_ref)      # even rows, even cols
    eo = mm(x_top, weo0_ref) + mm(x_bot, weo2_ref)      # even rows, odd cols
    oe = mm(x_top, woe1_ref)                            # odd rows, even cols
    oo = mm(x_top, woo1_ref)                            # odd rows, odd cols
    o_ref[0, 0] = jax.nn.sigmoid(ee + bias)
    o_ref[0, 1] = jax.nn.sigmoid(eo + bias)
    o_ref[0, 2] = jax.nn.sigmoid(oe + bias)
    o_ref[0, 3] = jax.nn.sigmoid(oo + bias)


def _convt3_call(u_pad, params, batch):
    npar = 17 * CP3
    w_spec = pl.BlockSpec((18 * 32, npar), lambda b: (0, 0))
    return pl.pallas_call(
        _convt3_kernel,
        grid=(batch,),
        in_specs=[pl.BlockSpec((1, 18, 18 * 32), lambda b: (b, 0, 0)),
                  w_spec, w_spec, w_spec, w_spec, w_spec, w_spec,
                  pl.BlockSpec((1, npar), lambda b: (0, 0))],
        out_specs=pl.BlockSpec((1, 4, 17, npar), lambda b: (b, 0, 0, 0)),
        out_shape=jax.ShapeDtypeStruct((batch, 4, 17, npar), jnp.float32),
        compiler_params=pltpu.CompilerParams(
            dimension_semantics=("parallel",),
            vmem_limit_bytes=_VMEM_LIMIT),
    )(u_pad, params["w3_ee0"], params["w3_ee2"], params["w3_eo0"],
      params["w3_eo2"], params["w3_oe1"], params["w3_oo1"], params["b3vec"])


# ----------------------------------------------------------------------------
# Parameters: PyTorch-layout init + one-time kernel-ready preparation
# ----------------------------------------------------------------------------
def init_params(key):
    ks = iter(jax.random.split(key, 20))

    def rnd(shape, scale=0.05):
        return jax.random.normal(next(ks), shape, jnp.float32) * scale

    return {
        # encoder convs (PyTorch [Cout, Cin, kh, kw])
        "conv1_w": rnd((32, 3, 2, 2)), "conv1_b": rnd((32,)),
        "conv2_w": rnd((64, 32, 2, 2)), "conv2_b": rnd((64,)),
        "conv3_w": rnd((128, 64, 2, 2)), "conv3_b": rnd((128,)),
        # linear layers (PyTorch [out, in])
        "fc_mu_w": rnd((LATENT, 128 * 4 * 4)), "fc_mu_b": rnd((LATENT,)),
        "fc_lv_w": rnd((LATENT, 128 * 4 * 4)), "fc_lv_b": rnd((LATENT,)),
        "dec_fc_w": rnd((128 * 4 * 4, LATENT)), "dec_fc_b": rnd((128 * 4 * 4,)),
        # decoder transposed convs (PyTorch [Cin, Cout, kh, kw])
        "convt1_w": rnd((128, 64, 2, 2)), "convt1_b": rnd((64,)),
        "convt2_w": rnd((64, 32, 2, 2)), "convt2_b": rnd((32,)),
        "convt3_w": rnd((32, 3, 3, 3)), "convt3_b": rnd((3,)),
    }


def prepare_params(p):
    """One-time conversion of PyTorch-layout weights into kernel layouts:
    block-diagonal pixel-expanded conv weights, flatten re-orderings,
    decoder_fc folded into convt1, block-Toeplitz convt3 weights, bf16 casts."""
    f32, bf16 = jnp.float32, jnp.bfloat16

    def conv_mat(w):                 # [Cout,Cin,kh,kw] -> [(ky,kx,cin), Cout]
        co, ci, kh, kw = w.shape
        return jnp.transpose(w, (2, 3, 1, 0)).reshape(kh * kw * ci, co).astype(f32)

    w1m = conv_mat(p["conv1_w"])                      # (12, 32)
    w2m = conv_mat(p["conv2_w"])                      # (128, 64)
    w3m = conv_mat(p["conv3_w"])                      # (256, 128)

    # encoder convs as block-diagonal matmuls over the 16 / 4 pixel positions
    # of one conv3 cell (keeps one 8x8 input patch = one matmul row end-to-end)
    w1e = jnp.kron(jnp.eye(16, dtype=f32), w1m)       # (192, 512)
    w2e = jnp.kron(jnp.eye(4, dtype=f32), w2m)        # (512, 256)
    b1e = jnp.tile(p["conv1_b"], 16).reshape(1, 512).astype(f32)
    b2e = jnp.tile(p["conv2_b"], 4).reshape(1, 256).astype(f32)
    b3e = p["conv3_b"].reshape(1, 128).astype(f32)

    # fc_mu / fc_log_var: re-order the 2048 inputs from NCHW-flatten (c*16+p)
    # to (pixel p, channel c) blocks; outputs padded lane-dense (mu in [:20],
    # log_var in [128:148]).
    def fc_enc(w):                                    # (20,2048) -> (16,128,20)
        return jnp.transpose(w.reshape(LATENT, 128, 16), (2, 1, 0)).astype(f32)

    wlat = jnp.zeros((16, 128, 2 * LANE), f32)
    wlat = wlat.at[:, :, :LATENT].set(fc_enc(p["fc_mu_w"]))
    wlat = wlat.at[:, :, LANE:LANE + LATENT].set(fc_enc(p["fc_lv_w"]))
    blat = jnp.zeros((1, 2 * LANE), f32)
    blat = blat.at[0, :LATENT].set(p["fc_mu_b"])
    blat = blat.at[0, LANE:LANE + LATENT].set(p["fc_lv_b"])

    # decoder_fc folded into convt1 (no nonlinearity between them in the spec)
    wt1m = jnp.transpose(p["convt1_w"], (0, 2, 3, 1)).reshape(128, 256).astype(f32)
    bt1 = jnp.tile(p["convt1_b"], 4).astype(f32)                       # (256,)
    wdec = jnp.transpose(p["dec_fc_w"].reshape(128, 16, LATENT), (1, 2, 0))
    bdec = jnp.transpose(p["dec_fc_b"].reshape(128, 16), (1, 0)).astype(f32)
    wdec_pad = jnp.zeros((16, LANE, 128), f32).at[:, :LATENT, :].set(wdec)
    wcomb = jnp.einsum("pnc,cm->pnm", wdec_pad, wt1m)                  # (16,128,256)
    bcomb = jnp.einsum("pc,cm->pm", bdec, wt1m) + bt1[None, :]         # (16,256)

    # convt2 as a per-pixel matmul, block-expanded over the convt1 (dy1,dx1)
    wt2m = jnp.transpose(p["convt2_w"], (0, 2, 3, 1)).reshape(64, 128).astype(f32)
    wt2e = jnp.kron(jnp.eye(4, dtype=f32), wt2m)                       # (256, 512)
    bt2 = jnp.tile(p["convt2_b"], 16).reshape(1, 512).astype(f32)

    # convt3 (k=3,s=2): block-Toeplitz weights, one per (row tap ky, col parity);
    # Cout padded 3 -> 32 so every parity plane stores densely.
    w3t = p["convt3_w"]                                                # (32,3,3,3)

    def tap(ky, kx):
        return jnp.zeros((32, CP3), f32).at[:, :OUT_CH].set(w3t[:, :, ky, kx])

    def toeplitz(ky, odd_cols):
        w = jnp.zeros((18 * 32, 17 * CP3), f32)
        for c in range(17):
            if odd_cols:
                w = w.at[(c + 1) * 32:(c + 2) * 32, c * CP3:(c + 1) * CP3].set(tap(ky, 1))
            else:
                w = w.at[(c + 1) * 32:(c + 2) * 32, c * CP3:(c + 1) * CP3].set(tap(ky, 0))
                w = w.at[c * 32:(c + 1) * 32, c * CP3:(c + 1) * CP3].set(tap(ky, 2))
        return w.astype(bf16)

    b3vec = jnp.tile(jnp.zeros((CP3,), f32).at[:OUT_CH].set(p["convt3_b"]), 17)

    return {
        "w1e": w1e.astype(bf16), "b1e": b1e,
        "w2e": w2e.astype(bf16), "b2e": b2e,
        "w3m": w3m.astype(bf16), "b3m": b3e,
        "wlat": wlat.astype(bf16), "blat": blat,
        "wcomb": wcomb.astype(bf16), "bcomb": bcomb.reshape(16, 1, 2 * LANE),
        "wt2e": wt2e.astype(bf16), "bt2": bt2,
        "w3_ee0": toeplitz(0, False), "w3_ee2": toeplitz(2, False),
        "w3_eo0": toeplitz(0, True), "w3_eo2": toeplitz(2, True),
        "w3_oe1": toeplitz(1, False), "w3_oo1": toeplitz(1, True),
        "b3vec": b3vec.reshape(1, 17 * CP3),
    }


# ----------------------------------------------------------------------------
# VAE forward
# ----------------------------------------------------------------------------
def vae_forward(params, x_nchw, eps):
    """Returns (reconstruction [B,3,33,33] NCHW f32, mu [B,20], log_var [B,20])."""
    B = x_nchw.shape[0]

    # Encoder input prep (one XLA transpose of the 12 KB input): rows are
    # (conv3 cell i3, j3, batch); columns are that cell's 8x8x3 receptive
    # field in (a2,b2,a1,b1,ky,kx,cin) order, matching the block-diag weights.
    xp = x_nchw.reshape(B, 3, 4, 2, 2, 2, 4, 2, 2, 2)
    xp = jnp.transpose(xp, (2, 6, 0, 3, 7, 4, 8, 5, 9, 1))
    xp = xp.reshape(16 * B, 192).astype(jnp.bfloat16)

    eps_pad = jnp.pad(eps.astype(jnp.float32), ((0, 0), (0, LANE - LATENT)))

    mu_pad, lv_pad, u = _vae_core_call(xp, params, eps_pad, B)
    mu = mu_pad[:, :LATENT]
    log_var = lv_pad[:, :LATENT]

    # Decoder layout glue (XLA, ~16 KB): un-nest the (cell, dy1, dy2) ordering
    # to a plain 16x16 NHWC map, add the k=3 zero halo, flatten W*C to lanes.
    # TODO(synk): fold this un-nest into the convt3 kernel's weight layout.
    u = u.reshape(4, 4, B, 2, 2, 2, 2, 32)
    u = jnp.transpose(u, (2, 0, 3, 5, 1, 4, 6, 7)).reshape(B, 16, 16, 32)
    u = jnp.pad(u, ((0, 0), (1, 1), (1, 1), (0, 0)))
    u = u.reshape(B, 18, 18 * 32)

    par = _convt3_call(u, params, B)                       # (B, 4, 17, 17*32)

    # Single interleave of the 4 parity planes -> (B, 33, 33, 3) -> NCHW.
    par = par.reshape(B, 2, 2, 17, 17, CP3)[..., :OUT_CH]
    r = jnp.transpose(par, (0, 3, 1, 4, 2, 5)).reshape(B, 34, 34, OUT_CH)
    recon = jnp.transpose(r[:, :33, :33, :], (0, 3, 1, 2))
    return recon, mu, log_var


# ----------------------------------------------------------------------------
# Pure-JAX f32 reference of the PyTorch module (for a numeric check)
# ----------------------------------------------------------------------------
def vae_reference(raw, x_nchw, eps):
    f32 = jnp.float32
    x = jnp.transpose(x_nchw, (0, 2, 3, 1)).astype(f32)

    def conv_k2s2(x, w, b):
        bsz, hh, ww, cc = x.shape
        xr = x.reshape(bsz, hh // 2, 2, ww // 2, 2, cc)
        return jnp.einsum("bpqrsc,ocqs->bpro", xr, w) + b

    h = jax.nn.relu(conv_k2s2(x, raw["conv1_w"], raw["conv1_b"]))
    h = conv_k2s2(h, raw["conv2_w"], raw["conv2_b"])
    mean = h.mean(axis=(0, 1, 2))
    var = h.var(axis=(0, 1, 2))
    h = jax.nn.relu((h - mean) / jnp.sqrt(var + 1e-5))
    h = jax.nn.relu(conv_k2s2(h, raw["conv3_w"], raw["conv3_b"]))
    flat = jnp.transpose(h, (0, 3, 1, 2)).reshape(h.shape[0], -1)
    mu = flat @ raw["fc_mu_w"].T + raw["fc_mu_b"]
    lv = flat @ raw["fc_lv_w"].T + raw["fc_lv_b"]
    z = mu + eps * jnp.exp(0.5 * lv)
    d = z @ raw["dec_fc_w"].T + raw["dec_fc_b"]
    d = jnp.transpose(d.reshape(-1, 128, 4, 4), (0, 2, 3, 1))

    def convt_k2s2(x, w, b):
        bsz, hh, ww, _ = x.shape
        t = jnp.einsum("bhwi,iojk->bhjwko", x, w)
        return t.reshape(bsz, 2 * hh, 2 * ww, w.shape[1]) + b

    u = jax.nn.relu(convt_k2s2(d, raw["convt1_w"], raw["convt1_b"]))
    u = jax.nn.relu(convt_k2s2(u, raw["convt2_w"], raw["convt2_b"]))

    w3, b3 = raw["convt3_w"], raw["convt3_b"]
    bsz, hh, ww, _ = u.shape
    out = jnp.zeros((bsz, 2 * hh + 1, 2 * ww + 1, w3.shape[1]), f32)
    for ky in range(3):
        for kx in range(3):
            t = jnp.einsum("bhwc,co->bhwo", u, w3[:, :, ky, kx])
            out = out.at[:, ky:ky + 2 * hh:2, kx:kx + 2 * ww:2, :].add(t)
    out = jax.nn.sigmoid(out + b3)
    return jnp.transpose(out, (0, 3, 1, 2)), mu, lv


if __name__ == "__main__":
    key = jax.random.PRNGKey(0)
    k_params, k_x, k_eps = jax.random.split(key, 3)

    raw = init_params(k_params)
    params = prepare_params(raw)                            # one-time weight prep
    x = jax.random.normal(k_x, (2, 3, 32, 32), jnp.float32)  # NCHW like PyTorch
    eps = jax.random.normal(k_eps, (2, LATENT), jnp.float32)  # reparam noise

    recon, mu, log_var = jax.jit(vae_forward)(params, x, eps)
    jax.block_until_ready((recon, mu, log_var))

    assert recon.shape == (2, 3, 33, 33), recon.shape
    assert mu.shape == (2, LATENT) and log_var.shape == (2, LATENT)
    assert bool(jnp.all(jnp.isfinite(recon)))
    assert bool(jnp.all(jnp.isfinite(mu))) and bool(jnp.all(jnp.isfinite(log_var)))
    assert bool(jnp.all((recon >= 0.0) & (recon <= 1.0)))   # sigmoid output range

    # Numeric check against a pure-JAX f32 reference of the PyTorch module
    # (loose tolerances: the kernel uses bf16 MXU operands, reference is f32).
    r_ref, mu_ref, lv_ref = jax.jit(vae_reference)(raw, x, eps)
    err_mu = float(jnp.max(jnp.abs(mu - mu_ref)))
    err_lv = float(jnp.max(jnp.abs(log_var - lv_ref)))
    err_rc = float(jnp.max(jnp.abs(recon - r_ref)))
    assert err_mu < 0.1, f"mu mismatch {err_mu}"
    assert err_lv < 0.1, f"log_var mismatch {err_lv}"
    assert err_rc < 0.05, f"recon mismatch {err_rc}"

    print("KERNEL_OK")
</pallas_src>

<mosaic_0001>
module attributes {stable_mosaic.version = 11 : i64} {
  func.func @_vae_core_kernel(%arg0: i32, %arg1: memref<32x192xbf16, #tpu.memory_space<vmem>>, %arg2: memref<192x512xbf16, #tpu.memory_space<vmem>>, %arg3: memref<1x512xf32, #tpu.memory_space<vmem>>, %arg4: memref<512x256xbf16, #tpu.memory_space<vmem>>, %arg5: memref<1x256xf32, #tpu.memory_space<vmem>>, %arg6: memref<256x128xbf16, #tpu.memory_space<vmem>>, %arg7: memref<1x128xf32, #tpu.memory_space<vmem>>, %arg8: memref<16x128x256xbf16, #tpu.memory_space<vmem>>, %arg9: memref<1x256xf32, #tpu.memory_space<vmem>>, %arg10: memref<2x128xf32, #tpu.memory_space<vmem>>, %arg11: memref<16x128x256xbf16, #tpu.memory_space<vmem>>, %arg12: memref<16x1x256xf32, #tpu.memory_space<vmem>>, %arg13: memref<256x512xbf16, #tpu.memory_space<vmem>>, %arg14: memref<1x512xf32, #tpu.memory_space<vmem>>, %arg15: memref<2x128xf32, #tpu.memory_space<vmem>>, %arg16: memref<2x128xf32, #tpu.memory_space<vmem>>, %arg17: memref<32x512xbf16, #tpu.memory_space<vmem>>) attributes {dimension_semantics = [#tpu.dimension_semantics<arbitrary>], iteration_bounds = array<i64: 1>, scalar_prefetch = 0 : i64, scratch_operands = 0 : i64, tpu.core_type = #tpu.core_type<tc>, window_params = [{pipeline_mode = #tpu.pipeline_mode<synchronous>, transform_indices = @transform_0, window_bounds = array<i64: 32, 192>}, {pipeline_mode = #tpu.pipeline_mode<synchronous>, transform_indices = @transform_1, window_bounds = array<i64: 192, 512>}, {pipeline_mode = #tpu.pipeline_mode<synchronous>, transform_indices = @transform_2, window_bounds = array<i64: 1, 512>}, {pipeline_mode = #tpu.pipeline_mode<synchronous>, transform_indices = @transform_3, window_bounds = array<i64: 512, 256>}, {pipeline_mode = #tpu.pipeline_mode<synchronous>, transform_indices = @transform_4, window_bounds = array<i64: 1, 256>}, {pipeline_mode = #tpu.pipeline_mode<synchronous>, transform_indices = @transform_5, window_bounds = array<i64: 256, 128>}, {pipeline_mode = #tpu.pipeline_mode<synchronous>, transform_indices = @transform_6, window_bounds = array<i64: 1, 128>}, {pipeline_mode = #tpu.pipeline_mode<synchronous>, transform_indices = @transform_7, window_bounds = array<i64: 16, 128, 256>}, {pipeline_mode = #tpu.pipeline_mode<synchronous>, transform_indices = @transform_8, window_bounds = array<i64: 1, 256>}, {pipeline_mode = #tpu.pipeline_mode<synchronous>, transform_indices = @transform_9, window_bounds = array<i64: 2, 128>}, {pipeline_mode = #tpu.pipeline_mode<synchronous>, transform_indices = @transform_10, window_bounds = array<i64: 16, 128, 256>}, {pipeline_mode = #tpu.pipeline_mode<synchronous>, transform_indices = @transform_11, window_bounds = array<i64: 16, 1, 256>}, {pipeline_mode = #tpu.pipeline_mode<synchronous>, transform_indices = @transform_12, window_bounds = array<i64: 256, 512>}, {pipeline_mode = #tpu.pipeline_mode<synchronous>, transform_indices = @transform_13, window_bounds = array<i64: 1, 512>}, {pipeline_mode = #tpu.pipeline_mode<synchronous>, transform_indices = @transform_14, window_bounds = array<i64: 2, 128>}, {pipeline_mode = #tpu.pipeline_mode<synchronous>, transform_indices = @transform_15, window_bounds = array<i64: 2, 128>}, {pipeline_mode = #tpu.pipeline_mode<synchronous>, transform_indices = @transform_16, window_bounds = array<i64: 32, 512>}]} {
    %c0 = arith.constant 0 : index
    %c0_0 = arith.constant 0 : index
    %0 = vector.load %arg1[%c0, %c0_0] : memref<32x192xbf16, #tpu.memory_space<vmem>>, vector<32x192xbf16>
    %c0_1 = arith.constant 0 : index
    %c0_2 = arith.constant 0 : index
    %1 = vector.load %arg2[%c0_1, %c0_2] : memref<192x512xbf16, #tpu.memory_space<vmem>>, vector<192x512xbf16>
    %cst = arith.constant dense<0.000000e+00> : vector<32x512xf32>
    %2 = tpu.matmul %0, %1, %cst {dimension_numbers = #tpu.dot_dimension_numbers<[1], [0], [0], [1], [0, 0, 1, 1], [], []>} : vector<32x192xbf16>, vector<192x512xbf16>, vector<32x512xf32> -> vector<32x512xf32>
    %c0_3 = arith.constant 0 : index
    %c0_4 = arith.constant 0 : index
    %3 = vector.load %arg3[%c0_3, %c0_4] : memref<1x512xf32, #tpu.memory_space<vmem>>, vector<1x512xf32>
    %4 = vector.broadcast %3 : vector<1x512xf32> to vector<32x512xf32>
    %5 = arith.addf %2, %4 : vector<32x512xf32>
    %cst_5 = arith.constant 0.000000e+00 : f32
    %6 = vector.broadcast %cst_5 : f32 to vector<32x512xf32>
    %7 = arith.maximumf %5, %6 : vector<32x512xf32>
    %8 = arith.truncf %7 : vector<32x512xf32> to vector<32x512xbf16>
    %c0_6 = arith.constant 0 : index
    %c0_7 = arith.constant 0 : index
    %9 = vector.load %arg4[%c0_6, %c0_7] : memref<512x256xbf16, #tpu.memory_space<vmem>>, vector<512x256xbf16>
    %cst_8 = arith.constant dense<0.000000e+00> : vector<32x256xf32>
    %10 = tpu.matmul %8, %9, %cst_8 {dimension_numbers = #tpu.dot_dimension_numbers<[1], [0], [0], [1], [0, 0, 1, 1], [], []>} : vector<32x512xbf16>, vector<512x256xbf16>, vector<32x256xf32> -> vector<32x256xf32>
    %c0_9 = arith.constant 0 : index
    %c0_10 = arith.constant 0 : index
    %11 = vector.load %arg5[%c0_9, %c0_10] : memref<1x256xf32, #tpu.memory_space<vmem>>, vector<1x256xf32>
    %12 = vector.broadcast %11 : vector<1x256xf32> to vector<32x256xf32>
    %13 = arith.addf %10, %12 : vector<32x256xf32>
    %cst_11 = arith.constant dense<0.000000e+00> : vector<256xf32>
    %14 = vector.multi_reduction <add>, %13, %cst_11 [0] : vector<32x256xf32> to vector<256xf32>
    %15 = vector.shape_cast %14 : vector<256xf32> to vector<1x256xf32>
    %16 = arith.mulf %13, %13 : vector<32x256xf32>
    %cst_12 = arith.constant dense<0.000000e+00> : vector<256xf32>
    %17 = vector.multi_reduction <add>, %16, %cst_12 [0] : vector<32x256xf32> to vector<256xf32>
    %18 = vector.shape_cast %17 : vector<256xf32> to vector<1x256xf32>
    %19 = vector.extract_strided_slice %15 {offsets = [0, 0], sizes = [1, 64], strides = [1, 1]} : vector<1x256xf32> to vector<1x64xf32>
    %20 = vector.extract_strided_slice %15 {offsets = [0, 64], sizes = [1, 64], strides = [1, 1]} : vector<1x256xf32> to vector<1x64xf32>
    %21 = arith.addf %19, %20 : vector<1x64xf32>
    %22 = vector.extract_strided_slice %15 {offsets = [0, 128], sizes = [1, 64], strides = [1, 1]} : vector<1x256xf32> to vector<1x64xf32>
    %23 = arith.addf %21, %22 : vector<1x64xf32>
    %24 = vector.extract_strided_slice %15 {offsets = [0, 192], sizes = [1, 64], strides = [1, 1]} : vector<1x256xf32> to vector<1x64xf32>
    %25 = arith.addf %23, %24 : vector<1x64xf32>
    %cst_13 = arith.constant 1.280000e+02 : f32
    %26 = vector.broadcast %cst_13 : f32 to vector<1x64xf32>
    %27 = arith.divf %25, %26 : vector<1x64xf32>
    %28 = vector.extract_strided_slice %18 {offsets = [0, 0], sizes = [1, 64], strides = [1, 1]} : vector<1x256xf32> to vector<1x64xf32>
    %29 = vector.extract_strided_slice %18 {offsets = [0, 64], sizes = [1, 64], strides = [1, 1]} : vector<1x256xf32> to vector<1x64xf32>
    %30 = arith.addf %28, %29 : vector<1x64xf32>
    %31 = vector.extract_strided_slice %18 {offsets = [0, 128], sizes = [1, 64], strides = [1, 1]} : vector<1x256xf32> to vector<1x64xf32>
    %32 = arith.addf %30, %31 : vector<1x64xf32>
    %33 = vector.extract_strided_slice %18 {offsets = [0, 192], sizes = [1, 64], strides = [1, 1]} : vector<1x256xf32> to vector<1x64xf32>
    %34 = arith.addf %32, %33 : vector<1x64xf32>
    %cst_14 = arith.constant 1.280000e+02 : f32
    %35 = vector.broadcast %cst_14 : f32 to vector<1x64xf32>
    %36 = arith.divf %34, %35 : vector<1x64xf32>
    %37 = arith.mulf %27, %27 : vector<1x64xf32>
    %38 = arith.subf %36, %37 : vector<1x64xf32>
    %cst_15 = arith.constant 9.99999974E-6 : f32
    %39 = vector.broadcast %cst_15 : f32 to vector<1x64xf32>
    %40 = arith.addf %38, %39 : vector<1x64xf32>
    %41 = math.rsqrt %40 : vector<1x64xf32>
    %42 = tpu.concatenate %27, %27, %27, %27 in 1 : vector<1x64xf32>, vector<1x64xf32>, vector<1x64xf32>, vector<1x64xf32> -> vector<1x256xf32>
    %43 = tpu.concatenate %41, %41, %41, %41 in 1 : vector<1x64xf32>, vector<1x64xf32>, vector<1x64xf32>, vector<1x64xf32> -> vector<1x256xf32>
    %44 = vector.broadcast %42 : vector<1x256xf32> to vector<32x256xf32>
    %45 = arith.subf %13, %44 : vector<32x256xf32>
    %46 = vector.broadcast %43 : vector<1x256xf32> to vector<32x256xf32>
    %47 = arith.mulf %45, %46 : vector<32x256xf32>
    %cst_16 = arith.constant 0.000000e+00 : f32
    %48 = vector.broadcast %cst_16 : f32 to vector<32x256xf32>
    %49 = arith.maximumf %47, %48 : vector<32x256xf32>
    %50 = arith.truncf %49 : vector<32x256xf32> to vector<32x256xbf16>
    %c0_17 = arith.constant 0 : index
    %c0_18 = arith.constant 0 : index
    %51 = vector.load %arg6[%c0_17, %c0_18] : memref<256x128xbf16, #tpu.memory_space<vmem>>, vector<256x128xbf16>
    %cst_19 = arith.constant dense<0.000000e+00> : vector<32x128xf32>
    %52 = tpu.matmul %50, %51, %cst_19 {dimension_numbers = #tpu.dot_dimension_numbers<[1], [0], [0], [1], [0, 0, 1, 1], [], []>} : vector<32x256xbf16>, vector<256x128xbf16>, vector<32x128xf32> -> vector<32x128xf32>
    %c0_20 = arith.constant 0 : index
    %c0_21 = arith.constant 0 : index
    %53 = vector.load %arg7[%c0_20, %c0_21] : memref<1x128xf32, #tpu.memory_space<vmem>>, vector<1x128xf32>
    %54 = vector.broadcast %53 : vector<1x128xf32> to vector<32x128xf32>
    %55 = arith.addf %52, %54 : vector<32x128xf32>
    %cst_22 = arith.constant 0.000000e+00 : f32
    %56 = vector.broadcast %cst_22 : f32 to vector<32x128xf32>
    %57 = arith.maximumf %55, %56 : vector<32x128xf32>
    %58 = arith.truncf %57 : vector<32x128xf32> to vector<32x128xbf16>
    %cst_23 = arith.constant 0.000000e+00 : f32
    %59 = vector.broadcast %cst_23 : f32 to vector<2x256xf32>
    %60 = vector.extract_strided_slice %58 {offsets = [0, 0], sizes = [2, 128], strides = [1, 1]} : vector<32x128xbf16> to vector<2x128xbf16>
    %c0_24 = arith.constant 0 : index
    %c0_25 = arith.constant 0 : index
    %c0_26 = arith.constant 0 : index
    %61 = vector.load %arg8[%c0_24, %c0_25, %c0_26] : memref<16x128x256xbf16, #tpu.memory_space<vmem>>, vector<1x128x256xbf16>
    %62 = vector.shape_cast %61 : vector<1x128x256xbf16> to vector<128x256xbf16>
    %cst_27 = arith.constant dense<0.000000e+00> : vector<2x256xf32>
    %63 = tpu.matmul %60, %62, %cst_27 {dimension_numbers = #tpu.dot_dimension_numbers<[1], [0], [0], [1], [0, 0, 1, 1], [], []>} : vector<2x128xbf16>, vector<128x256xbf16>, vector<2x256xf32> -> vector<2x256xf32>
    %64 = arith.addf %59, %63 : vector<2x256xf32>
    %65 = vector.extract_strided_slice %58 {offsets = [2, 0], sizes = [2, 128], strides = [1, 1]} : vector<32x128xbf16> to vector<2x128xbf16>
    %c1 = arith.constant 1 : index
    %c0_28 = arith.constant 0 : index
    %c0_29 = arith.constant 0 : index
    %66 = vector.load %arg8[%c1, %c0_28, %c0_29] : memref<16x128x256xbf16, #tpu.memory_space<vmem>>, vector<1x128x256xbf16>
    %67 = vector.shape_cast %66 : vector<1x128x256xbf16> to vector<128x256xbf16>
    %cst_30 = arith.constant dense<0.000000e+00> : vector<2x256xf32>
    %68 = tpu.matmul %65, %67, %cst_30 {dimension_numbers = #tpu.dot_dimension_numbers<[1], [0], [0], [1], [0, 0, 1, 1], [], []>} : vector<2x128xbf16>, vector<128x256xbf16>, vector<2x256xf32> -> vector<2x256xf32>
    %69 = arith.addf %64, %68 : vector<2x256xf32>
    %70 = vector.extract_strided_slice %58 {offsets = [4, 0], sizes = [2, 128], strides = [1, 1]} : vector<32x128xbf16> to vector<2x128xbf16>
    %c2 = arith.constant 2 : index
    %c0_31 = arith.constant 0 : index
    %c0_32 = arith.constant 0 : index
    %71 = vector.load %arg8[%c2, %c0_31, %c0_32] : memref<16x128x256xbf16, #tpu.memory_space<vmem>>, vector<1x128x256xbf16>
    %72 = vector.shape_cast %71 : vector<1x128x256xbf16> to vector<128x256xbf16>
    %cst_33 = arith.constant dense<0.000000e+00> : vector<2x256xf32>
    %73 = tpu.matmul %70, %72, %cst_33 {dimension_numbers = #tpu.dot_dimension_numbers<[1], [0], [0], [1], [0, 0, 1, 1], [], []>} : vector<2x128xbf16>, vector<128x256xbf16>, vector<2x256xf32> -> vector<2x256xf32>
    %74 = arith.addf %69, %73 : vector<2x256xf32>
    %75 = vector.extract_strided_slice %58 {offsets = [6, 0], sizes = [2, 128], strides = [1, 1]} : vector<32x128xbf16> to vector<2x128xbf16>
    %c3 = arith.constant 3 : index
    %c0_34 = arith.constant 0 : index
    %c0_35 = arith.constant 0 : index
    %76 = vector.load %arg8[%c3, %c0_34, %c0_35] : memref<16x128x256xbf16, #tpu.memory_space<vmem>>, vector<1x128x256xbf16>
    %77 = vector.shape_cast %76 : vector<1x128x256xbf16> to vector<128x256xbf16>
    %cst_36 = arith.constant dense<0.000000e+00> : vector<2x256xf32>
    %78 = tpu.matmul %75, %77, %cst_36 {dimension_numbers = #tpu.dot_dimension_numbers<[1], [0], [0], [1], [0, 0, 1, 1], [], []>} : vector<2x128xbf16>, vector<128x256xbf16>, vector<2x256xf32> -> vector<2x256xf32>
    %79 = arith.addf %74, %78 : vector<2x256xf32>
    %80 = vector.extract_strided_slice %58 {offsets = [8, 0], sizes = [2, 128], strides = [1, 1]} : vector<32x128xbf16> to vector<2x128xbf16>
    %c4 = arith.constant 4 : index
    %c0_37 = arith.constant 0 : index
    %c0_38 = arith.constant 0 : index
    %81 = vector.load %arg8[%c4, %c0_37, %c0_38] : memref<16x128x256xbf16, #tpu.memory_space<vmem>>, vector<1x128x256xbf16>
    %82 = vector.shape_cast %81 : vector<1x128x256xbf16> to vector<128x256xbf16>
    %cst_39 = arith.constant dense<0.000000e+00> : vector<2x256xf32>
    %83 = tpu.matmul %80, %82, %cst_39 {dimension_numbers = #tpu.dot_dimension_numbers<[1], [0], [0], [1], [0, 0, 1, 1], [], []>} : vector<2x128xbf16>, vector<128x256xbf16>, vector<2x256xf32> -> vector<2x256xf32>
    %84 = arith.addf %79, %83 : vector<2x256xf32>
    %85 = vector.extract_strided_slice %58 {offsets = [10, 0], sizes = [2, 128], strides = [1, 1]} : vector<32x128xbf16> to vector<2x128xbf16>
    %c5 = arith.constant 5 : index
    %c0_40 = arith.constant 0 : index
    %c0_41 = arith.constant 0 : index
    %86 = vector.load %arg8[%c5, %c0_40, %c0_41] : memref<16x128x256xbf16, #tpu.memory_space<vmem>>, vector<1x128x256xbf16>
    %87 = vector.shape_cast %86 : vector<1x128x256xbf16> to vector<128x256xbf16>
    %cst_42 = arith.constant dense<0.000000e+00> : vector<2x256xf32>
    %88 = tpu.matmul %85, %87, %cst_42 {dimension_numbers = #tpu.dot_dimension_numbers<[1], [0], [0], [1], [0, 0, 1, 1], [], []>} : vector<2x128xbf16>, vector<128x256xbf16>, vector<2x256xf32> -> vector<2x256xf32>
    %89 = arith.addf %84, %88 : vector<2x256xf32>
    %90 = vector.extract_strided_slice %58 {offsets = [12, 0], sizes = [2, 128], strides = [1, 1]} : vector<32x128xbf16> to vector<2x128xbf16>
    %c6 = arith.constant 6 : index
    %c0_43 = arith.constant 0 : index
    %c0_44 = arith.constant 0 : index
    %91 = vector.load %arg8[%c6, %c0_43, %c0_44] : memref<16x128x256xbf16, #tpu.memory_space<vmem>>, vector<1x128x256xbf16>
    %92 = vector.shape_cast %91 : vector<1x128x256xbf16> to vector<128x256xbf16>
    %cst_45 = arith.constant dense<0.000000e+00> : vector<2x256xf32>
    %93 = tpu.matmul %90, %92, %cst_45 {dimension_numbers = #tpu.dot_dimension_numbers<[1], [0], [0], [1], [0, 0, 1, 1], [], []>} : vector<2x128xbf16>, vector<128x256xbf16>, vector<2x256xf32> -> vector<2x256xf32>
    %94 = arith.addf %89, %93 : vector<2x256xf32>
    %95 = vector.extract_strided_slice %58 {offsets = [14, 0], sizes = [2, 128], strides = [1, 1]} : vector<32x128xbf16> to vector<2x128xbf16>
    %c7 = arith.constant 7 : index
    %c0_46 = arith.constant 0 : index
    %c0_47 = arith.constant 0 : index
    %96 = vector.load %arg8[%c7, %c0_46, %c0_47] : memref<16x128x256xbf16, #tpu.memory_space<vmem>>, vector<1x128x256xbf16>
    %97 = vector.shape_cast %96 : vector<1x128x256xbf16> to vector<128x256xbf16>
    %cst_48 = arith.constant dense<0.000000e+00> : vector<2x256xf32>
    %98 = tpu.matmul %95, %97, %cst_48 {dimension_numbers = #tpu.dot_dimension_numbers<[1], [0], [0], [1], [0, 0, 1, 1], [], []>} : vector<2x128xbf16>, vector<128x256xbf16>, vector<2x256xf32> -> vector<2x256xf32>
    %99 = arith.addf %94, %98 : vector<2x256xf32>
    %100 = vector.extract_strided_slice %58 {offsets = [16, 0], sizes = [2, 128], strides = [1, 1]} : vector<32x128xbf16> to vector<2x128xbf16>
    %c8 = arith.constant 8 : index
    %c0_49 = arith.constant 0 : index
    %c0_50 = arith.constant 0 : index
    %101 = vector.load %arg8[%c8, %c0_49, %c0_50] : memref<16x128x256xbf16, #tpu.memory_space<vmem>>, vector<1x128x256xbf16>
    %102 = vector.shape_cast %101 : vector<1x128x256xbf16> to vector<128x256xbf16>
    %cst_51 = arith.constant dense<0.000000e+00> : vector<2x256xf32>
    %103 = tpu.matmul %100, %102, %cst_51 {dimension_numbers = #tpu.dot_dimension_numbers<[1], [0], [0], [1], [0, 0, 1, 1], [], []>} : vector<2x128xbf16>, vector<128x256xbf16>, vector<2x256xf32> -> vector<2x256xf32>
    %104 = arith.addf %99, %103 : vector<2x256xf32>
    %105 = vector.extract_strided_slice %58 {offsets = [18, 0], sizes = [2, 128], strides = [1, 1]} : vector<32x128xbf16> to vector<2x128xbf16>
    %c9 = arith.constant 9 : index
    %c0_52 = arith.constant 0 : index
    %c0_53 = arith.constant 0 : index
    %106 = vector.load %arg8[%c9, %c0_52, %c0_53] : memref<16x128x256xbf16, #tpu.memory_space<vmem>>, vector<1x128x256xbf16>
    %107 = vector.shape_cast %106 : vector<1x128x256xbf16> to vector<128x256xbf16>
    %cst_54 = arith.constant dense<0.000000e+00> : vector<2x256xf32>
    %108 = tpu.matmul %105, %107, %cst_54 {dimension_numbers = #tpu.dot_dimension_numbers<[1], [0], [0], [1], [0, 0, 1, 1], [], []>} : vector<2x128xbf16>, vector<128x256xbf16>, vector<2x256xf32> -> vector<2x256xf32>
    %109 = arith.addf %104, %108 : vector<2x256xf32>
    %110 = vector.extract_strided_slice %58 {offsets = [20, 0], sizes = [2, 128], strides = [1, 1]} : vector<32x128xbf16> to vector<2x128xbf16>
    %c10 = arith.constant 10 : index
    %c0_55 = arith.constant 0 : index
    %c0_56 = arith.constant 0 : index
    %111 = vector.load %arg8[%c10, %c0_55, %c0_56] : memref<16x128x256xbf16, #tpu.memory_space<vmem>>, vector<1x128x256xbf16>
    %112 = vector.shape_cast %111 : vector<1x128x256xbf16> to vector<128x256xbf16>
    %cst_57 = arith.constant dense<0.000000e+00> : vector<2x256xf32>
    %113 = tpu.matmul %110, %112, %cst_57 {dimension_numbers = #tpu.dot_dimension_numbers<[1], [0], [0], [1], [0, 0, 1, 1], [], []>} : vector<2x128xbf16>, vector<128x256xbf16>, vector<2x256xf32> -> vector<2x256xf32>
    %114 = arith.addf %109, %113 : vector<2x256xf32>
    %115 = vector.extract_strided_slice %58 {offsets = [22, 0], sizes = [2, 128], strides = [1, 1]} : vector<32x128xbf16> to vector<2x128xbf16>
    %c11 = arith.constant 11 : index
    %c0_58 = arith.constant 0 : index
    %c0_59 = arith.constant 0 : index
    %116 = vector.load %arg8[%c11, %c0_58, %c0_59] : memref<16x128x256xbf16, #tpu.memory_space<vmem>>, vector<1x128x256xbf16>
    %117 = vector.shape_cast %116 : vector<1x128x256xbf16> to vector<128x256xbf16>
    %cst_60 = arith.constant dense<0.000000e+00> : vector<2x256xf32>
    %118 = tpu.matmul %115, %117, %cst_60 {dimension_numbers = #tpu.dot_dimension_numbers<[1], [0], [0], [1], [0, 0, 1, 1], [], []>} : vector<2x128xbf16>, vector<128x256xbf16>, vector<2x256xf32> -> vector<2x256xf32>
    %119 = arith.addf %114, %118 : vector<2x256xf32>
    %120 = vector.extract_strided_slice %58 {offsets = [24, 0], sizes = [2, 128], strides = [1, 1]} : vector<32x128xbf16> to vector<2x128xbf16>
    %c12 = arith.constant 12 : index
    %c0_61 = arith.constant 0 : index
    %c0_62 = arith.constant 0 : index
    %121 = vector.load %arg8[%c12, %c0_61, %c0_62] : memref<16x128x256xbf16, #tpu.memory_space<vmem>>, vector<1x128x256xbf16>
    %122 = vector.shape_cast %121 : vector<1x128x256xbf16> to vector<128x256xbf16>
    %cst_63 = arith.constant dense<0.000000e+00> : vector<2x256xf32>
    %123 = tpu.matmul %120, %122, %cst_63 {dimension_numbers = #tpu.dot_dimension_numbers<[1], [0], [0], [1], [0, 0, 1, 1], [], []>} : vector<2x128xbf16>, vector<128x256xbf16>, vector<2x256xf32> -> vector<2x256xf32>
    %124 = arith.addf %119, %123 : vector<2x256xf32>
    %125 = vector.extract_strided_slice %58 {offsets = [26, 0], sizes = [2, 128], strides = [1, 1]} : vector<32x128xbf16> to vector<2x128xbf16>
    %c13 = arith.constant 13 : index
    %c0_64 = arith.constant 0 : index
    %c0_65 = arith.constant 0 : index
    %126 = vector.load %arg8[%c13, %c0_64, %c0_65] : memref<16x128x256xbf16, #tpu.memory_space<vmem>>, vector<1x128x256xbf16>
    %127 = vector.shape_cast %126 : vector<1x128x256xbf16> to vector<128x256xbf16>
    %cst_66 = arith.constant dense<0.000000e+00> : vector<2x256xf32>
    %128 = tpu.matmul %125, %127, %cst_66 {dimension_numbers = #tpu.dot_dimension_numbers<[1], [0], [0], [1], [0, 0, 1, 1], [], []>} : vector<2x128xbf16>, vector<128x256xbf16>, vector<2x256xf32> -> vector<2x256xf32>
    %129 = arith.addf %124, %128 : vector<2x256xf32>
    %130 = vector.extract_strided_slice %58 {offsets = [28, 0], sizes = [2, 128], strides = [1, 1]} : vector<32x128xbf16> to vector<2x128xbf16>
    %c14 = arith.constant 14 : index
    %c0_67 = arith.constant 0 : index
    %c0_68 = arith.constant 0 : index
    %131 = vector.load %arg8[%c14, %c0_67, %c0_68] : memref<16x128x256xbf16, #tpu.memory_space<vmem>>, vector<1x128x256xbf16>
    %132 = vector.shape_cast %131 : vector<1x128x256xbf16> to vector<128x256xbf16>
    %cst_69 = arith.constant dense<0.000000e+00> : vector<2x256xf32>
    %133 = tpu.matmul %130, %132, %cst_69 {dimension_numbers = #tpu.dot_dimension_numbers<[1], [0], [0], [1], [0, 0, 1, 1], [], []>} : vector<2x128xbf16>, vector<128x256xbf16>, vector<2x256xf32> -> vector<2x256xf32>
    %134 = arith.addf %129, %133 : vector<2x256xf32>
    %135 = vector.extract_strided_slice %58 {offsets = [30, 0], sizes = [2, 128], strides = [1, 1]} : vector<32x128xbf16> to vector<2x128xbf16>
    %c15 = arith.constant 15 : index
    %c0_70 = arith.constant 0 : index
    %c0_71 = arith.constant 0 : index
    %136 = vector.load %arg8[%c15, %c0_70, %c0_71] : memref<16x128x256xbf16, #tpu.memory_space<vmem>>, vector<1x128x256xbf16>
    %137 = vector.shape_cast %136 : vector<1x128x256xbf16> to vector<128x256xbf16>
    %cst_72 = arith.constant dense<0.000000e+00> : vector<2x256xf32>
    %138 = tpu.matmul %135, %137, %cst_72 {dimension_numbers = #tpu.dot_dimension_numbers<[1], [0], [0], [1], [0, 0, 1, 1], [], []>} : vector<2x128xbf16>, vector<128x256xbf16>, vector<2x256xf32> -> vector<2x256xf32>
    %139 = arith.addf %134, %138 : vector<2x256xf32>
    %c0_73 = arith.constant 0 : index
    %c0_74 = arith.constant 0 : index
    %140 = vector.load %arg9[%c0_73, %c0_74] : memref<1x256xf32, #tpu.memory_space<vmem>>, vector<1x256xf32>
    %141 = vector.broadcast %140 : vector<1x256xf32> to vector<2x256xf32>
    %142 = arith.addf %139, %141 : vector<2x256xf32>
    %143 = vector.extract_strided_slice %142 {offsets = [0, 0], sizes = [2, 128], strides = [1, 1]} : vector<2x256xf32> to vector<2x128xf32>
    %144 = vector.extract_strided_slice %142 {offsets = [0, 128], sizes = [2, 128], strides = [1, 1]} : vector<2x256xf32> to vector<2x128xf32>
    %c0_75 = arith.constant 0 : index
    %c0_76 = arith.constant 0 : index
    %145 = vector.load %arg15[%c0_75, %c0_76] : memref<2x128xf32, #tpu.memory_space<vmem>>, vector<2x128xf32>
    tpu.vector_store %arg15[%c0_75, %c0_76], %143 {strides = array<i32>} : memref<2x128xf32, #tpu.memory_space<vmem>>, vector<2x128xf32>,
    %c0_77 = arith.constant 0 : index
    %c0_78 = arith.constant 0 : index
    %146 = vector.load %arg16[%c0_77, %c0_78] : memref<2x128xf32, #tpu.memory_space<vmem>>, vector<2x128xf32>
    tpu.vector_store %arg16[%c0_77, %c0_78], %144 {strides = array<i32>} : memref<2x128xf32, #tpu.memory_space<vmem>>, vector<2x128xf32>,
    %c0_79 = arith.constant 0 : index
    %c0_80 = arith.constant 0 : index
    %147 = vector.load %arg10[%c0_79, %c0_80] : memref<2x128xf32, #tpu.memory_space<vmem>>, vector<2x128xf32>
    %cst_81 = arith.constant 5.000000e-01 : f32
    %148 = vector.broadcast %cst_81 : f32 to vector<2x128xf32>
    %149 = arith.mulf %148, %144 : vector<2x128xf32>
    %150 = math.exp %149 : vector<2x128xf32>
    %151 = arith.mulf %147, %150 : vector<2x128xf32>
    %152 = arith.addf %143, %151 : vector<2x128xf32>
    %153 = arith.truncf %152 : vector<2x128xf32> to vector<2x128xbf16>
    %c0_82 = arith.constant 0 : index
    %c0_83 = arith.constant 0 : index
    %c0_84 = arith.constant 0 : index
    %154 = vector.load %arg11[%c0_82, %c0_83, %c0_84] : memref<16x128x256xbf16, #tpu.memory_space<vmem>>, vector<1x128x256xbf16>
    %155 = vector.shape_cast %154 : vector<1x128x256xbf16> to vector<128x256xbf16>
    %cst_85 = arith.constant dense<0.000000e+00> : vector<2x256xf32>
    %156 = tpu.matmul %153, %155, %cst_85 {dimension_numbers = #tpu.dot_dimension_numbers<[1], [0], [0], [1], [0, 0, 1, 1], [], []>} : vector<2x128xbf16>, vector<128x256xbf16>, vector<2x256xf32> -> vector<2x256xf32>
    %c0_86 = arith.constant 0 : index
    %c0_87 = arith.constant 0 : index
    %c0_88 = arith.constant 0 : index
    %157 = vector.load %arg12[%c0_86, %c0_87, %c0_88] : memref<16x1x256xf32, #tpu.memory_space<vmem>>, vector<1x1x256xf32>
    %158 = vector.shape_cast %157 : vector<1x1x256xf32> to vector<1x256xf32>
    %159 = vector.broadcast %158 : vector<1x256xf32> to vector<2x256xf32>
    %160 = arith.addf %156, %159 : vector<2x256xf32>
    %cst_89 = arith.constant 0.000000e+00 : f32
    %161 = vector.broadcast %cst_89 : f32 to vector<2x256xf32>
    %162 = arith.maximumf %160, %161 : vector<2x256xf32>
    %163 = arith.truncf %162 : vector<2x256xf32> to vector<2x256xbf16>
    %c1_90 = arith.constant 1 : index
    %c0_91 = arith.constant 0 : index
    %c0_92 = arith.constant 0 : index
    %164 = vector.load %arg11[%c1_90, %c0_91, %c0_92] : memref<16x128x256xbf16, #tpu.memory_space<vmem>>, vector<1x128x256xbf16>
    %165 = vector.shape_cast %164 : vector<1x128x256xbf16> to vector<128x256xbf16>
    %cst_93 = arith.constant dense<0.000000e+00> : vector<2x256xf32>
    %166 = tpu.matmul %153, %165, %cst_93 {dimension_numbers = #tpu.dot_dimension_numbers<[1], [0], [0], [1], [0, 0, 1, 1], [], []>} : vector<2x128xbf16>, vector<128x256xbf16>, vector<2x256xf32> -> vector<2x256xf32>
    %c1_94 = arith.constant 1 : index
    %c0_95 = arith.constant 0 : index
    %c0_96 = arith.constant 0 : index
    %167 = vector.load %arg12[%c1_94, %c0_95, %c0_96] : memref<16x1x256xf32, #tpu.memory_space<vmem>>, vector<1x1x256xf32>
    %168 = vector.shape_cast %167 : vector<1x1x256xf32> to vector<1x256xf32>
    %169 = vector.broadcast %168 : vector<1x256xf32> to vector<2x256xf32>
    %170 = arith.addf %166, %169 : vector<2x256xf32>
    %cst_97 = arith.constant 0.000000e+00 : f32
    %171 = vector.broadcast %cst_97 : f32 to vector<2x256xf32>
    %172 = arith.maximumf %170, %171 : vector<2x256xf32>
    %173 = arith.truncf %172 : vector<2x256xf32> to vector<2x256xbf16>
    %c2_98 = arith.constant 2 : index
    %c0_99 = arith.constant 0 : index
    %c0_100 = arith.constant 0 : index
    %174 = vector.load %arg11[%c2_98, %c0_99, %c0_100] : memref<16x128x256xbf16, #tpu.memory_space<vmem>>, vector<1x128x256xbf16>
    %175 = vector.shape_cast %174 : vector<1x128x256xbf16> to vector<128x256xbf16>
    %cst_101 = arith.constant dense<0.000000e+00> : vector<2x256xf32>
    %176 = tpu.matmul %153, %175, %cst_101 {dimension_numbers = #tpu.dot_dimension_numbers<[1], [0], [0], [1], [0, 0, 1, 1], [], []>} : vector<2x128xbf16>, vector<128x256xbf16>, vector<2x256xf32> -> vector<2x256xf32>
    %c2_102 = arith.constant 2 : index
    %c0_103 = arith.constant 0 : index
    %c0_104 = arith.constant 0 : index
    %177 = vector.load %arg12[%c2_102, %c0_103, %c0_104] : memref<16x1x256xf32, #tpu.memory_space<vmem>>, vector<1x1x256xf32>
    %178 = vector.shape_cast %177 : vector<1x1x256xf32> to vector<1x256xf32>
    %179 = vector.broadcast %178 : vector<1x256xf32> to vector<2x256xf32>
    %180 = arith.addf %176, %179 : vector<2x256xf32>
    %cst_105 = arith.constant 0.000000e+00 : f32
    %181 = vector.broadcast %cst_105 : f32 to vector<2x256xf32>
    %182 = arith.maximumf %180, %181 : vector<2x256xf32>
    %183 = arith.truncf %182 : vector<2x256xf32> to vector<2x256xbf16>
    %c3_106 = arith.constant 3 : index
    %c0_107 = arith.constant 0 : index
    %c0_108 = arith.constant 0 : index
    %184 = vector.load %arg11[%c3_106, %c0_107, %c0_108] : memref<16x128x256xbf16, #tpu.memory_space<vmem>>, vector<1x128x256xbf16>
    %185 = vector.shape_cast %184 : vector<1x128x256xbf16> to vector<128x256xbf16>
    %cst_109 = arith.constant dense<0.000000e+00> : vector<2x256xf32>
    %186 = tpu.matmul %153, %185, %cst_109 {dimension_numbers = #tpu.dot_dimension_numbers<[1], [0], [0], [1], [0, 0, 1, 1], [], []>} : vector<2x128xbf16>, vector<128x256xbf16>, vector<2x256xf32> -> vector<2x256xf32>
    %c3_110 = arith.constant 3 : index
    %c0_111 = arith.constant 0 : index
    %c0_112 = arith.constant 0 : index
    %187 = vector.load %arg12[%c3_110, %c0_111, %c0_112] : memref<16x1x256xf32, #tpu.memory_space<vmem>>, vector<1x1x256xf32>
    %188 = vector.shape_cast %187 : vector<1x1x256xf32> to vector<1x256xf32>
    %189 = vector.broadcast %188 : vector<1x256xf32> to vector<2x256xf32>
    %190 = arith.addf %186, %189 : vector<2x256xf32>
    %cst_113 = arith.constant 0.000000e+00 : f32
    %191 = vector.broadcast %cst_113 : f32 to vector<2x256xf32>
    %192 = arith.maximumf %190, %191 : vector<2x256xf32>
    %193 = arith.truncf %192 : vector<2x256xf32> to vector<2x256xbf16>
    %c4_114 = arith.constant 4 : index
    %c0_115 = arith.constant 0 : index
    %c0_116 = arith.constant 0 : index
    %194 = vector.load %arg11[%c4_114, %c0_115, %c0_116] : memref<16x128x256xbf16, #tpu.memory_space<vmem>>, vector<1x128x256xbf16>
    %195 = vector.shape_cast %194 : vector<1x128x256xbf16> to vector<128x256xbf16>
    %cst_117 = arith.constant dense<0.000000e+00> : vector<2x256xf32>
    %196 = tpu.matmul %153, %195, %cst_117 {dimension_numbers = #tpu.dot_dimension_numbers<[1], [0], [0], [1], [0, 0, 1, 1], [], []>} : vector<2x128xbf16>, vector<128x256xbf16>, vector<2x256xf32> -> vector<2x256xf32>
    %c4_118 = arith.constant 4 : index
    %c0_119 = arith.constant 0 : index
    %c0_120 = arith.constant 0 : index
    %197 = vector.load %arg12[%c4_118, %c0_119, %c0_120] : memref<16x1x256xf32, #tpu.memory_space<vmem>>, vector<1x1x256xf32>
    %198 = vector.shape_cast %197 : vector<1x1x256xf32> to vector<1x256xf32>
    %199 = vector.broadcast %198 : vector<1x256xf32> to vector<2x256xf32>
    %200 = arith.addf %196, %199 : vector<2x256xf32>
    %cst_121 = arith.constant 0.000000e+00 : f32
    %201 = vector.broadcast %cst_121 : f32 to vector<2x256xf32>
    %202 = arith.maximumf %200, %201 : vector<2x256xf32>
    %203 = arith.truncf %202 : vector<2x256xf32> to vector<2x256xbf16>
    %c5_122 = arith.constant 5 : index
    %c0_123 = arith.constant 0 : index
    %c0_124 = arith.constant 0 : index
    %204 = vector.load %arg11[%c5_122, %c0_123, %c0_124] : memref<16x128x256xbf16, #tpu.memory_space<vmem>>, vector<1x128x256xbf16>
    %205 = vector.shape_cast %204 : vector<1x128x256xbf16> to vector<128x256xbf16>
    %cst_125 = arith.constant dense<0.000000e+00> : vector<2x256xf32>
    %206 = tpu.matmul %153, %205, %cst_125 {dimension_numbers = #tpu.dot_dimension_numbers<[1], [0], [0], [1], [0, 0, 1, 1], [], []>} : vector<2x128xbf16>, vector<128x256xbf16>, vector<2x256xf32> -> vector<2x256xf32>
    %c5_126 = arith.constant 5 : index
    %c0_127 = arith.constant 0 : index
    %c0_128 = arith.constant 0 : index
    %207 = vector.load %arg12[%c5_126, %c0_127, %c0_128] : memref<16x1x256xf32, #tpu.memory_space<vmem>>, vector<1x1x256xf32>
    %208 = vector.shape_cast %207 : vector<1x1x256xf32> to vector<1x256xf32>
    %209 = vector.broadcast %208 : vector<1x256xf32> to vector<2x256xf32>
    %210 = arith.addf %206, %209 : vector<2x256xf32>
    %cst_129 = arith.constant 0.000000e+00 : f32
    %211 = vector.broadcast %cst_129 : f32 to vector<2x256xf32>
    %212 = arith.maximumf %210, %211 : vector<2x256xf32>
    %213 = arith.truncf %212 : vector<2x256xf32> to vector<2x256xbf16>
    %c6_130 = arith.constant 6 : index
    %c0_131 = arith.constant 0 : index
    %c0_132 = arith.constant 0 : index
    %214 = vector.load %arg11[%c6_130, %c0_131, %c0_132] : memref<16x128x256xbf16, #tpu.memory_space<vmem>>, vector<1x128x256xbf16>
    %215 = vector.shape_cast %214 : vector<1x128x256xbf16> to vector<128x256xbf16>
    %cst_133 = arith.constant dense<0.000000e+00> : vector<2x256xf32>
    %216 = tpu.matmul %153, %215, %cst_133 {dimension_numbers = #tpu.dot_dimension_numbers<[1], [0], [0], [1], [0, 0, 1, 1], [], []>} : vector<2x128xbf16>, vector<128x256xbf16>, vector<2x256xf32> -> vector<2x256xf32>
    %c6_134 = arith.constant 6 : index
    %c0_135 = arith.constant 0 : index
    %c0_136 = arith.constant 0 : index
    %217 = vector.load %arg12[%c6_134, %c0_135, %c0_136] : memref<16x1x256xf32, #tpu.memory_space<vmem>>, vector<1x1x256xf32>
    %218 = vector.shape_cast %217 : vector<1x1x256xf32> to vector<1x256xf32>
    %219 = vector.broadcast %218 : vector<1x256xf32> to vector<2x256xf32>
    %220 = arith.addf %216, %219 : vector<2x256xf32>
    %cst_137 = arith.constant 0.000000e+00 : f32
    %221 = vector.broadcast %cst_137 : f32 to vector<2x256xf32>
    %222 = arith.maximumf %220, %221 : vector<2x256xf32>
    %223 = arith.truncf %222 : vector<2x256xf32> to vector<2x256xbf16>
    %c7_138 = arith.constant 7 : index
    %c0_139 = arith.constant 0 : index
    %c0_140 = arith.constant 0 : index
    %224 = vector.load %arg11[%c7_138, %c0_139, %c0_140] : memref<16x128x256xbf16, #tpu.memory_space<vmem>>, vector<1x128x256xbf16>
    %225 = vector.shape_cast %224 : vector<1x128x256xbf16> to vector<128x256xbf16>
    %cst_141 = arith.constant dense<0.000000e+00> : vector<2x256xf32>
    %226 = tpu.matmul %153, %225, %cst_141 {dimension_numbers = #tpu.dot_dimension_numbers<[1], [0], [0], [1], [0, 0, 1, 1], [], []>} : vector<2x128xbf16>, vector<128x256xbf16>, vector<2x256xf32> -> vector<2x256xf32>
    %c7_142 = arith.constant 7 : index
    %c0_143 = arith.constant 0 : index
    %c0_144 = arith.constant 0 : index
    %227 = vector.load %arg12[%c7_142, %c0_143, %c0_144] : memref<16x1x256xf32, #tpu.memory_space<vmem>>, vector<1x1x256xf32>
    %228 = vector.shape_cast %227 : vector<1x1x256xf32> to vector<1x256xf32>
    %229 = vector.broadcast %228 : vector<1x256xf32> to vector<2x256xf32>
    %230 = arith.addf %226, %229 : vector<2x256xf32>
    %cst_145 = arith.constant 0.000000e+00 : f32
    %231 = vector.broadcast %cst_145 : f32 to vector<2x256xf32>
    %232 = arith.maximumf %230, %231 : vector<2x256xf32>
    %233 = arith.truncf %232 : vector<2x256xf32> to vector<2x256xbf16>
    %c8_146 = arith.constant 8 : index
    %c0_147 = arith.constant 0 : index
    %c0_148 = arith.constant 0 : index
    %234 = vector.load %arg11[%c8_146, %c0_147, %c0_148] : memref<16x128x256xbf16, #tpu.memory_space<vmem>>, vector<1x128x256xbf16>
    %235 = vector.shape_cast %234 : vector<1x128x256xbf16> to vector<128x256xbf16>
    %cst_149 = arith.constant dense<0.000000e+00> : vector<2x256xf32>
    %236 = tpu.matmul %153, %235, %cst_149 {dimension_numbers = #tpu.dot_dimension_numbers<[1], [0], [0], [1], [0, 0, 1, 1], [], []>} : vector<2x128xbf16>, vector<128x256xbf16>, vector<2x256xf32> -> vector<2x256xf32>
    %c8_150 = arith.constant 8 : index
    %c0_151 = arith.constant 0 : index
    %c0_152 = arith.constant 0 : index
    %237 = vector.load %arg12[%c8_150, %c0_151, %c0_152] : memref<16x1x256xf32, #tpu.memory_space<vmem>>, vector<1x1x256xf32>
    %238 = vector.shape_cast %237 : vector<1x1x256xf32> to vector<1x256xf32>
    %239 = vector.broadcast %238 : vector<1x256xf32> to vector<2x256xf32>
    %240 = arith.addf %236, %239 : vector<2x256xf32>
    %cst_153 = arith.constant 0.000000e+00 : f32
    %241 = vector.broadcast %cst_153 : f32 to vector<2x256xf32>
    %242 = arith.maximumf %240, %241 : vector<2x256xf32>
    %243 = arith.truncf %242 : vector<2x256xf32> to vector<2x256xbf16>
    %c9_154 = arith.constant 9 : index
    %c0_155 = arith.constant 0 : index
    %c0_156 = arith.constant 0 : index
    %244 = vector.load %arg11[%c9_154, %c0_155, %c0_156] : memref<16x128x256xbf16, #tpu.memory_space<vmem>>, vector<1x128x256xbf16>
    %245 = vector.shape_cast %244 : vector<1x128x256xbf16> to vector<128x256xbf16>
    %cst_157 = arith.constant dense<0.000000e+00> : vector<2x256xf32>
    %246 = tpu.matmul %153, %245, %cst_157 {dimension_numbers = #tpu.dot_dimension_numbers<[1], [0], [0], [1], [0, 0, 1, 1], [], []>} : vector<2x128xbf16>, vector<128x256xbf16>, vector<2x256xf32> -> vector<2x256xf32>
    %c9_158 = arith.constant 9 : index
    %c0_159 = arith.constant 0 : index
    %c0_160 = arith.constant 0 : index
    %247 = vector.load %arg12[%c9_158, %c0_159, %c0_160] : memref<16x1x256xf32, #tpu.memory_space<vmem>>, vector<1x1x256xf32>
    %248 = vector.shape_cast %247 : vector<1x1x256xf32> to vector<1x256xf32>
    %249 = vector.broadcast %248 : vector<1x256xf32> to vector<2x256xf32>
    %250 = arith.addf %246, %249 : vector<2x256xf32>
    %cst_161 = arith.constant 0.000000e+00 : f32
    %251 = vector.broadcast %cst_161 : f32 to vector<2x256xf32>
    %252 = arith.maximumf %250, %251 : vector<2x256xf32>
    %253 = arith.truncf %252 : vector<2x256xf32> to vector<2x256xbf16>
    %c10_162 = arith.constant 10 : index
    %c0_163 = arith.constant 0 : index
    %c0_164 = arith.constant 0 : index
    %254 = vector.load %arg11[%c10_162, %c0_163, %c0_164] : memref<16x128x256xbf16, #tpu.memory_space<vmem>>, vector<1x128x256xbf16>
    %255 = vector.shape_cast %254 : vector<1x128x256xbf16> to vector<128x256xbf16>
    %cst_165 = arith.constant dense<0.000000e+00> : vector<2x256xf32>
    %256 = tpu.matmul %153, %255, %cst_165 {dimension_numbers = #tpu.dot_dimension_numbers<[1], [0], [0], [1], [0, 0, 1, 1], [], []>} : vector<2x128xbf16>, vector<128x256xbf16>, vector<2x256xf32> -> vector<2x256xf32>
    %c10_166 = arith.constant 10 : index
    %c0_167 = arith.constant 0 : index
    %c0_168 = arith.constant 0 : index
    %257 = vector.load %arg12[%c10_166, %c0_167, %c0_168] : memref<16x1x256xf32, #tpu.memory_space<vmem>>, vector<1x1x256xf32>
    %258 = vector.shape_cast %257 : vector<1x1x256xf32> to vector<1x256xf32>
    %259 = vector.broadcast %258 : vector<1x256xf32> to vector<2x256xf32>
    %260 = arith.addf %256, %259 : vector<2x256xf32>
    %cst_169 = arith.constant 0.000000e+00 : f32
    %261 = vector.broadcast %cst_169 : f32 to vector<2x256xf32>
    %262 = arith.maximumf %260, %261 : vector<2x256xf32>
    %263 = arith.truncf %262 : vector<2x256xf32> to vector<2x256xbf16>
    %c11_170 = arith.constant 11 : index
    %c0_171 = arith.constant 0 : index
    %c0_172 = arith.constant 0 : index
    %264 = vector.load %arg11[%c11_170, %c0_171, %c0_172] : memref<16x128x256xbf16, #tpu.memory_space<vmem>>, vector<1x128x256xbf16>
    %265 = vector.shape_cast %264 : vector<1x128x256xbf16> to vector<128x256xbf16>
    %cst_173 = arith.constant dense<0.000000e+00> : vector<2x256xf32>
    %266 = tpu.matmul %153, %265, %cst_173 {dimension_numbers = #tpu.dot_dimension_numbers<[1], [0], [0], [1], [0, 0, 1, 1], [], []>} : vector<2x128xbf16>, vector<128x256xbf16>, vector<2x256xf32> -> vector<2x256xf32>
    %c11_174 = arith.constant 11 : index
    %c0_175 = arith.constant 0 : index
    %c0_176 = arith.constant 0 : index
    %267 = vector.load %arg12[%c11_174, %c0_175, %c0_176] : memref<16x1x256xf32, #tpu.memory_space<vmem>>, vector<1x1x256xf32>
    %268 = vector.shape_cast %267 : vector<1x1x256xf32> to vector<1x256xf32>
    %269 = vector.broadcast %268 : vector<1x256xf32> to vector<2x256xf32>
    %270 = arith.addf %266, %269 : vector<2x256xf32>
    %cst_177 = arith.constant 0.000000e+00 : f32
    %271 = vector.broadcast %cst_177 : f32 to vector<2x256xf32>
    %272 = arith.maximumf %270, %271 : vector<2x256xf32>
    %273 = arith.truncf %272 : vector<2x256xf32> to vector<2x256xbf16>
    %c12_178 = arith.constant 12 : index
    %c0_179 = arith.constant 0 : index
    %c0_180 = arith.constant 0 : index
    %274 = vector.load %arg11[%c12_178, %c0_179, %c0_180] : memref<16x128x256xbf16, #tpu.memory_space<vmem>>, vector<1x128x256xbf16>
    %275 = vector.shape_cast %274 : vector<1x128x256xbf16> to vector<128x256xbf16>
    %cst_181 = arith.constant dense<0.000000e+00> : vector<2x256xf32>
    %276 = tpu.matmul %153, %275, %cst_181 {dimension_numbers = #tpu.dot_dimension_numbers<[1], [0], [0], [1], [0, 0, 1, 1], [], []>} : vector<2x128xbf16>, vector<128x256xbf16>, vector<2x256xf32> -> vector<2x256xf32>
    %c12_182 = arith.constant 12 : index
    %c0_183 = arith.constant 0 : index
    %c0_184 = arith.constant 0 : index
    %277 = vector.load %arg12[%c12_182, %c0_183, %c0_184] : memref<16x1x256xf32, #tpu.memory_space<vmem>>, vector<1x1x256xf32>
    %278 = vector.shape_cast %277 : vector<1x1x256xf32> to vector<1x256xf32>
    %279 = vector.broadcast %278 : vector<1x256xf32> to vector<2x256xf32>
    %280 = arith.addf %276, %279 : vector<2x256xf32>
    %cst_185 = arith.constant 0.000000e+00 : f32
    %281 = vector.broadcast %cst_185 : f32 to vector<2x256xf32>
    %282 = arith.maximumf %280, %281 : vector<2x256xf32>
    %283 = arith.truncf %282 : vector<2x256xf32> to vector<2x256xbf16>
    %c13_186 = arith.constant 13 : index
    %c0_187 = arith.constant 0 : index
    %c0_188 = arith.constant 0 : index
    %284 = vector.load %arg11[%c13_186, %c0_187, %c0_188] : memref<16x128x256xbf16, #tpu.memory_space<vmem>>, vector<1x128x256xbf16>
    %285 = vector.shape_cast %284 : vector<1x128x256xbf16> to vector<128x256xbf16>
    %cst_189 = arith.constant dense<0.000000e+00> : vector<2x256xf32>
    %286 = tpu.matmul %153, %285, %cst_189 {dimension_numbers = #tpu.dot_dimension_numbers<[1], [0], [0], [1], [0, 0, 1, 1], [], []>} : vector<2x128xbf16>, vector<128x256xbf16>, vector<2x256xf32> -> vector<2x256xf32>
    %c13_190 = arith.constant 13 : index
    %c0_191 = arith.constant 0 : index
    %c0_192 = arith.constant 0 : index
    %287 = vector.load %arg12[%c13_190, %c0_191, %c0_192] : memref<16x1x256xf32, #tpu.memory_space<vmem>>, vector<1x1x256xf32>
    %288 = vector.shape_cast %287 : vector<1x1x256xf32> to vector<1x256xf32>
    %289 = vector.broadcast %288 : vector<1x256xf32> to vector<2x256xf32>
    %290 = arith.addf %286, %289 : vector<2x256xf32>
    %cst_193 = arith.constant 0.000000e+00 : f32
    %291 = vector.broadcast %cst_193 : f32 to vector<2x256xf32>
    %292 = arith.maximumf %290, %291 : vector<2x256xf32>
    %293 = arith.truncf %292 : vector<2x256xf32> to vector<2x256xbf16>
    %c14_194 = arith.constant 14 : index
    %c0_195 = arith.constant 0 : index
    %c0_196 = arith.constant 0 : index
    %294 = vector.load %arg11[%c14_194, %c0_195, %c0_196] : memref<16x128x256xbf16, #tpu.memory_space<vmem>>, vector<1x128x256xbf16>
    %295 = vector.shape_cast %294 : vector<1x128x256xbf16> to vector<128x256xbf16>
    %cst_197 = arith.constant dense<0.000000e+00> : vector<2x256xf32>
    %296 = tpu.matmul %153, %295, %cst_197 {dimension_numbers = #tpu.dot_dimension_numbers<[1], [0], [0], [1], [0, 0, 1, 1], [], []>} : vector<2x128xbf16>, vector<128x256xbf16>, vector<2x256xf32> -> vector<2x256xf32>
    %c14_198 = arith.constant 14 : index
    %c0_199 = arith.constant 0 : index
    %c0_200 = arith.constant 0 : index
    %297 = vector.load %arg12[%c14_198, %c0_199, %c0_200] : memref<16x1x256xf32, #tpu.memory_space<vmem>>, vector<1x1x256xf32>
    %298 = vector.shape_cast %297 : vector<1x1x256xf32> to vector<1x256xf32>
    %299 = vector.broadcast %298 : vector<1x256xf32> to vector<2x256xf32>
    %300 = arith.addf %296, %299 : vector<2x256xf32>
    %cst_201 = arith.constant 0.000000e+00 : f32
    %301 = vector.broadcast %cst_201 : f32 to vector<2x256xf32>
    %302 = arith.maximumf %300, %301 : vector<2x256xf32>
    %303 = arith.truncf %302 : vector<2x256xf32> to vector<2x256xbf16>
    %c15_202 = arith.constant 15 : index
    %c0_203 = arith.constant 0 : index
    %c0_204 = arith.constant 0 : index
    %304 = vector.load %arg11[%c15_202, %c0_203, %c0_204] : memref<16x128x256xbf16, #tpu.memory_space<vmem>>, vector<1x128x256xbf16>
    %305 = vector.shape_cast %304 : vector<1x128x256xbf16> to vector<128x256xbf16>
    %cst_205 = arith.constant dense<0.000000e+00> : vector<2x256xf32>
    %306 = tpu.matmul %153, %305, %cst_205 {dimension_numbers = #tpu.dot_dimension_numbers<[1], [0], [0], [1], [0, 0, 1, 1], [], []>} : vector<2x128xbf16>, vector<128x256xbf16>, vector<2x256xf32> -> vector<2x256xf32>
    %c15_206 = arith.constant 15 : index
    %c0_207 = arith.constant 0 : index
    %c0_208 = arith.constant 0 : index
    %307 = vector.load %arg12[%c15_206, %c0_207, %c0_208] : memref<16x1x256xf32, #tpu.memory_space<vmem>>, vector<1x1x256xf32>
    %308 = vector.shape_cast %307 : vector<1x1x256xf32> to vector<1x256xf32>
    %309 = vector.broadcast %308 : vector<1x256xf32> to vector<2x256xf32>
    %310 = arith.addf %306, %309 : vector<2x256xf32>
    %cst_209 = arith.constant 0.000000e+00 : f32
    %311 = vector.broadcast %cst_209 : f32 to vector<2x256xf32>
    %312 = arith.maximumf %310, %311 : vector<2x256xf32>
    %313 = arith.truncf %312 : vector<2x256xf32> to vector<2x256xbf16>
    %314 = tpu.concatenate %163, %173, %183, %193, %203, %213, %223, %233, %243, %253, %263, %273, %283, %293, %303, %313 in 0 : vector<2x256xbf16>, vector<2x256xbf16>, vector<2x256xbf16>, vector<2x256xbf16>, vector<2x256xbf16>, vector<2x256xbf16>, vector<2x256xbf16>, vector<2x256xbf16>, vector<2x256xbf16>, vector<2x256xbf16>, vector<2x256xbf16>, vector<2x256xbf16>, vector<2x256xbf16>, vector<2x256xbf16>, vector<2x256xbf16>, vector<2x256xbf16> -> vector<32x256xbf16>
    %c0_210 = arith.constant 0 : index
    %c0_211 = arith.constant 0 : index
    %315 = vector.load %arg13[%c0_210, %c0_211] : memref<256x512xbf16, #tpu.memory_space<vmem>>, vector<256x512xbf16>
    %cst_212 = arith.constant dense<0.000000e+00> : vector<32x512xf32>
    %316 = tpu.matmul %314, %315, %cst_212 {dimension_numbers = #tpu.dot_dimension_numbers<[1], [0], [0], [1], [0, 0, 1, 1], [], []>} : vector<32x256xbf16>, vector<256x512xbf16>, vector<32x512xf32> -> vector<32x512xf32>
    %c0_213 = arith.constant 0 : index
    %c0_214 = arith.constant 0 : index
    %317 = vector.load %arg14[%c0_213, %c0_214] : memref<1x512xf32, #tpu.memory_space<vmem>>, vector<1x512xf32>
    %318 = vector.broadcast %317 : vector<1x512xf32> to vector<32x512xf32>
    %319 = arith.addf %316, %318 : vector<32x512xf32>
    %cst_215 = arith.constant 0.000000e+00 : f32
    %320 = vector.broadcast %cst_215 : f32 to vector<32x512xf32>
    %321 = arith.maximumf %319, %320 : vector<32x512xf32>
    %322 = arith.truncf %321 : vector<32x512xf32> to vector<32x512xbf16>
    %c0_216 = arith.constant 0 : index
    %c0_217 = arith.constant 0 : index
    %323 = vector.load %arg17[%c0_216, %c0_217] : memref<32x512xbf16, #tpu.memory_space<vmem>>, vector<32x512xbf16>
    tpu.vector_store %arg17[%c0_216, %c0_217], %322 {strides = array<i32>} : memref<32x512xbf16, #tpu.memory_space<vmem>>, vector<32x512xbf16>,
    return
  }
  func.func @transform_0(%arg0: i32) -> (i32, i32) {
    %c0_i32 = arith.constant 0 : i32
    %c0_i32_0 = arith.constant 0 : i32
    %c0_i32_1 = arith.constant 0 : i32
    return %c0_i32, %c0_i32_0 : i32, i32
  }
  func.func @transform_1(%arg0: i32) -> (i32, i32) {
    %c0_i32 = arith.constant 0 : i32
    %c0_i32_0 = arith.constant 0 : i32
    %c0_i32_1 = arith.constant 0 : i32
    return %c0_i32, %c0_i32_0 : i32, i32
  }
  func.func @transform_2(%arg0: i32) -> (i32, i32) {
    %c0_i32 = arith.constant 0 : i32
    %c0_i32_0 = arith.constant 0 : i32
    %c0_i32_1 = arith.constant 0 : i32
    return %c0_i32, %c0_i32_0 : i32, i32
  }
  func.func @transform_3(%arg0: i32) -> (i32, i32) {
    %c0_i32 = arith.constant 0 : i32
    %c0_i32_0 = arith.constant 0 : i32
    %c0_i32_1 = arith.constant 0 : i32
    return %c0_i32, %c0_i32_0 : i32, i32
  }
  func.func @transform_4(%arg0: i32) -> (i32, i32) {
    %c0_i32 = arith.constant 0 : i32
    %c0_i32_0 = arith.constant 0 : i32
    %c0_i32_1 = arith.constant 0 : i32
    return %c0_i32, %c0_i32_0 : i32, i32
  }
  func.func @transform_5(%arg0: i32) -> (i32, i32) {
    %c0_i32 = arith.constant 0 : i32
    %c0_i32_0 = arith.constant 0 : i32
    %c0_i32_1 = arith.constant 0 : i32
    return %c0_i32, %c0_i32_0 : i32, i32
  }
  func.func @transform_6(%arg0: i32) -> (i32, i32) {
    %c0_i32 = arith.constant 0 : i32
    %c0_i32_0 = arith.constant 0 : i32
    %c0_i32_1 = arith.constant 0 : i32
    return %c0_i32, %c0_i32_0 : i32, i32
  }
  func.func @transform_7(%arg0: i32) -> (i32, i32, i32) {
    %c0_i32 = arith.constant 0 : i32
    %c0_i32_0 = arith.constant 0 : i32
    %c0_i32_1 = arith.constant 0 : i32
    %c0_i32_2 = arith.constant 0 : i32
    return %c0_i32, %c0_i32_0, %c0_i32_1 : i32, i32, i32
  }
  func.func @transform_8(%arg0: i32) -> (i32, i32) {
    %c0_i32 = arith.constant 0 : i32
    %c0_i32_0 = arith.constant 0 : i32
    %c0_i32_1 = arith.constant 0 : i32
    return %c0_i32, %c0_i32_0 : i32, i32
  }
  func.func @transform_9(%arg0: i32) -> (i32, i32) {
    %c0_i32 = arith.constant 0 : i32
    %c0_i32_0 = arith.constant 0 : i32
    %c0_i32_1 = arith.constant 0 : i32
    return %c0_i32, %c0_i32_0 : i32, i32
  }
  func.func @transform_10(%arg0: i32) -> (i32, i32, i32) {
    %c0_i32 = arith.constant 0 : i32
    %c0_i32_0 = arith.constant 0 : i32
    %c0_i32_1 = arith.constant 0 : i32
    %c0_i32_2 = arith.constant 0 : i32
    return %c0_i32, %c0_i32_0, %c0_i32_1 : i32, i32, i32
  }
  func.func @transform_11(%arg0: i32) -> (i32, i32, i32) {
    %c0_i32 = arith.constant 0 : i32
    %c0_i32_0 = arith.constant 0 : i32
    %c0_i32_1 = arith.constant 0 : i32
    %c0_i32_2 = arith.constant 0 : i32
    return %c0_i32, %c0_i32_0, %c0_i32_1 : i32, i32, i32
  }
  func.func @transform_12(%arg0: i32) -> (i32, i32) {
    %c0_i32 = arith.constant 0 : i32
    %c0_i32_0 = arith.constant 0 : i32
    %c0_i32_1 = arith.constant 0 : i32
    return %c0_i32, %c0_i32_0 : i32, i32
  }
  func.func @transform_13(%arg0: i32) -> (i32, i32) {
    %c0_i32 = arith.constant 0 : i32
    %c0_i32_0 = arith.constant 0 : i32
    %c0_i32_1 = arith.constant 0 : i32
    return %c0_i32, %c0_i32_0 : i32, i32
  }
  func.func @transform_14(%arg0: i32) -> (i32, i32) {
    %c0_i32 = arith.constant 0 : i32
    %c0_i32_0 = arith.constant 0 : i32
    %c0_i32_1 = arith.constant 0 : i32
    return %c0_i32, %c0_i32_0 : i32, i32
  }
  func.func @transform_15(%arg0: i32) -> (i32, i32) {
    %c0_i32 = arith.constant 0 : i32
    %c0_i32_0 = arith.constant 0 : i32
    %c0_i32_1 = arith.constant 0 : i32
    return %c0_i32, %c0_i32_0 : i32, i32
  }
  func.func @transform_16(%arg0: i32) -> (i32, i32) {
    %c0_i32 = arith.constant 0 : i32
    %c0_i32_0 = arith.constant 0 : i32
    %c0_i32_1 = arith.constant 0 : i32
    return %c0_i32, %c0_i32_0 : i32, i32
  }
}

module attributes {stable_mosaic.version = 11 : i64} {
  func.func @_convt3_kernel(%arg0: i32, %arg1: memref<1x18x576xbf16, #tpu.memory_space<vmem>>, %arg2: memref<576x544xbf16, #tpu.memory_space<vmem>>, %arg3: memref<576x544xbf16, #tpu.memory_space<vmem>>, %arg4: memref<576x544xbf16, #tpu.memory_space<vmem>>, %arg5: memref<576x544xbf16, #tpu.memory_space<vmem>>, %arg6: memref<576x544xbf16, #tpu.memory_space<vmem>>, %arg7: memref<576x544xbf16, #tpu.memory_space<vmem>>, %arg8: memref<1x544xf32, #tpu.memory_space<vmem>>, %arg9: memref<1x4x17x544xf32, #tpu.memory_space<vmem>>) attributes {dimension_semantics = [#tpu.dimension_semantics<parallel>], iteration_bounds = array<i64: 2>, scalar_prefetch = 0 : i64, scratch_operands = 0 : i64, tpu.core_type = #tpu.core_type<tc>, window_params = [{transform_indices = @transform_0, window_bounds = array<i64: 1, 18, 576>}, {pipeline_mode = #tpu.pipeline_mode<synchronous>, transform_indices = @transform_1, window_bounds = array<i64: 576, 544>}, {pipeline_mode = #tpu.pipeline_mode<synchronous>, transform_indices = @transform_2, window_bounds = array<i64: 576, 544>}, {pipeline_mode = #tpu.pipeline_mode<synchronous>, transform_indices = @transform_3, window_bounds = array<i64: 576, 544>}, {pipeline_mode = #tpu.pipeline_mode<synchronous>, transform_indices = @transform_4, window_bounds = array<i64: 576, 544>}, {pipeline_mode = #tpu.pipeline_mode<synchronous>, transform_indices = @transform_5, window_bounds = array<i64: 576, 544>}, {pipeline_mode = #tpu.pipeline_mode<synchronous>, transform_indices = @transform_6, window_bounds = array<i64: 576, 544>}, {pipeline_mode = #tpu.pipeline_mode<synchronous>, transform_indices = @transform_7, window_bounds = array<i64: 1, 544>}, {transform_indices = @transform_8, window_bounds = array<i64: 1, 4, 17, 544>}]} {
    %c0 = arith.constant 0 : index
    %c0_0 = arith.constant 0 : index
    %c0_1 = arith.constant 0 : index
    %0 = vector.load %arg1[%c0, %c0_0, %c0_1] : memref<1x18x576xbf16, #tpu.memory_space<vmem>>, vector<1x18x576xbf16>
    %1 = vector.shape_cast %0 : vector<1x18x576xbf16> to vector<18x576xbf16>
    %2 = vector.extract_strided_slice %1 {offsets = [1, 0], sizes = [17, 576], strides = [1, 1]} : vector<18x576xbf16> to vector<17x576xbf16>
    %3 = vector.extract_strided_slice %1 {offsets = [0, 0], sizes = [17, 576], strides = [1, 1]} : vector<18x576xbf16> to vector<17x576xbf16>
    %c0_2 = arith.constant 0 : index
    %c0_3 = arith.constant 0 : index
    %4 = vector.load %arg8[%c0_2, %c0_3] : memref<1x544xf32, #tpu.memory_space<vmem>>, vector<1x544xf32>
    %c0_4 = arith.constant 0 : index
    %c0_5 = arith.constant 0 : index
    %5 = vector.load %arg2[%c0_4, %c0_5] : memref<576x544xbf16, #tpu.memory_space<vmem>>, vector<576x544xbf16>
    %cst = arith.constant dense<0.000000e+00> : vector<17x544xf32>
    %6 = tpu.matmul %2, %5, %cst {dimension_numbers = #tpu.dot_dimension_numbers<[1], [0], [0], [1], [0, 0, 1, 1], [], []>} : vector<17x576xbf16>, vector<576x544xbf16>, vector<17x544xf32> -> vector<17x544xf32>
    %c0_6 = arith.constant 0 : index
    %c0_7 = arith.constant 0 : index
    %7 = vector.load %arg3[%c0_6, %c0_7] : memref<576x544xbf16, #tpu.memory_space<vmem>>, vector<576x544xbf16>
    %cst_8 = arith.constant dense<0.000000e+00> : vector<17x544xf32>
    %8 = tpu.matmul %3, %7, %cst_8 {dimension_numbers = #tpu.dot_dimension_numbers<[1], [0], [0], [1], [0, 0, 1, 1], [], []>} : vector<17x576xbf16>, vector<576x544xbf16>, vector<17x544xf32> -> vector<17x544xf32>
    %9 = arith.addf %6, %8 : vector<17x544xf32>
    %c0_9 = arith.constant 0 : index
    %c0_10 = arith.constant 0 : index
    %10 = vector.load %arg4[%c0_9, %c0_10] : memref<576x544xbf16, #tpu.memory_space<vmem>>, vector<576x544xbf16>
    %cst_11 = arith.constant dense<0.000000e+00> : vector<17x544xf32>
    %11 = tpu.matmul %2, %10, %cst_11 {dimension_numbers = #tpu.dot_dimension_numbers<[1], [0], [0], [1], [0, 0, 1, 1], [], []>} : vector<17x576xbf16>, vector<576x544xbf16>, vector<17x544xf32> -> vector<17x544xf32>
    %c0_12 = arith.constant 0 : index
    %c0_13 = arith.constant 0 : index
    %12 = vector.load %arg5[%c0_12, %c0_13] : memref<576x544xbf16, #tpu.memory_space<vmem>>, vector<576x544xbf16>
    %cst_14 = arith.constant dense<0.000000e+00> : vector<17x544xf32>
    %13 = tpu.matmul %3, %12, %cst_14 {dimension_numbers = #tpu.dot_dimension_numbers<[1], [0], [0], [1], [0, 0, 1, 1], [], []>} : vector<17x576xbf16>, vector<576x544xbf16>, vector<17x544xf32> -> vector<17x544xf32>
    %14 = arith.addf %11, %13 : vector<17x544xf32>
    %c0_15 = arith.constant 0 : index
    %c0_16 = arith.constant 0 : index
    %15 = vector.load %arg6[%c0_15, %c0_16] : memref<576x544xbf16, #tpu.memory_space<vmem>>, vector<576x544xbf16>
    %cst_17 = arith.constant dense<0.000000e+00> : vector<17x544xf32>
    %16 = tpu.matmul %2, %15, %cst_17 {dimension_numbers = #tpu.dot_dimension_numbers<[1], [0], [0], [1], [0, 0, 1, 1], [], []>} : vector<17x576xbf16>, vector<576x544xbf16>, vector<17x544xf32> -> vector<17x544xf32>
    %c0_18 = arith.constant 0 : index
    %c0_19 = arith.constant 0 : index
    %17 = vector.load %arg7[%c0_18, %c0_19] : memref<576x544xbf16, #tpu.memory_space<vmem>>, vector<576x544xbf16>
    %cst_20 = arith.constant dense<0.000000e+00> : vector<17x544xf32>
    %18 = tpu.matmul %2, %17, %cst_20 {dimension_numbers = #tpu.dot_dimension_numbers<[1], [0], [0], [1], [0, 0, 1, 1], [], []>} : vector<17x576xbf16>, vector<576x544xbf16>, vector<17x544xf32> -> vector<17x544xf32>
    %19 = vector.broadcast %4 : vector<1x544xf32> to vector<17x544xf32>
    %20 = arith.addf %9, %19 : vector<17x544xf32>
    %21 = arith.negf %20 : vector<17x544xf32>
    %22 = math.exp %21 : vector<17x544xf32>
    %cst_21 = arith.constant 1.000000e+00 : f32
    %23 = vector.broadcast %cst_21 : f32 to vector<17x544xf32>
    %24 = arith.addf %23, %22 : vector<17x544xf32>
    %25 = arith.divf %23, %24 : vector<17x544xf32>
    %c0_22 = arith.constant 0 : index
    %c0_23 = arith.constant 0 : index
    %c0_24 = arith.constant 0 : index
    %c0_25 = arith.constant 0 : index
    %26 = vector.load %arg9[%c0_22, %c0_23, %c0_24, %c0_25] : memref<1x4x17x544xf32, #tpu.memory_space<vmem>>, vector<1x1x17x544xf32>
    %27 = vector.shape_cast %26 : vector<1x1x17x544xf32> to vector<17x544xf32>
    %28 = vector.shape_cast %25 : vector<17x544xf32> to vector<1x1x17x544xf32>
    tpu.vector_store %arg9[%c0_22, %c0_23, %c0_24, %c0_25], %28 {strides = array<i32>} : memref<1x4x17x544xf32, #tpu.memory_space<vmem>>, vector<1x1x17x544xf32>,
    %29 = vector.broadcast %4 : vector<1x544xf32> to vector<17x544xf32>
    %30 = arith.addf %14, %29 : vector<17x544xf32>
    %31 = arith.negf %30 : vector<17x544xf32>
    %32 = math.exp %31 : vector<17x544xf32>
    %cst_26 = arith.constant 1.000000e+00 : f32
    %33 = vector.broadcast %cst_26 : f32 to vector<17x544xf32>
    %34 = arith.addf %33, %32 : vector<17x544xf32>
    %35 = arith.divf %33, %34 : vector<17x544xf32>
    %c0_27 = arith.constant 0 : index
    %c1 = arith.constant 1 : index
    %c0_28 = arith.constant 0 : index
    %c0_29 = arith.constant 0 : index
    %36 = vector.load %arg9[%c0_27, %c1, %c0_28, %c0_29] : memref<1x4x17x544xf32, #tpu.memory_space<vmem>>, vector<1x1x17x544xf32>
    %37 = vector.shape_cast %36 : vector<1x1x17x544xf32> to vector<17x544xf32>
    %38 = vector.shape_cast %35 : vector<17x544xf32> to vector<1x1x17x544xf32>
    tpu.vector_store %arg9[%c0_27, %c1, %c0_28, %c0_29], %38 {strides = array<i32>} : memref<1x4x17x544xf32, #tpu.memory_space<vmem>>, vector<1x1x17x544xf32>,
    %39 = vector.broadcast %4 : vector<1x544xf32> to vector<17x544xf32>
    %40 = arith.addf %16, %39 : vector<17x544xf32>
    %41 = arith.negf %40 : vector<17x544xf32>
    %42 = math.exp %41 : vector<17x544xf32>
    %cst_30 = arith.constant 1.000000e+00 : f32
    %43 = vector.broadcast %cst_30 : f32 to vector<17x544xf32>
    %44 = arith.addf %43, %42 : vector<17x544xf32>
    %45 = arith.divf %43, %44 : vector<17x544xf32>
    %c0_31 = arith.constant 0 : index
    %c2 = arith.constant 2 : index
    %c0_32 = arith.constant 0 : index
    %c0_33 = arith.constant 0 : index
    %46 = vector.load %arg9[%c0_31, %c2, %c0_32, %c0_33] : memref<1x4x17x544xf32, #tpu.memory_space<vmem>>, vector<1x1x17x544xf32>
    %47 = vector.shape_cast %46 : vector<1x1x17x544xf32> to vector<17x544xf32>
    %48 = vector.shape_cast %45 : vector<17x544xf32> to vector<1x1x17x544xf32>
    tpu.vector_store %arg9[%c0_31, %c2, %c0_32, %c0_33], %48 {strides = array<i32>} : memref<1x4x17x544xf32, #tpu.memory_space<vmem>>, vector<1x1x17x544xf32>,
    %49 = vector.broadcast %4 : vector<1x544xf32> to vector<17x544xf32>
    %50 = arith.addf %18, %49 : vector<17x544xf32>
    %51 = arith.negf %50 : vector<17x544xf32>
    %52 = math.exp %51 : vector<17x544xf32>
    %cst_34 = arith.constant 1.000000e+00 : f32
    %53 = vector.broadcast %cst_34 : f32 to vector<17x544xf32>
    %54 = arith.addf %53, %52 : vector<17x544xf32>
    %55 = arith.divf %53, %54 : vector<17x544xf32>
    %c0_35 = arith.constant 0 : index
    %c3 = arith.constant 3 : index
    %c0_36 = arith.constant 0 : index
    %c0_37 = arith.constant 0 : index
    %56 = vector.load %arg9[%c0_35, %c3, %c0_36, %c0_37] : memref<1x4x17x544xf32, #tpu.memory_space<vmem>>, vector<1x1x17x544xf32>
    %57 = vector.shape_cast %56 : vector<1x1x17x544xf32> to vector<17x544xf32>
    %58 = vector.shape_cast %55 : vector<17x544xf32> to vector<1x1x17x544xf32>
    tpu.vector_store %arg9[%c0_35, %c3, %c0_36, %c0_37], %58 {strides = array<i32>} : memref<1x4x17x544xf32, #tpu.memory_space<vmem>>, vector<1x1x17x544xf32>,
    return
  }
  func.func @transform_0(%arg0: i32) -> (i32, i32, i32) {
    %c0_i32 = arith.constant 0 : i32
    %c0_i32_0 = arith.constant 0 : i32
    %c0_i32_1 = arith.constant 0 : i32
    return %arg0, %c0_i32, %c0_i32_0 : i32, i32, i32
  }
  func.func @transform_1(%arg0: i32) -> (i32, i32) {
    %c0_i32 = arith.constant 0 : i32
    %c0_i32_0 = arith.constant 0 : i32
    %c0_i32_1 = arith.constant 0 : i32
    return %c0_i32, %c0_i32_0 : i32, i32
  }
  func.func @transform_2(%arg0: i32) -> (i32, i32) {
    %c0_i32 = arith.constant 0 : i32
    %c0_i32_0 = arith.constant 0 : i32
    %c0_i32_1 = arith.constant 0 : i32
    return %c0_i32, %c0_i32_0 : i32, i32
  }
  func.func @transform_3(%arg0: i32) -> (i32, i32) {
    %c0_i32 = arith.constant 0 : i32
    %c0_i32_0 = arith.constant 0 : i32
    %c0_i32_1 = arith.constant 0 : i32
    return %c0_i32, %c0_i32_0 : i32, i32
  }
  func.func @transform_4(%arg0: i32) -> (i32, i32) {
    %c0_i32 = arith.constant 0 : i32
    %c0_i32_0 = arith.constant 0 : i32
    %c0_i32_1 = arith.constant 0 : i32
    return %c0_i32, %c0_i32_0 : i32, i32
  }
  func.func @transform_5(%arg0: i32) -> (i32, i32) {
    %c0_i32 = arith.constant 0 : i32
    %c0_i32_0 = arith.constant 0 : i32
    %c0_i32_1 = arith.constant 0 : i32
    return %c0_i32, %c0_i32_0 : i32, i32
  }
  func.func @transform_6(%arg0: i32) -> (i32, i32) {
    %c0_i32 = arith.constant 0 : i32
    %c0_i32_0 = arith.constant 0 : i32
    %c0_i32_1 = arith.constant 0 : i32
    return %c0_i32, %c0_i32_0 : i32, i32
  }
  func.func @transform_7(%arg0: i32) -> (i32, i32) {
    %c0_i32 = arith.constant 0 : i32
    %c0_i32_0 = arith.constant 0 : i32
    %c0_i32_1 = arith.constant 0 : i32
    return %c0_i32, %c0_i32_0 : i32, i32
  }
  func.func @transform_8(%arg0: i32) -> (i32, i32, i32, i32) {
    %c0_i32 = arith.constant 0 : i32
    %c0_i32_0 = arith.constant 0 : i32
    %c0_i32_1 = arith.constant 0 : i32
    %c0_i32_2 = arith.constant 0 : i32
    return %arg0, %c0_i32, %c0_i32_0, %c0_i32_1 : i32, i32, i32, i32
  }
}

</mosaic_0001>

<bundles_post_ra>
// kernel: vae_forward.2
= control target key start
LH: loop header
LB: loop body
LE: loop exit
PB: predicated region body
PF: predicated region fallthrough
CT: control target
= control target key end

     0   :  { %s11828_s0 = inlined_call_operand.vmem [shape: bf16[32,192], index: 0, kind: input, shape index: {}]   ;;  %s11829_s1 = inlined_call_operand.vmem [shape: bf16[192,512], index: 1, kind: input, shape index: {}]   ;;  %s11830_s2 = inlined_call_operand.vmem [shape: f32[1,512], index: 2, kind: input, shape index: {}]   ;;  %s11831_s3 = inlined_call_operand.vmem [shape: bf16[512,256], index: 3, kind: input, shape index: {}]   ;;  %s11832_s4 = inlined_call_operand.vmem [shape: f32[1,256], index: 4, kind: input, shape index: {}]   ;;  %s11833_s5 = inlined_call_operand.hbm [shape: bf16[256,128], index: 5, kind: input, shape index: {}]   ;;  %s11834_s6 = inlined_call_operand.vmem [shape: f32[1,128], index: 6, kind: input, shape index: {}]   ;;  %s11835_s7 = inlined_call_operand.vmem [shape: bf16[16,128,256], index: 7, kind: input, shape index: {}]   ;;  %s11836_s8 = inlined_call_operand.vmem [shape: f32[1,256], index: 8, kind: input, shape index: {}]   ;;  %s11837_s9 = inlined_call_operand.vmem [shape: f32[2,128], index: 9, kind: input, shape index: {}]   ;;  %s11838_s10 = inlined_call_operand.vmem [shape: bf16[16,128,256], index: 10, kind: input, shape index: {}]   ;;  %s11839_s11 = inlined_call_operand.vmem [shape: f32[16,1,256], index: 11, kind: input, shape index: {}]   ;;  %s11840_s12 = inlined_call_operand.vmem [shape: bf16[256,512], index: 12, kind: input, shape index: {}]   ;;  %s11841_s13 = inlined_call_operand.vmem [shape: f32[1,512], index: 13, kind: input, shape index: {}]   ;;  %s11842_s14 = inlined_call_operand.hbm [shape: f32[2,128], index: 14, kind: output, shape index: {0}]   ;;  %s11843_s15 = inlined_call_operand.hbm [shape: f32[2,128], index: 15, kind: output, shape index: {1}]   ;;  %s11844_s16 = inlined_call_operand.vmem [shape: bf16[32,512], index: 16, kind: output, shape index: {2}]  }
   0x1   :  { %11846 = sst [smem:[#allocation11_spill]] %s11828_s0 }
   0x2   :  { %22 = vsyncpa [#allocation3], 0 }
   0x3   :  { %23 = vsyncpa [#allocation4], 0 }
   0x4   :  { %24 = vsyncpa [#allocation7], 0  ;;  %s9261_s21 = smov [#allocation2]   ;;  %s9189_s25 = scalar_lea.hbm %s11833_s5, 2048 }
   0x5   :  { %s40_s22 = sshll.u32 %s9261_s21, 4  ;;  %p9190_p0 = scmp.ne.s32.totalorder %s11833_s5, %s9189_s25  ;;  %s41_s22 = int_to_ptr.vmem [resolvable:$true] %s40_s22 }
   0x6   :  { %p9193_p1 = scmp.lt.u32.totalorder %s9189_s25, %s11833_s5 }
   0x8   :  { %p9195_p2 = pnand %p9193_p1, %p9190_p0 }
   0xa   :  { %9198 = shalt.err (!%p9195_p2)
}
   0xb   :  { %s9199_s30 = scalar_lea.vmem %s41_s22, 2048  ;;  %p9204_p4 = scmp.lt.s32.totalorder %s41_s22, %s41_s22 }
   0xc   :  { %p9200_p3 = scmp.ne.s32.totalorder %s41_s22, %s9199_s30  ;;  %p9205_p5 = scmp.lt.s32.totalorder %s9199_s30, %s9199_s30 }
   0xe   :  { %p9206_p6 = por %p9205_p5, %p9204_p4 }
  0x10   :  { %p9207_p7 = pnand %p9206_p6, %p9200_p3 }
  0x12   :  { %9210 = shalt.err (!%p9207_p7)
}
  0x13   :  { %s9262_s0 = smov 64   ;;  %s9263_s17 = smov 4  }
  0x14   :  { %46 = dma.hbm_to_vmem [thread:$0]  %s11833_s5, 2048, %s41_s22, [#allocation3], %s9262_s0, %s9262_s0, %s9263_s17  }
  0x15   :  { %9255 = dma.done.wait [#allocation3], 2048  }
  0x16   :  { %9256 = vsyncadd [#allocation3], 4294965248  ;;  %v8131_v0 = vld [vmem:[%s11829_s1 + $0x4] ss:$16 sps:$4 sm:$0xff]   ;;  %v8133_v1 = vld [vmem:[%s11829_s1] ss:$16 sps:$4 sm:$0xff]  }
  0x17   :  { %406 = vmatprep.subr.bf16.mxu0 %v8131_v0  ;;  %v8134_v2 = vld [vmem:[%s11829_s1 + $0x24] ss:$16 sps:$4 sm:$0xff]   ;;  %v8136_v3 = vld [vmem:[%s11829_s1 + $0x20] ss:$16 sps:$4 sm:$0xff]   ;;  %vm399_vm0 = vcmask 523264   ;;  %s11847_s22 = sld [smem:[#allocation11_spill]] }
  0x18   :  { %407 = vmatpush1.bf16.msra.mxu0 %v8133_v1  ;;  %v8137_v4 = vld [vmem:[%s11829_s1 + $0x44] ss:$16 sps:$4 sm:$0xff]   ;;  %v8139_v5 = vld [vmem:[%s11829_s1 + $0x40] ss:$16 sps:$4 sm:$0xff]   ;;  %v8170_v12 = vld [vmem:[%s11829_s1 + $0xc] ss:$16 sps:$4 sm:$0xff]  }
  0x19   :  { %408 = vmatprep.subr.bf16.mxu0 %v8134_v2  ;;  %v8140_v6 = vld [vmem:[%s11829_s1 + $0x64] ss:$16 sps:$4 sm:$0xff]   ;;  %v8142_v7 = vld [vmem:[%s11829_s1 + $0x60] ss:$16 sps:$4 sm:$0xff]   ;;  %v8172_v13 = vld [vmem:[%s11829_s1 + $0x8] ss:$16 sps:$4 sm:$0xff]   ;;  %459 = vmatprep.subr.bf16.mxu1 %v8170_v12 }
  0x1a   :  { %v8143_v8 = vld [vmem:[%s11829_s1 + $0x84] ss:$16 sps:$4 sm:$0xff]   ;;  %v8145_v9 = vld [vmem:[%s11829_s1 + $0x80] ss:$16 sps:$4 sm:$0xff]   ;;  %v8173_v15 = vld [vmem:[%s11829_s1 + $0x2c] ss:$16 sps:$4 sm:$0xff]   ;;  %460 = vmatpush1.bf16.msra.mxu1 %v8172_v13 }
  0x1b   :  { %v8146_v10 = vld [vmem:[%s11829_s1 + $0xa4] ss:$16 sps:$4 sm:$0xff]   ;;  %v8148_v14 = vld [vmem:[%s11829_s1 + $0xa0] ss:$16 sps:$4 sm:$0xff]   ;;  %v8175_v17 = vld [vmem:[%s11829_s1 + $0x28] ss:$16 sps:$4 sm:$0xff]   ;;  %461 = vmatprep.subr.bf16.mxu1 %v8173_v15 }
  0x1c   :  { %409 = vmatpush1.bf16.msra.mxu0 %v8136_v3  ;;  %v8149_v16 = vld [vmem:[%s11829_s1 + $0xc4] ss:$16 sps:$4 sm:$0xff]   ;;  %v8176_v18 = vld [vmem:[%s11829_s1 + $0x4c] ss:$16 sps:$4 sm:$0xff]   ;;  %v8151_v19 = vld [vmem:[%s11829_s1 + $0xc0] ss:$16 sps:$4 sm:$0xff]  }
  0x1d   :  { %410 = vmatprep.subr.bf16.mxu0 %v8137_v4  ;;  %v8169_v11 = vld [vmem:[%s11847_s22 + $0x4] ss:$8 sps:$4 sm:$0xff]   ;;  %v8178_v21 = vld [vmem:[%s11829_s1 + $0x48] ss:$16 sps:$4 sm:$0xff]   ;;  %v8154_v23 = vld [vmem:[%s11829_s1 + $0xe0] ss:$16 sps:$4 sm:$0xff]  }
  0x1e   :  { %6909 = vmatprep.mubr.msk.bf16.mxu0 %vm399_vm0, %v8169_v11  ;;  %6911 = vmatprep.mubr.msk.bf16.mxu1 %vm399_vm0, %v8169_v11  ;;  %v8152_v20 = vld [vmem:[%s11829_s1 + $0xe4] ss:$16 sps:$4 sm:$0xff]   ;;  %v8179_v22 = vld [vmem:[%s11829_s1 + $0x6c] ss:$16 sps:$4 sm:$0xff]   ;;  %v8181_v25 = vld [vmem:[%s11829_s1 + $0x68] ss:$16 sps:$4 sm:$0xff]  }
  0x1f   :  { %462 = vmatpush1.bf16.msra.mxu1 %v8175_v17  ;;  %v8155_v24 = vld [vmem:[%s11829_s1 + $0x104] ss:$16 sps:$4 sm:$0xff]   ;;  %v8182_v26 = vld [vmem:[%s11829_s1 + $0x8c] ss:$16 sps:$4 sm:$0xff]   ;;  %v8157_v27 = vld [vmem:[%s11829_s1 + $0x100] ss:$16 sps:$4 sm:$0xff]  }
  0x20   :  { %411 = vmatpush1.bf16.msra.mxu0 %v8139_v5  ;;  %463 = vmatprep.subr.bf16.mxu1 %v8176_v18  ;;  %v8158_v28 = vld [vmem:[%s11829_s1 + $0x124] ss:$16 sps:$4 sm:$0xff]   ;;  %v8184_v29 = vld [vmem:[%s11829_s1 + $0x88] ss:$16 sps:$4 sm:$0xff]   ;;  %v8185_v30 = vld [vmem:[%s11829_s1 + $0xac] ss:$16 sps:$4 sm:$0xff]  }
  0x21   :  { %412 = vmatprep.subr.bf16.mxu0 %v8140_v6  ;;  %v8160_v31 = vld [vmem:[%s11829_s1 + $0x120] ss:$16 sps:$4 sm:$0xff]   ;;  %v8161_v32 = vld [vmem:[%s11829_s1 + $0x144] ss:$16 sps:$4 sm:$0xff]   ;;  %v8187_v33 = vld [vmem:[%s11829_s1 + $0xa8] ss:$16 sps:$4 sm:$0xff]  }
  0x22   :  { %v8188_v34 = vld [vmem:[%s11829_s1 + $0xcc] ss:$16 sps:$4 sm:$0xff]   ;;  %v8163_v35 = vld [vmem:[%s11829_s1 + $0x140] ss:$16 sps:$4 sm:$0xff]   ;;  %v8164_v36 = vld [vmem:[%s11829_s1 + $0x164] ss:$16 sps:$4 sm:$0xff]  }
  0x23   :  { %464 = vmatpush1.bf16.msra.mxu1 %v8178_v21  ;;  %v8190_v37 = vld [vmem:[%s11829_s1 + $0xc8] ss:$16 sps:$4 sm:$0xff]   ;;  %v8191_v38 = vld [vmem:[%s11829_s1 + $0xec] ss:$16 sps:$4 sm:$0xff]   ;;  %v8166_v39 = vld [vmem:[%s11829_s1 + $0x160] ss:$16 sps:$4 sm:$0xff]   ;;  %v121_v21 = vlaneseq }
  0x24   :  { %413 = vmatpush1.bf16.msra.mxu0 %v8142_v7  ;;  %465 = vmatprep.subr.bf16.mxu1 %v8179_v22  ;;  %v8211_v40 = vld [vmem:[%s11831_s3 + $0x4] ss:$8 sps:$4 sm:$0xff]   ;;  %v8193_v41 = vld [vmem:[%s11829_s1 + $0xe8] ss:$16 sps:$4 sm:$0xff]   ;;  %v8200_v44 = vld [vmem:[%s11847_s22 + $0x14] ss:$8 sps:$4 sm:$0xff]  }
  0x25   :  { %414 = vmatprep.subr.bf16.mxu0 %v8143_v8  ;;  %v8167_v42 = vld [vmem:[%s11847_s22] ss:$8 sps:$4 sm:$0xff]   ;;  %v8194_v43 = vld [vmem:[%s11829_s1 + $0x10c] ss:$16 sps:$4 sm:$0xff]   ;;  %v8212_v50 = vld [vmem:[%s11831_s3 + $0x10] ss:$8 sps:$4 sm:$0xff]  }
  0x26   :  { %v8209_v45 = vld [vmem:[%s11831_s3] ss:$8 sps:$4 sm:$0xff]   ;;  %v8214_v46 = vld [vmem:[%s11831_s3 + $0x14] ss:$8 sps:$4 sm:$0xff]   ;;  %v8202_v51 = vld [vmem:[%s11847_s22 + $0x10] ss:$8 sps:$4 sm:$0xff]  }
  0x27   :  { %466 = vmatpush1.bf16.msra.mxu1 %v8181_v25  ;;  %v8196_v47 = vld [vmem:[%s11829_s1 + $0x108] ss:$16 sps:$4 sm:$0xff]   ;;  %v8197_v48 = vld [vmem:[%s11829_s1 + $0x12c] ss:$16 sps:$4 sm:$0xff]   ;;  %v9625_v22 = vshrl.u32 %v121_v21, 7  ;;  %vm6169_vm1 = vcmask 1040384  }
  0x28   :  { %415 = vmatpush1.bf16.msra.mxu0 %v8145_v9  ;;  %467 = vmatprep.subr.bf16.mxu1 %v8182_v26  ;;  %v8199_v49 = vld [vmem:[%s11829_s1 + $0x128] ss:$16 sps:$4 sm:$0xff]   ;;  %v8217_v52 = vld [vmem:[%s11831_s3 + $0x24] ss:$8 sps:$4 sm:$0xff]   ;;  %v8220_v55 = vld [vmem:[%s11831_s3 + $0x34] ss:$8 sps:$4 sm:$0xff]  }
  0x29   :  { %416 = vmatprep.subr.bf16.mxu0 %v8146_v10  ;;  %v8203_v53 = vld [vmem:[%s11829_s1 + $0x14c] ss:$16 sps:$4 sm:$0xff]   ;;  %v8215_v54 = vld [vmem:[%s11831_s3 + $0x20] ss:$8 sps:$4 sm:$0xff]   ;;  %v8218_v58 = vld [vmem:[%s11831_s3 + $0x30] ss:$8 sps:$4 sm:$0xff]  }
  0x2a   :  { %v8205_v56 = vld [vmem:[%s11829_s1 + $0x148] ss:$16 sps:$4 sm:$0xff]   ;;  %v8206_v57 = vld [vmem:[%s11829_s1 + $0x16c] ss:$16 sps:$4 sm:$0xff]   ;;  %v9634_v25 = vsub.s32 1, %v9625_v22  ;;  %vm6176_vm2 = vcmask 1041408  }
  0x2b   :  { %468 = vmatpush1.bf16.msra.mxu1 %v8184_v29  ;;  %v8223_v59 = vld [vmem:[%s11831_s3 + $0x44] ss:$8 sps:$4 sm:$0xff]   ;;  %v8208_v60 = vld [vmem:[%s11829_s1 + $0x168] ss:$16 sps:$4 sm:$0xff]   ;;  %v8226_v62 = vld [vmem:[%s11831_s3 + $0x54] ss:$8 sps:$4 sm:$0xff]  }
  0x2c   :  { %417 = vmatpush1.bf16.msra.mxu0 %v8148_v14  ;;  %469 = vmatprep.subr.bf16.mxu1 %v8185_v30  ;;  %v8221_v61 = vld [vmem:[%s11831_s3 + $0x40] ss:$8 sps:$4 sm:$0xff]   ;;  %v8224_v63 = vld [vmem:[%s11831_s3 + $0x50] ss:$8 sps:$4 sm:$0xff]   ;;  %v8229_v0 = vld [vmem:[%s11831_s3 + $0x64] ss:$8 sps:$4 sm:$0xff]  }
  0x2d   :  { %418 = vmatprep.subr.bf16.mxu0 %v8149_v16  ;;  %v8227_v1 = vld [vmem:[%s11831_s3 + $0x60] ss:$8 sps:$4 sm:$0xff]   ;;  %v8232_v2 = vld [vmem:[%s11831_s3 + $0x74] ss:$8 sps:$4 sm:$0xff]   ;;  %v8230_v3 = vld [vmem:[%s11831_s3 + $0x70] ss:$8 sps:$4 sm:$0xff]  }
  0x2e   :  { %v8235_v4 = vld [vmem:[%s11831_s3 + $0x84] ss:$8 sps:$4 sm:$0xff]   ;;  %v8233_v5 = vld [vmem:[%s11831_s3 + $0x80] ss:$8 sps:$4 sm:$0xff]   ;;  %v8238_v6 = vld [vmem:[%s11831_s3 + $0x94] ss:$8 sps:$4 sm:$0xff]  }
  0x2f   :  { %470 = vmatpush1.bf16.msra.mxu1 %v8187_v33  ;;  %v8236_v7 = vld [vmem:[%s11831_s3 + $0x90] ss:$8 sps:$4 sm:$0xff]   ;;  %v8241_v8 = vld [vmem:[%s11831_s3 + $0xa4] ss:$8 sps:$4 sm:$0xff]   ;;  %v8239_v9 = vld [vmem:[%s11831_s3 + $0xa0] ss:$8 sps:$4 sm:$0xff]  }
  0x30   :  { %419 = vmatpush1.bf16.msra.mxu0 %v8151_v19  ;;  %471 = vmatprep.subr.bf16.mxu1 %v8188_v34  ;;  %v8244_v10 = vld [vmem:[%s11831_s3 + $0xb4] ss:$8 sps:$4 sm:$0xff]   ;;  %v8242_v11 = vld [vmem:[%s11831_s3 + $0xb0] ss:$8 sps:$4 sm:$0xff]   ;;  %v8247_v12 = vld [vmem:[%s11831_s3 + $0xc4] ss:$8 sps:$4 sm:$0xff]  }
  0x31   :  { %420 = vmatprep.subr.bf16.mxu0 %v8152_v20  ;;  %v8245_v13 = vld [vmem:[%s11831_s3 + $0xc0] ss:$8 sps:$4 sm:$0xff]   ;;  %v8250_v14 = vld [vmem:[%s11831_s3 + $0xd4] ss:$8 sps:$4 sm:$0xff]   ;;  %v8248_v15 = vld [vmem:[%s11831_s3 + $0xd0] ss:$8 sps:$4 sm:$0xff]  }
  0x32   :  { %v8253_v16 = vld [vmem:[%s11831_s3 + $0xe4] ss:$8 sps:$4 sm:$0xff]   ;;  %v8251_v17 = vld [vmem:[%s11831_s3 + $0xe0] ss:$8 sps:$4 sm:$0xff]   ;;  %v8256_v18 = vld [vmem:[%s11831_s3 + $0xf4] ss:$8 sps:$4 sm:$0xff]  }
  0x33   :  { %472 = vmatpush1.bf16.msra.mxu1 %v8190_v37  ;;  %v8254_v19 = vld [vmem:[%s11831_s3 + $0xf0] ss:$8 sps:$4 sm:$0xff]   ;;  %v8259_v20 = vld [vmem:[%s11831_s3 + $0x104] ss:$8 sps:$4 sm:$0xff]   ;;  %vm6181_vm3 = vcmask 1042432   ;;  %vm6186_vm4 = vcmask 1043456  }
  0x34   :  { %421 = vmatpush1.bf16.msra.mxu0 %v8154_v23  ;;  %473 = vmatprep.subr.bf16.mxu1 %v8191_v38  ;;  %v119_v23 = vld [vmem:[%s11830_s2] sm:$0xf]  ;;  %vm6191_vm5 = vcmask 1044480   ;;  %vm6196_vm6 = vcmask 1045504   ;;  %vm6201_vm7 = vcmask 1046528   ;;  %s9265_s23 = smov [#allocation5]  }
  0x35   :  { %422 = vmatprep.subr.bf16.mxu0 %v8155_v24  ;;  %v9631_v24 = vsub.s32 0, %v9625_v22  ;;  %s6830_s24 = sshll.u32 %s9265_s23, 4  ;;  %s6831_s24 = int_to_ptr.vmem [resolvable:$true] %s6830_s24 }
  0x36   :  { %s9211_s28 = scalar_lea.vmem %s6831_s24, 32  ;;  %p9216_p9 = scmp.lt.s32.totalorder %s6831_s24, %s6831_s24 }
  0x37   :  { %474 = vmatpush1.bf16.msra.mxu1 %v8193_v41  ;;  %v124_v26 = vrot.slane %v119_v23, %v9631_v24  ;;  %p9212_p8 = scmp.ne.s32.totalorder %s6831_s24, %s9211_s28  ;;  %p9217_p10 = scmp.lt.s32.totalorder %s9211_s28, %s9211_s28 }
  0x38   :  { %423 = vmatpush1.bf16.msra.mxu0 %v8157_v27  ;;  %475 = vmatprep.subr.bf16.mxu1 %v8194_v43  ;;  %v128_v27 = vrot.slane %v119_v23, %v9634_v25 }
  0x39   :  { %424 = vmatprep.subr.bf16.mxu0 %v8158_v28  ;;  %p9218_p11 = por %p9217_p10, %p9216_p9 }
  0x3b   :  { %476 = vmatpush1.bf16.msra.mxu1 %v8196_v47  ;;  %v8260_v47 = vld [vmem:[%s11831_s3 + $0x110] ss:$8 sps:$4 sm:$0xff]   ;;  %p9219_p12 = pnand %p9218_p11, %p9212_p8 }
  0x3c   :  { %425 = vmatpush1.bf16.msra.mxu0 %v8160_v31  ;;  %477 = vmatprep.subr.bf16.mxu1 %v8197_v48 }
  0x3d   :  { %426 = vmatprep.subr.bf16.mxu0 %v8161_v32 }
  0x3f   :  { %478 = vmatpush1.bf16.msra.mxu1 %v8199_v49 }
  0x40   :  { %427 = vmatpush1.bf16.msra.mxu0 %v8163_v35  ;;  %479 = vmatprep.subr.bf16.mxu1 %v8203_v53 }
  0x41   :  { %428 = vmatprep.subr.bf16.mxu0 %v8164_v36 }
  0x43   :  { %480 = vmatpush1.bf16.msra.mxu1 %v8205_v56 }
  0x44   :  { %429 = vmatpush1.bf16.msra.mxu0 %v8166_v39  ;;  %481 = vmatprep.subr.bf16.mxu1 %v8206_v57  ;;  %v135_v57 = vsub.s32 3, %v9625_v22 }
  0x45   :  { %932 = vmatprep.subr.bf16.mxu0 %v8211_v40  ;;  %v8257_v40 = vld [vmem:[%s11831_s3 + $0x100] ss:$8 sps:$4 sm:$0xff]  }
  0x47   :  { %439 = vmatmul.mubr.bf16.vlgmr.msra.gmra.mrb[0].mxu0 %v8167_v42  ;;  %482 = vmatpush1.bf16.msra.mxu1 %v8208_v60 }
  0x48   :  { %6910 = vmatprep.mubr.msk.bf16.mxu0 %vm399_vm0, %v8200_v44  ;;  %933 = vmatpush1.bf16.msra.mxu0 %v8209_v45 }
  0x49   :  { %934 = vmatprep.subr.bf16.mxu0 %v8214_v46 }
  0x4a   :  { %492 = vmatmul.mubr.bf16.vlgmr.msra.gmra.mrb[0].mxu1 %v8167_v42  ;;  %v8262_v42 = vld [vmem:[%s11831_s3 + $0x114] ss:$8 sps:$4 sm:$0xff]  }
  0x4b   :  { %6912 = vmatprep.mubr.msk.bf16.mxu1 %vm399_vm0, %v8200_v44 }
  0x4c   :  { %935 = vmatpush1.bf16.msra.mxu0 %v8212_v50  ;;  %v8265_v50 = vld [vmem:[%s11831_s3 + $0x124] ss:$8 sps:$4 sm:$0xff]  }
  0x4d   :  { %936 = vmatprep.subr.bf16.mxu0 %v8217_v52 }
  0x4f   :  { %449 = vmatmul.mubr.bf16.gmra.mrb[4].mxu0 %v8202_v51 }
  0x50   :  { %937 = vmatpush1.bf16.msra.mxu0 %v8215_v54  ;;  %v131_v54 = vsub.s32 2, %v9625_v22 }
  0x51   :  { %938 = vmatprep.subr.bf16.mxu0 %v8220_v55 }
  0x52   :  { %502 = vmatmul.mubr.bf16.gmra.mrb[4].mxu1 %v8202_v51 }
  0x54   :  { %939 = vmatpush1.bf16.msra.mxu0 %v8218_v58 }
  0x55   :  { %940 = vmatprep.subr.bf16.mxu0 %v8223_v59  ;;  %v8263_v59 = vld [vmem:[%s11831_s3 + $0x120] ss:$8 sps:$4 sm:$0xff]  }
  0x58   :  { %941 = vmatpush1.bf16.msra.mxu0 %v8221_v61  ;;  %v8268_v61 = vld [vmem:[%s11831_s3 + $0x134] ss:$8 sps:$4 sm:$0xff]  }
  0x59   :  { %942 = vmatprep.subr.bf16.mxu0 %v8226_v62 }
  0x5c   :  { %943 = vmatpush1.bf16.msra.mxu0 %v8224_v63  ;;  %v132_v63 = vrot.slane %v119_v23, %v131_v54 }
  0x5d   :  { %944 = vmatprep.subr.bf16.mxu0 %v8229_v0 }
  0x60   :  { %945 = vmatpush1.bf16.msra.mxu0 %v8227_v1  ;;  %v136_v1 = vrot.slane %v119_v23, %v135_v57 }
  0x61   :  { %946 = vmatprep.subr.bf16.mxu0 %v8232_v2 }
  0x64   :  { %947 = vmatpush1.bf16.msra.mxu0 %v8230_v3 }
  0x65   :  { %948 = vmatprep.subr.bf16.mxu0 %v8235_v4 }
  0x68   :  { %949 = vmatpush1.bf16.msra.mxu0 %v8233_v5  ;;  %v8266_v5 = vld [vmem:[%s11831_s3 + $0x130] ss:$8 sps:$4 sm:$0xff]  }
  0x69   :  { %950 = vmatprep.subr.bf16.mxu0 %v8238_v6 }
  0x6c   :  { %951 = vmatpush1.bf16.msra.mxu0 %v8236_v7 }
  0x6d   :  { %952 = vmatprep.subr.bf16.mxu0 %v8241_v8  ;;  %v8271_v8 = vld [vmem:[%s11831_s3 + $0x144] ss:$8 sps:$4 sm:$0xff]  }
  0x70   :  { %953 = vmatpush1.bf16.msra.mxu0 %v8239_v9 }
  0x71   :  { %954 = vmatprep.subr.bf16.mxu0 %v8244_v10 }
  0x74   :  { %955 = vmatpush1.bf16.msra.mxu0 %v8242_v11 }
  0x75   :  { %956 = vmatprep.subr.bf16.mxu0 %v8247_v12 }
  0x78   :  { %957 = vmatpush1.bf16.msra.mxu0 %v8245_v13 }
  0x79   :  { %958 = vmatprep.subr.bf16.mxu0 %v8250_v14 }
  0x7c   :  { %959 = vmatpush1.bf16.msra.mxu0 %v8248_v15  ;;  %v8269_v15 = vld [vmem:[%s11831_s3 + $0x140] ss:$8 sps:$4 sm:$0xff]  }
  0x7d   :  { %960 = vmatprep.subr.bf16.mxu0 %v8253_v16 }
  0x80   :  { %961 = vmatpush1.bf16.msra.mxu0 %v8251_v17  ;;  %v8274_v17 = vld [vmem:[%s11831_s3 + $0x154] ss:$8 sps:$4 sm:$0xff]  }
  0x81   :  { %962 = vmatprep.subr.bf16.mxu0 %v8256_v18 }
  0x84   :  { %963 = vmatpush1.bf16.msra.mxu0 %v8254_v19 }
  0x85   :  { %985 = vmatprep.subr.bf16.mxu0 %v8259_v20 }
 0x11a   :  { %v440_v28 = vpop.f32.mrb[0].mxu0 }
 0x11b   :  { %v441_v29 = vadd.f32 %v440_v28, %v124_v26  ;;  %v442_v30 = vpop.f32.mrb[1].mxu0 }
 0x11c   :  { %v443_v31 = vadd.f32 %v442_v30, %v128_v27  ;;  %v444_v32 = vpop.f32.mrb[2].mxu0 }
 0x11d   :  { %v445_v33 = vadd.f32 %v444_v32, %v124_v26  ;;  %v446_v34 = vpop.f32.mrb[3].mxu0  ;;  %v512_v36 = vmax.f32 %v441_v29, 0.0  ;;  %v493_v2 = vpop.f32.mrb[0].mxu1  ;;  %v8277_v29 = vld [vmem:[%s11831_s3 + $0x164] ss:$8 sps:$4 sm:$0xff]  }
 0x11e   :  { %v447_v35 = vadd.f32 %v446_v34, %v128_v27  ;;  %v513_v38 = vmax.f32 %v443_v31, 0.0  ;;  %v494_v3 = vadd.f32 %v493_v2, %v132_v63  ;;  %v495_v4 = vpop.f32.mrb[1].mxu1 }
 0x11f   :  { %v516_v37 = vmax.f32 %v445_v33, 0.0  ;;  %v496_v6 = vadd.f32 %v495_v4, %v136_v1  ;;  %v497_v7 = vpop.f32.mrb[2].mxu1 }
 0x120   :  { %v517_v39 = vmax.f32 %v447_v35, 0.0  ;;  %v514_v9 = vmax.f32 %v494_v3, 0.0  ;;  %v498_v10 = vadd.f32 %v497_v7, %v132_v63  ;;  %v499_v11 = vpop.f32.mrb[3].mxu1 }
 0x121   :  { %v528_v41 = vpack.c.bf16 %v516_v37, %v512_v36  ;;  %v515_v12 = vmax.f32 %v496_v6, 0.0  ;;  %v500_v13 = vadd.f32 %v499_v11, %v136_v1  ;;  %v8275_v36 = vld [vmem:[%s11831_s3 + $0x160] ss:$8 sps:$4 sm:$0xff]  }
 0x122   :  { %v529_v43 = vpack.c.bf16 %v517_v39, %v513_v38  ;;  %v450_v44 = vpop.f32.mrb[4].mxu0  ;;  %v518_v14 = vmax.f32 %v498_v10, 0.0  ;;  %v8280_v38 = vld [vmem:[%s11831_s3 + $0x174] ss:$8 sps:$4 sm:$0xff]  }
 0x123   :  { %v451_v45 = vadd.f32 %v450_v44, %v124_v26  ;;  %v452_v46 = vpop.f32.mrb[5].mxu0  ;;  %v519_v16 = vmax.f32 %v500_v13, 0.0  ;;  %v8286_v44 = vld [vmem:[%s11831_s3 + $0x194] ss:$8 sps:$4 sm:$0xff]  }
 0x124   :  { %964 = vmatprep.mubr.bf16.mxu0 %v529_v43  ;;  %v453_v48 = vadd.f32 %v452_v46, %v128_v27  ;;  %v454_v49 = vpop.f32.mrb[6].mxu0  ;;  %v530_v18 = vpack.c.bf16 %v518_v14, %v514_v9  ;;  %v8281_v43 = vld [vmem:[%s11831_s3 + $0x180] ss:$8 sps:$4 sm:$0xff]   ;;  %v8289_v46 = vld [vmem:[%s11831_s3 + $0x1a4] ss:$8 sps:$4 sm:$0xff]  }
 0x125   :  { %965 = vmatmul.mubr.bf16.vlgmr.msra.gmra.mrb[8].mxu0 %v528_v41  ;;  %v520_v51 = vmax.f32 %v451_v45, 0.0  ;;  %v455_v52 = vadd.f32 %v454_v49, %v124_v26  ;;  %v456_v53 = vpop.f32.mrb[7].mxu0  ;;  %v531_v19 = vpack.c.bf16 %v519_v16, %v515_v12  ;;  %v503_v20 = vpop.f32.mrb[4].mxu1  ;;  %v8272_v26 = vld [vmem:[%s11831_s3 + $0x150] ss:$8 sps:$4 sm:$0xff]  }
 0x126   :  { %986 = vmatpush1.bf16.msra.mxu0 %v8257_v40  ;;  %v521_v55 = vmax.f32 %v453_v48, 0.0  ;;  %v457_v56 = vadd.f32 %v456_v53, %v128_v27  ;;  %v504_v21 = vadd.f32 %v503_v20, %v132_v63  ;;  %v505_v23 = vpop.f32.mrb[5].mxu1  ;;  %v8278_v41 = vld [vmem:[%s11831_s3 + $0x170] ss:$8 sps:$4 sm:$0xff]   ;;  %v8292_v48 = vld [vmem:[%s11831_s3 + $0x1b4] ss:$8 sps:$4 sm:$0xff]  }
 0x127   :  { %987 = vmatprep.subr.bf16.mxu0 %v8262_v42  ;;  %v524_v58 = vmax.f32 %v455_v52, 0.0  ;;  %v506_v27 = vadd.f32 %v505_v23, %v136_v1  ;;  %v507_v28 = vpop.f32.mrb[6].mxu1  ;;  %v8283_v42 = vld [vmem:[%s11831_s3 + $0x184] ss:$8 sps:$4 sm:$0xff]   ;;  %v8284_v45 = vld [vmem:[%s11831_s3 + $0x190] ss:$8 sps:$4 sm:$0xff]  }
 0x128   :  { %v525_v60 = vmax.f32 %v457_v56, 0.0  ;;  %v522_v30 = vmax.f32 %v504_v21, 0.0  ;;  %v508_v31 = vadd.f32 %v507_v28, %v132_v63  ;;  %v509_v32 = vpop.f32.mrb[7].mxu1  ;;  %v8290_v49 = vld [vmem:[%s11831_s3 + $0x1b0] ss:$8 sps:$4 sm:$0xff]  }
 0x129   :  { %v532_v62 = vpack.c.bf16 %v524_v58, %v520_v51  ;;  %v523_v33 = vmax.f32 %v506_v27, 0.0  ;;  %v510_v34 = vadd.f32 %v509_v32, %v136_v1  ;;  %v8293_v51 = vld [vmem:[%s11831_s3 + $0x1c0] ss:$8 sps:$4 sm:$0xff]   ;;  %v8298_v52 = vld [vmem:[%s11831_s3 + $0x1d4] ss:$8 sps:$4 sm:$0xff]  }
 0x12a   :  { %988 = vmatpush1.bf16.msra.mxu0 %v8260_v47  ;;  %v533_v0 = vpack.c.bf16 %v525_v60, %v521_v55  ;;  %v526_v35 = vmax.f32 %v508_v31, 0.0  ;;  %v8287_v47 = vld [vmem:[%s11831_s3 + $0x1a0] ss:$8 sps:$4 sm:$0xff]   ;;  %v8296_v53 = vld [vmem:[%s11831_s3 + $0x1d0] ss:$8 sps:$4 sm:$0xff]  }
 0x12b   :  { %989 = vmatprep.subr.bf16.mxu0 %v8265_v50  ;;  %v527_v37 = vmax.f32 %v510_v34, 0.0  ;;  %v8295_v50 = vld [vmem:[%s11831_s3 + $0x1c4] ss:$8 sps:$4 sm:$0xff]   ;;  %v8299_v56 = vld [vmem:[%s11831_s3 + $0x1e0] ss:$8 sps:$4 sm:$0xff]  }
 0x12c   :  { %974 = vmatprep.mubr.bf16.mxu0 %v533_v0  ;;  %v534_v39 = vpack.c.bf16 %v526_v35, %v522_v30  ;;  %v8301_v55 = vld [vmem:[%s11831_s3 + $0x1e4] ss:$8 sps:$4 sm:$0xff]   ;;  %v8304_v58 = vld [vmem:[%s11831_s3 + $0x1f4] ss:$8 sps:$4 sm:$0xff]   ;;  %v600_v60 = vld [vmem:[%s11832_s4] sm:$0x3] }
 0x12d   :  { %975 = vmatmul.mubr.bf16.gmra.mrb[12].mxu0 %v532_v62  ;;  %v535_v40 = vpack.c.bf16 %v527_v37, %v523_v33  ;;  %v605_v62 = vrot.slane %v600_v60, %v9631_v24  ;;  %v609_v0 = vrot.slane %v600_v60, %v9634_v25 }
 0x12e   :  { %990 = vmatpush1.bf16.msra.mxu0 %v8263_v59  ;;  %1017 = vmatprep.mubr.bf16.mxu0 %v531_v19  ;;  %v8302_v59 = vld [vmem:[%s11831_s3 + $0x1f0] ss:$8 sps:$4 sm:$0xff]  }
 0x12f   :  { %991 = vmatprep.subr.bf16.mxu0 %v8268_v61 }
 0x132   :  { %992 = vmatpush1.bf16.msra.mxu0 %v8266_v5 }
 0x133   :  { %993 = vmatprep.subr.bf16.mxu0 %v8271_v8 }
 0x136   :  { %994 = vmatpush1.bf16.msra.mxu0 %v8269_v15 }
 0x137   :  { %995 = vmatprep.subr.bf16.mxu0 %v8274_v17 }
 0x13a   :  { %996 = vmatpush1.bf16.msra.mxu0 %v8272_v26 }
 0x13b   :  { %997 = vmatprep.subr.bf16.mxu0 %v8277_v29 }
 0x13e   :  { %998 = vmatpush1.bf16.msra.mxu0 %v8275_v36 }
 0x13f   :  { %999 = vmatprep.subr.bf16.mxu0 %v8280_v38 }
 0x142   :  { %1000 = vmatpush1.bf16.msra.mxu0 %v8278_v41 }
 0x143   :  { %1001 = vmatprep.subr.bf16.mxu0 %v8283_v42 }
 0x146   :  { %1002 = vmatpush1.bf16.msra.mxu0 %v8281_v43 }
 0x147   :  { %1003 = vmatprep.subr.bf16.mxu0 %v8286_v44 }
 0x14a   :  { %1004 = vmatpush1.bf16.msra.mxu0 %v8284_v45 }
 0x14b   :  { %1005 = vmatprep.subr.bf16.mxu0 %v8289_v46 }
 0x14e   :  { %1006 = vmatpush1.bf16.msra.mxu0 %v8287_v47 }
 0x14f   :  { %1007 = vmatprep.subr.bf16.mxu0 %v8292_v48 }
 0x152   :  { %1008 = vmatpush1.bf16.msra.mxu0 %v8290_v49 }
 0x153   :  { %1009 = vmatprep.subr.bf16.mxu0 %v8295_v50 }
 0x156   :  { %1010 = vmatpush1.bf16.msra.mxu0 %v8293_v51 }
 0x157   :  { %1011 = vmatprep.subr.bf16.mxu0 %v8298_v52 }
 0x15a   :  { %1012 = vmatpush1.bf16.msra.mxu0 %v8296_v53 }
 0x15b   :  { %1013 = vmatprep.subr.bf16.mxu0 %v8301_v55 }
 0x15e   :  { %1014 = vmatpush1.bf16.msra.mxu0 %v8299_v56 }
 0x15f   :  { %1015 = vmatprep.subr.bf16.mxu0 %v8304_v58 }
 0x162   :  { %1016 = vmatpush1.bf16.msra.mxu0 %v8302_v59 }
 0x165   :  { %1018 = vmatmul.mubr.bf16.vlgmr.msra.gmra.mrb[8].mxu0 %v530_v18 }
 0x166   :  { %1027 = vmatprep.mubr.bf16.mxu0 %v535_v40 }
 0x16d   :  { %1028 = vmatmul.mubr.bf16.gmra.mrb[12].mxu0 %v534_v39 }
 0x238   :  { %v1019_v61 = vpop.f32.mrb[8].mxu0 }
 0x239   :  { %v1021_v63 = vpop.f32.mrb[9].mxu0  ;;  %v9746_v5 = vadd.f32 %v1019_v61, %v605_v62 }
 0x23a   :  { %v1023_v1 = vpop.f32.mrb[10].mxu0  ;;  %v9748_v6 = vadd.f32 %v1021_v63, %v609_v0 }
 0x23b   :  { %v9742_v2 = vadd.f32 %v1023_v1, %v605_v62  ;;  %v1025_v3 = vpop.f32.mrb[11].mxu0  ;;  %v1056_v10 = vmul.f32 %v9746_v5, %v9746_v5  ;;  %v8306_v1 = vld [vmem:[#allocation2] sm:$0xff]  }
 0x23c   :  { %v9744_v4 = vadd.f32 %v1025_v3, %v609_v0  ;;  %v1057_v14 = vmul.f32 %v9748_v6, %v9748_v6  ;;  %v8307_v3 = vld [vmem:[#allocation2 + $0x48] sm:$0xff]  }
 0x23d   :  { %v1058_v7 = vmul.f32 %v9742_v2, %v9742_v2  ;;  %v1038_v11 = vadd.f32 %v9742_v2, %v9746_v5 }
 0x23e   :  { %v1059_v8 = vmul.f32 %v9744_v4, %v9744_v4  ;;  %v1047_v15 = vadd.f32 %v9744_v4, %v9748_v6 }
 0x23f   :  { %v1064_v18 = vadd.f32 %v1058_v7, %v1056_v10  ;;  %v8308_v7 = vld [vmem:[#allocation2 + $0x8] sm:$0xff]   ;;  %v8311_v10 = vld [vmem:[#allocation2 + $0x58] sm:$0xff]  }
 0x240   :  { %v1029_v9 = vpop.f32.mrb[12].mxu0  ;;  %v1073_v26 = vadd.f32 %v1059_v8, %v1057_v14  ;;  %v8309_v8 = vld [vmem:[#allocation2 + $0x50] sm:$0xff]  }
 0x241   :  { %v9758_v12 = vadd.f32 %v1029_v9, %v605_v62  ;;  %v1031_v13 = vpop.f32.mrb[13].mxu0  ;;  %v8310_v9 = vld [vmem:[#allocation2 + $0x10] sm:$0xff]  }
 0x242   :  { %v9764_v16 = vadd.f32 %v1031_v13, %v609_v0  ;;  %v1033_v17 = vpop.f32.mrb[14].mxu0 }
 0x243   :  { %v1039_v19 = vadd.f32 %v9758_v12, %v1038_v11  ;;  %v1060_v20 = vmul.f32 %v9758_v12, %v9758_v12  ;;  %v9769_v21 = vadd.f32 %v1033_v17, %v605_v62  ;;  %v1035_v23 = vpop.f32.mrb[15].mxu0 }
 0x244   :  { %v1048_v27 = vadd.f32 %v9764_v16, %v1047_v15  ;;  %v1061_v28 = vmul.f32 %v9764_v16, %v9764_v16  ;;  %v9774_v29 = vadd.f32 %v1035_v23, %v609_v0  ;;  %v8305_v0 = vld [vmem:[#allocation2 + $0x40] sm:$0xff]   ;;  %v8312_v15 = vld [vmem:[#allocation2 + $0x18] sm:$0xff]  }
 0x245   :  { %v1065_v30 = vadd.f32 %v1064_v18, %v1060_v20  ;;  %v1040_v31 = vadd.f32 %v9769_v21, %v1039_v19  ;;  %v1062_v32 = vmul.f32 %v9769_v21, %v9769_v21  ;;  %8081 = vmatprep.subr.bf16.mxu1 %v8305_v0  ;;  %v8313_v18 = vld [vmem:[#allocation2 + $0x60] sm:$0xff]  }
 0x246   :  { %v1074_v33 = vadd.f32 %v1073_v26, %v1061_v28  ;;  %v1049_v34 = vadd.f32 %v9774_v29, %v1048_v27  ;;  %v1063_v35 = vmul.f32 %v9774_v29, %v9774_v29  ;;  %8082 = vmatpush3.bf16.msra.mxu1 %v8306_v1  ;;  %v8314_v26 = vld [vmem:[#allocation2 + $0x20] sm:$0xff]  }
 0x247   :  { %v1041_v36 = vrot.slane %v1040_v31, 4  ;;  %v1066_v37 = vadd.f32 %v1065_v30, %v1062_v32  ;;  %8083 = vmatprep.subr.bf16.mxu1 %v8307_v3  ;;  %v8315_v30 = vld [vmem:[#allocation2 + $0x68] sm:$0xff]  }
 0x248   :  { %v1050_v38 = vrot.slane %v1049_v34, 4  ;;  %v1075_v39 = vadd.f32 %v1074_v33, %v1063_v35  ;;  %v8316_v33 = vld [vmem:[#allocation2 + $0x28] sm:$0xff]  }
 0x249   :  { %v1042_v40 = vadd.f32 %v1041_v36, %v1040_v31  ;;  %v1067_v41 = vrot.slane %v1066_v37, 4 }
 0x24a   :  { %v1051_v42 = vadd.f32 %v1050_v38, %v1049_v34  ;;  %v1076_v43 = vrot.slane %v1075_v39, 4  ;;  %8084 = vmatpush3.bf16.msra.mxu1 %v8308_v7  ;;  %v8317_v38 = vld [vmem:[#allocation2 + $0x70] sm:$0xff]  }
 0x24b   :  { %v1043_v44 = vrot.slane %v1042_v40, 2  ;;  %v1068_v45 = vadd.f32 %v1067_v41, %v1066_v37  ;;  %8085 = vmatprep.subr.bf16.mxu1 %v8309_v8  ;;  %v8320_v41 = vld [vmem:[#allocation2 + $0x38] sm:$0xff]  }
 0x24c   :  { %v1052_v46 = vrot.slane %v1051_v42, 2  ;;  %v1077_v47 = vadd.f32 %v1076_v43, %v1075_v39  ;;  %v8318_v39 = vld [vmem:[#allocation2 + $0x30] sm:$0xff]   ;;  %v8323_v43 = vld [vmem:[%s11835_s7 + $0x84] ss:$8 sps:$4 sm:$0xff]  }
 0x24d   :  { %v1044_v48 = vadd.f32 %v1043_v44, %v1042_v40  ;;  %v1069_v49 = vrot.slane %v1068_v45, 2  ;;  %v8319_v40 = vld [vmem:[#allocation2 + $0x78] sm:$0xff]   ;;  %v8324_v44 = vld [vmem:[%s11835_s7 + $0x180] ss:$8 sps:$4 sm:$0xff]  }
 0x24e   :  { %v1053_v50 = vadd.f32 %v1052_v46, %v1051_v42  ;;  %v1078_v51 = vrot.slane %v1077_v47, 2  ;;  %8086 = vmatpush3.bf16.msra.mxu1 %v8310_v9  ;;  %v8332_v46 = vld [vmem:[%s11835_s7 + $0x194] ss:$8 sps:$4 sm:$0xff]  }
 0x24f   :  { %v1045_v52 = vrot.slane %v1044_v48, 1  ;;  %v1070_v53 = vadd.f32 %v1069_v49, %v1068_v45  ;;  %8087 = vmatprep.subr.bf16.mxu1 %v8311_v10  ;;  %v8326_v45 = vld [vmem:[%s11835_s7 + $0x184] ss:$8 sps:$4 sm:$0xff]   ;;  %v8336_v49 = vld [vmem:[%s11835_s7 + $0x1a0] ss:$8 sps:$4 sm:$0xff]  }
 0x250   :  { %v1054_v55 = vrot.slane %v1053_v50, 1  ;;  %v1079_v56 = vadd.f32 %v1078_v51, %v1077_v47  ;;  %1866 = vmatprep.subr.bf16.mxu0 %v8326_v45  ;;  %v8330_v47 = vld [vmem:[%s11835_s7 + $0x190] ss:$8 sps:$4 sm:$0xff]   ;;  %v8360_v45 = vld [vmem:[%s11835_s7 + $0x1e0] ss:$8 sps:$4 sm:$0xff]  }
 0x251   :  { %v1046_v58 = vadd.f32 %v1045_v52, %v1044_v48  ;;  %v1071_v59 = vrot.slane %v1070_v53, 1  ;;  %1867 = vmatpush1.bf16.msra.mxu0 %v8324_v44  ;;  %v8338_v48 = vld [vmem:[%s11835_s7 + $0x1a4] ss:$8 sps:$4 sm:$0xff]   ;;  %v8342_v51 = vld [vmem:[%s11835_s7 + $0x1b0] ss:$8 sps:$4 sm:$0xff]  }
 0x252   :  { %v1055_v60 = vadd.f32 %v1054_v55, %v1053_v50  ;;  %v1080_v61 = vrot.slane %v1079_v56, 1  ;;  %8088 = vmatpush3.bf16.msra.mxu1 %v8312_v15  ;;  %1868 = vmatprep.subr.bf16.mxu0 %v8332_v46  ;;  %v8344_v50 = vld [vmem:[%s11835_s7 + $0x1b4] ss:$8 sps:$4 sm:$0xff]   ;;  %v8350_v52 = vld [vmem:[%s11835_s7 + $0x1c4] ss:$8 sps:$4 sm:$0xff]  }
 0x253   :  { %1083 = vrot.lane.b32.xlu0 %v1046_v58, %s9262_s0  ;;  %v1072_v62 = vadd.f32 %v1071_v59, %v1070_v53  ;;  %8089 = vmatprep.subr.bf16.mxu1 %v8313_v18  ;;  %v8348_v53 = vld [vmem:[%s11835_s7 + $0x1c0] ss:$8 sps:$4 sm:$0xff]   ;;  %v8365_v46 = vld [vmem:[%s11835_s7 + $0xf4] ss:$8 sps:$4 sm:$0xff]  }
 0x254   :  { %1089 = vrot.lane.b32.xlu1 %v1055_v60, %s9262_s0  ;;  %v1081_v63 = vadd.f32 %v1080_v61, %v1079_v56  ;;  %v8357_v44 = vld [vmem:[%s11835_s7 + $0xe0] ss:$8 sps:$4 sm:$0xff]  }
 0x255   :  { %1869 = vmatpush1.bf16.msra.mxu0 %v8330_v47  ;;  %v8368_v47 = vld [vmem:[%s11835_s7 + $0x1f4] ss:$8 sps:$4 sm:$0xff]  }
 0x256   :  { %8090 = vmatpush3.bf16.msra.mxu1 %v8314_v26  ;;  %1870 = vmatprep.subr.bf16.mxu0 %v8338_v48  ;;  %v8363_v48 = vld [vmem:[%s11835_s7 + $0xf0] ss:$8 sps:$4 sm:$0xff]  }
 0x257   :  { %1096 = vrot.lane.b32.xlu0 %v1072_v62, %s9262_s0  ;;  %8091 = vmatprep.subr.bf16.mxu1 %v8315_v30 }
 0x258   :  { %1102 = vrot.lane.b32.xlu1 %v1081_v63, %s9262_s0 }
 0x259   :  { %1871 = vmatpush1.bf16.msra.mxu0 %v8336_v49  ;;  %v8366_v49 = vld [vmem:[%s11835_s7 + $0x1f0] ss:$8 sps:$4 sm:$0xff]  }
 0x25a   :  { %8092 = vmatpush3.bf16.msra.mxu1 %v8316_v33  ;;  %1872 = vmatprep.subr.bf16.mxu0 %v8344_v50  ;;  %v8371_v50 = vld [vmem:[%s11835_s7 + $0x4] ss:$8 sps:$4 sm:$0xff]  }
 0x25b   :  { %8093 = vmatprep.subr.bf16.mxu1 %v8317_v38  ;;  %v8353_v38 = vld [vmem:[%s11835_s7 + $0xd4] ss:$8 sps:$4 sm:$0xff]  }
 0x25d   :  { %1873 = vmatpush1.bf16.msra.mxu0 %v8342_v51  ;;  %v8374_v51 = vld [vmem:[%s11835_s7 + $0x284] ss:$8 sps:$4 sm:$0xff]  }
 0x25e   :  { %8094 = vmatpush3.bf16.msra.mxu1 %v8318_v39  ;;  %1874 = vmatprep.subr.bf16.mxu0 %v8350_v52  ;;  %v8356_v39 = vld [vmem:[%s11835_s7 + $0x1d4] ss:$8 sps:$4 sm:$0xff]   ;;  %v9264_v52 = vmov 0  }
 0x25f   :  { %8095 = vmatprep.subr.bf16.mxu1 %v8319_v40  ;;  %v8351_v40 = vld [vmem:[%s11835_s7 + $0xd0] ss:$8 sps:$4 sm:$0xff]   ;;  %1898 = vmatprep.mubr.bf16.mxu0 %v9264_v52 }
 0x261   :  { %1875 = vmatpush1.bf16.msra.mxu0 %v8348_v53 }
 0x262   :  { %8096 = vmatpush3.bf16.msra.mxu1 %v8320_v41  ;;  %v8354_v41 = vld [vmem:[%s11835_s7 + $0x1d0] ss:$8 sps:$4 sm:$0xff]   ;;  %1876 = vmatprep.subr.bf16.mxu0 %v8356_v39 }
 0x263   :  { %1463 = vmatprep.subr.bf16.mxu1 %v8323_v43  ;;  %v8362_v43 = vld [vmem:[%s11835_s7 + $0x1e4] ss:$8 sps:$4 sm:$0xff]   ;;  %v8399_v39 = vld [vmem:[%s11835_s7 + $0x50] ss:$8 sps:$4 sm:$0xff]  }
 0x265   :  { %1877 = vmatpush1.bf16.msra.mxu0 %v8354_v41  ;;  %v8407_v41 = vld [vmem:[%s11835_s7 + $0x64] ss:$8 sps:$4 sm:$0xff]  }
 0x266   :  { %1878 = vmatprep.subr.bf16.mxu0 %v8362_v43  ;;  %v8405_v43 = vld [vmem:[%s11835_s7 + $0x60] ss:$8 sps:$4 sm:$0xff]  }
 0x269   :  { %1879 = vmatpush1.bf16.msra.mxu0 %v8360_v45  ;;  %v8413_v45 = vld [vmem:[%s11835_s7 + $0x74] ss:$8 sps:$4 sm:$0xff]  }
 0x26a   :  { %1880 = vmatprep.subr.bf16.mxu0 %v8368_v47  ;;  %v8411_v47 = vld [vmem:[%s11835_s7 + $0x70] ss:$8 sps:$4 sm:$0xff]  }
 0x26d   :  { %1881 = vmatpush1.bf16.msra.mxu0 %v8366_v49  ;;  %v8419_v49 = vld [vmem:[%s11835_s7 + $0x104] ss:$8 sps:$4 sm:$0xff]  }
 0x26e   :  { %2150 = vmatprep.subr.bf16.mxu0 %v8374_v51  ;;  %v8417_v51 = vld [vmem:[%s11835_s7 + $0x100] ss:$8 sps:$4 sm:$0xff]  }
 0x2c5   :  { %v1084_v11 = vpop.permute.xlu0 %1083 }
 0x2c6   :  { %v1086_v13 = vadd.f32 %v1084_v11, %v1046_v58  ;;  %v1090_v14 = vpop.permute.xlu1 %1089 }
 0x2c8   :  { %v1087_v17 = vadd.f32 %v1086_v13, %v1055_v60 }
 0x2c9   :  { %v1097_v19 = vpop.permute.xlu0 %1096 }
 0x2ca   :  { %v1092_v20 = vadd.f32 %v1090_v14, %v1087_v17  ;;  %v1099_v23 = vadd.f32 %v1097_v19, %v1072_v62  ;;  %v1103_v31 = vpop.permute.xlu1 %1102 }
 0x2cc   :  { %v1094_v27 = vmul.f32 0.0078125, %v1092_v20  ;;  %v1100_v28 = vadd.f32 %v1099_v23, %v1081_v63 }
 0x2ce   :  { %v1105_v32 = vadd.f32 %v1103_v31, %v1100_v28  ;;  %1112 = vrot.lane.b32.xlu0 %v1094_v27, %s9262_s0  ;;  %v1107_v35 = vmul.f32 %v1094_v27, %v1094_v27  ;;  %v8335_v31 = vld [vmem:[%s11835_s7 + $0xa4] ss:$8 sps:$4 sm:$0xff]  }
 0x2d0   :  { %v1106_v34 = vmul.f32 0.0078125, %v1105_v32  ;;  %v8333_v32 = vld [vmem:[%s11835_s7 + $0xa0] ss:$8 sps:$4 sm:$0xff]  }
 0x2d2   :  { %v1108_v36 = vsub.f32 %v1106_v34, %v1107_v35  ;;  %v8341_v34 = vld [vmem:[%s11835_s7 + $0xb4] ss:$8 sps:$4 sm:$0xff]   ;;  %v8339_v35 = vld [vmem:[%s11835_s7 + $0xb0] ss:$8 sps:$4 sm:$0xff]  }
 0x2d4   :  { %v1109_v37 = vadd.f32 1e-05, %v1108_v36  ;;  %v8347_v36 = vld [vmem:[%s11835_s7 + $0xc4] ss:$8 sps:$4 sm:$0xff]  }
 0x2d6   :  { %9185 = vrsqrt.f32 %v1109_v37  ;;  %v8345_v37 = vld [vmem:[%s11835_s7 + $0xc0] ss:$8 sps:$4 sm:$0xff]  }
 0x2e0   :  { %v9186_v42 = vpop.eup %9185 }
 0x2e1   :  { %1117 = vrot.lane.b32.xlu1 %v9186_v42, %s9262_s0 }
 0x340   :  { %v1113_v55 = vpop.permute.xlu0 %1112 }
 0x341   :  { %v1115_v56 = vsel %vm399_vm0, %v1094_v27, %v1113_v55  ;;  %v8329_v27 = vld [vmem:[%s11835_s7 + $0x94] ss:$8 sps:$4 sm:$0xff]   ;;  %v6977_v55 = vld [vmem:[%s11834_s6] ss:$0 sm:$0xff] }
 0x342   :  { %v1124_v58 = vrot.slane %v1115_v56, %v9631_v24 }
 0x344   :  { %v1126_v61 = vsub.f32 %v9748_v6, %v1124_v58  ;;  %v1128_v63 = vsub.f32 %v9744_v4, %v1124_v58  ;;  %v1125_v0 = vsub.f32 %v9746_v5, %v1124_v58  ;;  %v1127_v1 = vsub.f32 %v9742_v2, %v1124_v58 }
 0x345   :  { %v1130_v3 = vsub.f32 %v9764_v16, %v1124_v58  ;;  %v1132_v7 = vsub.f32 %v9774_v29, %v1124_v58  ;;  %v1129_v5 = vsub.f32 %v9758_v12, %v1124_v58  ;;  %v1131_v2 = vsub.f32 %v9769_v21, %v1124_v58  ;;  %v8321_v29 = vld [vmem:[%s11835_s7 + $0x80] ss:$8 sps:$4 sm:$0xff]   ;;  %v8327_v12 = vld [vmem:[%s11835_s7 + $0x90] ss:$8 sps:$4 sm:$0xff]  }
 0x353   :  { %v1118_v59 = vpop.permute.xlu1 %1117 }
 0x354   :  { %v1120_v60 = vsel %vm399_vm0, %v9186_v42, %v1118_v59  ;;  %v8359_v42 = vld [vmem:[%s11835_s7 + $0xe4] ss:$8 sps:$4 sm:$0xff]  }
 0x355   :  { %v1136_v62 = vrot.slane %v1120_v60, %v9631_v24 }
 0x357   :  { %v1138_v8 = vmul.f32 %v1136_v62, %v1126_v61  ;;  %v1140_v9 = vmul.f32 %v1136_v62, %v1128_v63  ;;  %v1137_v10 = vmul.f32 %v1136_v62, %v1125_v0  ;;  %v1139_v11 = vmul.f32 %v1136_v62, %v1127_v1 }
 0x358   :  { %v1142_v13 = vmul.f32 %v1136_v62, %v1130_v3  ;;  %v1144_v14 = vmul.f32 %v1136_v62, %v1132_v7  ;;  %v1141_v23 = vmul.f32 %v1136_v62, %v1129_v5  ;;  %v1143_v26 = vmul.f32 %v1136_v62, %v1131_v2  ;;  %v8375_v2 = vld [vmem:[%s11835_s7 + $0x10] ss:$8 sps:$4 sm:$0xff]  }
 0x359   :  { %v1146_v15 = vmax.f32 %v1138_v8, 0.0  ;;  %v1148_v6 = vmax.f32 %v1140_v9, 0.0  ;;  %v1145_v17 = vmax.f32 %v1137_v10, 0.0  ;;  %v1147_v18 = vmax.f32 %v1139_v11, 0.0 }
 0x35a   :  { %v1150_v19 = vmax.f32 %v1142_v13, 0.0  ;;  %v1152_v4 = vmax.f32 %v1144_v14, 0.0  ;;  %v1149_v21 = vmax.f32 %v1141_v23, 0.0  ;;  %v1151_v30 = vmax.f32 %v1143_v26, 0.0  ;;  %v8369_v13 = vld [vmem:[%s11835_s7] ss:$8 sps:$4 sm:$0xff]  }
 0x35b   :  { %v1154_v20 = vpack.c.bf16 %v1148_v6, %v1146_v15  ;;  %v1153_v16 = vpack.c.bf16 %v1147_v18, %v1145_v17  ;;  %v8372_v14 = vld [vmem:[%s11835_s7 + $0x280] ss:$8 sps:$4 sm:$0xff]   ;;  %v8383_v23 = vld [vmem:[%s11835_s7 + $0x24] ss:$8 sps:$4 sm:$0xff]  }
 0x35c   :  { %v1156_v28 = vpack.c.bf16 %v1152_v4, %v1150_v19  ;;  %v1155_v33 = vpack.c.bf16 %v1151_v30, %v1149_v21  ;;  %v8377_v19 = vld [vmem:[%s11835_s7 + $0x14] ss:$8 sps:$4 sm:$0xff]   ;;  %v8386_v26 = vld [vmem:[%s11835_s7 + $0x2a4] ss:$8 sps:$4 sm:$0xff]  }
 0x35d   :  { %1324 = vmatprep.mubr.bf16.mxu1 %v1154_v20  ;;  %v8380_v4 = vld [vmem:[%s11835_s7 + $0x294] ss:$8 sps:$4 sm:$0xff]   ;;  %v8378_v20 = vld [vmem:[%s11835_s7 + $0x290] ss:$8 sps:$4 sm:$0xff]  }
 0x35e   :  { %1325 = vmatmul.mubr.bf16.vlgmr.msra.gmra.mrb[8].mxu1 %v1153_v16  ;;  %v8389_v21 = vld [vmem:[%s11835_s7 + $0x34] ss:$8 sps:$4 sm:$0xff]  }
 0x35f   :  { %1332 = vmatprep.mubr.bf16.mxu1 %v1156_v28  ;;  %1464 = vmatpush1.bf16.msra.mxu1 %v8321_v29  ;;  %v8381_v28 = vld [vmem:[%s11835_s7 + $0x20] ss:$8 sps:$4 sm:$0xff]   ;;  %v8392_v30 = vld [vmem:[%s11835_s7 + $0x2b4] ss:$8 sps:$4 sm:$0xff]  }
 0x360   :  { %1465 = vmatprep.subr.bf16.mxu1 %v8329_v27 }
 0x363   :  { %1466 = vmatpush1.bf16.msra.mxu1 %v8327_v12  ;;  %v8384_v12 = vld [vmem:[%s11835_s7 + $0x2a0] ss:$8 sps:$4 sm:$0xff]  }
 0x364   :  { %1467 = vmatprep.subr.bf16.mxu1 %v8335_v31  ;;  %v8387_v31 = vld [vmem:[%s11835_s7 + $0x30] ss:$8 sps:$4 sm:$0xff]  }
 0x366   :  { %1333 = vmatmul.mubr.bf16.gmra.mrb[12].mxu1 %v1155_v33  ;;  %v8395_v33 = vld [vmem:[%s11835_s7 + $0x44] ss:$8 sps:$4 sm:$0xff]  }
 0x367   :  { %1468 = vmatpush1.bf16.msra.mxu1 %v8333_v32  ;;  %1495 = vmatprep.mubr.bf16.mxu1 %v9264_v52  ;;  %v8390_v32 = vld [vmem:[%s11835_s7 + $0x2b0] ss:$8 sps:$4 sm:$0xff]  }
 0x368   :  { %1469 = vmatprep.subr.bf16.mxu1 %v8341_v34  ;;  %v8398_v34 = vld [vmem:[%s11835_s7 + $0x2c4] ss:$8 sps:$4 sm:$0xff]  }
 0x36b   :  { %1470 = vmatpush1.bf16.msra.mxu1 %v8339_v35  ;;  %v8393_v35 = vld [vmem:[%s11835_s7 + $0x40] ss:$8 sps:$4 sm:$0xff]  }
 0x36c   :  { %1471 = vmatprep.subr.bf16.mxu1 %v8347_v36  ;;  %v8396_v36 = vld [vmem:[%s11835_s7 + $0x2c0] ss:$8 sps:$4 sm:$0xff]  }
 0x36f   :  { %1472 = vmatpush1.bf16.msra.mxu1 %v8345_v37  ;;  %v8401_v37 = vld [vmem:[%s11835_s7 + $0x54] ss:$8 sps:$4 sm:$0xff]  }
 0x370   :  { %1473 = vmatprep.subr.bf16.mxu1 %v8353_v38  ;;  %v8404_v38 = vld [vmem:[%s11835_s7 + $0x2d4] ss:$8 sps:$4 sm:$0xff]  }
 0x373   :  { %1474 = vmatpush1.bf16.msra.mxu1 %v8351_v40  ;;  %v8402_v40 = vld [vmem:[%s11835_s7 + $0x2d0] ss:$8 sps:$4 sm:$0xff]  }
 0x374   :  { %1475 = vmatprep.subr.bf16.mxu1 %v8359_v42  ;;  %v8410_v42 = vld [vmem:[%s11835_s7 + $0x2e4] ss:$8 sps:$4 sm:$0xff]  }
 0x377   :  { %1476 = vmatpush1.bf16.msra.mxu1 %v8357_v44  ;;  %v8408_v44 = vld [vmem:[%s11835_s7 + $0x2e0] ss:$8 sps:$4 sm:$0xff]  }
 0x378   :  { %1477 = vmatprep.subr.bf16.mxu1 %v8365_v46  ;;  %v8416_v46 = vld [vmem:[%s11835_s7 + $0x2f4] ss:$8 sps:$4 sm:$0xff]  }
 0x37b   :  { %1478 = vmatpush1.bf16.msra.mxu1 %v8363_v48  ;;  %v8414_v48 = vld [vmem:[%s11835_s7 + $0x2f0] ss:$8 sps:$4 sm:$0xff]  }
 0x37c   :  { %1584 = vmatprep.subr.bf16.mxu1 %v8371_v50  ;;  %v8422_v50 = vld [vmem:[%s11835_s7 + $0x384] ss:$8 sps:$4 sm:$0xff]  }
 0x431   :  { %v8097_v53 = vpop.f32.mrb[8].mxu1 }
 0x432   :  { %v8098_v56 = vpop.f32.mrb[9].mxu1 }
 0x433   :  { %v8099_v58 = vadd.f32 %v8098_v56, %v8097_v53  ;;  %v8100_v59 = vpop.f32.mrb[10].mxu1  ;;  %v8420_v53 = vld [vmem:[%s11835_s7 + $0x380] ss:$8 sps:$4 sm:$0xff]   ;;  %v8425_v56 = vld [vmem:[%s11835_s7 + $0x114] ss:$8 sps:$4 sm:$0xff]  }
 0x434   :  { %v8101_v60 = vpop.f32.mrb[11].mxu1 }
 0x435   :  { %v1327_v61 = vadd.f32 %v8099_v58, %v6977_v55  ;;  %v8102_v62 = vadd.f32 %v8101_v60, %v8100_v59  ;;  %v8428_v58 = vld [vmem:[%s11835_s7 + $0x394] ss:$8 sps:$4 sm:$0xff]   ;;  %v8423_v59 = vld [vmem:[%s11835_s7 + $0x110] ss:$8 sps:$4 sm:$0xff]  }
 0x436   :  { %v8426_v60 = vld [vmem:[%s11835_s7 + $0x390] ss:$8 sps:$4 sm:$0xff]  }
 0x437   :  { %v1330_v63 = vadd.f32 %v8102_v62, %v6977_v55  ;;  %v1341_v0 = vmax.f32 %v1327_v61, 0.0  ;;  %v8431_v61 = vld [vmem:[%s11835_s7 + $0x124] ss:$8 sps:$4 sm:$0xff]  }
 0x438   :  { %v8434_v62 = vld [vmem:[%s11835_s7 + $0x3a4] ss:$8 sps:$4 sm:$0xff]  }
 0x439   :  { %v1342_v1 = vmax.f32 %v1330_v63, 0.0  ;;  %v8103_v3 = vpop.f32.mrb[12].mxu1  ;;  %v8429_v63 = vld [vmem:[%s11835_s7 + $0x120] ss:$8 sps:$4 sm:$0xff]  }
 0x43a   :  { %v8104_v7 = vpop.f32.mrb[13].mxu1 }
 0x43b   :  { %v9907_v8 = vpack.c.bf16 %v1342_v1, %v1341_v0  ;;  %v8105_v9 = vadd.f32 %v8104_v7, %v8103_v3  ;;  %v8106_v10 = vpop.f32.mrb[14].mxu1  ;;  %v8432_v0 = vld [vmem:[%s11835_s7 + $0x3a0] ss:$8 sps:$4 sm:$0xff]   ;;  %v8437_v1 = vld [vmem:[%s11835_s7 + $0x134] ss:$8 sps:$4 sm:$0xff]  }
 0x43c   :  { %v8107_v11 = vpop.f32.mrb[15].mxu1  ;;  %v8440_v3 = vld [vmem:[%s11835_s7 + $0x3b4] ss:$8 sps:$4 sm:$0xff]   ;;  %v8435_v7 = vld [vmem:[%s11835_s7 + $0x130] ss:$8 sps:$4 sm:$0xff]  }
 0x43d   :  { %v1335_v15 = vadd.f32 %v8105_v9, %v6977_v55  ;;  %v8108_v6 = vadd.f32 %v8107_v11, %v8106_v10  ;;  %v1381_v17 = vrot.slane %v9907_v8, 1  ;;  %v1784_v18 = vrot.slane %v9907_v8, 3  ;;  %v8438_v9 = vld [vmem:[%s11835_s7 + $0x3b0] ss:$8 sps:$4 sm:$0xff]   ;;  %v8443_v10 = vld [vmem:[%s11835_s7 + $0x144] ss:$8 sps:$4 sm:$0xff]  }
 0x43e   :  { %v8446_v11 = vld [vmem:[%s11835_s7 + $0x3c4] ss:$8 sps:$4 sm:$0xff]  }
 0x43f   :  { %v1338_v5 = vadd.f32 %v8108_v6, %v6977_v55  ;;  %1496 = vmatmul.mubr.bf16.vlgmr.msra.gmra.mrb[16].mxu1 %v1381_v17  ;;  %1899 = vmatmul.mubr.bf16.vlgmr.msra.gmra.mrb[16].mxu0 %v1784_v18  ;;  %v1343_v16 = vmax.f32 %v1335_v15, 0.0  ;;  %v2068_v55 = vrot.slane %v9907_v8, 5  ;;  %v8449_v15 = vld [vmem:[%s11835_s7 + $0x154] ss:$8 sps:$4 sm:$0xff]   ;;  %v8447_v17 = vld [vmem:[%s11835_s7 + $0x150] ss:$8 sps:$4 sm:$0xff]  }
 0x440   :  { %1585 = vmatpush1.bf16.msra.mxu1 %v8369_v13  ;;  %2151 = vmatpush1.bf16.msra.mxu0 %v8372_v14  ;;  %v8441_v13 = vld [vmem:[%s11835_s7 + $0x140] ss:$8 sps:$4 sm:$0xff]   ;;  %v8452_v6 = vld [vmem:[%s11835_s7 + $0x3d4] ss:$8 sps:$4 sm:$0xff]   ;;  %v8450_v18 = vld [vmem:[%s11835_s7 + $0x3d0] ss:$8 sps:$4 sm:$0xff]  }
 0x441   :  { %v1344_v29 = vmax.f32 %v1338_v5, 0.0  ;;  %1586 = vmatprep.subr.bf16.mxu1 %v8377_v19  ;;  %2152 = vmatprep.subr.bf16.mxu0 %v8380_v4  ;;  %v8444_v14 = vld [vmem:[%s11835_s7 + $0x3c0] ss:$8 sps:$4 sm:$0xff]   ;;  %v8455_v19 = vld [vmem:[%s11835_s7 + $0x164] ss:$8 sps:$4 sm:$0xff]  }
 0x442   :  { %1616 = vmatprep.mubr.bf16.mxu1 %v9264_v52  ;;  %2182 = vmatprep.mubr.bf16.mxu0 %v9264_v52  ;;  %v8458_v4 = vld [vmem:[%s11835_s7 + $0x3e4] ss:$8 sps:$4 sm:$0xff]   ;;  %v8453_v5 = vld [vmem:[%s11835_s7 + $0x160] ss:$8 sps:$4 sm:$0xff]  }
 0x443   :  { %v9937_v27 = vpack.c.bf16 %v1344_v29, %v1343_v16  ;;  %v8464_v16 = vld [vmem:[%s11835_s7 + $0x3f4] ss:$8 sps:$4 sm:$0xff]   ;;  %v8459_v29 = vld [vmem:[%s11835_s7 + $0x170] ss:$8 sps:$4 sm:$0xff]  }
 0x444   :  { %1587 = vmatpush1.bf16.msra.mxu1 %v8375_v2  ;;  %2153 = vmatpush1.bf16.msra.mxu0 %v8378_v20  ;;  %v8456_v2 = vld [vmem:[%s11835_s7 + $0x3e0] ss:$8 sps:$4 sm:$0xff]   ;;  %v8461_v20 = vld [vmem:[%s11835_s7 + $0x174] ss:$8 sps:$4 sm:$0xff]  }
 0x445   :  { %1588 = vmatprep.subr.bf16.mxu1 %v8383_v23  ;;  %2154 = vmatprep.subr.bf16.mxu0 %v8386_v26  ;;  %v8462_v23 = vld [vmem:[%s11835_s7 + $0x3f0] ss:$8 sps:$4 sm:$0xff]   ;;  %v8467_v26 = vld [vmem:[%s11835_s7 + $0x204] ss:$8 sps:$4 sm:$0xff]  }
 0x448   :  { %1589 = vmatpush1.bf16.msra.mxu1 %v8381_v28  ;;  %2155 = vmatpush1.bf16.msra.mxu0 %v8384_v12  ;;  %v8470_v28 = vld [vmem:[%s11835_s7 + $0x484] ss:$8 sps:$4 sm:$0xff]   ;;  %v8465_v12 = vld [vmem:[%s11835_s7 + $0x200] ss:$8 sps:$4 sm:$0xff]  }
 0x449   :  { %1590 = vmatprep.subr.bf16.mxu1 %v8389_v21  ;;  %2156 = vmatprep.subr.bf16.mxu0 %v8392_v30  ;;  %v8468_v21 = vld [vmem:[%s11835_s7 + $0x480] ss:$8 sps:$4 sm:$0xff]   ;;  %v1642_v30 = vrot.slane %v9907_v8, 2 }
 0x44c   :  { %1591 = vmatpush1.bf16.msra.mxu1 %v8387_v31  ;;  %2157 = vmatpush1.bf16.msra.mxu0 %v8390_v32  ;;  %v2352_v31 = vrot.slane %v9907_v8, 7  ;;  %v8473_v32 = vld [vmem:[%s11835_s7 + $0x214] ss:$8 sps:$4 sm:$0xff]  }
 0x44d   :  { %1592 = vmatprep.subr.bf16.mxu1 %v8395_v33  ;;  %2158 = vmatprep.subr.bf16.mxu0 %v8398_v34  ;;  %v8476_v33 = vld [vmem:[%s11835_s7 + $0x494] ss:$8 sps:$4 sm:$0xff]   ;;  %v8471_v34 = vld [vmem:[%s11835_s7 + $0x210] ss:$8 sps:$4 sm:$0xff]  }
 0x450   :  { %1593 = vmatpush1.bf16.msra.mxu1 %v8393_v35  ;;  %2159 = vmatpush1.bf16.msra.mxu0 %v8396_v36  ;;  %v8474_v35 = vld [vmem:[%s11835_s7 + $0x490] ss:$8 sps:$4 sm:$0xff]   ;;  %v8479_v36 = vld [vmem:[%s11835_s7 + $0x224] ss:$8 sps:$4 sm:$0xff]  }
 0x451   :  { %1594 = vmatprep.subr.bf16.mxu1 %v8401_v37  ;;  %2160 = vmatprep.subr.bf16.mxu0 %v8404_v38  ;;  %v8482_v37 = vld [vmem:[%s11835_s7 + $0x4a4] ss:$8 sps:$4 sm:$0xff]   ;;  %v8477_v38 = vld [vmem:[%s11835_s7 + $0x220] ss:$8 sps:$4 sm:$0xff]  }
 0x454   :  { %1595 = vmatpush1.bf16.msra.mxu1 %v8399_v39  ;;  %2161 = vmatpush1.bf16.msra.mxu0 %v8402_v40  ;;  %v8480_v39 = vld [vmem:[%s11835_s7 + $0x4a0] ss:$8 sps:$4 sm:$0xff]   ;;  %v8485_v40 = vld [vmem:[%s11835_s7 + $0x234] ss:$8 sps:$4 sm:$0xff]  }
 0x455   :  { %1596 = vmatprep.subr.bf16.mxu1 %v8407_v41  ;;  %2162 = vmatprep.subr.bf16.mxu0 %v8410_v42  ;;  %v8488_v41 = vld [vmem:[%s11835_s7 + $0x4b4] ss:$8 sps:$4 sm:$0xff]   ;;  %v8483_v42 = vld [vmem:[%s11835_s7 + $0x230] ss:$8 sps:$4 sm:$0xff]  }
 0x458   :  { %1597 = vmatpush1.bf16.msra.mxu1 %v8405_v43  ;;  %2163 = vmatpush1.bf16.msra.mxu0 %v8408_v44  ;;  %v8486_v43 = vld [vmem:[%s11835_s7 + $0x4b0] ss:$8 sps:$4 sm:$0xff]   ;;  %v8491_v44 = vld [vmem:[%s11835_s7 + $0x244] ss:$8 sps:$4 sm:$0xff]  }
 0x459   :  { %1598 = vmatprep.subr.bf16.mxu1 %v8413_v45  ;;  %2164 = vmatprep.subr.bf16.mxu0 %v8416_v46  ;;  %v8494_v45 = vld [vmem:[%s11835_s7 + $0x4c4] ss:$8 sps:$4 sm:$0xff]   ;;  %v8489_v46 = vld [vmem:[%s11835_s7 + $0x240] ss:$8 sps:$4 sm:$0xff]  }
 0x45c   :  { %1599 = vmatpush1.bf16.msra.mxu1 %v8411_v47  ;;  %2165 = vmatpush1.bf16.msra.mxu0 %v8414_v48  ;;  %v8492_v47 = vld [vmem:[%s11835_s7 + $0x4c0] ss:$8 sps:$4 sm:$0xff]   ;;  %v8497_v48 = vld [vmem:[%s11835_s7 + $0x254] ss:$8 sps:$4 sm:$0xff]  }
 0x45d   :  { %1724 = vmatprep.subr.bf16.mxu1 %v8419_v49  ;;  %2434 = vmatprep.subr.bf16.mxu0 %v8422_v50  ;;  %v8500_v49 = vld [vmem:[%s11835_s7 + $0x4d4] ss:$8 sps:$4 sm:$0xff]   ;;  %v8495_v50 = vld [vmem:[%s11835_s7 + $0x250] ss:$8 sps:$4 sm:$0xff]  }
 0x45f   :  { %1617 = vmatmul.mubr.bf16.vlgmr.msra.gmra.mrb[20].mxu1 %v9907_v8  ;;  %2183 = vmatmul.mubr.bf16.vlgmr.msra.gmra.mrb[20].mxu0 %v2068_v55  ;;  %v8506_v55 = vld [vmem:[%s11835_s7 + $0x4e4] ss:$8 sps:$4 sm:$0xff]  }
 0x460   :  { %1725 = vmatpush1.bf16.msra.mxu1 %v8417_v51  ;;  %2435 = vmatpush1.bf16.msra.mxu0 %v8420_v53  ;;  %v8498_v51 = vld [vmem:[%s11835_s7 + $0x4d0] ss:$8 sps:$4 sm:$0xff]   ;;  %v8503_v53 = vld [vmem:[%s11835_s7 + $0x264] ss:$8 sps:$4 sm:$0xff]  }
 0x461   :  { %1726 = vmatprep.subr.bf16.mxu1 %v8425_v56  ;;  %2436 = vmatprep.subr.bf16.mxu0 %v8428_v58  ;;  %v8501_v56 = vld [vmem:[%s11835_s7 + $0x260] ss:$8 sps:$4 sm:$0xff]  }
 0x462   :  { %1756 = vmatprep.mubr.bf16.mxu1 %v9264_v52  ;;  %2466 = vmatprep.mubr.bf16.mxu0 %v9264_v52  ;;  %v8504_v58 = vld [vmem:[%s11835_s7 + $0x4e0] ss:$8 sps:$4 sm:$0xff]  }
 0x464   :  { %1727 = vmatpush1.bf16.msra.mxu1 %v8423_v59  ;;  %2437 = vmatpush1.bf16.msra.mxu0 %v8426_v60  ;;  %v8509_v59 = vld [vmem:[%s11835_s7 + $0x274] ss:$8 sps:$4 sm:$0xff]  }
 0x465   :  { %1728 = vmatprep.subr.bf16.mxu1 %v8431_v61  ;;  %2438 = vmatprep.subr.bf16.mxu0 %v8434_v62  ;;  %v8512_v60 = vld [vmem:[%s11835_s7 + $0x4f4] ss:$8 sps:$4 sm:$0xff]   ;;  %v8507_v61 = vld [vmem:[%s11835_s7 + $0x270] ss:$8 sps:$4 sm:$0xff]  }
 0x466   :  { %v8510_v62 = vld [vmem:[%s11835_s7 + $0x4f0] ss:$8 sps:$4 sm:$0xff]  }
 0x468   :  { %1729 = vmatpush1.bf16.msra.mxu1 %v8429_v63  ;;  %2439 = vmatpush1.bf16.msra.mxu0 %v8432_v0  ;;  %v8515_v63 = vld [vmem:[%s11835_s7 + $0x304] ss:$8 sps:$4 sm:$0xff]  }
 0x469   :  { %1730 = vmatprep.subr.bf16.mxu1 %v8437_v1  ;;  %2440 = vmatprep.subr.bf16.mxu0 %v8440_v3  ;;  %v8518_v0 = vld [vmem:[%s11835_s7 + $0x584] ss:$8 sps:$4 sm:$0xff]   ;;  %v8513_v1 = vld [vmem:[%s11835_s7 + $0x300] ss:$8 sps:$4 sm:$0xff]  }
 0x46a   :  { %v8516_v3 = vld [vmem:[%s11835_s7 + $0x580] ss:$8 sps:$4 sm:$0xff]  }
 0x46c   :  { %1731 = vmatpush1.bf16.msra.mxu1 %v8435_v7  ;;  %2441 = vmatpush1.bf16.msra.mxu0 %v8438_v9  ;;  %v1926_v7 = vrot.slane %v9907_v8, 4  ;;  %v2635_v9 = vrot.slane %v9937_v27, 1 }
 0x46d   :  { %1732 = vmatprep.subr.bf16.mxu1 %v8443_v10  ;;  %2442 = vmatprep.subr.bf16.mxu0 %v8446_v11  ;;  %v8521_v10 = vld [vmem:[%s11835_s7 + $0x314] ss:$8 sps:$4 sm:$0xff]  }
 0x46e   :  { %v8524_v11 = vld [vmem:[%s11835_s7 + $0x594] ss:$8 sps:$4 sm:$0xff]  }
 0x470   :  { %1733 = vmatpush1.bf16.msra.mxu1 %v8441_v13  ;;  %2443 = vmatpush1.bf16.msra.mxu0 %v8444_v14  ;;  %v8519_v13 = vld [vmem:[%s11835_s7 + $0x310] ss:$8 sps:$4 sm:$0xff]  }
 0x471   :  { %1734 = vmatprep.subr.bf16.mxu1 %v8449_v15  ;;  %2444 = vmatprep.subr.bf16.mxu0 %v8452_v6  ;;  %v8522_v14 = vld [vmem:[%s11835_s7 + $0x590] ss:$8 sps:$4 sm:$0xff]   ;;  %v8527_v15 = vld [vmem:[%s11835_s7 + $0x324] ss:$8 sps:$4 sm:$0xff]  }
 0x472   :  { %v8530_v6 = vld [vmem:[%s11835_s7 + $0x5a4] ss:$8 sps:$4 sm:$0xff]  }
 0x474   :  { %1735 = vmatpush1.bf16.msra.mxu1 %v8447_v17  ;;  %2445 = vmatpush1.bf16.msra.mxu0 %v8450_v18  ;;  %v8525_v17 = vld [vmem:[%s11835_s7 + $0x320] ss:$8 sps:$4 sm:$0xff]  }
 0x475   :  { %1736 = vmatprep.subr.bf16.mxu1 %v8455_v19  ;;  %2446 = vmatprep.subr.bf16.mxu0 %v8458_v4  ;;  %v8528_v18 = vld [vmem:[%s11835_s7 + $0x5a0] ss:$8 sps:$4 sm:$0xff]   ;;  %v8533_v19 = vld [vmem:[%s11835_s7 + $0x334] ss:$8 sps:$4 sm:$0xff]  }
 0x476   :  { %v8536_v4 = vld [vmem:[%s11835_s7 + $0x5b4] ss:$8 sps:$4 sm:$0xff]  }
 0x478   :  { %1737 = vmatpush1.bf16.msra.mxu1 %v8453_v5  ;;  %2447 = vmatpush1.bf16.msra.mxu0 %v8456_v2  ;;  %v8531_v5 = vld [vmem:[%s11835_s7 + $0x330] ss:$8 sps:$4 sm:$0xff]  }
 0x479   :  { %1738 = vmatprep.subr.bf16.mxu1 %v8461_v20  ;;  %2448 = vmatprep.subr.bf16.mxu0 %v8464_v16  ;;  %v8534_v2 = vld [vmem:[%s11835_s7 + $0x5b0] ss:$8 sps:$4 sm:$0xff]   ;;  %v8539_v20 = vld [vmem:[%s11835_s7 + $0x344] ss:$8 sps:$4 sm:$0xff]  }
 0x47a   :  { %v8542_v16 = vld [vmem:[%s11835_s7 + $0x5c4] ss:$8 sps:$4 sm:$0xff]  }
 0x47c   :  { %1739 = vmatpush1.bf16.msra.mxu1 %v8459_v29  ;;  %2449 = vmatpush1.bf16.msra.mxu0 %v8462_v23  ;;  %v8537_v29 = vld [vmem:[%s11835_s7 + $0x340] ss:$8 sps:$4 sm:$0xff]  }
 0x47d   :  { %2008 = vmatprep.subr.bf16.mxu1 %v8467_v26  ;;  %2717 = vmatprep.subr.bf16.mxu0 %v8470_v28  ;;  %v8540_v23 = vld [vmem:[%s11835_s7 + $0x5c0] ss:$8 sps:$4 sm:$0xff]   ;;  %v8545_v26 = vld [vmem:[%s11835_s7 + $0x354] ss:$8 sps:$4 sm:$0xff]  }
 0x47e   :  { %v8548_v28 = vld [vmem:[%s11835_s7 + $0x5d4] ss:$8 sps:$4 sm:$0xff]  }
 0x47f   :  { %1757 = vmatmul.mubr.bf16.vlgmr.msra.gmra.mrb[24].mxu1 %v1642_v30  ;;  %2467 = vmatmul.mubr.bf16.vlgmr.msra.gmra.mrb[24].mxu0 %v2352_v31  ;;  %v8551_v30 = vld [vmem:[%s11835_s7 + $0x364] ss:$8 sps:$4 sm:$0xff]  }
 0x480   :  { %2009 = vmatpush1.bf16.msra.mxu1 %v8465_v12  ;;  %2718 = vmatpush1.bf16.msra.mxu0 %v8468_v21  ;;  %v8543_v12 = vld [vmem:[%s11835_s7 + $0x350] ss:$8 sps:$4 sm:$0xff]   ;;  %v8554_v31 = vld [vmem:[%s11835_s7 + $0x5e4] ss:$8 sps:$4 sm:$0xff]  }
 0x481   :  { %2010 = vmatprep.subr.bf16.mxu1 %v8473_v32  ;;  %2719 = vmatprep.subr.bf16.mxu0 %v8476_v33  ;;  %v8546_v21 = vld [vmem:[%s11835_s7 + $0x5d0] ss:$8 sps:$4 sm:$0xff]   ;;  %v8549_v32 = vld [vmem:[%s11835_s7 + $0x360] ss:$8 sps:$4 sm:$0xff]  }
 0x482   :  { %2040 = vmatprep.mubr.bf16.mxu1 %v9264_v52  ;;  %2749 = vmatprep.mubr.bf16.mxu0 %v9264_v52  ;;  %v8552_v33 = vld [vmem:[%s11835_s7 + $0x5e0] ss:$8 sps:$4 sm:$0xff]  }
 0x484   :  { %2011 = vmatpush1.bf16.msra.mxu1 %v8471_v34  ;;  %2720 = vmatpush1.bf16.msra.mxu0 %v8474_v35  ;;  %v8557_v34 = vld [vmem:[%s11835_s7 + $0x374] ss:$8 sps:$4 sm:$0xff]  }
 0x485   :  { %2012 = vmatprep.subr.bf16.mxu1 %v8479_v36  ;;  %2721 = vmatprep.subr.bf16.mxu0 %v8482_v37  ;;  %v8560_v35 = vld [vmem:[%s11835_s7 + $0x5f4] ss:$8 sps:$4 sm:$0xff]   ;;  %v8555_v36 = vld [vmem:[%s11835_s7 + $0x370] ss:$8 sps:$4 sm:$0xff]  }
 0x486   :  { %v8558_v37 = vld [vmem:[%s11835_s7 + $0x5f0] ss:$8 sps:$4 sm:$0xff]  }
 0x488   :  { %2013 = vmatpush1.bf16.msra.mxu1 %v8477_v38  ;;  %2722 = vmatpush1.bf16.msra.mxu0 %v8480_v39  ;;  %v8563_v38 = vld [vmem:[%s11835_s7 + $0x404] ss:$8 sps:$4 sm:$0xff]  }
 0x489   :  { %2014 = vmatprep.subr.bf16.mxu1 %v8485_v40  ;;  %2723 = vmatprep.subr.bf16.mxu0 %v8488_v41  ;;  %v8566_v39 = vld [vmem:[%s11835_s7 + $0x684] ss:$8 sps:$4 sm:$0xff]   ;;  %v8561_v40 = vld [vmem:[%s11835_s7 + $0x400] ss:$8 sps:$4 sm:$0xff]  }
 0x48a   :  { %v8564_v41 = vld [vmem:[%s11835_s7 + $0x680] ss:$8 sps:$4 sm:$0xff]  }
 0x48c   :  { %2015 = vmatpush1.bf16.msra.mxu1 %v8483_v42  ;;  %2724 = vmatpush1.bf16.msra.mxu0 %v8486_v43  ;;  %v2210_v42 = vrot.slane %v9907_v8, 6  ;;  %v2919_v43 = vrot.slane %v9937_v27, 3  ;;  %v8567_v8 = vld [vmem:[%s11835_s7 + $0x410] ss:$8 sps:$4 sm:$0xff]  }
 0x48d   :  { %2016 = vmatprep.subr.bf16.mxu1 %v8491_v44  ;;  %2725 = vmatprep.subr.bf16.mxu0 %v8494_v45  ;;  %v8569_v44 = vld [vmem:[%s11835_s7 + $0x414] ss:$8 sps:$4 sm:$0xff]  }
 0x48e   :  { %v8572_v45 = vld [vmem:[%s11835_s7 + $0x694] ss:$8 sps:$4 sm:$0xff]  }
 0x490   :  { %2017 = vmatpush1.bf16.msra.mxu1 %v8489_v46  ;;  %2726 = vmatpush1.bf16.msra.mxu0 %v8492_v47  ;;  %v8570_v46 = vld [vmem:[%s11835_s7 + $0x690] ss:$8 sps:$4 sm:$0xff]   ;;  %v8575_v47 = vld [vmem:[%s11835_s7 + $0x424] ss:$8 sps:$4 sm:$0xff]  }
 0x491   :  { %2018 = vmatprep.subr.bf16.mxu1 %v8497_v48  ;;  %2727 = vmatprep.subr.bf16.mxu0 %v8500_v49  ;;  %v8578_v48 = vld [vmem:[%s11835_s7 + $0x6a4] ss:$8 sps:$4 sm:$0xff]   ;;  %v8573_v49 = vld [vmem:[%s11835_s7 + $0x420] ss:$8 sps:$4 sm:$0xff]  }
 0x494   :  { %2019 = vmatpush1.bf16.msra.mxu1 %v8495_v50  ;;  %2728 = vmatpush1.bf16.msra.mxu0 %v8498_v51  ;;  %v8576_v50 = vld [vmem:[%s11835_s7 + $0x6a0] ss:$8 sps:$4 sm:$0xff]   ;;  %v8581_v51 = vld [vmem:[%s11835_s7 + $0x434] ss:$8 sps:$4 sm:$0xff]  }
 0x495   :  { %2020 = vmatprep.subr.bf16.mxu1 %v8503_v53  ;;  %2729 = vmatprep.subr.bf16.mxu0 %v8506_v55  ;;  %v8584_v53 = vld [vmem:[%s11835_s7 + $0x6b4] ss:$8 sps:$4 sm:$0xff]   ;;  %v8579_v55 = vld [vmem:[%s11835_s7 + $0x430] ss:$8 sps:$4 sm:$0xff]  }
 0x498   :  { %2021 = vmatpush1.bf16.msra.mxu1 %v8501_v56  ;;  %2730 = vmatpush1.bf16.msra.mxu0 %v8504_v58  ;;  %v8582_v56 = vld [vmem:[%s11835_s7 + $0x6b0] ss:$8 sps:$4 sm:$0xff]   ;;  %v8587_v58 = vld [vmem:[%s11835_s7 + $0x444] ss:$8 sps:$4 sm:$0xff]  }
 0x499   :  { %2022 = vmatprep.subr.bf16.mxu1 %v8509_v59  ;;  %2731 = vmatprep.subr.bf16.mxu0 %v8512_v60  ;;  %v8590_v59 = vld [vmem:[%s11835_s7 + $0x6c4] ss:$8 sps:$4 sm:$0xff]   ;;  %v8585_v60 = vld [vmem:[%s11835_s7 + $0x440] ss:$8 sps:$4 sm:$0xff]  }
 0x49c   :  { %2023 = vmatpush1.bf16.msra.mxu1 %v8507_v61  ;;  %2732 = vmatpush1.bf16.msra.mxu0 %v8510_v62  ;;  %v8588_v61 = vld [vmem:[%s11835_s7 + $0x6c0] ss:$8 sps:$4 sm:$0xff]   ;;  %v8593_v62 = vld [vmem:[%s11835_s7 + $0x454] ss:$8 sps:$4 sm:$0xff]  }
 0x49d   :  { %2292 = vmatprep.subr.bf16.mxu1 %v8515_v63  ;;  %3001 = vmatprep.subr.bf16.mxu0 %v8518_v0  ;;  %v8596_v63 = vld [vmem:[%s11835_s7 + $0x6d4] ss:$8 sps:$4 sm:$0xff]   ;;  %v8591_v0 = vld [vmem:[%s11835_s7 + $0x450] ss:$8 sps:$4 sm:$0xff]  }
 0x49f   :  { %2041 = vmatmul.mubr.bf16.vlgmr.msra.gmra.mrb[28].mxu1 %v1926_v7  ;;  %2750 = vmatmul.mubr.bf16.vlgmr.msra.gmra.mrb[28].mxu0 %v2635_v9  ;;  %v8602_v7 = vld [vmem:[%s11835_s7 + $0x6e4] ss:$8 sps:$4 sm:$0xff]   ;;  %v8597_v9 = vld [vmem:[%s11835_s7 + $0x460] ss:$8 sps:$4 sm:$0xff]  }
 0x4a0   :  { %2293 = vmatpush1.bf16.msra.mxu1 %v8513_v1  ;;  %3002 = vmatpush1.bf16.msra.mxu0 %v8516_v3  ;;  %v8594_v1 = vld [vmem:[%s11835_s7 + $0x6d0] ss:$8 sps:$4 sm:$0xff]   ;;  %v8599_v3 = vld [vmem:[%s11835_s7 + $0x464] ss:$8 sps:$4 sm:$0xff]  }
 0x4a1   :  { %2294 = vmatprep.subr.bf16.mxu1 %v8521_v10  ;;  %3003 = vmatprep.subr.bf16.mxu0 %v8524_v11  ;;  %v8600_v10 = vld [vmem:[%s11835_s7 + $0x6e0] ss:$8 sps:$4 sm:$0xff]   ;;  %v8605_v11 = vld [vmem:[%s11835_s7 + $0x474] ss:$8 sps:$4 sm:$0xff]  }
 0x4a2   :  { %2324 = vmatprep.mubr.bf16.mxu1 %v9264_v52  ;;  %3033 = vmatprep.mubr.bf16.mxu0 %v9264_v52 }
 0x4a4   :  { %2295 = vmatpush1.bf16.msra.mxu1 %v8519_v13  ;;  %3004 = vmatpush1.bf16.msra.mxu0 %v8522_v14  ;;  %v8608_v13 = vld [vmem:[%s11835_s7 + $0x6f4] ss:$8 sps:$4 sm:$0xff]   ;;  %v8603_v14 = vld [vmem:[%s11835_s7 + $0x470] ss:$8 sps:$4 sm:$0xff]  }
 0x4a5   :  { %2296 = vmatprep.subr.bf16.mxu1 %v8527_v15  ;;  %3005 = vmatprep.subr.bf16.mxu0 %v8530_v6  ;;  %v8606_v15 = vld [vmem:[%s11835_s7 + $0x6f0] ss:$8 sps:$4 sm:$0xff]   ;;  %v8611_v6 = vld [vmem:[%s11835_s7 + $0x504] ss:$8 sps:$4 sm:$0xff]  }
 0x4a8   :  { %2297 = vmatpush1.bf16.msra.mxu1 %v8525_v17  ;;  %3006 = vmatpush1.bf16.msra.mxu0 %v8528_v18  ;;  %v8614_v17 = vld [vmem:[%s11835_s7 + $0x784] ss:$8 sps:$4 sm:$0xff]   ;;  %v8609_v18 = vld [vmem:[%s11835_s7 + $0x500] ss:$8 sps:$4 sm:$0xff]  }
 0x4a9   :  { %2298 = vmatprep.subr.bf16.mxu1 %v8533_v19  ;;  %3007 = vmatprep.subr.bf16.mxu0 %v8536_v4  ;;  %v8612_v19 = vld [vmem:[%s11835_s7 + $0x780] ss:$8 sps:$4 sm:$0xff]   ;;  %v3203_v4 = vrot.slane %v9937_v27, 5 }
 0x4ac   :  { %2299 = vmatpush1.bf16.msra.mxu1 %v8531_v5  ;;  %3008 = vmatpush1.bf16.msra.mxu0 %v8534_v2  ;;  %v8617_v5 = vld [vmem:[%s11835_s7 + $0x514] ss:$8 sps:$4 sm:$0xff]  }
 0x4ad   :  { %2300 = vmatprep.subr.bf16.mxu1 %v8539_v20  ;;  %3009 = vmatprep.subr.bf16.mxu0 %v8542_v16  ;;  %v8620_v2 = vld [vmem:[%s11835_s7 + $0x794] ss:$8 sps:$4 sm:$0xff]   ;;  %v8615_v20 = vld [vmem:[%s11835_s7 + $0x510] ss:$8 sps:$4 sm:$0xff]  }
 0x4ae   :  { %v8618_v16 = vld [vmem:[%s11835_s7 + $0x790] ss:$8 sps:$4 sm:$0xff]  }
 0x4b0   :  { %2301 = vmatpush1.bf16.msra.mxu1 %v8537_v29  ;;  %3010 = vmatpush1.bf16.msra.mxu0 %v8540_v23  ;;  %v8623_v29 = vld [vmem:[%s11835_s7 + $0x524] ss:$8 sps:$4 sm:$0xff]  }
 0x4b1   :  { %2302 = vmatprep.subr.bf16.mxu1 %v8545_v26  ;;  %3011 = vmatprep.subr.bf16.mxu0 %v8548_v28  ;;  %v8626_v23 = vld [vmem:[%s11835_s7 + $0x7a4] ss:$8 sps:$4 sm:$0xff]   ;;  %v8621_v26 = vld [vmem:[%s11835_s7 + $0x520] ss:$8 sps:$4 sm:$0xff]  }
 0x4b2   :  { %v8624_v28 = vld [vmem:[%s11835_s7 + $0x7a0] ss:$8 sps:$4 sm:$0xff]  }
 0x4b4   :  { %2303 = vmatpush1.bf16.msra.mxu1 %v8543_v12  ;;  %3012 = vmatpush1.bf16.msra.mxu0 %v8546_v21  ;;  %v8629_v12 = vld [vmem:[%s11835_s7 + $0x534] ss:$8 sps:$4 sm:$0xff]  }
 0x4b5   :  { %2304 = vmatprep.subr.bf16.mxu1 %v8551_v30  ;;  %3013 = vmatprep.subr.bf16.mxu0 %v8554_v31  ;;  %v8632_v21 = vld [vmem:[%s11835_s7 + $0x7b4] ss:$8 sps:$4 sm:$0xff]   ;;  %v8627_v30 = vld [vmem:[%s11835_s7 + $0x530] ss:$8 sps:$4 sm:$0xff]  }
 0x4b6   :  { %v8630_v31 = vld [vmem:[%s11835_s7 + $0x7b0] ss:$8 sps:$4 sm:$0xff]  }
 0x4b8   :  { %2305 = vmatpush1.bf16.msra.mxu1 %v8549_v32  ;;  %3014 = vmatpush1.bf16.msra.mxu0 %v8552_v33  ;;  %v8635_v32 = vld [vmem:[%s11835_s7 + $0x544] ss:$8 sps:$4 sm:$0xff]  }
 0x4b9   :  { %2306 = vmatprep.subr.bf16.mxu1 %v8557_v34  ;;  %3015 = vmatprep.subr.bf16.mxu0 %v8560_v35  ;;  %v8638_v33 = vld [vmem:[%s11835_s7 + $0x7c4] ss:$8 sps:$4 sm:$0xff]   ;;  %v8633_v34 = vld [vmem:[%s11835_s7 + $0x540] ss:$8 sps:$4 sm:$0xff]  }
 0x4ba   :  { %v8636_v35 = vld [vmem:[%s11835_s7 + $0x7c0] ss:$8 sps:$4 sm:$0xff]  }
 0x4bc   :  { %2307 = vmatpush1.bf16.msra.mxu1 %v8555_v36  ;;  %3016 = vmatpush1.bf16.msra.mxu0 %v8558_v37  ;;  %v8641_v36 = vld [vmem:[%s11835_s7 + $0x554] ss:$8 sps:$4 sm:$0xff]  }
 0x4bd   :  { %2574 = vmatprep.subr.bf16.mxu1 %v8563_v38  ;;  %3285 = vmatprep.subr.bf16.mxu0 %v8566_v39  ;;  %v8644_v37 = vld [vmem:[%s11835_s7 + $0x7d4] ss:$8 sps:$4 sm:$0xff]   ;;  %v8639_v38 = vld [vmem:[%s11835_s7 + $0x550] ss:$8 sps:$4 sm:$0xff]  }
 0x4be   :  { %v8642_v39 = vld [vmem:[%s11835_s7 + $0x7d0] ss:$8 sps:$4 sm:$0xff]  }
 0x4bf   :  { %2325 = vmatmul.mubr.bf16.vlgmr.msra.gmra.mrb[32].mxu1 %v2210_v42  ;;  %3034 = vmatmul.mubr.bf16.vlgmr.msra.gmra.mrb[32].mxu0 %v2919_v43  ;;  %v8645_v42 = vld [vmem:[%s11835_s7 + $0x560] ss:$8 sps:$4 sm:$0xff]  }
 0x4c0   :  { %2575 = vmatpush1.bf16.msra.mxu1 %v8561_v40  ;;  %3286 = vmatpush1.bf16.msra.mxu0 %v8564_v41  ;;  %v8647_v40 = vld [vmem:[%s11835_s7 + $0x564] ss:$8 sps:$4 sm:$0xff]   ;;  %v8648_v43 = vld [vmem:[%s11835_s7 + $0x7e0] ss:$8 sps:$4 sm:$0xff]  }
 0x4c1   :  { %2576 = vmatprep.subr.bf16.mxu1 %v8569_v44  ;;  %3287 = vmatprep.subr.bf16.mxu0 %v8572_v45  ;;  %v8650_v41 = vld [vmem:[%s11835_s7 + $0x7e4] ss:$8 sps:$4 sm:$0xff]   ;;  %v8653_v44 = vld [vmem:[%s11835_s7 + $0x574] ss:$8 sps:$4 sm:$0xff]  }
 0x4c2   :  { %2606 = vmatprep.mubr.bf16.mxu1 %v9264_v52  ;;  %3317 = vmatprep.mubr.bf16.mxu0 %v9264_v52  ;;  %v8656_v45 = vld [vmem:[%s11835_s7 + $0x7f4] ss:$8 sps:$4 sm:$0xff]  }
 0x4c4   :  { %2577 = vmatpush1.bf16.msra.mxu1 %v8567_v8  ;;  %3288 = vmatpush1.bf16.msra.mxu0 %v8570_v46  ;;  %v8651_v8 = vld [vmem:[%s11835_s7 + $0x570] ss:$8 sps:$4 sm:$0xff]  }
 0x4c5   :  { %2578 = vmatprep.subr.bf16.mxu1 %v8575_v47  ;;  %3289 = vmatprep.subr.bf16.mxu0 %v8578_v48  ;;  %v8654_v46 = vld [vmem:[%s11835_s7 + $0x7f0] ss:$8 sps:$4 sm:$0xff]   ;;  %v8659_v47 = vld [vmem:[%s11835_s7 + $0x604] ss:$8 sps:$4 sm:$0xff]   ;;  %v8657_v48 = vld [vmem:[%s11835_s7 + $0x600] ss:$8 sps:$4 sm:$0xff]  }
 0x4c8   :  { %2579 = vmatpush1.bf16.msra.mxu1 %v8573_v49  ;;  %3290 = vmatpush1.bf16.msra.mxu0 %v8576_v50  ;;  %v2777_v49 = vrot.slane %v9937_v27, 2  ;;  %v3487_v50 = vrot.slane %v9937_v27, 7 }
 0x4c9   :  { %2580 = vmatprep.subr.bf16.mxu1 %v8581_v51  ;;  %3291 = vmatprep.subr.bf16.mxu0 %v8584_v53  ;;  %v8662_v51 = vld [vmem:[%s11835_s7 + $0x614] ss:$8 sps:$4 sm:$0xff]   ;;  %v8660_v53 = vld [vmem:[%s11835_s7 + $0x610] ss:$8 sps:$4 sm:$0xff]  }
 0x4cc   :  { %2581 = vmatpush1.bf16.msra.mxu1 %v8579_v55  ;;  %3292 = vmatpush1.bf16.msra.mxu0 %v8582_v56  ;;  %v8665_v55 = vld [vmem:[%s11835_s7 + $0x624] ss:$8 sps:$4 sm:$0xff]   ;;  %v8663_v56 = vld [vmem:[%s11835_s7 + $0x620] ss:$8 sps:$4 sm:$0xff]  }
 0x4cd   :  { %2582 = vmatprep.subr.bf16.mxu1 %v8587_v58  ;;  %3293 = vmatprep.subr.bf16.mxu0 %v8590_v59  ;;  %v8668_v58 = vld [vmem:[%s11835_s7 + $0x634] ss:$8 sps:$4 sm:$0xff]   ;;  %v8666_v59 = vld [vmem:[%s11835_s7 + $0x630] ss:$8 sps:$4 sm:$0xff]  }
 0x4d0   :  { %2583 = vmatpush1.bf16.msra.mxu1 %v8585_v60  ;;  %3294 = vmatpush1.bf16.msra.mxu0 %v8588_v61  ;;  %v8671_v60 = vld [vmem:[%s11835_s7 + $0x644] ss:$8 sps:$4 sm:$0xff]   ;;  %v8669_v61 = vld [vmem:[%s11835_s7 + $0x640] ss:$8 sps:$4 sm:$0xff]  }
 0x4d1   :  { %2584 = vmatprep.subr.bf16.mxu1 %v8593_v62  ;;  %3295 = vmatprep.subr.bf16.mxu0 %v8596_v63  ;;  %v8674_v62 = vld [vmem:[%s11835_s7 + $0x654] ss:$8 sps:$4 sm:$0xff]   ;;  %v8672_v63 = vld [vmem:[%s11835_s7 + $0x650] ss:$8 sps:$4 sm:$0xff]  }
 0x4d4   :  { %2585 = vmatpush1.bf16.msra.mxu1 %v8591_v0  ;;  %3296 = vmatpush1.bf16.msra.mxu0 %v8594_v1  ;;  %v8677_v0 = vld [vmem:[%s11835_s7 + $0x664] ss:$8 sps:$4 sm:$0xff]  }
 0x4d5   :  { %2586 = vmatprep.subr.bf16.mxu1 %v8599_v3  ;;  %3297 = vmatprep.subr.bf16.mxu0 %v8602_v7 }
 0x4d8   :  { %2587 = vmatpush1.bf16.msra.mxu1 %v8597_v9  ;;  %3298 = vmatpush1.bf16.msra.mxu0 %v8600_v10 }
 0x4d9   :  { %2588 = vmatprep.subr.bf16.mxu1 %v8605_v11  ;;  %3299 = vmatprep.subr.bf16.mxu0 %v8608_v13  ;;  %v8675_v13 = vld [vmem:[%s11835_s7 + $0x660] ss:$8 sps:$4 sm:$0xff]  }
 0x4dc   :  { %2589 = vmatpush1.bf16.msra.mxu1 %v8603_v14  ;;  %3300 = vmatpush1.bf16.msra.mxu0 %v8606_v15 }
 0x4dd   :  { %2859 = vmatprep.subr.bf16.mxu1 %v8611_v6  ;;  %3569 = vmatprep.subr.bf16.mxu0 %v8614_v17  ;;  %v8680_v6 = vld [vmem:[%s11835_s7 + $0x674] ss:$8 sps:$4 sm:$0xff]   ;;  %v8678_v17 = vld [vmem:[%s11835_s7 + $0x670] ss:$8 sps:$4 sm:$0xff]  }
 0x4df   :  { %2607 = vmatmul.mubr.bf16.vlgmr.msra.gmra.mrb[36].mxu1 %v9937_v27  ;;  %3318 = vmatmul.mubr.bf16.vlgmr.msra.gmra.mrb[36].mxu0 %v3203_v4  ;;  %v3061_v4 = vrot.slane %v9937_v27, 4 }
 0x4e0   :  { %2860 = vmatpush1.bf16.msra.mxu1 %v8609_v18  ;;  %3570 = vmatpush1.bf16.msra.mxu0 %v8612_v19  ;;  %v8683_v18 = vld [vmem:[%s11835_s7 + $0x704] ss:$8 sps:$4 sm:$0xff]   ;;  %v8681_v19 = vld [vmem:[%s11835_s7 + $0x700] ss:$8 sps:$4 sm:$0xff]  }
 0x4e1   :  { %2861 = vmatprep.subr.bf16.mxu1 %v8617_v5  ;;  %3571 = vmatprep.subr.bf16.mxu0 %v8620_v2  ;;  %v8686_v5 = vld [vmem:[%s11835_s7 + $0x714] ss:$8 sps:$4 sm:$0xff]   ;;  %v8684_v2 = vld [vmem:[%s11835_s7 + $0x710] ss:$8 sps:$4 sm:$0xff]  }
 0x4e2   :  { %2891 = vmatprep.mubr.bf16.mxu1 %v9264_v52  ;;  %3601 = vmatprep.mubr.bf16.mxu0 %v9264_v52 }
 0x4e4   :  { %2862 = vmatpush1.bf16.msra.mxu1 %v8615_v20  ;;  %3572 = vmatpush1.bf16.msra.mxu0 %v8618_v16  ;;  %v8689_v20 = vld [vmem:[%s11835_s7 + $0x724] ss:$8 sps:$4 sm:$0xff]   ;;  %v8687_v16 = vld [vmem:[%s11835_s7 + $0x720] ss:$8 sps:$4 sm:$0xff]  }
 0x4e5   :  { %2863 = vmatprep.subr.bf16.mxu1 %v8623_v29  ;;  %3573 = vmatprep.subr.bf16.mxu0 %v8626_v23  ;;  %v8692_v29 = vld [vmem:[%s11835_s7 + $0x734] ss:$8 sps:$4 sm:$0xff]   ;;  %v8690_v23 = vld [vmem:[%s11835_s7 + $0x730] ss:$8 sps:$4 sm:$0xff]  }
 0x4e8   :  { %2864 = vmatpush1.bf16.msra.mxu1 %v8621_v26  ;;  %3574 = vmatpush1.bf16.msra.mxu0 %v8624_v28  ;;  %v8695_v26 = vld [vmem:[%s11835_s7 + $0x744] ss:$8 sps:$4 sm:$0xff]   ;;  %v8693_v28 = vld [vmem:[%s11835_s7 + $0x740] ss:$8 sps:$4 sm:$0xff]  }
 0x4e9   :  { %2865 = vmatprep.subr.bf16.mxu1 %v8629_v12  ;;  %3575 = vmatprep.subr.bf16.mxu0 %v8632_v21  ;;  %v8698_v12 = vld [vmem:[%s11835_s7 + $0x754] ss:$8 sps:$4 sm:$0xff]   ;;  %v8696_v21 = vld [vmem:[%s11835_s7 + $0x750] ss:$8 sps:$4 sm:$0xff]  }
 0x4ec   :  { %2866 = vmatpush1.bf16.msra.mxu1 %v8627_v30  ;;  %3576 = vmatpush1.bf16.msra.mxu0 %v8630_v31  ;;  %v8701_v30 = vld [vmem:[%s11835_s7 + $0x764] ss:$8 sps:$4 sm:$0xff]  }
 0x4ed   :  { %2867 = vmatprep.subr.bf16.mxu1 %v8635_v32  ;;  %3577 = vmatprep.subr.bf16.mxu0 %v8638_v33 }
 0x4f0   :  { %2868 = vmatpush1.bf16.msra.mxu1 %v8633_v34  ;;  %3578 = vmatpush1.bf16.msra.mxu0 %v8636_v35 }
 0x4f1   :  { %2869 = vmatprep.subr.bf16.mxu1 %v8641_v36  ;;  %3579 = vmatprep.subr.bf16.mxu0 %v8644_v37 }
 0x4f4   :  { %2870 = vmatpush1.bf16.msra.mxu1 %v8639_v38  ;;  %3580 = vmatpush1.bf16.msra.mxu0 %v8642_v39  ;;  %v8699_v39 = vld [vmem:[%s11835_s7 + $0x760] ss:$8 sps:$4 sm:$0xff]  }
 0x4f5   :  { %2871 = vmatprep.subr.bf16.mxu1 %v8647_v40  ;;  %3581 = vmatprep.subr.bf16.mxu0 %v8650_v41 }
 0x4f8   :  { %2872 = vmatpush1.bf16.msra.mxu1 %v8645_v42  ;;  %3582 = vmatpush1.bf16.msra.mxu0 %v8648_v43  ;;  %v8704_v42 = vld [vmem:[%s11835_s7 + $0x774] ss:$8 sps:$4 sm:$0xff]   ;;  %v8702_v43 = vld [vmem:[%s11835_s7 + $0x770] ss:$8 sps:$4 sm:$0xff]  }
 0x4f9   :  { %2873 = vmatprep.subr.bf16.mxu1 %v8653_v44  ;;  %3583 = vmatprep.subr.bf16.mxu0 %v8656_v45  ;;  %v3345_v44 = vrot.slane %v9937_v27, 6 }
 0x4fc   :  { %2874 = vmatpush1.bf16.msra.mxu1 %v8651_v8  ;;  %3584 = vmatpush1.bf16.msra.mxu0 %v8654_v46 }
 0x4fd   :  { %3143 = vmatprep.subr.bf16.mxu1 %v8659_v47 }
 0x4ff   :  { %2892 = vmatmul.mubr.bf16.vlgmr.msra.gmra.mrb[40].mxu1 %v2777_v49  ;;  %3602 = vmatmul.mubr.bf16.vlgmr.msra.gmra.mrb[40].mxu0 %v3487_v50 }
 0x500   :  { %3144 = vmatpush1.bf16.msra.mxu1 %v8657_v48  ;;  %3175 = vmatprep.mubr.bf16.mxu1 %v9264_v52 }
 0x501   :  { %3145 = vmatprep.subr.bf16.mxu1 %v8662_v51  ;;  %3930 = vmatprep.mubr.bf16.mxu0 %v9264_v52 }
 0x504   :  { %3146 = vmatpush1.bf16.msra.mxu1 %v8660_v53 }
 0x505   :  { %3147 = vmatprep.subr.bf16.mxu1 %v8665_v55 }
 0x508   :  { %3148 = vmatpush1.bf16.msra.mxu1 %v8663_v56 }
 0x509   :  { %3149 = vmatprep.subr.bf16.mxu1 %v8668_v58 }
 0x50c   :  { %3150 = vmatpush1.bf16.msra.mxu1 %v8666_v59 }
 0x50d   :  { %3151 = vmatprep.subr.bf16.mxu1 %v8671_v60 }
 0x510   :  { %3152 = vmatpush1.bf16.msra.mxu1 %v8669_v61 }
 0x511   :  { %3153 = vmatprep.subr.bf16.mxu1 %v8674_v62 }
 0x512   :  { %v1497_v1 = vpop.f32.mrb[16].mxu1  ;;  %v10548_v3 = vpop.f32.mrb[16].mxu0 }
 0x513   :  { %v1499_v7 = vpop.f32.mrb[17].mxu1  ;;  %v10550_v9 = vpop.f32.mrb[17].mxu0 }
 0x514   :  { %3154 = vmatpush1.bf16.msra.mxu1 %v8672_v63  ;;  %v1501_v10 = vpop.f32.mrb[18].mxu1  ;;  %v1904_v11 = vpop.f32.mrb[18].mxu0 }
 0x515   :  { %v1502_v14 = vpop.f32.mrb[19].mxu1  ;;  %v1905_v15 = vpop.f32.mrb[19].mxu0  ;;  %3155 = vmatprep.subr.bf16.mxu1 %v8677_v0 }
 0x516   :  { %v8708_v14 = vld [vmem:[%s11838_s10 + $0x80] ss:$8 sps:$4 sm:$0xff]   ;;  %v8710_v15 = vld [vmem:[%s11838_s10 + $0x84] ss:$8 sps:$4 sm:$0xff]  }
 0x517   :  { %3898 = vmatprep.subr.bf16.mxu0 %v8710_v15 }
 0x518   :  { %3156 = vmatpush1.bf16.msra.mxu1 %v8675_v13  ;;  %v8705_v13 = vld [vmem:[%s11838_s10] ss:$8 sps:$4 sm:$0xff]   ;;  %3899 = vmatpush1.bf16.msra.mxu0 %v8708_v14 }
 0x519   :  { %3157 = vmatprep.subr.bf16.mxu1 %v8680_v6  ;;  %v8713_v6 = vld [vmem:[%s11838_s10 + $0x14] ss:$8 sps:$4 sm:$0xff]  }
 0x51c   :  { %3158 = vmatpush1.bf16.msra.mxu1 %v8678_v17  ;;  %v8716_v17 = vld [vmem:[%s11838_s10 + $0x94] ss:$8 sps:$4 sm:$0xff]  }
 0x51d   :  { %3427 = vmatprep.subr.bf16.mxu1 %v8683_v18  ;;  %3900 = vmatprep.subr.bf16.mxu0 %v8716_v17 }
 0x51f   :  { %3176 = vmatmul.mubr.bf16.vlgmr.msra.gmra.mrb[44].mxu1 %v3061_v4  ;;  %v8711_v4 = vld [vmem:[%s11838_s10 + $0x10] ss:$8 sps:$4 sm:$0xff]  }
 0x520   :  { %3428 = vmatpush1.bf16.msra.mxu1 %v8681_v19  ;;  %3459 = vmatprep.mubr.bf16.mxu1 %v9264_v52 }
 0x521   :  { %3429 = vmatprep.subr.bf16.mxu1 %v8686_v5  ;;  %v8714_v5 = vld [vmem:[%s11838_s10 + $0x90] ss:$8 sps:$4 sm:$0xff]  }
 0x522   :  { %3901 = vmatpush1.bf16.msra.mxu0 %v8714_v5 }
 0x524   :  { %3430 = vmatpush1.bf16.msra.mxu1 %v8684_v2 }
 0x525   :  { %3431 = vmatprep.subr.bf16.mxu1 %v8689_v20 }
 0x528   :  { %3432 = vmatpush1.bf16.msra.mxu1 %v8687_v16 }
 0x529   :  { %3433 = vmatprep.subr.bf16.mxu1 %v8692_v29 }
 0x52c   :  { %3434 = vmatpush1.bf16.msra.mxu1 %v8690_v23 }
 0x52d   :  { %3435 = vmatprep.subr.bf16.mxu1 %v8695_v26 }
 0x530   :  { %3436 = vmatpush1.bf16.msra.mxu1 %v8693_v28 }
 0x531   :  { %3437 = vmatprep.subr.bf16.mxu1 %v8698_v12 }
 0x532   :  { %v1618_v31 = vpop.f32.mrb[20].mxu1  ;;  %v2184_v32 = vpop.f32.mrb[20].mxu0 }
 0x533   :  { %v1619_v33 = vadd.f32 %v1618_v31, %v1497_v1  ;;  %v1620_v34 = vpop.f32.mrb[21].mxu1  ;;  %v2186_v35 = vpop.f32.mrb[21].mxu0 }
 0x534   :  { %v1621_v36 = vadd.f32 %v1620_v34, %v1499_v7  ;;  %v1622_v37 = vpop.f32.mrb[22].mxu1  ;;  %v2188_v38 = vpop.f32.mrb[22].mxu0  ;;  %3438 = vmatpush1.bf16.msra.mxu1 %v8696_v21  ;;  %v8722_v34 = vld [vmem:[%s11838_s10 + $0xa4] ss:$8 sps:$4 sm:$0xff]  }
 0x535   :  { %v1623_v40 = vpop.f32.mrb[23].mxu1  ;;  %v2189_v41 = vpop.f32.mrb[23].mxu0  ;;  %3439 = vmatprep.subr.bf16.mxu1 %v8701_v30  ;;  %v8719_v30 = vld [vmem:[%s11838_s10 + $0x24] ss:$8 sps:$4 sm:$0xff]   ;;  %3902 = vmatprep.subr.bf16.mxu0 %v8722_v34  ;;  %v8723_v37 = vld [vmem:[%s11838_s10 + $0x30] ss:$8 sps:$4 sm:$0xff]  }
 0x536   :  { %v8726_v38 = vld [vmem:[%s11838_s10 + $0xb0] ss:$8 sps:$4 sm:$0xff]   ;;  %v8734_v40 = vld [vmem:[%s11838_s10 + $0xc4] ss:$8 sps:$4 sm:$0xff]   ;;  %v8729_v41 = vld [vmem:[%s11838_s10 + $0x40] ss:$8 sps:$4 sm:$0xff]  }
 0x538   :  { %3440 = vmatpush1.bf16.msra.mxu1 %v8699_v39  ;;  %v8731_v39 = vld [vmem:[%s11838_s10 + $0x44] ss:$8 sps:$4 sm:$0xff]  }
 0x539   :  { %3441 = vmatprep.subr.bf16.mxu1 %v8704_v42  ;;  %v8732_v42 = vld [vmem:[%s11838_s10 + $0xc0] ss:$8 sps:$4 sm:$0xff]  }
 0x53c   :  { %3442 = vmatpush1.bf16.msra.mxu1 %v8702_v43  ;;  %v8737_v43 = vld [vmem:[%s11838_s10 + $0x54] ss:$8 sps:$4 sm:$0xff]  }
 0x53f   :  { %3460 = vmatmul.mubr.bf16.vlgmr.msra.gmra.mrb[48].mxu1 %v3345_v44  ;;  %v8740_v44 = vld [vmem:[%s11838_s10 + $0xd4] ss:$8 sps:$4 sm:$0xff]  }
 0x540   :  { %3775 = vmatprep.mubr.bf16.mxu1 %v9264_v52 }
 0x552   :  { %v1758_v45 = vpop.f32.mrb[24].mxu1  ;;  %v2468_v8 = vpop.f32.mrb[24].mxu0 }
 0x553   :  { %v1765_v46 = vadd.f32 %v1758_v45, %v1619_v33  ;;  %v1760_v47 = vpop.f32.mrb[25].mxu1  ;;  %v2470_v48 = vpop.f32.mrb[25].mxu0  ;;  %v8720_v33 = vld [vmem:[%s11838_s10 + $0xa0] ss:$8 sps:$4 sm:$0xff]   ;;  %v8735_v45 = vld [vmem:[%s11838_s10 + $0x50] ss:$8 sps:$4 sm:$0xff]  }
 0x554   :  { %v1766_v49 = vadd.f32 %v1760_v47, %v1621_v36  ;;  %v1762_v50 = vpop.f32.mrb[26].mxu1  ;;  %v2472_v51 = vpop.f32.mrb[26].mxu0  ;;  %3903 = vmatpush1.bf16.msra.mxu0 %v8720_v33  ;;  %v8728_v36 = vld [vmem:[%s11838_s10 + $0xb4] ss:$8 sps:$4 sm:$0xff]   ;;  %v8746_v47 = vld [vmem:[%s11838_s10 + $0xe4] ss:$8 sps:$4 sm:$0xff]  }
 0x555   :  { %v1763_v53 = vpop.f32.mrb[27].mxu1  ;;  %v2473_v55 = vpop.f32.mrb[27].mxu0  ;;  %v1907_v56 = vadd.f32 %v10548_v3, %v1765_v46  ;;  %v8707_v3 = vld [vmem:[%s11838_s10 + $0x4] ss:$8 sps:$4 sm:$0xff]   ;;  %3904 = vmatprep.subr.bf16.mxu0 %v8728_v36  ;;  %v8749_v50 = vld [vmem:[%s11838_s10 + $0x74] ss:$8 sps:$4 sm:$0xff]  }
 0x556   :  { %v1908_v58 = vadd.f32 %v10550_v9, %v1766_v49  ;;  %3743 = vmatprep.subr.bf16.mxu1 %v8707_v3  ;;  %v8743_v46 = vld [vmem:[%s11838_s10 + $0x64] ss:$8 sps:$4 sm:$0xff]   ;;  %v8744_v49 = vld [vmem:[%s11838_s10 + $0xe0] ss:$8 sps:$4 sm:$0xff]   ;;  %v8752_v51 = vld [vmem:[%s11838_s10 + $0xf4] ss:$8 sps:$4 sm:$0xff]  }
 0x557   :  { %3744 = vmatpush1.bf16.msra.mxu1 %v8705_v13  ;;  %v8747_v53 = vld [vmem:[%s11838_s10 + $0x70] ss:$8 sps:$4 sm:$0xff]   ;;  %v3612_v33 = vld [vmem:[%s11836_s8] sm:$0x3] }
 0x558   :  { %3745 = vmatprep.subr.bf16.mxu1 %v8713_v6  ;;  %3905 = vmatpush1.bf16.msra.mxu0 %v8726_v38  ;;  %v8750_v55 = vld [vmem:[%s11838_s10 + $0xf0] ss:$8 sps:$4 sm:$0xff]   ;;  %v3617_v36 = vrot.slane %v3612_v33, %v9631_v24 }
 0x559   :  { %3906 = vmatprep.subr.bf16.mxu0 %v8734_v40 }
 0x55b   :  { %3746 = vmatpush1.bf16.msra.mxu1 %v8711_v4 }
 0x55c   :  { %3747 = vmatprep.subr.bf16.mxu1 %v8719_v30  ;;  %3907 = vmatpush1.bf16.msra.mxu0 %v8732_v42 }
 0x55d   :  { %3908 = vmatprep.subr.bf16.mxu0 %v8740_v44 }
 0x572   :  { %v2042_v59 = vpop.f32.mrb[28].mxu1  ;;  %v10615_v60 = vpop.f32.mrb[28].mxu0 }
 0x573   :  { %v2049_v27 = vadd.f32 %v2042_v59, %v1907_v56  ;;  %v2044_v61 = vpop.f32.mrb[29].mxu1  ;;  %v10617_v62 = vpop.f32.mrb[29].mxu0  ;;  %v8755_v56 = vld [vmem:[%s11838_s10 + $0x104] ss:$8 sps:$4 sm:$0xff]  }
 0x574   :  { %v2050_v63 = vadd.f32 %v2044_v61, %v1908_v58  ;;  %v2046_v0 = vpop.f32.mrb[30].mxu1  ;;  %v2755_v1 = vpop.f32.mrb[30].mxu0  ;;  %v8758_v58 = vld [vmem:[%s11838_s10 + $0x184] ss:$8 sps:$4 sm:$0xff]  }
 0x575   :  { %v2047_v7 = vpop.f32.mrb[31].mxu1  ;;  %v2756_v10 = vpop.f32.mrb[31].mxu0  ;;  %v2191_v11 = vadd.f32 %v2184_v32, %v2049_v27  ;;  %v8717_v32 = vld [vmem:[%s11838_s10 + $0x20] ss:$8 sps:$4 sm:$0xff]  }
 0x576   :  { %v2192_v9 = vadd.f32 %v2186_v35, %v2050_v63  ;;  %3748 = vmatpush1.bf16.msra.mxu1 %v8717_v32  ;;  %v8725_v35 = vld [vmem:[%s11838_s10 + $0x34] ss:$8 sps:$4 sm:$0xff]  }
 0x577   :  { %3749 = vmatprep.subr.bf16.mxu1 %v8725_v35 }
 0x57a   :  { %3750 = vmatpush1.bf16.msra.mxu1 %v8723_v37 }
 0x57b   :  { %3751 = vmatprep.subr.bf16.mxu1 %v8731_v39 }
 0x57e   :  { %3752 = vmatpush1.bf16.msra.mxu1 %v8729_v41 }
 0x57f   :  { %3753 = vmatprep.subr.bf16.mxu1 %v8737_v43 }
 0x582   :  { %3754 = vmatpush1.bf16.msra.mxu1 %v8735_v45 }
 0x583   :  { %3755 = vmatprep.subr.bf16.mxu1 %v8743_v46 }
 0x592   :  { %v2326_v18 = vpop.f32.mrb[32].mxu1  ;;  %v10637_v19 = vpop.f32.mrb[32].mxu0 }
 0x593   :  { %v2333_v2 = vadd.f32 %v2326_v18, %v2191_v11  ;;  %v2328_v20 = vpop.f32.mrb[33].mxu1  ;;  %v10645_v16 = vpop.f32.mrb[33].mxu0 }
 0x594   :  { %v2334_v29 = vadd.f32 %v2328_v20, %v2192_v9  ;;  %v2330_v23 = vpop.f32.mrb[34].mxu1  ;;  %v3039_v26 = vpop.f32.mrb[34].mxu0 }
 0x595   :  { %v2331_v28 = vpop.f32.mrb[35].mxu1  ;;  %v3040_v12 = vpop.f32.mrb[35].mxu0  ;;  %v2475_v21 = vadd.f32 %v2468_v8, %v2333_v2  ;;  %v8738_v8 = vld [vmem:[%s11838_s10 + $0xd0] ss:$8 sps:$4 sm:$0xff]  }
 0x596   :  { %v2476_v31 = vadd.f32 %v2470_v48, %v2334_v29  ;;  %3909 = vmatpush1.bf16.msra.mxu0 %v8738_v8  ;;  %v8741_v48 = vld [vmem:[%s11838_s10 + $0x60] ss:$8 sps:$4 sm:$0xff]  }
 0x597   :  { %3910 = vmatprep.subr.bf16.mxu0 %v8746_v47  ;;  %3756 = vmatpush1.bf16.msra.mxu1 %v8741_v48  ;;  %v3628_v8 = vld [vmem:[%s11837_s9] sm:$0x3] }
 0x598   :  { %3757 = vmatprep.subr.bf16.mxu1 %v8749_v50  ;;  %v8756_v50 = vld [vmem:[%s11838_s10 + $0x180] ss:$8 sps:$4 sm:$0xff]  }
 0x59a   :  { %3911 = vmatpush1.bf16.msra.mxu0 %v8744_v49  ;;  %v8753_v49 = vld [vmem:[%s11838_s10 + $0x100] ss:$8 sps:$4 sm:$0xff]  }
 0x59b   :  { %3912 = vmatprep.subr.bf16.mxu0 %v8752_v51  ;;  %3758 = vmatpush1.bf16.msra.mxu1 %v8747_v53  ;;  %v8761_v53 = vld [vmem:[%s11838_s10 + $0x114] ss:$8 sps:$4 sm:$0xff]  }
 0x59c   :  { %4053 = vmatprep.subr.bf16.mxu1 %v8755_v56  ;;  %v8759_v56 = vld [vmem:[%s11838_s10 + $0x110] ss:$8 sps:$4 sm:$0xff]  }
 0x59e   :  { %3913 = vmatpush1.bf16.msra.mxu0 %v8750_v55  ;;  %v8764_v55 = vld [vmem:[%s11838_s10 + $0x194] ss:$8 sps:$4 sm:$0xff]  }
 0x59f   :  { %4208 = vmatprep.subr.bf16.mxu0 %v8758_v58  ;;  %v8762_v58 = vld [vmem:[%s11838_s10 + $0x190] ss:$8 sps:$4 sm:$0xff]  }
 0x5b2   :  { %v2608_v59 = vpop.f32.mrb[36].mxu1  ;;  %v3319_v27 = vpop.f32.mrb[36].mxu0 }
 0x5b3   :  { %v2615_v61 = vadd.f32 %v2608_v59, %v2475_v21  ;;  %v2610_v63 = vpop.f32.mrb[37].mxu1  ;;  %v3321_v0 = vpop.f32.mrb[37].mxu0  ;;  %v8767_v59 = vld [vmem:[%s11838_s10 + $0x124] ss:$8 sps:$4 sm:$0xff]  }
 0x5b4   :  { %v2616_v1 = vadd.f32 %v2610_v63, %v2476_v31  ;;  %v2612_v7 = vpop.f32.mrb[38].mxu1  ;;  %v3323_v10 = vpop.f32.mrb[38].mxu0  ;;  %v8768_v63 = vld [vmem:[%s11838_s10 + $0x1a0] ss:$8 sps:$4 sm:$0xff]  }
 0x5b5   :  { %v2613_v11 = vpop.f32.mrb[39].mxu1  ;;  %v3324_v13 = vpop.f32.mrb[39].mxu0  ;;  %v2758_v3 = vadd.f32 %v10615_v60, %v2615_v61  ;;  %v8765_v61 = vld [vmem:[%s11838_s10 + $0x120] ss:$8 sps:$4 sm:$0xff]   ;;  %v8771_v7 = vld [vmem:[%s11838_s10 + $0x130] ss:$8 sps:$4 sm:$0xff]  }
 0x5b6   :  { %v2759_v9 = vadd.f32 %v10617_v62, %v2616_v1  ;;  %v8776_v1 = vld [vmem:[%s11838_s10 + $0x1b4] ss:$8 sps:$4 sm:$0xff]   ;;  %v8774_v10 = vld [vmem:[%s11838_s10 + $0x1b0] ss:$8 sps:$4 sm:$0xff]   ;;  %v8779_v11 = vld [vmem:[%s11838_s10 + $0x144] ss:$8 sps:$4 sm:$0xff]  }
 0x5b7   :  { %v8782_v13 = vld [vmem:[%s11838_s10 + $0x1c4] ss:$8 sps:$4 sm:$0xff]  }
 0x5d2   :  { %v2893_v14 = vpop.f32.mrb[40].mxu1  ;;  %v3603_v15 = vpop.f32.mrb[40].mxu0 }
 0x5d3   :  { %v2900_v6 = vadd.f32 %v2893_v14, %v2758_v3  ;;  %v2895_v17 = vpop.f32.mrb[41].mxu1  ;;  %v3605_v18 = vpop.f32.mrb[41].mxu0  ;;  %v8777_v3 = vld [vmem:[%s11838_s10 + $0x140] ss:$8 sps:$4 sm:$0xff]   ;;  %v8785_v14 = vld [vmem:[%s11838_s10 + $0x154] ss:$8 sps:$4 sm:$0xff]  }
 0x5d4   :  { %v2901_v4 = vadd.f32 %v2895_v17, %v2759_v9  ;;  %v2897_v5 = vpop.f32.mrb[42].mxu1  ;;  %v3607_v2 = vpop.f32.mrb[42].mxu0  ;;  %v8780_v9 = vld [vmem:[%s11838_s10 + $0x1c0] ss:$8 sps:$4 sm:$0xff]   ;;  %v8786_v17 = vld [vmem:[%s11838_s10 + $0x1d0] ss:$8 sps:$4 sm:$0xff]  }
 0x5d5   :  { %v2898_v20 = vpop.f32.mrb[43].mxu1  ;;  %v3608_v29 = vpop.f32.mrb[43].mxu0  ;;  %v3042_v23 = vadd.f32 %v10637_v19, %v2900_v6  ;;  %v8783_v6 = vld [vmem:[%s11838_s10 + $0x150] ss:$8 sps:$4 sm:$0xff]   ;;  %v8789_v5 = vld [vmem:[%s11838_s10 + $0x160] ss:$8 sps:$4 sm:$0xff]  }
 0x5d6   :  { %v3043_v26 = vadd.f32 %v10645_v16, %v2901_v4  ;;  %v3621_v16 = vrot.slane %v3612_v33, %v9634_v25  ;;  %v8794_v4 = vld [vmem:[%s11838_s10 + $0x1e4] ss:$8 sps:$4 sm:$0xff]   ;;  %v8792_v2 = vld [vmem:[%s11838_s10 + $0x1e0] ss:$8 sps:$4 sm:$0xff]   ;;  %v8797_v20 = vld [vmem:[%s11838_s10 + $0x174] ss:$8 sps:$4 sm:$0xff]  }
 0x5d7   :  { %v8800_v29 = vld [vmem:[%s11838_s10 + $0x1f4] ss:$8 sps:$4 sm:$0xff]   ;;  %v8815_v33 = vld [vmem:[%s11838_s10 + $0x224] ss:$8 sps:$4 sm:$0xff]  }
 0x5f2   :  { %v3177_v28 = vpop.f32.mrb[44].mxu1 }
 0x5f3   :  { %v3184_v12 = vadd.f32 %v3177_v28, %v3042_v23  ;;  %v3179_v21 = vpop.f32.mrb[45].mxu1  ;;  %v8795_v23 = vld [vmem:[%s11838_s10 + $0x170] ss:$8 sps:$4 sm:$0xff]   ;;  %v8803_v28 = vld [vmem:[%s11838_s10 + $0x204] ss:$8 sps:$4 sm:$0xff]  }
 0x5f4   :  { %v3185_v60 = vadd.f32 %v3179_v21, %v3043_v26  ;;  %v3181_v30 = vpop.f32.mrb[46].mxu1  ;;  %v8798_v26 = vld [vmem:[%s11838_s10 + $0x1f0] ss:$8 sps:$4 sm:$0xff]   ;;  %v8801_v21 = vld [vmem:[%s11838_s10 + $0x200] ss:$8 sps:$4 sm:$0xff]  }
 0x5f5   :  { %v3182_v62 = vpop.f32.mrb[47].mxu1  ;;  %v3326_v31 = vadd.f32 %v3319_v27, %v3184_v12  ;;  %v8770_v27 = vld [vmem:[%s11838_s10 + $0x1a4] ss:$8 sps:$4 sm:$0xff]   ;;  %v8809_v30 = vld [vmem:[%s11838_s10 + $0x214] ss:$8 sps:$4 sm:$0xff]  }
 0x5f6   :  { %v3327_v32 = vadd.f32 %v3321_v0, %v3185_v60  ;;  %v8773_v0 = vld [vmem:[%s11838_s10 + $0x134] ss:$8 sps:$4 sm:$0xff]   ;;  %v8806_v12 = vld [vmem:[%s11838_s10 + $0x284] ss:$8 sps:$4 sm:$0xff]   ;;  %v8804_v60 = vld [vmem:[%s11838_s10 + $0x280] ss:$8 sps:$4 sm:$0xff]  }
 0x5f7   :  { %v8812_v62 = vld [vmem:[%s11838_s10 + $0x294] ss:$8 sps:$4 sm:$0xff]  }
 0x612   :  { %v3461_v34 = vpop.f32.mrb[48].mxu1 }
 0x613   :  { %v3468_v35 = vadd.f32 %v3461_v34, %v3326_v31  ;;  %v3463_v37 = vpop.f32.mrb[49].mxu1  ;;  %v8807_v31 = vld [vmem:[%s11838_s10 + $0x210] ss:$8 sps:$4 sm:$0xff]   ;;  %v8818_v34 = vld [vmem:[%s11838_s10 + $0x2a4] ss:$8 sps:$4 sm:$0xff]  }
 0x614   :  { %v3469_v19 = vadd.f32 %v3463_v37, %v3327_v32  ;;  %v3465_v38 = vpop.f32.mrb[50].mxu1  ;;  %v8810_v32 = vld [vmem:[%s11838_s10 + $0x290] ss:$8 sps:$4 sm:$0xff]   ;;  %v8821_v37 = vld [vmem:[%s11838_s10 + $0x234] ss:$8 sps:$4 sm:$0xff]  }
 0x615   :  { %v3610_v39 = vadd.f32 %v3603_v15, %v3468_v35  ;;  %v3466_v40 = vpop.f32.mrb[51].mxu1  ;;  %v8788_v15 = vld [vmem:[%s11838_s10 + $0x1d4] ss:$8 sps:$4 sm:$0xff]   ;;  %v8813_v35 = vld [vmem:[%s11838_s10 + $0x220] ss:$8 sps:$4 sm:$0xff]  }
 0x616   :  { %v3611_v41 = vadd.f32 %v3605_v18, %v3469_v19  ;;  %v8791_v18 = vld [vmem:[%s11838_s10 + $0x164] ss:$8 sps:$4 sm:$0xff]   ;;  %v8824_v19 = vld [vmem:[%s11838_s10 + $0x2b4] ss:$8 sps:$4 sm:$0xff]   ;;  %v8822_v38 = vld [vmem:[%s11838_s10 + $0x2b0] ss:$8 sps:$4 sm:$0xff]  }
 0x617   :  { %v3624_v42 = vadd.f32 %v3617_v36, %v3610_v39  ;;  %v8816_v36 = vld [vmem:[%s11838_s10 + $0x2a0] ss:$8 sps:$4 sm:$0xff]   ;;  %v8827_v39 = vld [vmem:[%s11838_s10 + $0x244] ss:$8 sps:$4 sm:$0xff]  }
 0x618   :  { %v3625_v43 = vadd.f32 %v3621_v16, %v3611_v41  ;;  %v8819_v16 = vld [vmem:[%s11838_s10 + $0x230] ss:$8 sps:$4 sm:$0xff]   ;;  %v8830_v40 = vld [vmem:[%s11838_s10 + $0x2c4] ss:$8 sps:$4 sm:$0xff]   ;;  %v8825_v41 = vld [vmem:[%s11838_s10 + $0x240] ss:$8 sps:$4 sm:$0xff]  }
 0x619   :  { %3626 = vst [vmem:[#allocation5] sm:$0x3] %v3624_v42 }
 0x61a   :  { %v3629_v44 = vmul.f32 0.5, %v3625_v43  ;;  %3627 = vst [vmem:[#allocation6] sm:$0x3] %v3625_v43  ;;  %v8833_v43 = vld [vmem:[%s11838_s10 + $0x254] ss:$8 sps:$4 sm:$0xff]  }
 0x61c   :  { %v3630_v45 = vmul.f32 1.442695, %v3629_v44  ;;  %v8836_v44 = vld [vmem:[%s11838_s10 + $0x2d4] ss:$8 sps:$4 sm:$0xff]  }
 0x61e   :  { %9187 = vpow2.f32 %v3630_v45  ;;  %v8831_v45 = vld [vmem:[%s11838_s10 + $0x250] ss:$8 sps:$4 sm:$0xff]  }
 0x628   :  { %v9188_v46 = vpop.eup %9187 }
 0x629   :  { %v3632_v47 = vmul.f32 %v9188_v46, %v3628_v8  ;;  %v8834_v8 = vld [vmem:[%s11838_s10 + $0x2d0] ss:$8 sps:$4 sm:$0xff]   ;;  %v8839_v46 = vld [vmem:[%s11838_s10 + $0x264] ss:$8 sps:$4 sm:$0xff]  }
 0x62b   :  { %v3633_v48 = vadd.f32 %v3632_v47, %v3624_v42  ;;  %v8828_v42 = vld [vmem:[%s11838_s10 + $0x2c0] ss:$8 sps:$4 sm:$0xff]   ;;  %v8842_v47 = vld [vmem:[%s11838_s10 + $0x2e4] ss:$8 sps:$4 sm:$0xff]  }
 0x62d   :  { %v10743_v51 = vpack.c.bf16 %v3633_v48, %v3633_v48  ;;  %v8837_v48 = vld [vmem:[%s11838_s10 + $0x260] ss:$8 sps:$4 sm:$0xff]  }
 0x62f   :  { %3776 = vmatmul.mubr.bf16.vlgmr.msra.gmra.mrb[52].mxu1 %v10743_v51  ;;  %3931 = vmatmul.mubr.bf16.vlgmr.msra.gmra.mrb[44].mxu0 %v10743_v51 }
 0x630   :  { %4054 = vmatpush1.bf16.msra.mxu1 %v8753_v49  ;;  %4209 = vmatpush1.bf16.msra.mxu0 %v8756_v50  ;;  %v8840_v49 = vld [vmem:[%s11838_s10 + $0x2e0] ss:$8 sps:$4 sm:$0xff]   ;;  %v8845_v50 = vld [vmem:[%s11838_s10 + $0x274] ss:$8 sps:$4 sm:$0xff]  }
 0x631   :  { %4055 = vmatprep.subr.bf16.mxu1 %v8761_v53  ;;  %4210 = vmatprep.subr.bf16.mxu0 %v8764_v55  ;;  %v8848_v53 = vld [vmem:[%s11838_s10 + $0x2f4] ss:$8 sps:$4 sm:$0xff]   ;;  %v8843_v55 = vld [vmem:[%s11838_s10 + $0x270] ss:$8 sps:$4 sm:$0xff]  }
 0x632   :  { %4085 = vmatprep.mubr.bf16.mxu1 %v9264_v52  ;;  %4240 = vmatprep.mubr.bf16.mxu0 %v9264_v52 }
 0x634   :  { %4056 = vmatpush1.bf16.msra.mxu1 %v8759_v56  ;;  %4211 = vmatpush1.bf16.msra.mxu0 %v8762_v58  ;;  %v8846_v56 = vld [vmem:[%s11838_s10 + $0x2f0] ss:$8 sps:$4 sm:$0xff]   ;;  %v8851_v58 = vld [vmem:[%s11838_s10 + $0x304] ss:$8 sps:$4 sm:$0xff]  }
 0x635   :  { %4057 = vmatprep.subr.bf16.mxu1 %v8767_v59  ;;  %4212 = vmatprep.subr.bf16.mxu0 %v8770_v27  ;;  %v8854_v59 = vld [vmem:[%s11838_s10 + $0x384] ss:$8 sps:$4 sm:$0xff]   ;;  %v8849_v27 = vld [vmem:[%s11838_s10 + $0x300] ss:$8 sps:$4 sm:$0xff]  }
 0x638   :  { %4058 = vmatpush1.bf16.msra.mxu1 %v8765_v61  ;;  %4213 = vmatpush1.bf16.msra.mxu0 %v8768_v63  ;;  %v8852_v61 = vld [vmem:[%s11838_s10 + $0x380] ss:$8 sps:$4 sm:$0xff]   ;;  %v8857_v63 = vld [vmem:[%s11838_s10 + $0x314] ss:$8 sps:$4 sm:$0xff]  }
 0x639   :  { %4059 = vmatprep.subr.bf16.mxu1 %v8773_v0  ;;  %4214 = vmatprep.subr.bf16.mxu0 %v8776_v1  ;;  %v8860_v0 = vld [vmem:[%s11838_s10 + $0x394] ss:$8 sps:$4 sm:$0xff]   ;;  %v8855_v1 = vld [vmem:[%s11838_s10 + $0x310] ss:$8 sps:$4 sm:$0xff]  }
 0x63c   :  { %4060 = vmatpush1.bf16.msra.mxu1 %v8771_v7  ;;  %4215 = vmatpush1.bf16.msra.mxu0 %v8774_v10  ;;  %v8858_v7 = vld [vmem:[%s11838_s10 + $0x390] ss:$8 sps:$4 sm:$0xff]   ;;  %v8863_v10 = vld [vmem:[%s11838_s10 + $0x324] ss:$8 sps:$4 sm:$0xff]  }
 0x63d   :  { %4061 = vmatprep.subr.bf16.mxu1 %v8779_v11  ;;  %4216 = vmatprep.subr.bf16.mxu0 %v8782_v13  ;;  %v8866_v11 = vld [vmem:[%s11838_s10 + $0x3a4] ss:$8 sps:$4 sm:$0xff]   ;;  %v8861_v13 = vld [vmem:[%s11838_s10 + $0x320] ss:$8 sps:$4 sm:$0xff]  }
 0x640   :  { %4062 = vmatpush1.bf16.msra.mxu1 %v8777_v3  ;;  %4217 = vmatpush1.bf16.msra.mxu0 %v8780_v9  ;;  %v8864_v3 = vld [vmem:[%s11838_s10 + $0x3a0] ss:$8 sps:$4 sm:$0xff]   ;;  %v8869_v9 = vld [vmem:[%s11838_s10 + $0x334] ss:$8 sps:$4 sm:$0xff]  }
 0x641   :  { %4063 = vmatprep.subr.bf16.mxu1 %v8785_v14  ;;  %4218 = vmatprep.subr.bf16.mxu0 %v8788_v15  ;;  %v8872_v14 = vld [vmem:[%s11838_s10 + $0x3b4] ss:$8 sps:$4 sm:$0xff]   ;;  %v8867_v15 = vld [vmem:[%s11838_s10 + $0x330] ss:$8 sps:$4 sm:$0xff]  }
 0x644   :  { %4064 = vmatpush1.bf16.msra.mxu1 %v8783_v6  ;;  %4219 = vmatpush1.bf16.msra.mxu0 %v8786_v17  ;;  %v8870_v6 = vld [vmem:[%s11838_s10 + $0x3b0] ss:$8 sps:$4 sm:$0xff]   ;;  %v8875_v17 = vld [vmem:[%s11838_s10 + $0x344] ss:$8 sps:$4 sm:$0xff]  }
 0x645   :  { %4065 = vmatprep.subr.bf16.mxu1 %v8791_v18  ;;  %4220 = vmatprep.subr.bf16.mxu0 %v8794_v4  ;;  %v8878_v18 = vld [vmem:[%s11838_s10 + $0x3c4] ss:$8 sps:$4 sm:$0xff]   ;;  %v8873_v4 = vld [vmem:[%s11838_s10 + $0x340] ss:$8 sps:$4 sm:$0xff]  }
 0x648   :  { %4066 = vmatpush1.bf16.msra.mxu1 %v8789_v5  ;;  %4221 = vmatpush1.bf16.msra.mxu0 %v8792_v2  ;;  %v8876_v5 = vld [vmem:[%s11838_s10 + $0x3c0] ss:$8 sps:$4 sm:$0xff]   ;;  %v8881_v2 = vld [vmem:[%s11838_s10 + $0x354] ss:$8 sps:$4 sm:$0xff]  }
 0x649   :  { %4067 = vmatprep.subr.bf16.mxu1 %v8797_v20  ;;  %4222 = vmatprep.subr.bf16.mxu0 %v8800_v29  ;;  %v8884_v20 = vld [vmem:[%s11838_s10 + $0x3d4] ss:$8 sps:$4 sm:$0xff]   ;;  %v8879_v29 = vld [vmem:[%s11838_s10 + $0x350] ss:$8 sps:$4 sm:$0xff]  }
 0x64c   :  { %4068 = vmatpush1.bf16.msra.mxu1 %v8795_v23  ;;  %4223 = vmatpush1.bf16.msra.mxu0 %v8798_v26  ;;  %v8882_v23 = vld [vmem:[%s11838_s10 + $0x3d0] ss:$8 sps:$4 sm:$0xff]   ;;  %v8887_v26 = vld [vmem:[%s11838_s10 + $0x364] ss:$8 sps:$4 sm:$0xff]  }
 0x64d   :  { %4363 = vmatprep.subr.bf16.mxu1 %v8803_v28  ;;  %4518 = vmatprep.subr.bf16.mxu0 %v8806_v12  ;;  %v8890_v28 = vld [vmem:[%s11838_s10 + $0x3e4] ss:$8 sps:$4 sm:$0xff]   ;;  %v8885_v12 = vld [vmem:[%s11838_s10 + $0x360] ss:$8 sps:$4 sm:$0xff]  }
 0x64f   :  { %4086 = vmatmul.mubr.bf16.vlgmr.msra.gmra.mrb[56].mxu1 %v10743_v51  ;;  %4241 = vmatmul.mubr.bf16.vlgmr.msra.gmra.mrb[48].mxu0 %v10743_v51 }
 0x650   :  { %4364 = vmatpush1.bf16.msra.mxu1 %v8801_v21  ;;  %4519 = vmatpush1.bf16.msra.mxu0 %v8804_v60  ;;  %v8888_v21 = vld [vmem:[%s11838_s10 + $0x3e0] ss:$8 sps:$4 sm:$0xff]   ;;  %v8893_v60 = vld [vmem:[%s11838_s10 + $0x374] ss:$8 sps:$4 sm:$0xff]  }
 0x651   :  { %4365 = vmatprep.subr.bf16.mxu1 %v8809_v30  ;;  %4520 = vmatprep.subr.bf16.mxu0 %v8812_v62  ;;  %v8896_v30 = vld [vmem:[%s11838_s10 + $0x3f4] ss:$8 sps:$4 sm:$0xff]   ;;  %v8891_v62 = vld [vmem:[%s11838_s10 + $0x370] ss:$8 sps:$4 sm:$0xff]  }
 0x652   :  { %4395 = vmatprep.mubr.bf16.mxu1 %v9264_v52  ;;  %4550 = vmatprep.mubr.bf16.mxu0 %v9264_v52 }
 0x654   :  { %4366 = vmatpush1.bf16.msra.mxu1 %v8807_v31  ;;  %4521 = vmatpush1.bf16.msra.mxu0 %v8810_v32  ;;  %v8894_v31 = vld [vmem:[%s11838_s10 + $0x3f0] ss:$8 sps:$4 sm:$0xff]   ;;  %v8899_v32 = vld [vmem:[%s11838_s10 + $0x404] ss:$8 sps:$4 sm:$0xff]  }
 0x655   :  { %4367 = vmatprep.subr.bf16.mxu1 %v8815_v33  ;;  %4522 = vmatprep.subr.bf16.mxu0 %v8818_v34  ;;  %v8902_v33 = vld [vmem:[%s11838_s10 + $0x484] ss:$8 sps:$4 sm:$0xff]   ;;  %v8897_v34 = vld [vmem:[%s11838_s10 + $0x400] ss:$8 sps:$4 sm:$0xff]  }
 0x658   :  { %4368 = vmatpush1.bf16.msra.mxu1 %v8813_v35  ;;  %4523 = vmatpush1.bf16.msra.mxu0 %v8816_v36  ;;  %v8900_v35 = vld [vmem:[%s11838_s10 + $0x480] ss:$8 sps:$4 sm:$0xff]   ;;  %v8905_v36 = vld [vmem:[%s11838_s10 + $0x414] ss:$8 sps:$4 sm:$0xff]  }
 0x659   :  { %4369 = vmatprep.subr.bf16.mxu1 %v8821_v37  ;;  %4524 = vmatprep.subr.bf16.mxu0 %v8824_v19  ;;  %v8908_v37 = vld [vmem:[%s11838_s10 + $0x494] ss:$8 sps:$4 sm:$0xff]   ;;  %v8903_v19 = vld [vmem:[%s11838_s10 + $0x410] ss:$8 sps:$4 sm:$0xff]  }
 0x65c   :  { %4370 = vmatpush1.bf16.msra.mxu1 %v8819_v16  ;;  %4525 = vmatpush1.bf16.msra.mxu0 %v8822_v38  ;;  %v8906_v16 = vld [vmem:[%s11838_s10 + $0x490] ss:$8 sps:$4 sm:$0xff]   ;;  %v8911_v38 = vld [vmem:[%s11838_s10 + $0x424] ss:$8 sps:$4 sm:$0xff]  }
 0x65d   :  { %4371 = vmatprep.subr.bf16.mxu1 %v8827_v39  ;;  %4526 = vmatprep.subr.bf16.mxu0 %v8830_v40  ;;  %v8914_v39 = vld [vmem:[%s11838_s10 + $0x4a4] ss:$8 sps:$4 sm:$0xff]   ;;  %v8909_v40 = vld [vmem:[%s11838_s10 + $0x420] ss:$8 sps:$4 sm:$0xff]  }
 0x660   :  { %4372 = vmatpush1.bf16.msra.mxu1 %v8825_v41  ;;  %4527 = vmatpush1.bf16.msra.mxu0 %v8828_v42  ;;  %v8912_v41 = vld [vmem:[%s11838_s10 + $0x4a0] ss:$8 sps:$4 sm:$0xff]   ;;  %v8917_v42 = vld [vmem:[%s11838_s10 + $0x434] ss:$8 sps:$4 sm:$0xff]  }
 0x661   :  { %4373 = vmatprep.subr.bf16.mxu1 %v8833_v43  ;;  %4528 = vmatprep.subr.bf16.mxu0 %v8836_v44  ;;  %v8920_v43 = vld [vmem:[%s11838_s10 + $0x4b4] ss:$8 sps:$4 sm:$0xff]   ;;  %v8915_v44 = vld [vmem:[%s11838_s10 + $0x430] ss:$8 sps:$4 sm:$0xff]  }
 0x664   :  { %4374 = vmatpush1.bf16.msra.mxu1 %v8831_v45  ;;  %4529 = vmatpush1.bf16.msra.mxu0 %v8834_v8  ;;  %v8918_v45 = vld [vmem:[%s11838_s10 + $0x4b0] ss:$8 sps:$4 sm:$0xff]   ;;  %v8923_v8 = vld [vmem:[%s11838_s10 + $0x444] ss:$8 sps:$4 sm:$0xff]  }
 0x665   :  { %4375 = vmatprep.subr.bf16.mxu1 %v8839_v46  ;;  %4530 = vmatprep.subr.bf16.mxu0 %v8842_v47  ;;  %v8926_v46 = vld [vmem:[%s11838_s10 + $0x4c4] ss:$8 sps:$4 sm:$0xff]   ;;  %v8921_v47 = vld [vmem:[%s11838_s10 + $0x440] ss:$8 sps:$4 sm:$0xff]  }
 0x668   :  { %4376 = vmatpush1.bf16.msra.mxu1 %v8837_v48  ;;  %4531 = vmatpush1.bf16.msra.mxu0 %v8840_v49  ;;  %v8924_v48 = vld [vmem:[%s11838_s10 + $0x4c0] ss:$8 sps:$4 sm:$0xff]   ;;  %v8929_v49 = vld [vmem:[%s11838_s10 + $0x454] ss:$8 sps:$4 sm:$0xff]  }
 0x669   :  { %4377 = vmatprep.subr.bf16.mxu1 %v8845_v50  ;;  %4532 = vmatprep.subr.bf16.mxu0 %v8848_v53  ;;  %v8932_v50 = vld [vmem:[%s11838_s10 + $0x4d4] ss:$8 sps:$4 sm:$0xff]   ;;  %v8927_v53 = vld [vmem:[%s11838_s10 + $0x450] ss:$8 sps:$4 sm:$0xff]  }
 0x66c   :  { %4378 = vmatpush1.bf16.msra.mxu1 %v8843_v55  ;;  %4533 = vmatpush1.bf16.msra.mxu0 %v8846_v56  ;;  %v8930_v55 = vld [vmem:[%s11838_s10 + $0x4d0] ss:$8 sps:$4 sm:$0xff]   ;;  %v8935_v56 = vld [vmem:[%s11838_s10 + $0x464] ss:$8 sps:$4 sm:$0xff]  }
 0x66d   :  { %4673 = vmatprep.subr.bf16.mxu1 %v8851_v58  ;;  %4828 = vmatprep.subr.bf16.mxu0 %v8854_v59  ;;  %v8938_v58 = vld [vmem:[%s11838_s10 + $0x4e4] ss:$8 sps:$4 sm:$0xff]   ;;  %v8933_v59 = vld [vmem:[%s11838_s10 + $0x460] ss:$8 sps:$4 sm:$0xff]  }
 0x66f   :  { %4396 = vmatmul.mubr.bf16.vlgmr.msra.gmra.mrb[60].mxu1 %v10743_v51  ;;  %4551 = vmatmul.mubr.bf16.vlgmr.msra.gmra.mrb[52].mxu0 %v10743_v51 }
 0x670   :  { %4674 = vmatpush1.bf16.msra.mxu1 %v8849_v27  ;;  %4829 = vmatpush1.bf16.msra.mxu0 %v8852_v61  ;;  %v8936_v27 = vld [vmem:[%s11838_s10 + $0x4e0] ss:$8 sps:$4 sm:$0xff]   ;;  %v8941_v61 = vld [vmem:[%s11838_s10 + $0x474] ss:$8 sps:$4 sm:$0xff]  }
 0x671   :  { %4675 = vmatprep.subr.bf16.mxu1 %v8857_v63  ;;  %4830 = vmatprep.subr.bf16.mxu0 %v8860_v0  ;;  %v8944_v63 = vld [vmem:[%s11838_s10 + $0x4f4] ss:$8 sps:$4 sm:$0xff]   ;;  %v8939_v0 = vld [vmem:[%s11838_s10 + $0x470] ss:$8 sps:$4 sm:$0xff]  }
 0x672   :  { %4705 = vmatprep.mubr.bf16.mxu1 %v9264_v52  ;;  %4860 = vmatprep.mubr.bf16.mxu0 %v9264_v52 }
 0x674   :  { %4676 = vmatpush1.bf16.msra.mxu1 %v8855_v1  ;;  %4831 = vmatpush1.bf16.msra.mxu0 %v8858_v7  ;;  %v8942_v1 = vld [vmem:[%s11838_s10 + $0x4f0] ss:$8 sps:$4 sm:$0xff]   ;;  %v8947_v7 = vld [vmem:[%s11838_s10 + $0x504] ss:$8 sps:$4 sm:$0xff]  }
 0x675   :  { %4677 = vmatprep.subr.bf16.mxu1 %v8863_v10  ;;  %4832 = vmatprep.subr.bf16.mxu0 %v8866_v11  ;;  %v8950_v10 = vld [vmem:[%s11838_s10 + $0x584] ss:$8 sps:$4 sm:$0xff]   ;;  %v8945_v11 = vld [vmem:[%s11838_s10 + $0x500] ss:$8 sps:$4 sm:$0xff]  }
 0x678   :  { %4678 = vmatpush1.bf16.msra.mxu1 %v8861_v13  ;;  %4833 = vmatpush1.bf16.msra.mxu0 %v8864_v3  ;;  %v8948_v13 = vld [vmem:[%s11838_s10 + $0x580] ss:$8 sps:$4 sm:$0xff]   ;;  %v8953_v3 = vld [vmem:[%s11838_s10 + $0x514] ss:$8 sps:$4 sm:$0xff]  }
 0x679   :  { %4679 = vmatprep.subr.bf16.mxu1 %v8869_v9  ;;  %4834 = vmatprep.subr.bf16.mxu0 %v8872_v14  ;;  %v8956_v9 = vld [vmem:[%s11838_s10 + $0x594] ss:$8 sps:$4 sm:$0xff]   ;;  %v8951_v14 = vld [vmem:[%s11838_s10 + $0x510] ss:$8 sps:$4 sm:$0xff]  }
 0x67c   :  { %4680 = vmatpush1.bf16.msra.mxu1 %v8867_v15  ;;  %4835 = vmatpush1.bf16.msra.mxu0 %v8870_v6  ;;  %v8954_v15 = vld [vmem:[%s11838_s10 + $0x590] ss:$8 sps:$4 sm:$0xff]   ;;  %v8959_v6 = vld [vmem:[%s11838_s10 + $0x524] ss:$8 sps:$4 sm:$0xff]  }
 0x67d   :  { %4681 = vmatprep.subr.bf16.mxu1 %v8875_v17  ;;  %4836 = vmatprep.subr.bf16.mxu0 %v8878_v18  ;;  %v8962_v17 = vld [vmem:[%s11838_s10 + $0x5a4] ss:$8 sps:$4 sm:$0xff]   ;;  %v8957_v18 = vld [vmem:[%s11838_s10 + $0x520] ss:$8 sps:$4 sm:$0xff]  }
 0x680   :  { %4682 = vmatpush1.bf16.msra.mxu1 %v8873_v4  ;;  %4837 = vmatpush1.bf16.msra.mxu0 %v8876_v5  ;;  %v8960_v4 = vld [vmem:[%s11838_s10 + $0x5a0] ss:$8 sps:$4 sm:$0xff]   ;;  %v8965_v5 = vld [vmem:[%s11838_s10 + $0x534] ss:$8 sps:$4 sm:$0xff]  }
 0x681   :  { %4683 = vmatprep.subr.bf16.mxu1 %v8881_v2  ;;  %4838 = vmatprep.subr.bf16.mxu0 %v8884_v20  ;;  %v8968_v2 = vld [vmem:[%s11838_s10 + $0x5b4] ss:$8 sps:$4 sm:$0xff]   ;;  %v8963_v20 = vld [vmem:[%s11838_s10 + $0x530] ss:$8 sps:$4 sm:$0xff]  }
 0x684   :  { %4684 = vmatpush1.bf16.msra.mxu1 %v8879_v29  ;;  %4839 = vmatpush1.bf16.msra.mxu0 %v8882_v23  ;;  %v8966_v29 = vld [vmem:[%s11838_s10 + $0x5b0] ss:$8 sps:$4 sm:$0xff]   ;;  %v8971_v23 = vld [vmem:[%s11838_s10 + $0x544] ss:$8 sps:$4 sm:$0xff]  }
 0x685   :  { %4685 = vmatprep.subr.bf16.mxu1 %v8887_v26  ;;  %4840 = vmatprep.subr.bf16.mxu0 %v8890_v28  ;;  %v8974_v26 = vld [vmem:[%s11838_s10 + $0x5c4] ss:$8 sps:$4 sm:$0xff]   ;;  %v8969_v28 = vld [vmem:[%s11838_s10 + $0x540] ss:$8 sps:$4 sm:$0xff]  }
 0x688   :  { %4686 = vmatpush1.bf16.msra.mxu1 %v8885_v12  ;;  %4841 = vmatpush1.bf16.msra.mxu0 %v8888_v21  ;;  %v8972_v12 = vld [vmem:[%s11838_s10 + $0x5c0] ss:$8 sps:$4 sm:$0xff]   ;;  %v8977_v21 = vld [vmem:[%s11838_s10 + $0x554] ss:$8 sps:$4 sm:$0xff]  }
 0x689   :  { %4687 = vmatprep.subr.bf16.mxu1 %v8893_v60  ;;  %4842 = vmatprep.subr.bf16.mxu0 %v8896_v30  ;;  %v8980_v60 = vld [vmem:[%s11838_s10 + $0x5d4] ss:$8 sps:$4 sm:$0xff]   ;;  %v8975_v30 = vld [vmem:[%s11838_s10 + $0x550] ss:$8 sps:$4 sm:$0xff]  }
 0x68c   :  { %4688 = vmatpush1.bf16.msra.mxu1 %v8891_v62  ;;  %4843 = vmatpush1.bf16.msra.mxu0 %v8894_v31  ;;  %v8978_v62 = vld [vmem:[%s11838_s10 + $0x5d0] ss:$8 sps:$4 sm:$0xff]   ;;  %v8983_v31 = vld [vmem:[%s11838_s10 + $0x564] ss:$8 sps:$4 sm:$0xff]  }
 0x68d   :  { %4983 = vmatprep.subr.bf16.mxu1 %v8899_v32  ;;  %5138 = vmatprep.subr.bf16.mxu0 %v8902_v33  ;;  %v8986_v32 = vld [vmem:[%s11838_s10 + $0x5e4] ss:$8 sps:$4 sm:$0xff]   ;;  %v8981_v33 = vld [vmem:[%s11838_s10 + $0x560] ss:$8 sps:$4 sm:$0xff]  }
 0x68f   :  { %4706 = vmatmul.mubr.bf16.vlgmr.msra.gmra.mrb[64].mxu1 %v10743_v51  ;;  %4861 = vmatmul.mubr.bf16.vlgmr.msra.gmra.mrb[56].mxu0 %v10743_v51 }
 0x690   :  { %4984 = vmatpush1.bf16.msra.mxu1 %v8897_v34  ;;  %5139 = vmatpush1.bf16.msra.mxu0 %v8900_v35  ;;  %v8984_v34 = vld [vmem:[%s11838_s10 + $0x5e0] ss:$8 sps:$4 sm:$0xff]   ;;  %v8989_v35 = vld [vmem:[%s11838_s10 + $0x574] ss:$8 sps:$4 sm:$0xff]  }
 0x691   :  { %4985 = vmatprep.subr.bf16.mxu1 %v8905_v36  ;;  %5140 = vmatprep.subr.bf16.mxu0 %v8908_v37  ;;  %v8992_v36 = vld [vmem:[%s11838_s10 + $0x5f4] ss:$8 sps:$4 sm:$0xff]   ;;  %v8987_v37 = vld [vmem:[%s11838_s10 + $0x570] ss:$8 sps:$4 sm:$0xff]  }
 0x692   :  { %5015 = vmatprep.mubr.bf16.mxu1 %v9264_v52  ;;  %5170 = vmatprep.mubr.bf16.mxu0 %v9264_v52 }
 0x694   :  { %4986 = vmatpush1.bf16.msra.mxu1 %v8903_v19  ;;  %5141 = vmatpush1.bf16.msra.mxu0 %v8906_v16  ;;  %v8990_v19 = vld [vmem:[%s11838_s10 + $0x5f0] ss:$8 sps:$4 sm:$0xff]   ;;  %v8995_v16 = vld [vmem:[%s11838_s10 + $0x604] ss:$8 sps:$4 sm:$0xff]  }
 0x695   :  { %4987 = vmatprep.subr.bf16.mxu1 %v8911_v38  ;;  %5142 = vmatprep.subr.bf16.mxu0 %v8914_v39  ;;  %v8998_v38 = vld [vmem:[%s11838_s10 + $0x684] ss:$8 sps:$4 sm:$0xff]   ;;  %v8993_v39 = vld [vmem:[%s11838_s10 + $0x600] ss:$8 sps:$4 sm:$0xff]  }
 0x698   :  { %4988 = vmatpush1.bf16.msra.mxu1 %v8909_v40  ;;  %5143 = vmatpush1.bf16.msra.mxu0 %v8912_v41  ;;  %v8996_v40 = vld [vmem:[%s11838_s10 + $0x680] ss:$8 sps:$4 sm:$0xff]   ;;  %v9001_v41 = vld [vmem:[%s11838_s10 + $0x614] ss:$8 sps:$4 sm:$0xff]  }
 0x699   :  { %4989 = vmatprep.subr.bf16.mxu1 %v8917_v42  ;;  %5144 = vmatprep.subr.bf16.mxu0 %v8920_v43  ;;  %v9004_v42 = vld [vmem:[%s11838_s10 + $0x694] ss:$8 sps:$4 sm:$0xff]   ;;  %v8999_v43 = vld [vmem:[%s11838_s10 + $0x610] ss:$8 sps:$4 sm:$0xff]  }
 0x69c   :  { %4990 = vmatpush1.bf16.msra.mxu1 %v8915_v44  ;;  %5145 = vmatpush1.bf16.msra.mxu0 %v8918_v45  ;;  %v9002_v44 = vld [vmem:[%s11838_s10 + $0x690] ss:$8 sps:$4 sm:$0xff]   ;;  %v9007_v45 = vld [vmem:[%s11838_s10 + $0x624] ss:$8 sps:$4 sm:$0xff]  }
 0x69d   :  { %4991 = vmatprep.subr.bf16.mxu1 %v8923_v8  ;;  %5146 = vmatprep.subr.bf16.mxu0 %v8926_v46  ;;  %v9010_v8 = vld [vmem:[%s11838_s10 + $0x6a4] ss:$8 sps:$4 sm:$0xff]   ;;  %v9005_v46 = vld [vmem:[%s11838_s10 + $0x620] ss:$8 sps:$4 sm:$0xff]  }
 0x6a0   :  { %4992 = vmatpush1.bf16.msra.mxu1 %v8921_v47  ;;  %5147 = vmatpush1.bf16.msra.mxu0 %v8924_v48  ;;  %v9008_v47 = vld [vmem:[%s11838_s10 + $0x6a0] ss:$8 sps:$4 sm:$0xff]   ;;  %v9013_v48 = vld [vmem:[%s11838_s10 + $0x634] ss:$8 sps:$4 sm:$0xff]  }
 0x6a1   :  { %4993 = vmatprep.subr.bf16.mxu1 %v8929_v49  ;;  %5148 = vmatprep.subr.bf16.mxu0 %v8932_v50  ;;  %v9016_v49 = vld [vmem:[%s11838_s10 + $0x6b4] ss:$8 sps:$4 sm:$0xff]   ;;  %v9011_v50 = vld [vmem:[%s11838_s10 + $0x630] ss:$8 sps:$4 sm:$0xff]  }
 0x6a4   :  { %4994 = vmatpush1.bf16.msra.mxu1 %v8927_v53  ;;  %5149 = vmatpush1.bf16.msra.mxu0 %v8930_v55  ;;  %v9014_v53 = vld [vmem:[%s11838_s10 + $0x6b0] ss:$8 sps:$4 sm:$0xff]   ;;  %v9019_v55 = vld [vmem:[%s11838_s10 + $0x644] ss:$8 sps:$4 sm:$0xff]  }
 0x6a5   :  { %4995 = vmatprep.subr.bf16.mxu1 %v8935_v56  ;;  %5150 = vmatprep.subr.bf16.mxu0 %v8938_v58  ;;  %v9022_v56 = vld [vmem:[%s11838_s10 + $0x6c4] ss:$8 sps:$4 sm:$0xff]   ;;  %v9017_v58 = vld [vmem:[%s11838_s10 + $0x640] ss:$8 sps:$4 sm:$0xff]  }
 0x6a8   :  { %4996 = vmatpush1.bf16.msra.mxu1 %v8933_v59  ;;  %5151 = vmatpush1.bf16.msra.mxu0 %v8936_v27  ;;  %v9020_v59 = vld [vmem:[%s11838_s10 + $0x6c0] ss:$8 sps:$4 sm:$0xff]   ;;  %v9025_v27 = vld [vmem:[%s11838_s10 + $0x654] ss:$8 sps:$4 sm:$0xff]  }
 0x6a9   :  { %4997 = vmatprep.subr.bf16.mxu1 %v8941_v61  ;;  %5152 = vmatprep.subr.bf16.mxu0 %v8944_v63  ;;  %v9028_v61 = vld [vmem:[%s11838_s10 + $0x6d4] ss:$8 sps:$4 sm:$0xff]   ;;  %v9023_v63 = vld [vmem:[%s11838_s10 + $0x650] ss:$8 sps:$4 sm:$0xff]  }
 0x6ac   :  { %4998 = vmatpush1.bf16.msra.mxu1 %v8939_v0  ;;  %5153 = vmatpush1.bf16.msra.mxu0 %v8942_v1  ;;  %v9026_v0 = vld [vmem:[%s11838_s10 + $0x6d0] ss:$8 sps:$4 sm:$0xff]   ;;  %v9031_v1 = vld [vmem:[%s11838_s10 + $0x664] ss:$8 sps:$4 sm:$0xff]  }
 0x6ad   :  { %5293 = vmatprep.subr.bf16.mxu1 %v8947_v7  ;;  %5448 = vmatprep.subr.bf16.mxu0 %v8950_v10  ;;  %v9034_v7 = vld [vmem:[%s11838_s10 + $0x6e4] ss:$8 sps:$4 sm:$0xff]   ;;  %v9029_v10 = vld [vmem:[%s11838_s10 + $0x660] ss:$8 sps:$4 sm:$0xff]  }
 0x6af   :  { %5016 = vmatmul.mubr.bf16.vlgmr.msra.gmra.mrb[68].mxu1 %v10743_v51  ;;  %5171 = vmatmul.mubr.bf16.vlgmr.msra.gmra.mrb[60].mxu0 %v10743_v51 }
 0x6b0   :  { %5294 = vmatpush1.bf16.msra.mxu1 %v8945_v11  ;;  %5449 = vmatpush1.bf16.msra.mxu0 %v8948_v13  ;;  %v9032_v11 = vld [vmem:[%s11838_s10 + $0x6e0] ss:$8 sps:$4 sm:$0xff]   ;;  %v9037_v13 = vld [vmem:[%s11838_s10 + $0x674] ss:$8 sps:$4 sm:$0xff]  }
 0x6b1   :  { %5295 = vmatprep.subr.bf16.mxu1 %v8953_v3  ;;  %5450 = vmatprep.subr.bf16.mxu0 %v8956_v9  ;;  %v9040_v3 = vld [vmem:[%s11838_s10 + $0x6f4] ss:$8 sps:$4 sm:$0xff]   ;;  %v9035_v9 = vld [vmem:[%s11838_s10 + $0x670] ss:$8 sps:$4 sm:$0xff]  }
 0x6b2   :  { %5325 = vmatprep.mubr.bf16.mxu1 %v9264_v52  ;;  %5480 = vmatprep.mubr.bf16.mxu0 %v9264_v52 }
 0x6b4   :  { %5296 = vmatpush1.bf16.msra.mxu1 %v8951_v14  ;;  %5451 = vmatpush1.bf16.msra.mxu0 %v8954_v15  ;;  %v9038_v14 = vld [vmem:[%s11838_s10 + $0x6f0] ss:$8 sps:$4 sm:$0xff]   ;;  %v9043_v15 = vld [vmem:[%s11838_s10 + $0x704] ss:$8 sps:$4 sm:$0xff]  }
 0x6b5   :  { %5297 = vmatprep.subr.bf16.mxu1 %v8959_v6  ;;  %5452 = vmatprep.subr.bf16.mxu0 %v8962_v17  ;;  %v9046_v6 = vld [vmem:[%s11838_s10 + $0x784] ss:$8 sps:$4 sm:$0xff]   ;;  %v9041_v17 = vld [vmem:[%s11838_s10 + $0x700] ss:$8 sps:$4 sm:$0xff]  }
 0x6b8   :  { %5298 = vmatpush1.bf16.msra.mxu1 %v8957_v18  ;;  %5453 = vmatpush1.bf16.msra.mxu0 %v8960_v4  ;;  %v9044_v18 = vld [vmem:[%s11838_s10 + $0x780] ss:$8 sps:$4 sm:$0xff]   ;;  %v9049_v4 = vld [vmem:[%s11838_s10 + $0x714] ss:$8 sps:$4 sm:$0xff]  }
 0x6b9   :  { %5299 = vmatprep.subr.bf16.mxu1 %v8965_v5  ;;  %5454 = vmatprep.subr.bf16.mxu0 %v8968_v2  ;;  %v9052_v5 = vld [vmem:[%s11838_s10 + $0x794] ss:$8 sps:$4 sm:$0xff]   ;;  %v9047_v2 = vld [vmem:[%s11838_s10 + $0x710] ss:$8 sps:$4 sm:$0xff]  }
 0x6bc   :  { %5300 = vmatpush1.bf16.msra.mxu1 %v8963_v20  ;;  %5455 = vmatpush1.bf16.msra.mxu0 %v8966_v29  ;;  %v9050_v20 = vld [vmem:[%s11838_s10 + $0x790] ss:$8 sps:$4 sm:$0xff]   ;;  %v9055_v29 = vld [vmem:[%s11838_s10 + $0x724] ss:$8 sps:$4 sm:$0xff]  }
 0x6bd   :  { %5301 = vmatprep.subr.bf16.mxu1 %v8971_v23  ;;  %5456 = vmatprep.subr.bf16.mxu0 %v8974_v26  ;;  %v9058_v23 = vld [vmem:[%s11838_s10 + $0x7a4] ss:$8 sps:$4 sm:$0xff]   ;;  %v9053_v26 = vld [vmem:[%s11838_s10 + $0x720] ss:$8 sps:$4 sm:$0xff]  }
 0x6c0   :  { %5302 = vmatpush1.bf16.msra.mxu1 %v8969_v28  ;;  %5457 = vmatpush1.bf16.msra.mxu0 %v8972_v12  ;;  %v9056_v28 = vld [vmem:[%s11838_s10 + $0x7a0] ss:$8 sps:$4 sm:$0xff]   ;;  %v9061_v12 = vld [vmem:[%s11838_s10 + $0x734] ss:$8 sps:$4 sm:$0xff]  }
 0x6c1   :  { %5303 = vmatprep.subr.bf16.mxu1 %v8977_v21  ;;  %5458 = vmatprep.subr.bf16.mxu0 %v8980_v60  ;;  %v9059_v21 = vld [vmem:[%s11838_s10 + $0x730] ss:$8 sps:$4 sm:$0xff]  }
 0x6c2   :  { %v9062_v60 = vld [vmem:[%s11838_s10 + $0x7b0] ss:$8 sps:$4 sm:$0xff]  }
 0x6c4   :  { %5304 = vmatpush1.bf16.msra.mxu1 %v8975_v30  ;;  %5459 = vmatpush1.bf16.msra.mxu0 %v8978_v62  ;;  %v9067_v30 = vld [vmem:[%s11838_s10 + $0x744] ss:$8 sps:$4 sm:$0xff]  }
 0x6c5   :  { %5305 = vmatprep.subr.bf16.mxu1 %v8983_v31  ;;  %5460 = vmatprep.subr.bf16.mxu0 %v8986_v32  ;;  %v9070_v62 = vld [vmem:[%s11838_s10 + $0x7c4] ss:$8 sps:$4 sm:$0xff]   ;;  %v9065_v31 = vld [vmem:[%s11838_s10 + $0x740] ss:$8 sps:$4 sm:$0xff]  }
 0x6c6   :  { %v9068_v32 = vld [vmem:[%s11838_s10 + $0x7c0] ss:$8 sps:$4 sm:$0xff]  }
 0x6c8   :  { %5306 = vmatpush1.bf16.msra.mxu1 %v8981_v33  ;;  %5461 = vmatpush1.bf16.msra.mxu0 %v8984_v34  ;;  %v3651_v33 = vld [vmem:[%s11839_s11] sm:$0x3]  ;;  %v7522_v34 = vld [vmem:[%s11839_s11 + $0x2] sm:$0x3] }
 0x6c9   :  { %5307 = vmatprep.subr.bf16.mxu1 %v8989_v35  ;;  %5462 = vmatprep.subr.bf16.mxu0 %v8992_v36  ;;  %v9073_v35 = vld [vmem:[%s11838_s10 + $0x754] ss:$8 sps:$4 sm:$0xff]  }
 0x6ca   :  { %v9076_v36 = vld [vmem:[%s11838_s10 + $0x7d4] ss:$8 sps:$4 sm:$0xff]  }
 0x6cc   :  { %5308 = vmatpush1.bf16.msra.mxu1 %v8987_v37  ;;  %5463 = vmatpush1.bf16.msra.mxu0 %v8990_v19  ;;  %v3656_v37 = vrot.slane %v3651_v33, %v9631_v24  ;;  %v3811_v19 = vrot.slane %v7522_v34, %v9631_v24 }
 0x6cd   :  { %5603 = vmatprep.subr.bf16.mxu1 %v8995_v16  ;;  %5758 = vmatprep.subr.bf16.mxu0 %v8998_v38  ;;  %v9071_v16 = vld [vmem:[%s11838_s10 + $0x750] ss:$8 sps:$4 sm:$0xff]  }
 0x6ce   :  { %v9074_v38 = vld [vmem:[%s11838_s10 + $0x7d0] ss:$8 sps:$4 sm:$0xff]  }
 0x6cf   :  { %5326 = vmatmul.mubr.bf16.vlgmr.msra.gmra.mrb[72].mxu1 %v10743_v51  ;;  %5481 = vmatmul.mubr.bf16.vlgmr.msra.gmra.mrb[64].mxu0 %v10743_v51 }
 0x6d0   :  { %5604 = vmatpush1.bf16.msra.mxu1 %v8993_v39  ;;  %5759 = vmatpush1.bf16.msra.mxu0 %v8996_v40  ;;  %v3660_v39 = vrot.slane %v3651_v33, %v9634_v25  ;;  %v3815_v40 = vrot.slane %v7522_v34, %v9634_v25  ;;  %v9118_v33 = vld [vmem:[%s11840_s12 + $0x8c] ss:$16 sps:$4 sm:$0xff]   ;;  %v7555_v34 = vld [vmem:[%s11839_s11 + $0x4] sm:$0x3] }
 0x6d1   :  { %5605 = vmatprep.subr.bf16.mxu1 %v9001_v41  ;;  %5760 = vmatprep.subr.bf16.mxu0 %v9004_v42  ;;  %v9079_v41 = vld [vmem:[%s11838_s10 + $0x764] ss:$8 sps:$4 sm:$0xff]  }
 0x6d2   :  { %5635 = vmatprep.mubr.bf16.mxu1 %v9264_v52  ;;  %5790 = vmatprep.mubr.bf16.mxu0 %v9264_v52  ;;  %v9082_v42 = vld [vmem:[%s11838_s10 + $0x7e4] ss:$8 sps:$4 sm:$0xff]  }
 0x6d4   :  { %5606 = vmatpush1.bf16.msra.mxu1 %v8999_v43  ;;  %5761 = vmatpush1.bf16.msra.mxu0 %v9002_v44 }
 0x6d5   :  { %5607 = vmatprep.subr.bf16.mxu1 %v9007_v45  ;;  %5762 = vmatprep.subr.bf16.mxu0 %v9010_v8 }
 0x6d8   :  { %5608 = vmatpush1.bf16.msra.mxu1 %v9005_v46  ;;  %5763 = vmatpush1.bf16.msra.mxu0 %v9008_v47 }
 0x6d9   :  { %5609 = vmatprep.subr.bf16.mxu1 %v9013_v48  ;;  %5764 = vmatprep.subr.bf16.mxu0 %v9016_v49  ;;  %v9077_v48 = vld [vmem:[%s11838_s10 + $0x760] ss:$8 sps:$4 sm:$0xff]  }
 0x6dc   :  { %5610 = vmatpush1.bf16.msra.mxu1 %v9011_v50  ;;  %5765 = vmatpush1.bf16.msra.mxu0 %v9014_v53 }
 0x6dd   :  { %5611 = vmatprep.subr.bf16.mxu1 %v9019_v55  ;;  %5766 = vmatprep.subr.bf16.mxu0 %v9022_v56  ;;  %v9080_v56 = vld [vmem:[%s11838_s10 + $0x7e0] ss:$8 sps:$4 sm:$0xff]  }
 0x6e0   :  { %5612 = vmatpush1.bf16.msra.mxu1 %v9017_v58  ;;  %5767 = vmatpush1.bf16.msra.mxu0 %v9020_v59  ;;  %v9085_v58 = vld [vmem:[%s11838_s10 + $0x774] ss:$8 sps:$4 sm:$0xff]  }
 0x6e1   :  { %5613 = vmatprep.subr.bf16.mxu1 %v9025_v27  ;;  %5768 = vmatprep.subr.bf16.mxu0 %v9028_v61 }
 0x6e4   :  { %5614 = vmatpush1.bf16.msra.mxu1 %v9023_v63  ;;  %5769 = vmatpush1.bf16.msra.mxu0 %v9026_v0  ;;  %v9088_v0 = vld [vmem:[%s11838_s10 + $0x7f4] ss:$8 sps:$4 sm:$0xff]  }
 0x6e5   :  { %5615 = vmatprep.subr.bf16.mxu1 %v9031_v1  ;;  %5770 = vmatprep.subr.bf16.mxu0 %v9034_v7 }
 0x6e8   :  { %5616 = vmatpush1.bf16.msra.mxu1 %v9029_v10  ;;  %5771 = vmatpush1.bf16.msra.mxu0 %v9032_v11 }
 0x6e9   :  { %5617 = vmatprep.subr.bf16.mxu1 %v9037_v13  ;;  %5772 = vmatprep.subr.bf16.mxu0 %v9040_v3  ;;  %v9083_v13 = vld [vmem:[%s11838_s10 + $0x770] ss:$8 sps:$4 sm:$0xff]  }
 0x6ea   :  { %v9086_v3 = vld [vmem:[%s11838_s10 + $0x7f0] ss:$8 sps:$4 sm:$0xff]  }
 0x6ec   :  { %5618 = vmatpush1.bf16.msra.mxu1 %v9035_v9  ;;  %5773 = vmatpush1.bf16.msra.mxu0 %v9038_v14 }
 0x6ed   :  { %5913 = vmatprep.subr.bf16.mxu1 %v9043_v15  ;;  %6068 = vmatprep.subr.bf16.mxu0 %v9046_v6  ;;  %v9091_v15 = vld [vmem:[%s11840_s12 + $0x4] ss:$16 sps:$4 sm:$0xff]   ;;  %v9094_v6 = vld [vmem:[%s11840_s12 + $0xc] ss:$16 sps:$4 sm:$0xff]  }
 0x6ef   :  { %5636 = vmatmul.mubr.bf16.vlgmr.msra.gmra.mrb[76].mxu1 %v10743_v51  ;;  %5791 = vmatmul.mubr.bf16.vlgmr.msra.gmra.mrb[68].mxu0 %v10743_v51 }
 0x6f0   :  { %5914 = vmatpush1.bf16.msra.mxu1 %v9041_v17  ;;  %6069 = vmatpush1.bf16.msra.mxu0 %v9044_v18 }
 0x6f1   :  { %5915 = vmatprep.subr.bf16.mxu1 %v9049_v4  ;;  %6070 = vmatprep.subr.bf16.mxu0 %v9052_v5 }
 0x6f2   :  { %5945 = vmatprep.mubr.bf16.mxu1 %v9264_v52  ;;  %6100 = vmatprep.mubr.bf16.mxu0 %v9264_v52  ;;  %v9064_v52 = vld [vmem:[%s11838_s10 + $0x7b4] ss:$8 sps:$4 sm:$0xff]  }
 0x6f4   :  { %5916 = vmatpush1.bf16.msra.mxu1 %v9047_v2  ;;  %6071 = vmatpush1.bf16.msra.mxu0 %v9050_v20  ;;  %v9089_v2 = vld [vmem:[%s11840_s12] ss:$16 sps:$4 sm:$0xff]   ;;  %v9092_v20 = vld [vmem:[%s11840_s12 + $0x8] ss:$16 sps:$4 sm:$0xff]  }
 0x6f5   :  { %5917 = vmatprep.subr.bf16.mxu1 %v9055_v29  ;;  %6072 = vmatprep.subr.bf16.mxu0 %v9058_v23  ;;  %v9097_v29 = vld [vmem:[%s11840_s12 + $0x24] ss:$16 sps:$4 sm:$0xff]   ;;  %v9100_v23 = vld [vmem:[%s11840_s12 + $0x2c] ss:$16 sps:$4 sm:$0xff]  }
 0x6f8   :  { %5918 = vmatpush1.bf16.msra.mxu1 %v9053_v26  ;;  %6073 = vmatpush1.bf16.msra.mxu0 %v9056_v28  ;;  %v9095_v26 = vld [vmem:[%s11840_s12 + $0x20] ss:$16 sps:$4 sm:$0xff]   ;;  %v9098_v28 = vld [vmem:[%s11840_s12 + $0x28] ss:$16 sps:$4 sm:$0xff]  }
 0x6f9   :  { %5919 = vmatprep.subr.bf16.mxu1 %v9061_v12  ;;  %6074 = vmatprep.subr.bf16.mxu0 %v9064_v52  ;;  %v9103_v12 = vld [vmem:[%s11840_s12 + $0x44] ss:$16 sps:$4 sm:$0xff]   ;;  %v9101_v52 = vld [vmem:[%s11840_s12 + $0x40] ss:$16 sps:$4 sm:$0xff]  }
 0x6fc   :  { %5920 = vmatpush1.bf16.msra.mxu1 %v9059_v21  ;;  %6075 = vmatpush1.bf16.msra.mxu0 %v9062_v60  ;;  %v9104_v21 = vld [vmem:[%s11840_s12 + $0x48] ss:$16 sps:$4 sm:$0xff]   ;;  %v9109_v60 = vld [vmem:[%s11840_s12 + $0x64] ss:$16 sps:$4 sm:$0xff]  }
 0x6fd   :  { %5921 = vmatprep.subr.bf16.mxu1 %v9067_v30  ;;  %6076 = vmatprep.subr.bf16.mxu0 %v9070_v62  ;;  %v9112_v30 = vld [vmem:[%s11840_s12 + $0x6c] ss:$16 sps:$4 sm:$0xff]   ;;  %v9107_v62 = vld [vmem:[%s11840_s12 + $0x60] ss:$16 sps:$4 sm:$0xff]  }
 0x700   :  { %5922 = vmatpush1.bf16.msra.mxu1 %v9065_v31  ;;  %6077 = vmatpush1.bf16.msra.mxu0 %v9068_v32  ;;  %v9110_v31 = vld [vmem:[%s11840_s12 + $0x68] ss:$16 sps:$4 sm:$0xff]   ;;  %v9115_v32 = vld [vmem:[%s11840_s12 + $0x84] ss:$16 sps:$4 sm:$0xff]  }
 0x701   :  { %5923 = vmatprep.subr.bf16.mxu1 %v9073_v35  ;;  %6078 = vmatprep.subr.bf16.mxu0 %v9076_v36  ;;  %v7588_v35 = vld [vmem:[%s11839_s11 + $0x6] sm:$0x3]  ;;  %v9113_v36 = vld [vmem:[%s11840_s12 + $0x80] ss:$16 sps:$4 sm:$0xff]  }
 0x702   :  { %v3777_v43 = vpop.f32.mrb[52].mxu1  ;;  %v3932_v44 = vpop.f32.mrb[44].mxu0 }
 0x703   :  { %v3778_v45 = vadd.f32 %v3777_v43, %v3656_v37  ;;  %v3933_v8 = vadd.f32 %v3932_v44, %v3811_v19  ;;  %v3779_v46 = vpop.f32.mrb[53].mxu1  ;;  %v3934_v47 = vpop.f32.mrb[45].mxu0  ;;  %v9116_v37 = vld [vmem:[%s11840_s12 + $0x88] ss:$16 sps:$4 sm:$0xff]   ;;  %v9121_v19 = vld [vmem:[%s11840_s12 + $0xa4] ss:$16 sps:$4 sm:$0xff]  }
 0x704   :  { %v3780_v49 = vadd.f32 %v3779_v46, %v3660_v39  ;;  %v3935_v50 = vadd.f32 %v3934_v47, %v3815_v40  ;;  %5924 = vmatpush1.bf16.msra.mxu1 %v9071_v16  ;;  %6079 = vmatpush1.bf16.msra.mxu0 %v9074_v38  ;;  %v3781_v53 = vpop.f32.mrb[54].mxu1  ;;  %v3936_v55 = vpop.f32.mrb[46].mxu0  ;;  %v9124_v16 = vld [vmem:[%s11840_s12 + $0xac] ss:$16 sps:$4 sm:$0xff]   ;;  %v3966_v38 = vrot.slane %v7555_v34, %v9631_v24  ;;  %v9122_v43 = vld [vmem:[%s11840_s12 + $0xa8] ss:$16 sps:$4 sm:$0xff]  }
 0x705   :  { %v3784_v59 = vmax.f32 %v3778_v45, 0.0  ;;  %v3939_v27 = vmax.f32 %v3933_v8, 0.0  ;;  %v3782_v61 = vpop.f32.mrb[55].mxu1  ;;  %v3937_v63 = vpop.f32.mrb[47].mxu0  ;;  %5925 = vmatprep.subr.bf16.mxu1 %v9079_v41  ;;  %6080 = vmatprep.subr.bf16.mxu0 %v9082_v42  ;;  %v4121_v39 = vrot.slane %v7588_v35, %v9631_v24  ;;  %v3970_v40 = vrot.slane %v7555_v34, %v9634_v25  ;;  %v9119_v42 = vld [vmem:[%s11840_s12 + $0xa0] ss:$16 sps:$4 sm:$0xff]  }
 0x706   :  { %v3785_v1 = vmax.f32 %v3780_v49, 0.0  ;;  %v3940_v7 = vmax.f32 %v3935_v50, 0.0  ;;  %v4125_v41 = vrot.slane %v7588_v35, %v9634_v25  ;;  %v9127_v44 = vld [vmem:[%s11840_s12 + $0xc4] ss:$16 sps:$4 sm:$0xff]   ;;  %v9130_v45 = vld [vmem:[%s11840_s12 + $0xcc] ss:$16 sps:$4 sm:$0xff]  }
 0x707   :  { %v3941_v10 = vpack.c.bf16 %v3939_v27, %v3939_v27  ;;  %v3786_v9 = vpack.c.bf16 %v3784_v59, %v3784_v59  ;;  %v9125_v53 = vld [vmem:[%s11840_s12 + $0xc0] ss:$16 sps:$4 sm:$0xff]   ;;  %v9128_v27 = vld [vmem:[%s11840_s12 + $0xc8] ss:$16 sps:$4 sm:$0xff]   ;;  %v9133_v61 = vld [vmem:[%s11840_s12 + $0xe4] ss:$16 sps:$4 sm:$0xff]  }
 0x708   :  { %v3942_v11 = vpack.c.bf16 %v3940_v7, %v3940_v7  ;;  %5926 = vmatpush1.bf16.msra.mxu1 %v9077_v48  ;;  %6081 = vmatpush1.bf16.msra.mxu0 %v9080_v56  ;;  %v3787_v17 = vpack.c.bf16 %v3785_v1, %v3785_v1  ;;  %v9152_v34 = vld [vmem:[%s11840_s12 + $0x148] ss:$16 sps:$4 sm:$0xff]   ;;  %v9157_v35 = vld [vmem:[%s11840_s12 + $0x164] ss:$16 sps:$4 sm:$0xff]  }
 0x709   :  { %v6115_v14 = vrot.slane %v3941_v10, 7  ;;  %5927 = vmatprep.subr.bf16.mxu1 %v9085_v58  ;;  %6082 = vmatprep.subr.bf16.mxu0 %v9088_v0  ;;  %v9136_v10 = vld [vmem:[%s11840_s12 + $0xec] ss:$16 sps:$4 sm:$0xff]  }
 0x70a   :  { %v6116_v18 = vrot.slane %v3942_v11, 7 }
 0x70b   :  { %v11450_v4 = vsel %vm6169_vm1, %v3786_v9, %v6115_v14 }
 0x70c   :  { %v11453_v5 = vsel %vm6169_vm1, %v3787_v17, %v6116_v18  ;;  %5928 = vmatpush1.bf16.msra.mxu1 %v9083_v13  ;;  %6083 = vmatpush1.bf16.msra.mxu0 %v9086_v3  ;;  %v9134_v17 = vld [vmem:[%s11840_s12 + $0xe8] ss:$16 sps:$4 sm:$0xff]  }
 0x70d   :  { %6646 = vmatprep.subr.bf16.mxu1 %v9091_v15  ;;  %6699 = vmatprep.subr.bf16.mxu0 %v9094_v6  ;;  %v9131_v6 = vld [vmem:[%s11840_s12 + $0xe0] ss:$16 sps:$4 sm:$0xff]  }
 0x70f   :  { %5946 = vmatmul.mubr.bf16.vlgmr.msra.gmra.mrb[80].mxu1 %v10743_v51  ;;  %6101 = vmatmul.mubr.bf16.vlgmr.msra.gmra.mrb[72].mxu0 %v10743_v51  ;;  %v9106_v51 = vld [vmem:[%s11840_s12 + $0x4c] ss:$16 sps:$4 sm:$0xff]  }
 0x710   :  { %6647 = vmatpush1.bf16.msra.mxu1 %v9089_v2  ;;  %6700 = vmatpush1.bf16.msra.mxu0 %v9092_v20  ;;  %v9139_v20 = vld [vmem:[%s11840_s12 + $0x104] ss:$16 sps:$4 sm:$0xff]  }
 0x711   :  { %6648 = vmatprep.subr.bf16.mxu1 %v9097_v29  ;;  %6701 = vmatprep.subr.bf16.mxu0 %v9100_v23  ;;  %v9142_v29 = vld [vmem:[%s11840_s12 + $0x10c] ss:$16 sps:$4 sm:$0xff]  }
 0x714   :  { %6649 = vmatpush1.bf16.msra.mxu1 %v9095_v26  ;;  %6702 = vmatpush1.bf16.msra.mxu0 %v9098_v28 }
 0x715   :  { %6650 = vmatprep.subr.bf16.mxu1 %v9103_v12  ;;  %6703 = vmatprep.subr.bf16.mxu0 %v9106_v51 }
 0x718   :  { %6651 = vmatpush1.bf16.msra.mxu1 %v9101_v52  ;;  %6704 = vmatpush1.bf16.msra.mxu0 %v9104_v21  ;;  %v9137_v52 = vld [vmem:[%s11840_s12 + $0x100] ss:$16 sps:$4 sm:$0xff]   ;;  %v9140_v21 = vld [vmem:[%s11840_s12 + $0x108] ss:$16 sps:$4 sm:$0xff]  }
 0x719   :  { %6652 = vmatprep.subr.bf16.mxu1 %v9109_v60  ;;  %6705 = vmatprep.subr.bf16.mxu0 %v9112_v30  ;;  %v9143_v30 = vld [vmem:[%s11840_s12 + $0x120] ss:$16 sps:$4 sm:$0xff]  }
 0x71c   :  { %6653 = vmatpush1.bf16.msra.mxu1 %v9107_v62  ;;  %6706 = vmatpush1.bf16.msra.mxu0 %v9110_v31  ;;  %v9146_v62 = vld [vmem:[%s11840_s12 + $0x128] ss:$16 sps:$4 sm:$0xff]   ;;  %v9151_v31 = vld [vmem:[%s11840_s12 + $0x144] ss:$16 sps:$4 sm:$0xff]  }
 0x71d   :  { %6654 = vmatprep.subr.bf16.mxu1 %v9115_v32  ;;  %6707 = vmatprep.subr.bf16.mxu0 %v9118_v33  ;;  %v9154_v32 = vld [vmem:[%s11840_s12 + $0x14c] ss:$16 sps:$4 sm:$0xff]   ;;  %v9149_v33 = vld [vmem:[%s11840_s12 + $0x140] ss:$16 sps:$4 sm:$0xff]  }
 0x720   :  { %6655 = vmatpush1.bf16.msra.mxu1 %v9113_v36  ;;  %6708 = vmatpush1.bf16.msra.mxu0 %v9116_v37  ;;  %v9160_v36 = vld [vmem:[%s11840_s12 + $0x16c] ss:$16 sps:$4 sm:$0xff]   ;;  %v9155_v37 = vld [vmem:[%s11840_s12 + $0x160] ss:$16 sps:$4 sm:$0xff]  }
 0x721   :  { %6656 = vmatprep.subr.bf16.mxu1 %v9121_v19  ;;  %6709 = vmatprep.subr.bf16.mxu0 %v9124_v16  ;;  %v9158_v19 = vld [vmem:[%s11840_s12 + $0x168] ss:$16 sps:$4 sm:$0xff]   ;;  %v9163_v16 = vld [vmem:[%s11840_s12 + $0x184] ss:$16 sps:$4 sm:$0xff]  }
 0x722   :  { %v4087_v8 = vpop.f32.mrb[56].mxu1  ;;  %v4242_v46 = vpop.f32.mrb[48].mxu0 }
 0x723   :  { %v4088_v47 = vadd.f32 %v4087_v8, %v3966_v38  ;;  %v4243_v48 = vadd.f32 %v4242_v46, %v4121_v39  ;;  %v4089_v49 = vpop.f32.mrb[57].mxu1  ;;  %v4244_v50 = vpop.f32.mrb[49].mxu0  ;;  %v9166_v38 = vld [vmem:[%s11840_s12 + $0x18c] ss:$16 sps:$4 sm:$0xff]   ;;  %v7621_v39 = vld [vmem:[%s11839_s11 + $0x8] sm:$0x3] }
 0x724   :  { %v4090_v55 = vadd.f32 %v4089_v49, %v3970_v40  ;;  %v4245_v56 = vadd.f32 %v4244_v50, %v4125_v41  ;;  %v4091_v58 = vpop.f32.mrb[58].mxu1  ;;  %v4246_v59 = vpop.f32.mrb[50].mxu0  ;;  %6657 = vmatpush1.bf16.msra.mxu1 %v9119_v42  ;;  %6710 = vmatpush1.bf16.msra.mxu0 %v9122_v43  ;;  %v7654_v40 = vld [vmem:[%s11839_s11 + $0xa] sm:$0x3]  ;;  %v9161_v41 = vld [vmem:[%s11840_s12 + $0x180] ss:$16 sps:$4 sm:$0xff]   ;;  %v4280_v46 = vrot.slane %v7621_v39, %v9634_v25 }
 0x725   :  { %v4094_v63 = vmax.f32 %v4088_v47, 0.0  ;;  %v4249_v0 = vmax.f32 %v4243_v48, 0.0  ;;  %v4092_v1 = vpop.f32.mrb[59].mxu1  ;;  %v4247_v7 = vpop.f32.mrb[51].mxu0  ;;  %6658 = vmatprep.subr.bf16.mxu1 %v9127_v44  ;;  %6711 = vmatprep.subr.bf16.mxu0 %v9130_v45  ;;  %v9164_v42 = vld [vmem:[%s11840_s12 + $0x188] ss:$16 sps:$4 sm:$0xff]   ;;  %v4276_v45 = vrot.slane %v7621_v39, %v9631_v24  ;;  %v4431_v8 = vrot.slane %v7654_v40, %v9631_v24 }
 0x726   :  { %v4095_v11 = vmax.f32 %v4090_v55, 0.0  ;;  %v4250_v13 = vmax.f32 %v4245_v56, 0.0  ;;  %v9169_v43 = vld [vmem:[%s11840_s12 + $0x1a4] ss:$16 sps:$4 sm:$0xff]   ;;  %v9172_v44 = vld [vmem:[%s11840_s12 + $0x1ac] ss:$16 sps:$4 sm:$0xff]   ;;  %v4435_v47 = vrot.slane %v7654_v40, %v9634_v25 }
 0x727   :  { %v4096_v3 = vpack.c.bf16 %v4094_v63, %v4094_v63  ;;  %v4251_v9 = vpack.c.bf16 %v4249_v0, %v4249_v0  ;;  %v9167_v48 = vld [vmem:[%s11840_s12 + $0x1a0] ss:$16 sps:$4 sm:$0xff]   ;;  %v9170_v49 = vld [vmem:[%s11840_s12 + $0x1a8] ss:$16 sps:$4 sm:$0xff]   ;;  %v9175_v50 = vld [vmem:[%s11840_s12 + $0x1c4] ss:$16 sps:$4 sm:$0xff]  }
 0x728   :  { %v4097_v14 = vpack.c.bf16 %v4095_v11, %v4095_v11  ;;  %v4252_v15 = vpack.c.bf16 %v4250_v13, %v4250_v13  ;;  %6659 = vmatpush1.bf16.msra.mxu1 %v9125_v53  ;;  %6712 = vmatpush1.bf16.msra.mxu0 %v9128_v27  ;;  %v9178_v53 = vld [vmem:[%s11840_s12 + $0x1cc] ss:$16 sps:$4 sm:$0xff]   ;;  %v9173_v63 = vld [vmem:[%s11840_s12 + $0x1c0] ss:$16 sps:$4 sm:$0xff]   ;;  %v9176_v11 = vld [vmem:[%s11840_s12 + $0x1c8] ss:$16 sps:$4 sm:$0xff]  }
 0x729   :  { %v6119_v18 = vrot.slane %v4096_v3, 6  ;;  %v6123_v2 = vrot.slane %v4251_v9, 5  ;;  %6660 = vmatprep.subr.bf16.mxu1 %v9133_v61  ;;  %6713 = vmatprep.subr.bf16.mxu0 %v9136_v10  ;;  %v9181_v13 = vld [vmem:[%s11840_s12 + $0x1e4] ss:$16 sps:$4 sm:$0xff]  }
 0x72a   :  { %v6120_v23 = vrot.slane %v4097_v14, 6  ;;  %v6124_v26 = vrot.slane %v4252_v15, 5 }
 0x72b   :  { %v6178_v28 = vsel %vm6176_vm2, %v11450_v4, %v6119_v18  ;;  %v9145_v4 = vld [vmem:[%s11840_s12 + $0x124] ss:$16 sps:$4 sm:$0xff]  }
 0x72c   :  { %v11566_v12 = vsel %vm6181_vm3, %v6178_v28, %v6123_v2  ;;  %v6180_v51 = vsel %vm6176_vm2, %v11453_v5, %v6120_v23  ;;  %6661 = vmatpush1.bf16.msra.mxu1 %v9131_v6  ;;  %6714 = vmatpush1.bf16.msra.mxu0 %v9134_v17  ;;  %v9148_v5 = vld [vmem:[%s11840_s12 + $0x12c] ss:$16 sps:$4 sm:$0xff]   ;;  %v9182_v28 = vld [vmem:[%s11840_s12 + $0x1e8] ss:$16 sps:$4 sm:$0xff]  }
 0x72d   :  { %v11577_v60 = vsel %vm6181_vm3, %v6180_v51, %v6124_v26  ;;  %6662 = vmatprep.subr.bf16.mxu1 %v9139_v20  ;;  %6715 = vmatprep.subr.bf16.mxu0 %v9142_v29  ;;  %v9184_v6 = vld [vmem:[%s11840_s12 + $0x1ec] ss:$16 sps:$4 sm:$0xff]   ;;  %v9179_v26 = vld [vmem:[%s11840_s12 + $0x1e0] ss:$16 sps:$4 sm:$0xff]   ;;  %s9266_s12 = smov [#allocation6]  }
 0x72e   :  { %s6840_s25 = sshll.u32 %s9266_s12, 4  ;;  %s6841_s25 = int_to_ptr.vmem [resolvable:$true] %s6840_s25 }
 0x730   :  { %6663 = vmatpush1.bf16.msra.mxu1 %v9137_v52  ;;  %6716 = vmatpush1.bf16.msra.mxu0 %v9140_v21 }
 0x731   :  { %6664 = vmatprep.subr.bf16.mxu1 %v9145_v4  ;;  %6717 = vmatprep.subr.bf16.mxu0 %v9148_v5 }
 0x734   :  { %6665 = vmatpush1.bf16.msra.mxu1 %v9143_v30  ;;  %6718 = vmatpush1.bf16.msra.mxu0 %v9146_v62 }
 0x735   :  { %6666 = vmatprep.subr.bf16.mxu1 %v9151_v31  ;;  %6719 = vmatprep.subr.bf16.mxu0 %v9154_v32  ;;  %v7687_v32 = vld [vmem:[%s11839_s11 + $0xc] sm:$0x3] }
 0x738   :  { %6667 = vmatpush1.bf16.msra.mxu1 %v9149_v33  ;;  %6720 = vmatpush1.bf16.msra.mxu0 %v9152_v34  ;;  %v7720_v33 = vld [vmem:[%s11839_s11 + $0xe] sm:$0x3]  ;;  %v4586_v34 = vrot.slane %v7687_v32, %v9631_v24 }
 0x739   :  { %6668 = vmatprep.subr.bf16.mxu1 %v9157_v35  ;;  %6721 = vmatprep.subr.bf16.mxu0 %v9160_v36  ;;  %v4590_v35 = vrot.slane %v7687_v32, %v9634_v25 }
 0x73c   :  { %6669 = vmatpush1.bf16.msra.mxu1 %v9155_v37  ;;  %6722 = vmatpush1.bf16.msra.mxu0 %v9158_v19 }
 0x73d   :  { %6670 = vmatprep.subr.bf16.mxu1 %v9163_v16  ;;  %6723 = vmatprep.subr.bf16.mxu0 %v9166_v38 }
 0x740   :  { %6671 = vmatpush1.bf16.msra.mxu1 %v9161_v41  ;;  %6724 = vmatpush1.bf16.msra.mxu0 %v9164_v42 }
 0x741   :  { %6672 = vmatprep.subr.bf16.mxu1 %v9169_v43  ;;  %6725 = vmatprep.subr.bf16.mxu0 %v9172_v44 }
 0x742   :  { %v4397_v55 = vpop.f32.mrb[60].mxu1  ;;  %v4552_v56 = vpop.f32.mrb[52].mxu0 }
 0x743   :  { %v4398_v58 = vadd.f32 %v4397_v55, %v4276_v45  ;;  %v4553_v59 = vadd.f32 %v4552_v56, %v4431_v8  ;;  %v4399_v27 = vpop.f32.mrb[61].mxu1  ;;  %v4554_v61 = vpop.f32.mrb[53].mxu0 }
 0x744   :  { %v4400_v0 = vadd.f32 %v4399_v27, %v4280_v46  ;;  %v4555_v1 = vadd.f32 %v4554_v61, %v4435_v47  ;;  %v4401_v7 = vpop.f32.mrb[62].mxu1  ;;  %v4556_v10 = vpop.f32.mrb[54].mxu0  ;;  %6673 = vmatpush1.bf16.msra.mxu1 %v9167_v48  ;;  %6726 = vmatpush1.bf16.msra.mxu0 %v9170_v49 }
 0x745   :  { %v4404_v3 = vmax.f32 %v4398_v58, 0.0  ;;  %v4559_v9 = vmax.f32 %v4553_v59, 0.0  ;;  %v4402_v14 = vpop.f32.mrb[63].mxu1  ;;  %v4557_v15 = vpop.f32.mrb[55].mxu0  ;;  %6674 = vmatprep.subr.bf16.mxu1 %v9175_v50  ;;  %6727 = vmatprep.subr.bf16.mxu0 %v9178_v53  ;;  %v7753_v7 = vld [vmem:[%s11839_s11 + $0x10] sm:$0x3] }
 0x746   :  { %v4405_v17 = vmax.f32 %v4400_v0, 0.0  ;;  %v4560_v18 = vmax.f32 %v4555_v1, 0.0  ;;  %v7786_v10 = vld [vmem:[%s11839_s11 + $0x12] sm:$0x3] }
 0x747   :  { %v4406_v2 = vpack.c.bf16 %v4404_v3, %v4404_v3  ;;  %v4561_v20 = vpack.c.bf16 %v4559_v9, %v4559_v9  ;;  %v4900_v3 = vrot.slane %v7753_v7, %v9634_v25  ;;  %v5055_v9 = vrot.slane %v7786_v10, %v9634_v25 }
 0x748   :  { %v4407_v29 = vpack.c.bf16 %v4405_v17, %v4405_v17  ;;  %v4562_v23 = vpack.c.bf16 %v4560_v18, %v4560_v18  ;;  %6675 = vmatpush1.bf16.msra.mxu1 %v9173_v63  ;;  %6728 = vmatpush1.bf16.msra.mxu0 %v9176_v11  ;;  %v4896_v11 = vrot.slane %v7753_v7, %v9631_v24 }
 0x749   :  { %v6127_v51 = vrot.slane %v4406_v2, 4  ;;  %v6131_v52 = vrot.slane %v4561_v20, 3  ;;  %6676 = vmatprep.subr.bf16.mxu1 %v9181_v13  ;;  %6729 = vmatprep.subr.bf16.mxu0 %v9184_v6  ;;  %v5051_v13 = vrot.slane %v7786_v10, %v9631_v24 }
 0x74a   :  { %v6128_v21 = vrot.slane %v4407_v29, 4  ;;  %v6132_v4 = vrot.slane %v4562_v23, 3 }
 0x74b   :  { %v6188_v5 = vsel %vm6186_vm4, %v11566_v12, %v6127_v51  ;;  %v4741_v12 = vrot.slane %v7720_v33, %v9631_v24 }
 0x74c   :  { %v6193_v30 = vsel %vm6191_vm5, %v6188_v5, %v6131_v52  ;;  %v6190_v62 = vsel %vm6186_vm4, %v11577_v60, %v6128_v21  ;;  %6677 = vmatpush1.bf16.msra.mxu1 %v9179_v26  ;;  %6730 = vmatpush1.bf16.msra.mxu0 %v9182_v28  ;;  %v4745_v60 = vrot.slane %v7720_v33, %v9634_v25 }
 0x74d   :  { %v6195_v31 = vsel %vm6191_vm5, %v6190_v62, %v6132_v4 }
 0x762   :  { %v4707_v36 = vpop.f32.mrb[64].mxu1  ;;  %v4862_v37 = vpop.f32.mrb[56].mxu0 }
 0x763   :  { %v4708_v19 = vadd.f32 %v4707_v36, %v4586_v34  ;;  %v4863_v16 = vadd.f32 %v4862_v37, %v4741_v12  ;;  %v4709_v38 = vpop.f32.mrb[65].mxu1  ;;  %v4864_v39 = vpop.f32.mrb[57].mxu0  ;;  %v7852_v36 = vld [vmem:[%s11839_s11 + $0x16] sm:$0x3] }
 0x764   :  { %v4710_v40 = vadd.f32 %v4709_v38, %v4590_v35  ;;  %v4865_v41 = vadd.f32 %v4864_v39, %v4745_v60  ;;  %v4711_v42 = vpop.f32.mrb[66].mxu1  ;;  %v4866_v43 = vpop.f32.mrb[58].mxu0  ;;  %v7819_v60 = vld [vmem:[%s11839_s11 + $0x14] sm:$0x3]  ;;  %v5365_v38 = vrot.slane %v7852_v36, %v9634_v25 }
 0x765   :  { %v4714_v44 = vmax.f32 %v4708_v19, 0.0  ;;  %v4869_v45 = vmax.f32 %v4863_v16, 0.0  ;;  %v4712_v8 = vpop.f32.mrb[67].mxu1  ;;  %v4867_v46 = vpop.f32.mrb[59].mxu0  ;;  %v5206_v37 = vrot.slane %v7819_v60, %v9631_v24  ;;  %v5361_v19 = vrot.slane %v7852_v36, %v9631_v24 }
 0x766   :  { %v4715_v47 = vmax.f32 %v4710_v40, 0.0  ;;  %v4870_v48 = vmax.f32 %v4865_v41, 0.0  ;;  %v5210_v16 = vrot.slane %v7819_v60, %v9634_v25 }
 0x767   :  { %v4716_v49 = vpack.c.bf16 %v4714_v44, %v4714_v44  ;;  %v4871_v50 = vpack.c.bf16 %v4869_v45, %v4869_v45 }
 0x768   :  { %v4717_v53 = vpack.c.bf16 %v4715_v47, %v4715_v47  ;;  %v4872_v55 = vpack.c.bf16 %v4870_v48, %v4870_v48 }
 0x769   :  { %v6135_v56 = vrot.slane %v4716_v49, 2  ;;  %v6139_v58 = vrot.slane %v4871_v50, 1 }
 0x76a   :  { %v6136_v59 = vrot.slane %v4717_v53, 2  ;;  %v6140_v27 = vrot.slane %v4872_v55, 1 }
 0x76b   :  { %v6198_v61 = vsel %vm6196_vm6, %v6193_v30, %v6135_v56 }
 0x76c   :  { %v6200_v63 = vsel %vm6196_vm6, %v6195_v31, %v6136_v59  ;;  %v6203_v0 = vsel %vm6201_vm7, %v6198_v61, %v6139_v58 }
 0x76d   :  { %v6206_v1 = vsel %vm6201_vm7, %v6200_v63, %v6140_v27 }
 0x76e   :  { %6678 = vmatprep.mubr.bf16.mxu1 %v6206_v1  ;;  %6731 = vmatprep.mubr.bf16.mxu0 %v6206_v1 }
 0x76f   :  { %6679 = vmatmul.mubr.bf16.vlgmr.msra.gmra.mrb[84].mxu1 %v6203_v0  ;;  %6732 = vmatmul.mubr.bf16.vlgmr.msra.gmra.mrb[76].mxu0 %v6203_v0 }
 0x782   :  { %v5017_v14 = vpop.f32.mrb[68].mxu1  ;;  %v5172_v15 = vpop.f32.mrb[60].mxu0 }
 0x783   :  { %v5018_v6 = vadd.f32 %v5017_v14, %v4896_v11  ;;  %v5173_v17 = vadd.f32 %v5172_v15, %v5051_v13  ;;  %v5019_v18 = vpop.f32.mrb[69].mxu1  ;;  %v5174_v2 = vpop.f32.mrb[61].mxu0  ;;  %v7918_v14 = vld [vmem:[%s11839_s11 + $0x1a] sm:$0x3] }
 0x784   :  { %v5020_v20 = vadd.f32 %v5019_v18, %v4900_v3  ;;  %v5175_v29 = vadd.f32 %v5174_v2, %v5055_v9  ;;  %v5021_v23 = vpop.f32.mrb[70].mxu1  ;;  %v5176_v26 = vpop.f32.mrb[62].mxu0  ;;  %v7885_v9 = vld [vmem:[%s11839_s11 + $0x18] sm:$0x3]  ;;  %v5675_v18 = vrot.slane %v7918_v14, %v9634_v25 }
 0x785   :  { %v5024_v28 = vmax.f32 %v5018_v6, 0.0  ;;  %v5179_v51 = vmax.f32 %v5173_v17, 0.0  ;;  %v5022_v52 = vpop.f32.mrb[71].mxu1  ;;  %v5177_v21 = vpop.f32.mrb[63].mxu0  ;;  %v5516_v15 = vrot.slane %v7885_v9, %v9631_v24  ;;  %v5671_v6 = vrot.slane %v7918_v14, %v9631_v24 }
 0x786   :  { %v5025_v4 = vmax.f32 %v5020_v20, 0.0  ;;  %v5180_v5 = vmax.f32 %v5175_v29, 0.0  ;;  %v5520_v17 = vrot.slane %v7885_v9, %v9634_v25 }
 0x787   :  { %v5181_v30 = vpack.c.bf16 %v5179_v51, %v5179_v51  ;;  %v5026_v31 = vpack.c.bf16 %v5024_v28, %v5024_v28 }
 0x788   :  { %v5182_v62 = vpack.c.bf16 %v5180_v5, %v5180_v5  ;;  %v5027_v33 = vpack.c.bf16 %v5025_v4, %v5025_v4 }
 0x789   :  { %v6143_v32 = vrot.slane %v5181_v30, 7 }
 0x78a   :  { %v6144_v34 = vrot.slane %v5182_v62, 7 }
 0x78b   :  { %v6210_v12 = vsel %vm6169_vm1, %v5026_v31, %v6143_v32 }
 0x78c   :  { %v6213_v35 = vsel %vm6169_vm1, %v5027_v33, %v6144_v34 }
 0x7a2   :  { %v5327_v39 = vpop.f32.mrb[72].mxu1  ;;  %v5482_v40 = vpop.f32.mrb[64].mxu0 }
 0x7a3   :  { %v5328_v41 = vadd.f32 %v5327_v39, %v5206_v37  ;;  %v5483_v42 = vadd.f32 %v5482_v40, %v5361_v19  ;;  %v5329_v43 = vpop.f32.mrb[73].mxu1  ;;  %v5484_v44 = vpop.f32.mrb[65].mxu0 }
 0x7a4   :  { %v5330_v45 = vadd.f32 %v5329_v43, %v5210_v16  ;;  %v5485_v8 = vadd.f32 %v5484_v44, %v5365_v38  ;;  %v5331_v46 = vpop.f32.mrb[74].mxu1  ;;  %v5486_v47 = vpop.f32.mrb[66].mxu0  ;;  %v7984_v43 = vld [vmem:[%s11839_s11 + $0x1e] sm:$0x3] }
 0x7a5   :  { %v5334_v48 = vmax.f32 %v5328_v41, 0.0  ;;  %v5489_v49 = vmax.f32 %v5483_v42, 0.0  ;;  %v5332_v50 = vpop.f32.mrb[75].mxu1  ;;  %v5487_v53 = vpop.f32.mrb[67].mxu0  ;;  %v7951_v42 = vld [vmem:[%s11839_s11 + $0x1c] sm:$0x3]  ;;  %v5985_v46 = vrot.slane %v7984_v43, %v9634_v25 }
 0x7a6   :  { %v5335_v55 = vmax.f32 %v5330_v45, 0.0  ;;  %v5490_v56 = vmax.f32 %v5485_v8, 0.0  ;;  %v5826_v44 = vrot.slane %v7951_v42, %v9631_v24  ;;  %v5981_v45 = vrot.slane %v7984_v43, %v9631_v24 }
 0x7a7   :  { %v5336_v58 = vpack.c.bf16 %v5334_v48, %v5334_v48  ;;  %v5491_v59 = vpack.c.bf16 %v5489_v49, %v5489_v49  ;;  %v5830_v8 = vrot.slane %v7951_v42, %v9634_v25 }
 0x7a8   :  { %v5337_v27 = vpack.c.bf16 %v5335_v55, %v5335_v55  ;;  %v5492_v61 = vpack.c.bf16 %v5490_v56, %v5490_v56 }
 0x7a9   :  { %v6147_v63 = vrot.slane %v5336_v58, 6  ;;  %v6151_v0 = vrot.slane %v5491_v59, 5 }
 0x7aa   :  { %v6148_v1 = vrot.slane %v5337_v27, 6  ;;  %v6152_v7 = vrot.slane %v5492_v61, 5 }
 0x7ab   :  { %v6215_v10 = vsel %vm6176_vm2, %v6210_v12, %v6147_v63 }
 0x7ac   :  { %v6219_v11 = vsel %vm6181_vm3, %v6215_v10, %v6151_v0  ;;  %v6217_v13 = vsel %vm6176_vm2, %v6213_v35, %v6148_v1 }
 0x7ad   :  { %v6221_v3 = vsel %vm6181_vm3, %v6217_v13, %v6152_v7 }
 0x7c2   :  { %v5637_v2 = vpop.f32.mrb[76].mxu1  ;;  %v5792_v20 = vpop.f32.mrb[68].mxu0 }
 0x7c3   :  { %v5638_v29 = vadd.f32 %v5637_v2, %v5516_v15  ;;  %v5793_v23 = vadd.f32 %v5792_v20, %v5671_v6  ;;  %v5639_v26 = vpop.f32.mrb[77].mxu1  ;;  %v5794_v28 = vpop.f32.mrb[69].mxu0 }
 0x7c4   :  { %v5640_v51 = vadd.f32 %v5639_v26, %v5520_v17  ;;  %v5795_v52 = vadd.f32 %v5794_v28, %v5675_v18  ;;  %v5641_v21 = vpop.f32.mrb[78].mxu1  ;;  %v5796_v4 = vpop.f32.mrb[70].mxu0 }
 0x7c5   :  { %v5644_v5 = vmax.f32 %v5638_v29, 0.0  ;;  %v5799_v30 = vmax.f32 %v5793_v23, 0.0  ;;  %v5642_v62 = vpop.f32.mrb[79].mxu1  ;;  %v5797_v31 = vpop.f32.mrb[71].mxu0  ;;  %v6304_v23 = vld [vmem:[%s11841_s13] sm:$0xf] }
 0x7c6   :  { %v5645_v32 = vmax.f32 %v5640_v51, 0.0  ;;  %v5800_v33 = vmax.f32 %v5795_v52, 0.0  ;;  %v11751_v26 = vrot.slane %v6304_v23, %v9631_v24  ;;  %v11755_v28 = vrot.slane %v6304_v23, %v131_v54 }
 0x7c7   :  { %v5646_v34 = vpack.c.bf16 %v5644_v5, %v5644_v5  ;;  %v5801_v12 = vpack.c.bf16 %v5799_v30, %v5799_v30  ;;  %v11758_v51 = vrot.slane %v6304_v23, %v9634_v25  ;;  %v11762_v52 = vrot.slane %v6304_v23, %v135_v57 }
 0x7c8   :  { %v5647_v35 = vpack.c.bf16 %v5645_v32, %v5645_v32  ;;  %v5802_v60 = vpack.c.bf16 %v5800_v33, %v5800_v33 }
 0x7c9   :  { %v6155_v36 = vrot.slane %v5646_v34, 4  ;;  %v6159_v37 = vrot.slane %v5801_v12, 3 }
 0x7ca   :  { %v6156_v19 = vrot.slane %v5647_v35, 4  ;;  %v6160_v16 = vrot.slane %v5802_v60, 3 }
 0x7cb   :  { %v6223_v38 = vsel %vm6186_vm4, %v6219_v11, %v6155_v36 }
 0x7cc   :  { %v6225_v39 = vsel %vm6186_vm4, %v6221_v3, %v6156_v19  ;;  %v6227_v40 = vsel %vm6191_vm5, %v6223_v38, %v6159_v37 }
 0x7cd   :  { %v6229_v41 = vsel %vm6191_vm5, %v6225_v39, %v6160_v16 }
 0x7e2   :  { %v5947_v47 = vpop.f32.mrb[80].mxu1  ;;  %v6102_v48 = vpop.f32.mrb[72].mxu0 }
 0x7e3   :  { %v5948_v49 = vadd.f32 %v5947_v47, %v5826_v44  ;;  %v6103_v50 = vadd.f32 %v6102_v48, %v5981_v45  ;;  %v5949_v53 = vpop.f32.mrb[81].mxu1  ;;  %v6104_v55 = vpop.f32.mrb[73].mxu0 }
 0x7e4   :  { %v5950_v56 = vadd.f32 %v5949_v53, %v5830_v8  ;;  %v6105_v58 = vadd.f32 %v6104_v55, %v5985_v46  ;;  %v5951_v59 = vpop.f32.mrb[82].mxu1  ;;  %v6106_v27 = vpop.f32.mrb[74].mxu0 }
 0x7e5   :  { %v5954_v61 = vmax.f32 %v5948_v49, 0.0  ;;  %v6109_v63 = vmax.f32 %v6103_v50, 0.0  ;;  %v5952_v0 = vpop.f32.mrb[83].mxu1  ;;  %v6107_v1 = vpop.f32.mrb[75].mxu0 }
 0x7e6   :  { %v5955_v7 = vmax.f32 %v5950_v56, 0.0  ;;  %v6110_v10 = vmax.f32 %v6105_v58, 0.0 }
 0x7e7   :  { %v5956_v11 = vpack.c.bf16 %v5954_v61, %v5954_v61  ;;  %v6111_v13 = vpack.c.bf16 %v6109_v63, %v6109_v63 }
 0x7e8   :  { %v5957_v3 = vpack.c.bf16 %v5955_v7, %v5955_v7  ;;  %v6112_v9 = vpack.c.bf16 %v6110_v10, %v6110_v10 }
 0x7e9   :  { %v6163_v14 = vrot.slane %v5956_v11, 2  ;;  %v6167_v15 = vrot.slane %v6111_v13, 1 }
 0x7ea   :  { %v6164_v6 = vrot.slane %v5957_v3, 2  ;;  %v6168_v17 = vrot.slane %v6112_v9, 1 }
 0x7eb   :  { %v6231_v18 = vsel %vm6196_vm6, %v6227_v40, %v6163_v14 }
 0x7ec   :  { %v6233_v2 = vsel %vm6196_vm6, %v6229_v41, %v6164_v6  ;;  %v6235_v20 = vsel %vm6201_vm7, %v6231_v18, %v6167_v15 }
 0x7ed   :  { %v6238_v29 = vsel %vm6201_vm7, %v6233_v2, %v6168_v17 }
 0x7ee   :  { %6688 = vmatprep.mubr.bf16.mxu1 %v6238_v29  ;;  %6741 = vmatprep.mubr.bf16.mxu0 %v6238_v29 }
 0x7ef   :  { %6689 = vmatmul.mubr.bf16.gmra.mrb[88].mxu1 %v6235_v20  ;;  %6742 = vmatmul.mubr.bf16.gmra.mrb[80].mxu0 %v6235_v20 }
 0x842   :  { %v6680_v21 = vpop.f32.mrb[84].mxu1  ;;  %v6733_v4 = vpop.f32.mrb[76].mxu0 }
 0x843   :  { %v6681_v5 = vadd.f32 %v6680_v21, %v11751_v26  ;;  %v6734_v30 = vadd.f32 %v6733_v4, %v11755_v28  ;;  %v6682_v62 = vpop.f32.mrb[85].mxu1  ;;  %v6735_v24 = vpop.f32.mrb[77].mxu0 }
 0x844   :  { %v6683_v31 = vadd.f32 %v6682_v62, %v11758_v51  ;;  %v6736_v54 = vadd.f32 %v6735_v24, %v11762_v52  ;;  %v6684_v32 = vpop.f32.mrb[86].mxu1  ;;  %v6737_v33 = vpop.f32.mrb[78].mxu0 }
 0x845   :  { %v6752_v25 = vmax.f32 %v6681_v5, 0.0  ;;  %v6754_v34 = vmax.f32 %v6734_v30, 0.0  ;;  %v6685_v22 = vadd.f32 %v6684_v32, %v11751_v26  ;;  %v6738_v57 = vadd.f32 %v6737_v33, %v11755_v28  ;;  %v6686_v12 = vpop.f32.mrb[87].mxu1  ;;  %v6739_v35 = vpop.f32.mrb[79].mxu0 }
 0x846   :  { %v6753_v60 = vmax.f32 %v6683_v31, 0.0  ;;  %v6755_v36 = vmax.f32 %v6736_v54, 0.0  ;;  %v6687_v37 = vadd.f32 %v6686_v12, %v11758_v51  ;;  %v6740_v19 = vadd.f32 %v6739_v35, %v11762_v52 }
 0x847   :  { %v6756_v16 = vmax.f32 %v6685_v22, 0.0  ;;  %v6758_v38 = vmax.f32 %v6738_v57, 0.0 }
 0x848   :  { %v8073_v39 = vpack.c.bf16 %v6753_v60, %v6752_v25  ;;  %v8074_v40 = vpack.c.bf16 %v6755_v36, %v6754_v34  ;;  %v6757_v41 = vmax.f32 %v6687_v37, 0.0  ;;  %v6759_v42 = vmax.f32 %v6740_v19, 0.0 }
 0x84a   :  { %6816 = vst [vmem:[%s11844_s16] sm:$0xff] %v8073_v39  ;;  %6817 = vst [vmem:[%s11844_s16 + $0x8] sm:$0xff] %v8074_v40  ;;  %v8075_v43 = vpack.c.bf16 %v6757_v41, %v6756_v16  ;;  %v8076_v44 = vpack.c.bf16 %v6759_v42, %v6758_v38 }
 0x84c   :  { %6818 = vst [vmem:[%s11844_s16 + $0x10] sm:$0xff] %v8075_v43  ;;  %6819 = vst [vmem:[%s11844_s16 + $0x18] sm:$0xff] %v8076_v44 }
 0x84d   :  { %9222 = shalt.err (!%p9219_p12)
}
 0x84e   :  { %s9223_s29 = scalar_lea.hbm %s11842_s14, 32 }
 0x84f   :  { %p9224_p13 = scmp.ne.s32.totalorder %s11842_s14, %s9223_s29  ;;  %p9227_p0 = scmp.lt.u32.totalorder %s9223_s29, %s11842_s14 }
 0x851   :  { %p9229_p1 = pnand %p9227_p0, %p9224_p13 }
 0x853   :  { %9232 = shalt.err (!%p9229_p1)
}
 0x854   :  { %6833 = dma.vmem_to_hbm [thread:$0]  %s6831_s24, 32, %s11842_s14, [#allocation4]  }
 0x855   :  { %s9233_s6 = scalar_lea.vmem %s6841_s25, 32  ;;  %p9238_p3 = scmp.lt.s32.totalorder %s6841_s25, %s6841_s25 }
 0x856   :  { %p9234_p2 = scmp.ne.s32.totalorder %s6841_s25, %s9233_s6  ;;  %p9239_p4 = scmp.lt.s32.totalorder %s9233_s6, %s9233_s6 }
 0x858   :  { %p9240_p5 = por %p9239_p4, %p9238_p3 }
 0x85a   :  { %p9241_p6 = pnand %p9240_p5, %p9234_p2 }
 0x85c   :  { %9244 = shalt.err (!%p9241_p6)
}
 0x85d   :  { %s9245_s10 = scalar_lea.hbm %s11843_s15, 32 }
 0x85e   :  { %p9246_p7 = scmp.ne.s32.totalorder %s11843_s15, %s9245_s10  ;;  %p9249_p8 = scmp.lt.u32.totalorder %s9245_s10, %s11843_s15 }
 0x860   :  { %p9251_p9 = pnand %p9249_p8, %p9246_p7 }
 0x862   :  { %9254 = shalt.err (!%p9251_p9)
}
 0x863   :  { %6843 = dma.vmem_to_hbm [thread:$0]  %s6841_s25, 32, %s11843_s15, [#allocation7]  }
 0x8c2   :  { %v6690_v45 = vpop.f32.mrb[88].mxu1  ;;  %v6743_v8 = vpop.f32.mrb[80].mxu0 }
 0x8c3   :  { %v6691_v46 = vadd.f32 %v6690_v45, %v11751_v26  ;;  %v6744_v47 = vadd.f32 %v6743_v8, %v11755_v28  ;;  %v6692_v48 = vpop.f32.mrb[89].mxu1  ;;  %v6745_v49 = vpop.f32.mrb[81].mxu0 }
 0x8c4   :  { %v6693_v50 = vadd.f32 %v6692_v48, %v11758_v51  ;;  %v6746_v53 = vadd.f32 %v6745_v49, %v11762_v52  ;;  %v6694_v55 = vpop.f32.mrb[90].mxu1  ;;  %v6747_v56 = vpop.f32.mrb[82].mxu0 }
 0x8c5   :  { %v6760_v58 = vmax.f32 %v6691_v46, 0.0  ;;  %v6762_v59 = vmax.f32 %v6744_v47, 0.0  ;;  %v6695_v27 = vadd.f32 %v6694_v55, %v11751_v26  ;;  %v6748_v61 = vadd.f32 %v6747_v56, %v11755_v28  ;;  %v6696_v63 = vpop.f32.mrb[91].mxu1  ;;  %v6749_v0 = vpop.f32.mrb[83].mxu0 }
 0x8c6   :  { %v6761_v1 = vmax.f32 %v6693_v50, 0.0  ;;  %v6763_v7 = vmax.f32 %v6746_v53, 0.0  ;;  %v6697_v10 = vadd.f32 %v6696_v63, %v11758_v51  ;;  %v6750_v11 = vadd.f32 %v6749_v0, %v11762_v52 }
 0x8c7   :  { %v6764_v13 = vmax.f32 %v6695_v27, 0.0  ;;  %v6766_v3 = vmax.f32 %v6748_v61, 0.0 }
 0x8c8   :  { %v8077_v9 = vpack.c.bf16 %v6761_v1, %v6760_v58  ;;  %v8078_v14 = vpack.c.bf16 %v6763_v7, %v6762_v59  ;;  %v6765_v15 = vmax.f32 %v6697_v10, 0.0  ;;  %v6767_v6 = vmax.f32 %v6750_v11, 0.0 }
 0x8ca   :  { %6820 = vst [vmem:[%s11844_s16 + $0x20] sm:$0xff] %v8077_v9  ;;  %6821 = vst [vmem:[%s11844_s16 + $0x28] sm:$0xff] %v8078_v14  ;;  %v8079_v17 = vpack.c.bf16 %v6765_v15, %v6764_v13  ;;  %v8080_v18 = vpack.c.bf16 %v6767_v6, %v6766_v3 }
 0x8cc   :  { %6822 = vst [vmem:[%s11844_s16 + $0x30] sm:$0xff] %v8079_v17  ;;  %6823 = vst [vmem:[%s11844_s16 + $0x38] sm:$0xff] %v8080_v18 }
 0x8cd   :  { %9257 = dma.done.wait [#allocation4], 32  }
 0x8ce   :  { %9258 = vsyncadd [#allocation4], 4294967264 }
 0x8cf   :  { %9259 = dma.done.wait [#allocation7], 32  }
 0x8d0   :  { %9260 = vsyncadd [#allocation7], 4294967264 }
 0x8d1   :  { %6854 = vsyncpa [#allocation3], 1 }
 0x8d2   :  { %6855 = vsyncpa [#allocation4], 1 }
 0x8d3   :  { %6856 = vsyncpa [#allocation7], 1 }

// kernel: vae_forward.3
= control target key start
LH: loop header
LB: loop body
LE: loop exit
PB: predicated region body
PF: predicated region fallthrough
CT: control target
= control target key end

     0   :  { %s14292_s27 = smov 0   ;;  %s18160_s0 = inlined_call_operand.vmem [shape: bf16[2,18,576], index: 0, kind: input, shape index: {}]   ;;  %s18161_s1 = inlined_call_operand.vmem [shape: bf16[576,544], index: 1, kind: input, shape index: {}]   ;;  %s18162_s2 = inlined_call_operand.vmem [shape: bf16[576,544], index: 2, kind: input, shape index: {}]   ;;  %s18163_s3 = inlined_call_operand.vmem [shape: bf16[576,544], index: 3, kind: input, shape index: {}]   ;;  %s18164_s4 = inlined_call_operand.vmem [shape: bf16[576,544], index: 4, kind: input, shape index: {}]   ;;  %s18165_s5 = inlined_call_operand.vmem [shape: bf16[576,544], index: 5, kind: input, shape index: {}]   ;;  %s18166_s6 = inlined_call_operand.vmem [shape: bf16[576,544], index: 6, kind: input, shape index: {}]   ;;  %s18167_s7 = inlined_call_operand.vmem [shape: f32[1,544], index: 7, kind: input, shape index: {}]   ;;  %s18168_s8 = inlined_call_operand.vmem [shape: f32[2,4,17,544], index: 8, kind: output, shape index: {}]  }
   0x1 LB: > { %s10597_s28 = sadd.s32 4294967295, %s14244_s27   ;;  %p10601_p0 = scmp.ge.s32.totalorder %s14244_s27, 1  ;;  %s14244_s27 = sphi %s14292_s27, %s18_s27  }
   0x2   : > { %p262_p1 = scmp.lt.s32.totalorder %s14244_s27, 3 }
   0x4   : > { %p263_p2 = pnand %p10601_p0, %p262_p1 }
   0x5   : > { %v12460_v0 = vld [vmem:[%s18162_s2 + $0x4] ss:$20 sps:$4 sm:$0xff] (!%p263_p2)   ;;  %v12462_v1 = vld [vmem:[%s18162_s2 + $0xc] ss:$20 sps:$4 sm:$0xff] (!%p263_p2)   ;;  %v12465_v3 = vld [vmem:[%s18162_s2 + $0x8] ss:$20 sps:$4 sm:$0xff] (!%p263_p2)  }
   0x6   : > { %266 = sbr.rel (%p263_p2) target bundleno = 1364 (0x554), region = 52  ;;  %1734 = vmatprep.subr.bf16.mxu0 (!%p263_p2), %v12460_v0  ;;  %v12464_v2 = vld [vmem:[%s18162_s2] ss:$20 sps:$4 sm:$0xff] (!%p263_p2)   ;;  %1887 = vmatprep.subr.bf16.mxu1 (!%p263_p2), %v12462_v1  ;;  %v12470_v6 = vld [vmem:[%s18162_s2 + $0x28] ss:$20 sps:$4 sm:$0xff] (!%p263_p2)   ;;  %p296_p3 = scmp.lt.s32.totalorder (!%p263_p2), %s10597_s28, 1 }
   0x7   : > { %v12466_v4 = vld [vmem:[%s18162_s2 + $0x2c] ss:$20 sps:$4 sm:$0xff] (!%p263_p2)   ;;  %1735 = vmatpush1.bf16.msra.mxu0 (!%p263_p2), %v12464_v2  ;;  %1888 = vmatpush1.bf16.msra.mxu1 (!%p263_p2), %v12465_v3  ;;  %v12468_v5 = vld [vmem:[%s18162_s2 + $0x34] ss:$20 sps:$4 sm:$0xff] (!%p263_p2)   ;;  %v12471_v7 = vld [vmem:[%s18162_s2 + $0x30] ss:$20 sps:$4 sm:$0xff] (!%p263_p2)  }
   0x8   : > { %1736 = vmatprep.subr.bf16.mxu0 (!%p263_p2), %v12466_v4  ;;  %1889 = vmatprep.subr.bf16.mxu1 (!%p263_p2), %v12468_v5  ;;  %v12472_v8 = vld [vmem:[%s18162_s2 + $0x54] ss:$20 sps:$4 sm:$0xff] (!%p263_p2)   ;;  %v12474_v9 = vld [vmem:[%s18162_s2 + $0x5c] ss:$20 sps:$4 sm:$0xff] (!%p263_p2)   ;;  %v12477_v11 = vld [vmem:[%s18162_s2 + $0x58] ss:$20 sps:$4 sm:$0xff] (!%p263_p2)  }
   0x9   : > { %v12476_v10 = vld [vmem:[%s18162_s2 + $0x50] ss:$20 sps:$4 sm:$0xff] (!%p263_p2)   ;;  %v12482_v14 = vld [vmem:[%s18162_s2 + $0x78] ss:$20 sps:$4 sm:$0xff] (!%p263_p2)   ;;  %v12483_v15 = vld [vmem:[%s18162_s2 + $0x80] ss:$20 sps:$4 sm:$0xff] (!%p263_p2)  }
   0xa   : > { %v12478_v12 = vld [vmem:[%s18162_s2 + $0x7c] ss:$20 sps:$4 sm:$0xff] (!%p263_p2)   ;;  %v12480_v13 = vld [vmem:[%s18162_s2 + $0x84] ss:$20 sps:$4 sm:$0xff] (!%p263_p2)   ;;  %v12486_v17 = vld [vmem:[%s18162_s2 + $0xac] ss:$20 sps:$4 sm:$0xff] (!%p263_p2)  }
   0xb   : > { %1737 = vmatpush1.bf16.msra.mxu0 (!%p263_p2), %v12470_v6  ;;  %1890 = vmatpush1.bf16.msra.mxu1 (!%p263_p2), %v12471_v7  ;;  %v12484_v16 = vld [vmem:[%s18162_s2 + $0xa4] ss:$20 sps:$4 sm:$0xff] (!%p263_p2)   ;;  %v12488_v18 = vld [vmem:[%s18162_s2 + $0xa0] ss:$20 sps:$4 sm:$0xff] (!%p263_p2)   ;;  %v12489_v19 = vld [vmem:[%s18162_s2 + $0xa8] ss:$20 sps:$4 sm:$0xff] (!%p263_p2)  }
   0xc   : > { %1738 = vmatprep.subr.bf16.mxu0 (!%p263_p2), %v12472_v8  ;;  %1891 = vmatprep.subr.bf16.mxu1 (!%p263_p2), %v12474_v9  ;;  %v12490_v20 = vld [vmem:[%s18162_s2 + $0xcc] ss:$20 sps:$4 sm:$0xff] (!%p263_p2)   ;;  %v12492_v21 = vld [vmem:[%s18162_s2 + $0xd4] ss:$20 sps:$4 sm:$0xff] (!%p263_p2)   ;;  %v12495_v23 = vld [vmem:[%s18162_s2 + $0xd0] ss:$20 sps:$4 sm:$0xff] (!%p263_p2)  }
   0xd   : > { %v12494_v22 = vld [vmem:[%s18162_s2 + $0xc8] ss:$20 sps:$4 sm:$0xff]   ;;  %v12500_v26 = vld [vmem:[%s18162_s2 + $0xf0] ss:$20 sps:$4 sm:$0xff]   ;;  %v12501_v27 = vld [vmem:[%s18162_s2 + $0xf8] ss:$20 sps:$4 sm:$0xff]  }
   0xe   : > { %v12496_v24 = vld [vmem:[%s18162_s2 + $0xf4] ss:$20 sps:$4 sm:$0xff]   ;;  %v12498_v25 = vld [vmem:[%s18162_s2 + $0xfc] ss:$20 sps:$4 sm:$0xff]   ;;  %v12504_v29 = vld [vmem:[%s18162_s2 + $0x124] ss:$20 sps:$4 sm:$0xff]  }
   0xf   : > { %1739 = vmatpush1.bf16.msra.mxu0 %v12476_v10  ;;  %1892 = vmatpush1.bf16.msra.mxu1 %v12477_v11  ;;  %v12502_v28 = vld [vmem:[%s18162_s2 + $0x11c] ss:$20 sps:$4 sm:$0xff]   ;;  %v12506_v30 = vld [vmem:[%s18162_s2 + $0x118] ss:$20 sps:$4 sm:$0xff]   ;;  %v12507_v31 = vld [vmem:[%s18162_s2 + $0x120] ss:$20 sps:$4 sm:$0xff]  }
  0x10   : > { %1740 = vmatprep.subr.bf16.mxu0 %v12478_v12  ;;  %1893 = vmatprep.subr.bf16.mxu1 %v12480_v13  ;;  %v12508_v32 = vld [vmem:[%s18162_s2 + $0x144] ss:$20 sps:$4 sm:$0xff]   ;;  %v12510_v33 = vld [vmem:[%s18162_s2 + $0x14c] ss:$20 sps:$4 sm:$0xff]   ;;  %v12513_v35 = vld [vmem:[%s18162_s2 + $0x148] ss:$20 sps:$4 sm:$0xff]  }
  0x11   : > { %v12512_v34 = vld [vmem:[%s18162_s2 + $0x140] ss:$20 sps:$4 sm:$0xff]   ;;  %s18170_s28 = smov (!%p296_p3, %s10597_s28), 1  ;;  %v12518_v38 = vld [vmem:[%s18162_s2 + $0x168] ss:$20 sps:$4 sm:$0xff]   ;;  %vm1727_vm0 = vcmask 523264  }
  0x12   : > { %v12514_v36 = vld [vmem:[%s18162_s2 + $0x16c] ss:$20 sps:$4 sm:$0xff]   ;;  %v12516_v37 = vld [vmem:[%s18162_s2 + $0x174] ss:$20 sps:$4 sm:$0xff]   ;;  %v12519_v39 = vld [vmem:[%s18162_s2 + $0x170] ss:$20 sps:$4 sm:$0xff]  }
  0x13   : > { %1741 = vmatpush1.bf16.msra.mxu0 %v12482_v14  ;;  %1894 = vmatpush1.bf16.msra.mxu1 %v12483_v15  ;;  %v12520_v40 = vld [vmem:[%s18162_s2 + $0x194] ss:$20 sps:$4 sm:$0xff]   ;;  %s12449_s9 = smul.u32 60, %s18170_s28  ;;  %v12522_v41 = vld [vmem:[%s18162_s2 + $0x19c] ss:$20 sps:$4 sm:$0xff]   ;;  %vm7424_vm2 = vcmask 261120  }
  0x14   : > { %1742 = vmatprep.subr.bf16.mxu0 %v12484_v16  ;;  %1895 = vmatprep.subr.bf16.mxu1 %v12486_v17  ;;  %v12524_v42 = vld [vmem:[%s18162_s2 + $0x190] ss:$20 sps:$4 sm:$0xff]   ;;  %v12525_v43 = vld [vmem:[%s18162_s2 + $0x198] ss:$20 sps:$4 sm:$0xff]   ;;  %v12531_v48 = vld [vmem:[%s18162_s2 + $0x1c0] ss:$20 sps:$4 sm:$0xff]  }
  0x15   : > { %v12526_v44 = vld [vmem:[%s18162_s2 + $0x1bc] ss:$20 sps:$4 sm:$0xff]   ;;  %s14445_s20 = scalar_lea.vmem %s18160_s0, %s12449_s9  ;;  %v12528_v45 = vld [vmem:[%s18162_s2 + $0x1c4] ss:$20 sps:$4 sm:$0xff]   ;;  %v12534_v50 = vld [vmem:[%s18162_s2 + $0x1ec] ss:$20 sps:$4 sm:$0xff]  }
  0x16   : > { %v12530_v46 = vld [vmem:[%s18162_s2 + $0x1b8] ss:$20 sps:$4 sm:$0xff]   ;;  %v12536_v51 = vld [vmem:[%s18162_s2 + $0x1e0] ss:$20 sps:$4 sm:$0xff]   ;;  %v12537_v52 = vld [vmem:[%s18162_s2 + $0x1e8] ss:$20 sps:$4 sm:$0xff]  }
  0x17   : > { %1743 = vmatpush1.bf16.msra.mxu0 %v12488_v18  ;;  %1896 = vmatpush1.bf16.msra.mxu1 %v12489_v19  ;;  %v14454_v47 = vld [vmem:[%s14445_s20 + $0x4] ss:$20 sps:$4 sm:$0xff]   ;;  %v12538_v53 = vld [vmem:[%s18162_s2 + $0x20c] ss:$20 sps:$4 sm:$0xff]   ;;  %v12540_v54 = vld [vmem:[%s18162_s2 + $0x214] ss:$20 sps:$4 sm:$0xff]  }
  0x18   : > { %1744 = vmatprep.subr.bf16.mxu0 %v12490_v20  ;;  %1897 = vmatprep.subr.bf16.mxu1 %v12492_v21  ;;  %v12532_v49 = vld [vmem:[%s18162_s2 + $0x1e4] ss:$20 sps:$4 sm:$0xff]   ;;  %v12542_v55 = vld [vmem:[%s18162_s2 + $0x208] ss:$20 sps:$4 sm:$0xff]   ;;  %v12555_v0 = vld [vmem:[%s18162_s2 + $0x260] ss:$20 sps:$4 sm:$0xff]  }
  0x19   : > { %1766 = vmatprep.mubr.bf16.mxu0 %v14454_v47  ;;  %1919 = vmatprep.mubr.bf16.mxu1 %v14454_v47  ;;  %v12543_v56 = vld [vmem:[%s18162_s2 + $0x210] ss:$20 sps:$4 sm:$0xff]   ;;  %v12544_v57 = vld [vmem:[%s18162_s2 + $0x234] ss:$20 sps:$4 sm:$0xff]   ;;  %v12549_v60 = vld [vmem:[%s18162_s2 + $0x238] ss:$20 sps:$4 sm:$0xff]  }
  0x1a   : > { %v12546_v58 = vld [vmem:[%s18162_s2 + $0x23c] ss:$20 sps:$4 sm:$0xff]   ;;  %v12552_v62 = vld [vmem:[%s18162_s2 + $0x264] ss:$20 sps:$4 sm:$0xff]   ;;  %v12563_v2 = vld [vmem:[%s18162_s2 + $0x28c] ss:$20 sps:$4 sm:$0xff]  }
  0x1b   : > { %1745 = vmatpush1.bf16.msra.mxu0 %v12494_v22  ;;  %1898 = vmatpush1.bf16.msra.mxu1 %v12495_v23  ;;  %v12548_v59 = vld [vmem:[%s18162_s2 + $0x230] ss:$20 sps:$4 sm:$0xff]   ;;  %v12554_v63 = vld [vmem:[%s18162_s2 + $0x258] ss:$20 sps:$4 sm:$0xff]   ;;  %v12558_v3 = vld [vmem:[%s18162_s2 + $0x280] ss:$20 sps:$4 sm:$0xff]  }
  0x1c   : > { %1746 = vmatprep.subr.bf16.mxu0 %v12496_v24  ;;  %1899 = vmatprep.subr.bf16.mxu1 %v12498_v25  ;;  %v12550_v61 = vld [vmem:[%s18162_s2 + $0x25c] ss:$20 sps:$4 sm:$0xff]   ;;  %v12560_v1 = vld [vmem:[%s18162_s2 + $0x284] ss:$20 sps:$4 sm:$0xff]   ;;  %v14522_v5 = vld [vmem:[%s14445_s20] ss:$20 sps:$4 sm:$0xff]  }
  0x1d   : > { %v12561_v4 = vld [vmem:[%s18162_s2 + $0x288] ss:$20 sps:$4 sm:$0xff]   ;;  %v12567_v6 = vld [vmem:[%s18162_s2 + $0x2ac] ss:$20 sps:$4 sm:$0xff]   ;;  %v12568_v9 = vld [vmem:[%s18162_s2 + $0x2b0] ss:$20 sps:$4 sm:$0xff]  }
  0x1e   : > { %v12570_v7 = vld [vmem:[%s18162_s2 + $0x2b4] ss:$20 sps:$4 sm:$0xff]   ;;  %v12576_v11 = vld [vmem:[%s18162_s2 + $0x2dc] ss:$20 sps:$4 sm:$0xff]   ;;  %v12574_v13 = vld [vmem:[%s18162_s2 + $0x2d8] ss:$20 sps:$4 sm:$0xff]  }
  0x1f   : > { %1747 = vmatpush1.bf16.msra.mxu0 %v12500_v26  ;;  %1900 = vmatpush1.bf16.msra.mxu1 %v12501_v27  ;;  %v12565_v8 = vld [vmem:[%s18162_s2 + $0x2a8] ss:$20 sps:$4 sm:$0xff]   ;;  %v12571_v12 = vld [vmem:[%s18162_s2 + $0x2d0] ss:$20 sps:$4 sm:$0xff]   ;;  %v12577_v16 = vld [vmem:[%s18162_s2 + $0x2f8] ss:$20 sps:$4 sm:$0xff]  }
  0x20   : > { %1748 = vmatprep.subr.bf16.mxu0 %v12502_v28  ;;  %1901 = vmatprep.subr.bf16.mxu1 %v12504_v29  ;;  %v12573_v10 = vld [vmem:[%s18162_s2 + $0x2d4] ss:$20 sps:$4 sm:$0xff]   ;;  %v12579_v14 = vld [vmem:[%s18162_s2 + $0x2fc] ss:$20 sps:$4 sm:$0xff]   ;;  %v12582_v15 = vld [vmem:[%s18162_s2 + $0x304] ss:$20 sps:$4 sm:$0xff]  }
  0x21   : > { %v12580_v17 = vld [vmem:[%s18162_s2 + $0x300] ss:$20 sps:$4 sm:$0xff]   ;;  %v12585_v18 = vld [vmem:[%s18162_s2 + $0x324] ss:$20 sps:$4 sm:$0xff]   ;;  %v12586_v21 = vld [vmem:[%s18162_s2 + $0x328] ss:$20 sps:$4 sm:$0xff]  }
  0x22   : > { %v12588_v19 = vld [vmem:[%s18162_s2 + $0x32c] ss:$20 sps:$4 sm:$0xff]   ;;  %v12594_v23 = vld [vmem:[%s18162_s2 + $0x354] ss:$20 sps:$4 sm:$0xff]   ;;  %v12592_v28 = vld [vmem:[%s18162_s2 + $0x350] ss:$20 sps:$4 sm:$0xff]  }
  0x23   : > { %1749 = vmatpush1.bf16.msra.mxu0 %v12506_v30  ;;  %1902 = vmatpush1.bf16.msra.mxu1 %v12507_v31  ;;  %v12583_v20 = vld [vmem:[%s18162_s2 + $0x320] ss:$20 sps:$4 sm:$0xff]   ;;  %v313_v24 = vld [vmem:[%s14445_s20 + $0x28] sm:$0x11]  ;;  %v12600_v30 = vld [vmem:[%s18162_s2 + $0x37c] ss:$20 sps:$4 sm:$0xff]  }
  0x24   : > { %1750 = vmatprep.subr.bf16.mxu0 %v12508_v32  ;;  %1903 = vmatprep.subr.bf16.mxu1 %v12510_v33  ;;  %v12591_v22 = vld [vmem:[%s18162_s2 + $0x34c] ss:$20 sps:$4 sm:$0xff]   ;;  %v14581_v25 = vcombine.high %v313_v24, %v313_v24  ;;  %v12589_v26 = vld [vmem:[%s18162_s2 + $0x348] ss:$20 sps:$4 sm:$0xff]   ;;  %v14586_v27 = vcombine.low %v313_v24, %v313_v24  ;;  %v12595_v31 = vld [vmem:[%s18162_s2 + $0x370] ss:$20 sps:$4 sm:$0xff]  }
  0x25   : > { %v12597_v29 = vld [vmem:[%s18162_s2 + $0x374] ss:$20 sps:$4 sm:$0xff]   ;;  %v14605_v32 = vld [vmem:[%s14445_s20 + $0xc] ss:$20 sps:$4 sm:$0xff]   ;;  %v12682_v24 = vld [vmem:[%s18162_s2 + $0x57c] ss:$20 sps:$4 sm:$0xff]  }
  0x26   : > { %v12598_v33 = vld [vmem:[%s18162_s2 + $0x378] ss:$20 sps:$4 sm:$0xff]   ;;  %vm2184_vm1 = vsmask.f32 7424  ;;  %s12450_s18 = smul.u32 480, %s18170_s28  ;;  %vm7435_vm3 = vcmask 253952  }
  0x27   : > { %1751 = vmatpush1.bf16.msra.mxu0 %v12512_v34  ;;  %1904 = vmatpush1.bf16.msra.mxu1 %v12513_v35  ;;  %v12603_v34 = vld [vmem:[%s18162_s2 + $0x39c] ss:$20 sps:$4 sm:$0xff]   ;;  %v12606_v35 = vld [vmem:[%s18162_s2 + $0x3a4] ss:$20 sps:$4 sm:$0xff]  }
  0x28   : > { %1752 = vmatprep.subr.bf16.mxu0 %v12514_v36  ;;  %1905 = vmatprep.subr.bf16.mxu1 %v12516_v37  ;;  %v12601_v36 = vld [vmem:[%s18162_s2 + $0x398] ss:$20 sps:$4 sm:$0xff]   ;;  %v12604_v37 = vld [vmem:[%s18162_s2 + $0x3a0] ss:$20 sps:$4 sm:$0xff]   ;;  %s16257_s14 = scalar_lea.vmem %s18168_s8, %s12450_s18 }
  0x2b   : > { %1753 = vmatpush1.bf16.msra.mxu0 %v12518_v38  ;;  %1906 = vmatpush1.bf16.msra.mxu1 %v12519_v39  ;;  %v12609_v38 = vld [vmem:[%s18162_s2 + $0x3c4] ss:$20 sps:$4 sm:$0xff]   ;;  %v12612_v39 = vld [vmem:[%s18162_s2 + $0x3cc] ss:$20 sps:$4 sm:$0xff]  }
  0x2c   : > { %1754 = vmatprep.subr.bf16.mxu0 %v12520_v40  ;;  %1907 = vmatprep.subr.bf16.mxu1 %v12522_v41  ;;  %v12607_v40 = vld [vmem:[%s18162_s2 + $0x3c0] ss:$20 sps:$4 sm:$0xff]   ;;  %v12610_v41 = vld [vmem:[%s18162_s2 + $0x3c8] ss:$20 sps:$4 sm:$0xff]  }
  0x2f   : > { %1755 = vmatpush1.bf16.msra.mxu0 %v12524_v42  ;;  %1908 = vmatpush1.bf16.msra.mxu1 %v12525_v43  ;;  %v12615_v42 = vld [vmem:[%s18162_s2 + $0x3ec] ss:$20 sps:$4 sm:$0xff]   ;;  %v12618_v43 = vld [vmem:[%s18162_s2 + $0x3f4] ss:$20 sps:$4 sm:$0xff]  }
  0x30   : > { %1756 = vmatprep.subr.bf16.mxu0 %v12526_v44  ;;  %1909 = vmatprep.subr.bf16.mxu1 %v12528_v45  ;;  %v12613_v44 = vld [vmem:[%s18162_s2 + $0x3e8] ss:$20 sps:$4 sm:$0xff]   ;;  %v12616_v45 = vld [vmem:[%s18162_s2 + $0x3f0] ss:$20 sps:$4 sm:$0xff]  }
  0x33   : > { %1757 = vmatpush1.bf16.msra.mxu0 %v12530_v46  ;;  %1910 = vmatpush1.bf16.msra.mxu1 %v12531_v48  ;;  %v12621_v46 = vld [vmem:[%s18162_s2 + $0x414] ss:$20 sps:$4 sm:$0xff]   ;;  %v12624_v48 = vld [vmem:[%s18162_s2 + $0x41c] ss:$20 sps:$4 sm:$0xff]  }
  0x34   : > { %1758 = vmatprep.subr.bf16.mxu0 %v12532_v49  ;;  %1911 = vmatprep.subr.bf16.mxu1 %v12534_v50  ;;  %v12619_v49 = vld [vmem:[%s18162_s2 + $0x410] ss:$20 sps:$4 sm:$0xff]   ;;  %v12622_v50 = vld [vmem:[%s18162_s2 + $0x418] ss:$20 sps:$4 sm:$0xff]  }
  0x37   : > { %1759 = vmatpush1.bf16.msra.mxu0 %v12536_v51  ;;  %1912 = vmatpush1.bf16.msra.mxu1 %v12537_v52  ;;  %v12627_v51 = vld [vmem:[%s18162_s2 + $0x43c] ss:$20 sps:$4 sm:$0xff]   ;;  %v12630_v52 = vld [vmem:[%s18162_s2 + $0x444] ss:$20 sps:$4 sm:$0xff]  }
  0x38   : > { %1760 = vmatprep.subr.bf16.mxu0 %v12538_v53  ;;  %1913 = vmatprep.subr.bf16.mxu1 %v12540_v54  ;;  %v12625_v53 = vld [vmem:[%s18162_s2 + $0x438] ss:$20 sps:$4 sm:$0xff]   ;;  %v12628_v54 = vld [vmem:[%s18162_s2 + $0x440] ss:$20 sps:$4 sm:$0xff]  }
  0x3b   : > { %1761 = vmatpush1.bf16.msra.mxu0 %v12542_v55  ;;  %1914 = vmatpush1.bf16.msra.mxu1 %v12543_v56  ;;  %v12633_v55 = vld [vmem:[%s18162_s2 + $0x464] ss:$20 sps:$4 sm:$0xff]   ;;  %v12636_v56 = vld [vmem:[%s18162_s2 + $0x46c] ss:$20 sps:$4 sm:$0xff]  }
  0x3c   : > { %1762 = vmatprep.subr.bf16.mxu0 %v12544_v57  ;;  %1915 = vmatprep.subr.bf16.mxu1 %v12546_v58  ;;  %v12631_v57 = vld [vmem:[%s18162_s2 + $0x460] ss:$20 sps:$4 sm:$0xff]   ;;  %v12634_v58 = vld [vmem:[%s18162_s2 + $0x468] ss:$20 sps:$4 sm:$0xff]  }
  0x3f   : > { %1763 = vmatpush1.bf16.msra.mxu0 %v12548_v59  ;;  %1916 = vmatpush1.bf16.msra.mxu1 %v12549_v60  ;;  %v12639_v59 = vld [vmem:[%s18162_s2 + $0x48c] ss:$20 sps:$4 sm:$0xff]   ;;  %v12642_v60 = vld [vmem:[%s18162_s2 + $0x494] ss:$20 sps:$4 sm:$0xff]  }
  0x40   : > { %1764 = vmatprep.subr.bf16.mxu0 %v12550_v61  ;;  %1917 = vmatprep.subr.bf16.mxu1 %v12552_v62  ;;  %v12637_v61 = vld [vmem:[%s18162_s2 + $0x488] ss:$20 sps:$4 sm:$0xff]   ;;  %v12640_v62 = vld [vmem:[%s18162_s2 + $0x490] ss:$20 sps:$4 sm:$0xff]  }
  0x43   : > { %1765 = vmatpush1.bf16.msra.mxu0 %v12554_v63  ;;  %1918 = vmatpush1.bf16.msra.mxu1 %v12555_v0  ;;  %v12647_v63 = vld [vmem:[%s18162_s2 + $0x4b4] ss:$20 sps:$4 sm:$0xff]   ;;  %v12650_v0 = vld [vmem:[%s18162_s2 + $0x4bc] ss:$20 sps:$4 sm:$0xff]  }
  0x44   : > { %1785 = vmatprep.subr.bf16.mxu0 %v12560_v1  ;;  %1938 = vmatprep.subr.bf16.mxu1 %v12563_v2  ;;  %v12645_v1 = vld [vmem:[%s18162_s2 + $0x4b0] ss:$20 sps:$4 sm:$0xff]   ;;  %v12648_v2 = vld [vmem:[%s18162_s2 + $0x4b8] ss:$20 sps:$4 sm:$0xff]  }
  0x46   : > { %1767 = vmatmul.mubr.bf16.vlgmr.msra.gmra.mrb[0].mxu0 %v14522_v5  ;;  %1920 = vmatmul.mubr.bf16.vlgmr.msra.gmra.mrb[0].mxu1 %v14522_v5 }
  0x47   : > { %1786 = vmatpush1.bf16.msra.mxu0 %v12558_v3  ;;  %1939 = vmatpush1.bf16.msra.mxu1 %v12561_v4  ;;  %v12653_v3 = vld [vmem:[%s18162_s2 + $0x4dc] ss:$20 sps:$4 sm:$0xff]   ;;  %v12656_v4 = vld [vmem:[%s18162_s2 + $0x4e4] ss:$20 sps:$4 sm:$0xff]  }
  0x48   : > { %1787 = vmatprep.subr.bf16.mxu0 %v12567_v6  ;;  %1940 = vmatprep.subr.bf16.mxu1 %v12570_v7  ;;  %v12651_v6 = vld [vmem:[%s18162_s2 + $0x4d8] ss:$20 sps:$4 sm:$0xff]   ;;  %v12654_v7 = vld [vmem:[%s18162_s2 + $0x4e0] ss:$20 sps:$4 sm:$0xff]  }
  0x49   : > { %1776 = vmatprep.mubr.bf16.mxu0 %v14581_v25  ;;  %1929 = vmatprep.mubr.bf16.mxu1 %v14581_v25 }
  0x4b   : > { %1788 = vmatpush1.bf16.msra.mxu0 %v12565_v8  ;;  %1941 = vmatpush1.bf16.msra.mxu1 %v12568_v9  ;;  %v12662_v8 = vld [vmem:[%s18162_s2 + $0x504] ss:$20 sps:$4 sm:$0xff]   ;;  %v14724_v9 = vld [vmem:[%s14445_s20 + $0x8] ss:$20 sps:$4 sm:$0xff]  }
  0x4c   : > { %1789 = vmatprep.subr.bf16.mxu0 %v12573_v10  ;;  %1942 = vmatprep.subr.bf16.mxu1 %v12576_v11  ;;  %v12665_v10 = vld [vmem:[%s18162_s2 + $0x50c] ss:$20 sps:$4 sm:$0xff]  }
  0x4d   : > { %v12660_v11 = vld [vmem:[%s18162_s2 + $0x500] ss:$20 sps:$4 sm:$0xff]  }
  0x4e   : > { %1777 = vmatmul.mubr.bf16.gmra.mrb[4].mxu0 %v14586_v27  ;;  %1930 = vmatmul.mubr.bf16.gmra.mrb[4].mxu1 %v14586_v27 }
  0x4f   : > { %1790 = vmatpush1.bf16.msra.mxu0 %v12571_v12  ;;  %1943 = vmatpush1.bf16.msra.mxu1 %v12574_v13  ;;  %v12663_v12 = vld [vmem:[%s18162_s2 + $0x508] ss:$20 sps:$4 sm:$0xff]   ;;  %v314_v13 = vld [vmem:[%s14445_s20 + $0x30] sm:$0x11] }
  0x50   : > { %1791 = vmatprep.subr.bf16.mxu0 %v12579_v14  ;;  %1944 = vmatprep.subr.bf16.mxu1 %v12582_v15  ;;  %v12668_v14 = vld [vmem:[%s18162_s2 + $0x52c] ss:$20 sps:$4 sm:$0xff]   ;;  %v12671_v15 = vld [vmem:[%s18162_s2 + $0x534] ss:$20 sps:$4 sm:$0xff]  }
  0x51   : > { %1817 = vmatprep.mubr.bf16.mxu0 %v14605_v32  ;;  %1970 = vmatprep.mubr.bf16.mxu1 %v14605_v32 }
  0x53   : > { %1792 = vmatpush1.bf16.msra.mxu0 %v12577_v16  ;;  %1945 = vmatpush1.bf16.msra.mxu1 %v12580_v17  ;;  %v12666_v16 = vld [vmem:[%s18162_s2 + $0x528] ss:$20 sps:$4 sm:$0xff]   ;;  %v14745_v17 = vcombine.high %v314_v13, %v314_v13 }
  0x54   : > { %1793 = vmatprep.subr.bf16.mxu0 %v12585_v18  ;;  %1946 = vmatprep.subr.bf16.mxu1 %v12588_v19  ;;  %v12669_v18 = vld [vmem:[%s18162_s2 + $0x530] ss:$20 sps:$4 sm:$0xff]   ;;  %v12676_v19 = vld [vmem:[%s18162_s2 + $0x554] ss:$20 sps:$4 sm:$0xff]  }
  0x57   : > { %1794 = vmatpush1.bf16.msra.mxu0 %v12583_v20  ;;  %1947 = vmatpush1.bf16.msra.mxu1 %v12586_v21  ;;  %v12679_v20 = vld [vmem:[%s18162_s2 + $0x55c] ss:$20 sps:$4 sm:$0xff]   ;;  %v14760_v21 = vcombine.low %v314_v13, %v314_v13  ;;  %v2205_v13 = vshll.u32 %v14581_v25, 16 }
  0x58   : > { %1795 = vmatprep.subr.bf16.mxu0 %v12591_v22  ;;  %1948 = vmatprep.subr.bf16.mxu1 %v12594_v23  ;;  %v12674_v22 = vld [vmem:[%s18162_s2 + $0x550] ss:$20 sps:$4 sm:$0xff]   ;;  %v12677_v23 = vld [vmem:[%s18162_s2 + $0x558] ss:$20 sps:$4 sm:$0xff]  }
  0x5b   : > { %1796 = vmatpush1.bf16.msra.mxu0 %v12589_v26  ;;  %1949 = vmatpush1.bf16.msra.mxu1 %v12592_v28  ;;  %v12685_v26 = vld [vmem:[%s18162_s2 + $0x584] ss:$20 sps:$4 sm:$0xff]  }
  0x5c   : > { %1797 = vmatprep.subr.bf16.mxu0 %v12597_v29  ;;  %1950 = vmatprep.subr.bf16.mxu1 %v12600_v30  ;;  %v12680_v28 = vld [vmem:[%s18162_s2 + $0x578] ss:$20 sps:$4 sm:$0xff]   ;;  %v12683_v29 = vld [vmem:[%s18162_s2 + $0x580] ss:$20 sps:$4 sm:$0xff]   ;;  %v12687_v30 = vld [vmem:[%s18162_s2 + $0x150] ss:$20 sps:$4 sm:$0xff]  }
  0x5f   : > { %1798 = vmatpush1.bf16.msra.mxu0 %v12595_v31  ;;  %1951 = vmatpush1.bf16.msra.mxu1 %v12598_v33  ;;  %v12688_v31 = vld [vmem:[%s18162_s2 + $0x3d0] ss:$20 sps:$4 sm:$0xff]   ;;  %v14246_v33 = vmov 0  }
  0x60   : > { %1799 = vmatprep.subr.bf16.mxu0 %v12603_v34  ;;  %1952 = vmatprep.subr.bf16.mxu1 %v12606_v35  ;;  %v14791_v34 = vld [vmem:[%s14445_s20 + $0x10] ss:$20 sps:$4 sm:$0xff]  }
  0x61   : > { %v12689_v35 = vld [vmem:[%s18162_s2 + $0x10] ss:$20 sps:$4 sm:$0xff]  }
  0x63   : > { %1800 = vmatpush1.bf16.msra.mxu0 %v12601_v36  ;;  %1953 = vmatpush1.bf16.msra.mxu1 %v12604_v37  ;;  %v12690_v36 = vld [vmem:[%s18162_s2 + $0x290] ss:$20 sps:$4 sm:$0xff]   ;;  %v12691_v37 = vld [vmem:[%s18162_s2 + $0x178] ss:$20 sps:$4 sm:$0xff]  }
  0x64   : > { %1801 = vmatprep.subr.bf16.mxu0 %v12609_v38  ;;  %1954 = vmatprep.subr.bf16.mxu1 %v12612_v39  ;;  %v12692_v38 = vld [vmem:[%s18162_s2 + $0x3f8] ss:$20 sps:$4 sm:$0xff]  }
  0x65   : > { %v12693_v39 = vld [vmem:[%s18162_s2 + $0x38] ss:$20 sps:$4 sm:$0xff]  }
  0x67   : > { %1802 = vmatpush1.bf16.msra.mxu0 %v12607_v40  ;;  %1955 = vmatpush1.bf16.msra.mxu1 %v12610_v41  ;;  %v12694_v40 = vld [vmem:[%s18162_s2 + $0x2b8] ss:$20 sps:$4 sm:$0xff]   ;;  %v12696_v41 = vld [vmem:[%s18162_s2 + $0x1a0] ss:$20 sps:$4 sm:$0xff]  }
  0x68   : > { %1803 = vmatprep.subr.bf16.mxu0 %v12615_v42  ;;  %1956 = vmatprep.subr.bf16.mxu1 %v12618_v43  ;;  %v12697_v42 = vld [vmem:[%s18162_s2 + $0x420] ss:$20 sps:$4 sm:$0xff]   ;;  %v14824_v43 = vld [vmem:[%s14445_s20 + $0x38] ss:$0 sps:$4 sm:$0x11]  }
  0x6b   : > { %1804 = vmatpush1.bf16.msra.mxu0 %v12613_v44  ;;  %1957 = vmatpush1.bf16.msra.mxu1 %v12616_v45  ;;  %v12698_v44 = vld [vmem:[%s18162_s2 + $0x60] ss:$20 sps:$4 sm:$0xff]  }
  0x6c   : > { %1805 = vmatprep.subr.bf16.mxu0 %v12621_v46  ;;  %1958 = vmatprep.subr.bf16.mxu1 %v12624_v48  ;;  %v12699_v45 = vld [vmem:[%s18162_s2 + $0x2e0] ss:$20 sps:$4 sm:$0xff]   ;;  %v12700_v46 = vld [vmem:[%s18162_s2 + $0x1c8] ss:$20 sps:$4 sm:$0xff]  }
  0x6d   : > { %v12701_v48 = vld [vmem:[%s18162_s2 + $0x448] ss:$20 sps:$4 sm:$0xff]  }
  0x6f   : > { %1806 = vmatpush1.bf16.msra.mxu0 %v12619_v49  ;;  %1959 = vmatpush1.bf16.msra.mxu1 %v12622_v50  ;;  %v12702_v49 = vld [vmem:[%s18162_s2 + $0x88] ss:$20 sps:$4 sm:$0xff]  }
  0x70   : > { %1807 = vmatprep.subr.bf16.mxu0 %v12627_v51  ;;  %1960 = vmatprep.subr.bf16.mxu1 %v12630_v52  ;;  %v12703_v50 = vld [vmem:[%s18162_s2 + $0x308] ss:$20 sps:$4 sm:$0xff]   ;;  %v12704_v51 = vld [vmem:[%s18162_s2 + $0x1f0] ss:$20 sps:$4 sm:$0xff]  }
  0x71   : > { %v12705_v52 = vld [vmem:[%s18162_s2 + $0x470] ss:$20 sps:$4 sm:$0xff]  }
  0x73   : > { %1808 = vmatpush1.bf16.msra.mxu0 %v12625_v53  ;;  %1961 = vmatpush1.bf16.msra.mxu1 %v12628_v54  ;;  %v12706_v53 = vld [vmem:[%s18162_s2 + $0xb0] ss:$20 sps:$4 sm:$0xff]  }
  0x74   : > { %1809 = vmatprep.subr.bf16.mxu0 %v12633_v55  ;;  %1962 = vmatprep.subr.bf16.mxu1 %v12636_v56  ;;  %v12707_v54 = vld [vmem:[%s18162_s2 + $0x330] ss:$20 sps:$4 sm:$0xff]   ;;  %v12708_v55 = vld [vmem:[%s18162_s2 + $0x218] ss:$20 sps:$4 sm:$0xff]  }
  0x75   : > { %v12711_v56 = vld [vmem:[%s18162_s2 + $0x358] ss:$20 sps:$4 sm:$0xff]  }
  0x77   : > { %1810 = vmatpush1.bf16.msra.mxu0 %v12631_v57  ;;  %1963 = vmatpush1.bf16.msra.mxu1 %v12634_v58  ;;  %v12712_v57 = vld [vmem:[%s18162_s2 + $0x240] ss:$20 sps:$4 sm:$0xff]  }
  0x78   : > { %1811 = vmatprep.subr.bf16.mxu0 %v12639_v59  ;;  %1964 = vmatprep.subr.bf16.mxu1 %v12642_v60  ;;  %v12713_v58 = vld [vmem:[%s18162_s2 + $0x4c0] ss:$20 sps:$4 sm:$0xff]  }
  0x79   : > { %v12714_v59 = vld [vmem:[%s18162_s2 + $0x100] ss:$20 sps:$4 sm:$0xff]  }
  0x7a   : > { %v12715_v60 = vld [vmem:[%s18162_s2 + $0x380] ss:$20 sps:$4 sm:$0xff]  }
  0x7b   : > { %1812 = vmatpush1.bf16.msra.mxu0 %v12637_v61  ;;  %1965 = vmatpush1.bf16.msra.mxu1 %v12640_v62  ;;  %v12716_v61 = vld [vmem:[%s18162_s2 + $0x268] ss:$20 sps:$4 sm:$0xff]  }
  0x7c   : > { %1813 = vmatprep.subr.bf16.mxu0 %v12647_v63  ;;  %1966 = vmatprep.subr.bf16.mxu1 %v12650_v0  ;;  %v12717_v62 = vld [vmem:[%s18162_s2 + $0x4e8] ss:$20 sps:$4 sm:$0xff]  }
  0x7d   : > { %v12718_v63 = vld [vmem:[%s18162_s2 + $0x128] ss:$20 sps:$4 sm:$0xff]  }
  0x7e   : > { %v12719_v0 = vld [vmem:[%s18162_s2 + $0x3a8] ss:$20 sps:$4 sm:$0xff]  }
  0x7f   : > { %1814 = vmatpush1.bf16.msra.mxu0 %v12645_v1  ;;  %1967 = vmatpush1.bf16.msra.mxu1 %v12648_v2  ;;  %v12720_v1 = vld [vmem:[%s18162_s2 + $0x510] ss:$20 sps:$4 sm:$0xff]   ;;  %v12723_v2 = vld [vmem:[%s18161_s1 + $0xc] ss:$20 sps:$4 sm:$0xff]  }
  0x80   : > { %1815 = vmatprep.subr.bf16.mxu0 %v12653_v3  ;;  %1968 = vmatprep.subr.bf16.mxu1 %v12656_v4  ;;  %v12721_v3 = vld [vmem:[%s18161_s1 + $0x8] ss:$20 sps:$4 sm:$0xff]   ;;  %v14224_v4 = vld [vmem:[%s14445_s20 + $0x4] ss:$20 sps:$4 sm:$0xff]  }
  0x83   : > { %1816 = vmatpush1.bf16.msra.mxu0 %v12651_v6  ;;  %1969 = vmatpush1.bf16.msra.mxu1 %v12654_v7  ;;  %v2200_v6 = vshll.u32 %v14224_v4, 16  ;;  %v12724_v7 = vld [vmem:[%s18162_s2 + $0x538] ss:$20 sps:$4 sm:$0xff]  }
  0x84   : > { %1836 = vmatprep.subr.bf16.mxu0 %v12662_v8  ;;  %1989 = vmatprep.subr.bf16.mxu1 %v12665_v10  ;;  %v12727_v8 = vld [vmem:[%s18161_s1 + $0x34] ss:$20 sps:$4 sm:$0xff]   ;;  %v12725_v10 = vld [vmem:[%s18161_s1 + $0x30] ss:$20 sps:$4 sm:$0xff]  }
  0x86   : > { %1818 = vmatmul.mubr.bf16.vlgmr.msra.gmra.mrb[0].mxu0 %v14724_v9  ;;  %1971 = vmatmul.mubr.bf16.vlgmr.msra.gmra.mrb[0].mxu1 %v14724_v9 }
  0x87   : > { %1837 = vmatpush1.bf16.msra.mxu0 %v12660_v11  ;;  %1990 = vmatpush1.bf16.msra.mxu1 %v12663_v12  ;;  %v2198_v11 = vshrl.u32 %v14224_v4, 16  ;;  %v2202_v12 = vrot.slane %v2200_v6, 1  ;;  %v12798_v4 = vld [vmem:[%s18161_s1 + $0x194] ss:$20 sps:$4 sm:$0xff]   ;;  %v12801_v6 = vld [vmem:[%s18161_s1 + $0x23c] ss:$20 sps:$4 sm:$0xff]  }
  0x88   : > { %1838 = vmatprep.subr.bf16.mxu0 %v12668_v14  ;;  %1991 = vmatprep.subr.bf16.mxu1 %v12671_v15  ;;  %v12728_v14 = vld [vmem:[%s18162_s2 + $0x560] ss:$20 sps:$4 sm:$0xff]  }
  0x89   : > { %1827 = vmatprep.mubr.bf16.mxu0 %v14745_v17  ;;  %1980 = vmatprep.mubr.bf16.mxu1 %v14745_v17  ;;  %v2203_v15 = vor.u32 %v2202_v12, %v2198_v11  ;;  %v12799_v12 = vld [vmem:[%s18161_s1 + $0x238] ss:$20 sps:$4 sm:$0xff]  }
  0x8b   : > { %1839 = vmatpush1.bf16.msra.mxu0 %v12666_v16  ;;  %1992 = vmatpush1.bf16.msra.mxu1 %v12669_v18  ;;  %v2207_v16 = vrot.slane %v2205_v13, 1  ;;  %v12732_v18 = vld [vmem:[%s18162_s2 + $0x588] ss:$20 sps:$4 sm:$0xff]  }
  0x8c   : > { %1840 = vmatprep.subr.bf16.mxu0 %v12676_v19  ;;  %1993 = vmatprep.subr.bf16.mxu1 %v12679_v20  ;;  %v12735_v19 = vld [vmem:[%s18161_s1 + $0x84] ss:$20 sps:$4 sm:$0xff]   ;;  %v12733_v20 = vld [vmem:[%s18161_s1 + $0x80] ss:$20 sps:$4 sm:$0xff]   ;;  %v12804_v13 = vld [vmem:[%s18161_s1 + $0x1bc] ss:$20 sps:$4 sm:$0xff]  }
  0x8e   : > { %1828 = vmatmul.mubr.bf16.gmra.mrb[8].mxu0 %v14760_v21  ;;  %1981 = vmatmul.mubr.bf16.gmra.mrb[8].mxu1 %v14760_v21 }
  0x8f   : > { %1841 = vmatpush1.bf16.msra.mxu0 %v12674_v22  ;;  %1994 = vmatpush1.bf16.msra.mxu1 %v12677_v23  ;;  %v14943_v22 = vsel %vm2184_vm1, %v2203_v15, %v2207_v16  ;;  %v12738_v23 = vld [vmem:[%s18161_s1 + $0x4] ss:$20 sps:$4 sm:$0xff]   ;;  %v14226_v15 = vld [vmem:[%s14445_s20 + $0xc] ss:$20 sps:$4 sm:$0xff]  }
  0x90   : > { %1842 = vmatprep.subr.bf16.mxu0 %v12682_v24  ;;  %1995 = vmatprep.subr.bf16.mxu1 %v12685_v26  ;;  %v12741_v24 = vld [vmem:[%s18161_s1 + $0xac] ss:$20 sps:$4 sm:$0xff]   ;;  %v2224_v16 = vshll.u32 %v14226_v15, 16 }
  0x91   : > { %1868 = vmatprep.mubr.bf16.mxu0 %v14246_v33  ;;  %2021 = vmatprep.mubr.bf16.mxu1 %v14246_v33  ;;  %v12736_v26 = vld [vmem:[%s18161_s1] ss:$20 sps:$4 sm:$0xff]  }
  0x93   : > { %1843 = vmatpush1.bf16.msra.mxu0 %v12680_v28  ;;  %1996 = vmatpush1.bf16.msra.mxu1 %v12683_v29  ;;  %v12739_v28 = vld [vmem:[%s18161_s1 + $0xa8] ss:$20 sps:$4 sm:$0xff]   ;;  %v12744_v29 = vld [vmem:[%s18161_s1 + $0x2c] ss:$20 sps:$4 sm:$0xff]  }
  0x94   : > { %11837 = vmatprep.subr.bf16.mxu0 %v12687_v30  ;;  %11865 = vmatprep.subr.bf16.mxu1 %v12688_v31  ;;  %v12747_v30 = vld [vmem:[%s18161_s1 + $0xd4] ss:$20 sps:$4 sm:$0xff]  }
  0x95   : > { %v12742_v31 = vld [vmem:[%s18161_s1 + $0x28] ss:$20 sps:$4 sm:$0xff]  }
  0x96   : > { %10794 = vmatmul.mubr.msk.bf16.vlgmr.msra.gmra.mrb[0].mxu0 %vm1727_vm0, %v14791_v34  ;;  %10796 = vmatmul.mubr.msk.bf16.vlgmr.msra.gmra.mrb[0].mxu1 %vm1727_vm0, %v14791_v34 }
  0x97   : > { %11838 = vmatpush3.bf16.msra.mxu0 %v12689_v35  ;;  %11866 = vmatpush3.bf16.msra.mxu1 %v12690_v36  ;;  %v12750_v35 = vld [vmem:[%s18161_s1 + $0x54] ss:$20 sps:$4 sm:$0xff]   ;;  %v12753_v36 = vld [vmem:[%s18161_s1 + $0xfc] ss:$20 sps:$4 sm:$0xff]  }
  0x98   : > { %11839 = vmatprep.subr.bf16.mxu0 %v12691_v37  ;;  %11867 = vmatprep.subr.bf16.mxu1 %v12692_v38  ;;  %v12748_v37 = vld [vmem:[%s18161_s1 + $0x50] ss:$20 sps:$4 sm:$0xff]   ;;  %v12751_v38 = vld [vmem:[%s18161_s1 + $0xf8] ss:$20 sps:$4 sm:$0xff]  }
  0x99   : > { %1878 = vmatprep.mubr.bf16.mxu0 %v14246_v33  ;;  %2031 = vmatprep.mubr.bf16.mxu1 %v14246_v33 }
  0x9b   : > { %11840 = vmatpush3.bf16.msra.mxu0 %v12693_v39  ;;  %11868 = vmatpush3.bf16.msra.mxu1 %v12694_v40  ;;  %v12756_v39 = vld [vmem:[%s18161_s1 + $0x7c] ss:$20 sps:$4 sm:$0xff]   ;;  %v12759_v40 = vld [vmem:[%s18161_s1 + $0x124] ss:$20 sps:$4 sm:$0xff]  }
  0x9c   : > { %11841 = vmatprep.subr.bf16.mxu0 %v12696_v41  ;;  %11869 = vmatprep.subr.bf16.mxu1 %v12697_v42  ;;  %v12754_v41 = vld [vmem:[%s18161_s1 + $0x78] ss:$20 sps:$4 sm:$0xff]   ;;  %v12757_v42 = vld [vmem:[%s18161_s1 + $0x120] ss:$20 sps:$4 sm:$0xff]  }
  0x9e   : > { %10795 = vmatmul.mubr.msk.bf16.gmra.mrb[12].mxu0 %vm1727_vm0, %v14824_v43  ;;  %10797 = vmatmul.mubr.msk.bf16.gmra.mrb[12].mxu1 %vm1727_vm0, %v14824_v43 }
  0x9f   : > { %11842 = vmatpush3.bf16.msra.mxu0 %v12698_v44  ;;  %11870 = vmatpush3.bf16.msra.mxu1 %v12699_v45  ;;  %v12765_v44 = vld [vmem:[%s18161_s1 + $0x14c] ss:$20 sps:$4 sm:$0xff]  }
  0xa0   : > { %11843 = vmatprep.subr.bf16.mxu0 %v12700_v46  ;;  %11871 = vmatprep.subr.bf16.mxu1 %v12701_v48  ;;  %v12760_v45 = vld [vmem:[%s18161_s1 + $0xa0] ss:$20 sps:$4 sm:$0xff]   ;;  %v12763_v46 = vld [vmem:[%s18161_s1 + $0x148] ss:$20 sps:$4 sm:$0xff]  }
  0xa1   : > { %2072 = vmatprep.mubr.bf16.mxu0 %v14454_v47  ;;  %2120 = vmatprep.mubr.bf16.mxu1 %v14605_v32  ;;  %v12709_v47 = vld [vmem:[%s18162_s2 + $0x498] ss:$20 sps:$4 sm:$0xff]  }
  0xa2   : > { %v12710_v32 = vld [vmem:[%s18162_s2 + $0xd8] ss:$20 sps:$4 sm:$0xff]  }
  0xa3   : > { %11844 = vmatpush3.bf16.msra.mxu0 %v12702_v49  ;;  %11872 = vmatpush3.bf16.msra.mxu1 %v12703_v50  ;;  %v12768_v48 = vld [vmem:[%s18161_s1 + $0xcc] ss:$20 sps:$4 sm:$0xff]   ;;  %v12771_v49 = vld [vmem:[%s18161_s1 + $0x174] ss:$20 sps:$4 sm:$0xff]  }
  0xa4   : > { %11845 = vmatprep.subr.bf16.mxu0 %v12704_v51  ;;  %11873 = vmatprep.subr.bf16.mxu1 %v12705_v52  ;;  %v12766_v50 = vld [vmem:[%s18161_s1 + $0xc8] ss:$20 sps:$4 sm:$0xff]   ;;  %v12769_v51 = vld [vmem:[%s18161_s1 + $0x170] ss:$20 sps:$4 sm:$0xff]  }
  0xa5   : > { %v12774_v52 = vld [vmem:[%s18161_s1 + $0xf4] ss:$20 sps:$4 sm:$0xff]  }
  0xa7   : > { %11846 = vmatpush3.bf16.msra.mxu0 %v12706_v53  ;;  %11874 = vmatpush3.bf16.msra.mxu1 %v12707_v54  ;;  %v12777_v53 = vld [vmem:[%s18161_s1 + $0x19c] ss:$20 sps:$4 sm:$0xff]  }
  0xa8   : > { %11847 = vmatprep.subr.bf16.mxu0 %v12708_v55  ;;  %11875 = vmatprep.subr.bf16.mxu1 %v12709_v47  ;;  %v12772_v54 = vld [vmem:[%s18161_s1 + $0xf0] ss:$20 sps:$4 sm:$0xff]   ;;  %v12775_v55 = vld [vmem:[%s18161_s1 + $0x198] ss:$20 sps:$4 sm:$0xff]  }
  0xa9   : > { %v12780_v47 = vld [vmem:[%s18161_s1 + $0x11c] ss:$20 sps:$4 sm:$0xff]  }
  0xab   : > { %11848 = vmatpush3.bf16.msra.mxu0 %v12710_v32  ;;  %11876 = vmatpush3.bf16.msra.mxu1 %v12711_v56  ;;  %v12783_v32 = vld [vmem:[%s18161_s1 + $0x1c4] ss:$20 sps:$4 sm:$0xff]  }
  0xac   : > { %11849 = vmatprep.subr.bf16.mxu0 %v12712_v57  ;;  %11877 = vmatprep.subr.bf16.mxu1 %v12713_v58  ;;  %v12778_v56 = vld [vmem:[%s18161_s1 + $0x118] ss:$20 sps:$4 sm:$0xff]   ;;  %v12781_v57 = vld [vmem:[%s18161_s1 + $0x1c0] ss:$20 sps:$4 sm:$0xff]  }
  0xad   : > { %v12786_v58 = vld [vmem:[%s18161_s1 + $0x144] ss:$20 sps:$4 sm:$0xff]  }
  0xaf   : > { %11850 = vmatpush3.bf16.msra.mxu0 %v12714_v59  ;;  %11878 = vmatpush3.bf16.msra.mxu1 %v12715_v60  ;;  %v12789_v59 = vld [vmem:[%s18161_s1 + $0x1ec] ss:$20 sps:$4 sm:$0xff]  }
  0xb0   : > { %11851 = vmatprep.subr.bf16.mxu0 %v12716_v61  ;;  %11879 = vmatprep.subr.bf16.mxu1 %v12717_v62  ;;  %v12784_v60 = vld [vmem:[%s18161_s1 + $0x140] ss:$20 sps:$4 sm:$0xff]   ;;  %v12787_v61 = vld [vmem:[%s18161_s1 + $0x1e8] ss:$20 sps:$4 sm:$0xff]  }
  0xb1   : > { %v12792_v62 = vld [vmem:[%s18161_s1 + $0x16c] ss:$20 sps:$4 sm:$0xff]  }
  0xb3   : > { %11852 = vmatpush3.bf16.msra.mxu0 %v12718_v63  ;;  %11880 = vmatpush3.bf16.msra.mxu1 %v12719_v0  ;;  %v12795_v63 = vld [vmem:[%s18161_s1 + $0x214] ss:$20 sps:$4 sm:$0xff]  }
  0xb4   : > { %12209 = vmatprep.subr.bf16.mxu0 %v12720_v1  ;;  %3356 = vmatprep.subr.bf16.mxu1 %v12723_v2  ;;  %v12790_v0 = vld [vmem:[%s18161_s1 + $0x168] ss:$20 sps:$4 sm:$0xff]   ;;  %v14225_v2 = vld [vmem:[%s14445_s20] ss:$20 sps:$4 sm:$0xff]  }
  0xb6   : > { %2073 = vmatmul.mubr.bf16.vlgmr.msra.gmra.mrb[16].mxu0 %v14522_v5  ;;  %2121 = vmatmul.mubr.bf16.vlgmr.msra.gmra.mrb[16].mxu1 %v14724_v9  ;;  %v12731_v5 = vld [vmem:[%s18161_s1 + $0x5c] ss:$20 sps:$4 sm:$0xff]   ;;  %v12729_v9 = vld [vmem:[%s18161_s1 + $0x58] ss:$20 sps:$4 sm:$0xff]  }
  0xb7   : > { %12210 = vmatpush3.bf16.msra.mxu0 %v12720_v1  ;;  %3357 = vmatpush1.bf16.msra.mxu1 %v12721_v3  ;;  %v12793_v1 = vld [vmem:[%s18161_s1 + $0x210] ss:$20 sps:$4 sm:$0xff]   ;;  %v2188_v3 = vshll.u32 %v14225_v2, 16 }
  0xb8   : > { %12211 = vmatprep.subr.bf16.mxu0 %v12724_v7  ;;  %3358 = vmatprep.subr.bf16.mxu1 %v12727_v8  ;;  %v12796_v8 = vld [vmem:[%s18161_s1 + $0x190] ss:$20 sps:$4 sm:$0xff]  }
  0xb9   : > { %2080 = vmatprep.mubr.bf16.mxu0 %v14581_v25  ;;  %2128 = vmatprep.mubr.bf16.mxu1 %v14745_v17  ;;  %v2190_v11 = vrot.slane %v2188_v3, 1  ;;  %v12861_v3 = vld [vmem:[%s18161_s1 + $0x3cc] ss:$20 sps:$4 sm:$0xff]  }
  0xbb   : > { %12212 = vmatpush3.bf16.msra.mxu0 %v12724_v7  ;;  %3359 = vmatpush1.bf16.msra.mxu1 %v12725_v10  ;;  %v2193_v7 = vshll.u32 %v14586_v27, 16  ;;  %v2186_v10 = vshrl.u32 %v14225_v2, 16  ;;  %v12858_v2 = vld [vmem:[%s18161_s1 + $0x324] ss:$20 sps:$4 sm:$0xff]  }
  0xbc   : > { %12213 = vmatprep.subr.bf16.mxu0 %v12728_v14  ;;  %3360 = vmatprep.subr.bf16.mxu1 %v12731_v5  ;;  %v15092_v5 = vshrl.u32 %v14581_v25, 16 }
  0xbe   : > { %2081 = vmatmul.mubr.bf16.gmra.mrb[20].mxu0 %v14586_v27  ;;  %2129 = vmatmul.mubr.bf16.gmra.mrb[20].mxu1 %v14760_v21 }
  0xbf   : > { %12214 = vmatpush3.bf16.msra.mxu0 %v12728_v14  ;;  %3361 = vmatpush1.bf16.msra.mxu1 %v12729_v9  ;;  %v12807_v14 = vld [vmem:[%s18161_s1 + $0x264] ss:$20 sps:$4 sm:$0xff]   ;;  %v2195_v9 = vrot.slane %v2193_v7, 1  ;;  %v12864_v7 = vld [vmem:[%s18161_s1 + $0x34c] ss:$20 sps:$4 sm:$0xff]  }
  0xc0   : > { %12215 = vmatprep.subr.bf16.mxu0 %v12732_v18  ;;  %3362 = vmatprep.subr.bf16.mxu1 %v12735_v19  ;;  %v12805_v19 = vld [vmem:[%s18161_s1 + $0x260] ss:$20 sps:$4 sm:$0xff]  }
  0xc1   : > { %12217 = vmatprep.mubr.msk.bf16.mxu0 %vm1727_vm0, %v14791_v34  ;;  %3388 = vmatprep.mubr.bf16.mxu1 %v14943_v22  ;;  %v12745_v34 = vld [vmem:[%s18161_s1 + $0xd0] ss:$20 sps:$4 sm:$0xff]  }
  0xc3   : > { %12216 = vmatpush3.bf16.msra.mxu0 %v12732_v18  ;;  %3363 = vmatpush1.bf16.msra.mxu1 %v12733_v20  ;;  %v12802_v18 = vld [vmem:[%s18161_s1 + $0x1b8] ss:$20 sps:$4 sm:$0xff]   ;;  %v2229_v20 = vshll.u32 %v14745_v17, 16 }
  0xc4   : > { %3203 = vmatprep.subr.bf16.mxu0 %v12738_v23  ;;  %3364 = vmatprep.subr.bf16.mxu1 %v12741_v24  ;;  %v12810_v23 = vld [vmem:[%s18161_s1 + $0x1e4] ss:$20 sps:$4 sm:$0xff]   ;;  %v2191_v24 = vor.u32 %v2190_v11, %v2186_v10  ;;  %v12862_v10 = vld [vmem:[%s18161_s1 + $0x348] ss:$20 sps:$4 sm:$0xff]  }
  0xc5   : > { %v12865_v11 = vld [vmem:[%s18161_s1 + $0x3f0] ss:$20 sps:$4 sm:$0xff]  }
  0xc6   : > { %12218 = vmatmul.mubr.msk.bf16.vlgmr.msra.gmra.mrb[24].mxu0 %vm1727_vm0, %v14824_v43  ;;  %v12762_v43 = vld [vmem:[%s18161_s1 + $0xa4] ss:$20 sps:$4 sm:$0xff]  }
  0xc7   : > { %3204 = vmatpush1.bf16.msra.mxu0 %v12736_v26  ;;  %3365 = vmatpush1.bf16.msra.mxu1 %v12739_v28  ;;  %v12813_v26 = vld [vmem:[%s18161_s1 + $0x28c] ss:$20 sps:$4 sm:$0xff]   ;;  %v15109_v28 = vshrl.u32 %v14586_v27, 16 }
  0xc8   : > { %3205 = vmatprep.subr.bf16.mxu0 %v12744_v29  ;;  %3366 = vmatprep.subr.bf16.mxu1 %v12747_v30  ;;  %v12808_v29 = vld [vmem:[%s18161_s1 + $0x1e0] ss:$20 sps:$4 sm:$0xff]   ;;  %v12811_v30 = vld [vmem:[%s18161_s1 + $0x288] ss:$20 sps:$4 sm:$0xff]  }
  0xc9   : > { %3235 = vmatprep.mubr.bf16.mxu0 %v14943_v22 }
  0xcb   : > { %3206 = vmatpush1.bf16.msra.mxu0 %v12742_v31  ;;  %3367 = vmatpush1.bf16.msra.mxu1 %v12745_v34  ;;  %v2222_v31 = vshrl.u32 %v14226_v15, 16  ;;  %v2226_v34 = vrot.slane %v2224_v16, 1  ;;  %v12876_v15 = vld [vmem:[%s18161_s1 + $0x39c] ss:$20 sps:$4 sm:$0xff]   ;;  %v12879_v16 = vld [vmem:[%s18161_s1 + $0x444] ss:$20 sps:$4 sm:$0xff]  }
  0xcc   : > { %3207 = vmatprep.subr.bf16.mxu0 %v12750_v35  ;;  %3368 = vmatprep.subr.bf16.mxu1 %v12753_v36  ;;  %v2231_v35 = vrot.slane %v2229_v20, 1  ;;  %v15118_v36 = vsel %vm2184_vm1, %v2191_v24, %v2195_v9  ;;  %v12871_v9 = vld [vmem:[%s18161_s1 + $0x418] ss:$20 sps:$4 sm:$0xff]   ;;  %v12880_v24 = vld [vmem:[%s18161_s1 + $0x3c0] ss:$20 sps:$4 sm:$0xff]  }
  0xcd   : > { %v12882_v20 = vld [vmem:[%s18161_s1 + $0x3c4] ss:$20 sps:$4 sm:$0xff]  }
  0xcf   : > { %3208 = vmatpush1.bf16.msra.mxu0 %v12748_v37  ;;  %3369 = vmatpush1.bf16.msra.mxu1 %v12751_v38  ;;  %v12816_v37 = vld [vmem:[%s18161_s1 + $0x20c] ss:$20 sps:$4 sm:$0xff]   ;;  %v12819_v38 = vld [vmem:[%s18161_s1 + $0x2b4] ss:$20 sps:$4 sm:$0xff]  }
  0xd0   : > { %3209 = vmatprep.subr.bf16.mxu0 %v12756_v39  ;;  %3370 = vmatprep.subr.bf16.mxu1 %v12759_v40  ;;  %v12814_v39 = vld [vmem:[%s18161_s1 + $0x208] ss:$20 sps:$4 sm:$0xff]   ;;  %v12817_v40 = vld [vmem:[%s18161_s1 + $0x2b0] ss:$20 sps:$4 sm:$0xff]  }
  0xd3   : > { %3210 = vmatpush1.bf16.msra.mxu0 %v12754_v41  ;;  %3371 = vmatpush1.bf16.msra.mxu1 %v12757_v42  ;;  %v12822_v41 = vld [vmem:[%s18161_s1 + $0x234] ss:$20 sps:$4 sm:$0xff]   ;;  %v12825_v42 = vld [vmem:[%s18161_s1 + $0x2dc] ss:$20 sps:$4 sm:$0xff]  }
  0xd4   : > { %3211 = vmatprep.subr.bf16.mxu0 %v12762_v43  ;;  %3372 = vmatprep.subr.bf16.mxu1 %v12765_v44  ;;  %v12820_v43 = vld [vmem:[%s18161_s1 + $0x230] ss:$20 sps:$4 sm:$0xff]   ;;  %v12823_v44 = vld [vmem:[%s18161_s1 + $0x2d8] ss:$20 sps:$4 sm:$0xff]  }
  0xd7   : > { %3212 = vmatpush1.bf16.msra.mxu0 %v12760_v45  ;;  %3373 = vmatpush1.bf16.msra.mxu1 %v12763_v46  ;;  %v2227_v45 = vor.u32 %v2226_v34, %v2222_v31  ;;  %v12828_v46 = vld [vmem:[%s18161_s1 + $0x25c] ss:$20 sps:$4 sm:$0xff]  }
  0xd8   : > { %3213 = vmatprep.subr.bf16.mxu0 %v12768_v48  ;;  %3374 = vmatprep.subr.bf16.mxu1 %v12771_v49  ;;  %v12831_v48 = vld [vmem:[%s18161_s1 + $0x304] ss:$20 sps:$4 sm:$0xff]   ;;  %v12886_v31 = vld [vmem:[%s18161_s1 + $0x3e8] ss:$20 sps:$4 sm:$0xff]  }
  0xd9   : > { %v12826_v49 = vld [vmem:[%s18161_s1 + $0x258] ss:$20 sps:$4 sm:$0xff]   ;;  %v12889_v34 = vld [vmem:[%s18161_s1 + $0x490] ss:$20 sps:$4 sm:$0xff]  }
  0xdb   : > { %3214 = vmatpush1.bf16.msra.mxu0 %v12766_v50  ;;  %3375 = vmatpush1.bf16.msra.mxu1 %v12769_v51  ;;  %v12829_v50 = vld [vmem:[%s18161_s1 + $0x300] ss:$20 sps:$4 sm:$0xff]   ;;  %v15160_v51 = vsel %vm2184_vm1, %v2227_v45, %v2231_v35 }
  0xdc   : > { %3215 = vmatprep.subr.bf16.mxu0 %v12774_v52  ;;  %3376 = vmatprep.subr.bf16.mxu1 %v12777_v53  ;;  %v12834_v52 = vld [vmem:[%s18161_s1 + $0x284] ss:$20 sps:$4 sm:$0xff]   ;;  %v12837_v53 = vld [vmem:[%s18161_s1 + $0x32c] ss:$20 sps:$4 sm:$0xff]   ;;  %v12894_v35 = vld [vmem:[%s18161_s1 + $0x414] ss:$20 sps:$4 sm:$0xff]  }
  0xdf   : > { %3216 = vmatpush1.bf16.msra.mxu0 %v12772_v54  ;;  %3377 = vmatpush1.bf16.msra.mxu1 %v12775_v55  ;;  %v12832_v54 = vld [vmem:[%s18161_s1 + $0x280] ss:$20 sps:$4 sm:$0xff]   ;;  %v12835_v55 = vld [vmem:[%s18161_s1 + $0x328] ss:$20 sps:$4 sm:$0xff]  }
  0xe0   : > { %3217 = vmatprep.subr.bf16.mxu0 %v12780_v47  ;;  %3378 = vmatprep.subr.bf16.mxu1 %v12783_v32  ;;  %v12840_v47 = vld [vmem:[%s18161_s1 + $0x2ac] ss:$20 sps:$4 sm:$0xff]   ;;  %v12843_v32 = vld [vmem:[%s18161_s1 + $0x354] ss:$20 sps:$4 sm:$0xff]  }
  0xe3   : > { %3218 = vmatpush1.bf16.msra.mxu0 %v12778_v56  ;;  %3379 = vmatpush1.bf16.msra.mxu1 %v12781_v57  ;;  %v12838_v56 = vld [vmem:[%s18161_s1 + $0x2a8] ss:$20 sps:$4 sm:$0xff]   ;;  %v12841_v57 = vld [vmem:[%s18161_s1 + $0x350] ss:$20 sps:$4 sm:$0xff]  }
  0xe4   : > { %3219 = vmatprep.subr.bf16.mxu0 %v12786_v58  ;;  %3380 = vmatprep.subr.bf16.mxu1 %v12789_v59  ;;  %v12846_v58 = vld [vmem:[%s18161_s1 + $0x2d4] ss:$20 sps:$4 sm:$0xff]   ;;  %v12849_v59 = vld [vmem:[%s18161_s1 + $0x37c] ss:$20 sps:$4 sm:$0xff]  }
  0xe7   : > { %3220 = vmatpush1.bf16.msra.mxu0 %v12784_v60  ;;  %3381 = vmatpush1.bf16.msra.mxu1 %v12787_v61  ;;  %v12844_v60 = vld [vmem:[%s18161_s1 + $0x2d0] ss:$20 sps:$4 sm:$0xff]   ;;  %v12847_v61 = vld [vmem:[%s18161_s1 + $0x378] ss:$20 sps:$4 sm:$0xff]  }
  0xe8   : > { %3221 = vmatprep.subr.bf16.mxu0 %v12792_v62  ;;  %3382 = vmatprep.subr.bf16.mxu1 %v12795_v63  ;;  %v12852_v62 = vld [vmem:[%s18161_s1 + $0x2fc] ss:$20 sps:$4 sm:$0xff]   ;;  %v12855_v63 = vld [vmem:[%s18161_s1 + $0x3a4] ss:$20 sps:$4 sm:$0xff]  }
  0xeb   : > { %3222 = vmatpush1.bf16.msra.mxu0 %v12790_v0  ;;  %3383 = vmatpush1.bf16.msra.mxu1 %v12793_v1  ;;  %v12850_v0 = vld [vmem:[%s18161_s1 + $0x2f8] ss:$20 sps:$4 sm:$0xff]   ;;  %v12853_v1 = vld [vmem:[%s18161_s1 + $0x3a0] ss:$20 sps:$4 sm:$0xff]  }
  0xec   : > { %3223 = vmatprep.subr.bf16.mxu0 %v12798_v4  ;;  %3384 = vmatprep.subr.bf16.mxu1 %v12801_v6  ;;  %v12856_v4 = vld [vmem:[%s18161_s1 + $0x320] ss:$20 sps:$4 sm:$0xff]   ;;  %v12859_v6 = vld [vmem:[%s18161_s1 + $0x3c8] ss:$20 sps:$4 sm:$0xff]  }
  0xef   : > { %3224 = vmatpush1.bf16.msra.mxu0 %v12796_v8  ;;  %3385 = vmatpush1.bf16.msra.mxu1 %v12799_v12  ;;  %v12867_v8 = vld [vmem:[%s18161_s1 + $0x3f4] ss:$20 sps:$4 sm:$0xff]  }
  0xf0   : > { %3225 = vmatprep.subr.bf16.mxu0 %v12804_v13  ;;  %3386 = vmatprep.subr.bf16.mxu1 %v12807_v14  ;;  %v12870_v12 = vld [vmem:[%s18161_s1 + $0x374] ss:$20 sps:$4 sm:$0xff]   ;;  %v12873_v13 = vld [vmem:[%s18161_s1 + $0x41c] ss:$20 sps:$4 sm:$0xff]  }
  0xf1   : > { %v12868_v14 = vld [vmem:[%s18161_s1 + $0x370] ss:$20 sps:$4 sm:$0xff]  }
  0xf3   : > { %3226 = vmatpush1.bf16.msra.mxu0 %v12802_v18  ;;  %3387 = vmatpush1.bf16.msra.mxu1 %v12805_v19  ;;  %v12874_v18 = vld [vmem:[%s18161_s1 + $0x398] ss:$20 sps:$4 sm:$0xff]   ;;  %v12877_v19 = vld [vmem:[%s18161_s1 + $0x440] ss:$20 sps:$4 sm:$0xff]  }
  0xf4   : > { %3227 = vmatprep.subr.bf16.mxu0 %v12810_v23  ;;  %3407 = vmatprep.subr.bf16.mxu1 %v12813_v26  ;;  %v12885_v23 = vld [vmem:[%s18161_s1 + $0x46c] ss:$20 sps:$4 sm:$0xff]   ;;  %v12883_v26 = vld [vmem:[%s18161_s1 + $0x468] ss:$20 sps:$4 sm:$0xff]  }
  0xf6   : > { %3389 = vmatmul.mubr.bf16.vlgmr.msra.gmra.mrb[0].mxu1 %v15118_v36 }
  0xf7   : > { %3228 = vmatpush1.bf16.msra.mxu0 %v12808_v29  ;;  %3408 = vmatpush1.bf16.msra.mxu1 %v12811_v30  ;;  %v12888_v29 = vld [vmem:[%s18161_s1 + $0x3ec] ss:$20 sps:$4 sm:$0xff]   ;;  %v12891_v30 = vld [vmem:[%s18161_s1 + $0x494] ss:$20 sps:$4 sm:$0xff]  }
  0xf8   : > { %3229 = vmatprep.subr.bf16.mxu0 %v12816_v37  ;;  %3409 = vmatprep.subr.bf16.mxu1 %v12819_v38  ;;  %v14227_v37 = vld [vmem:[%s14445_s20 + $0x8] ss:$20 sps:$4 sm:$0xff]  }
  0xf9   : > { %3398 = vmatprep.mubr.bf16.mxu1 %v15092_v5  ;;  %v2212_v38 = vshll.u32 %v14227_v37, 16 }
  0xfb   : > { %3230 = vmatpush1.bf16.msra.mxu0 %v12814_v39  ;;  %3410 = vmatpush1.bf16.msra.mxu1 %v12817_v40  ;;  %v12897_v39 = vld [vmem:[%s18161_s1 + $0x4bc] ss:$20 sps:$4 sm:$0xff]   ;;  %v2217_v40 = vshll.u32 %v14760_v21, 16  ;;  %v2214_v45 = vrot.slane %v2212_v38, 1  ;;  %v12936_v38 = vld [vmem:[%s18161_s1 + $0x178] ss:$20 sps:$4 sm:$0xff]  }
  0xfc   : > { %3231 = vmatprep.subr.bf16.mxu0 %v12822_v41  ;;  %3411 = vmatprep.subr.bf16.mxu1 %v12825_v42  ;;  %v12892_v41 = vld [vmem:[%s18161_s1 + $0x410] ss:$20 sps:$4 sm:$0xff]   ;;  %v12895_v42 = vld [vmem:[%s18161_s1 + $0x4b8] ss:$20 sps:$4 sm:$0xff]  }
  0xfe   : > { %3399 = vmatmul.mubr.bf16.gmra.mrb[24].mxu1 %v15109_v28 }
  0xff   : > { %3232 = vmatpush1.bf16.msra.mxu0 %v12820_v43  ;;  %3412 = vmatpush1.bf16.msra.mxu1 %v12823_v44  ;;  %v12900_v43 = vld [vmem:[%s18161_s1 + $0x43c] ss:$20 sps:$4 sm:$0xff]   ;;  %v2210_v44 = vshrl.u32 %v14227_v37, 16  ;;  %v12935_v37 = vld [vmem:[%s18161_s1 + $0x52c] ss:$20 sps:$4 sm:$0xff]  }
 0x100   : > { %3233 = vmatprep.subr.bf16.mxu0 %v12828_v46  ;;  %3413 = vmatprep.subr.bf16.mxu1 %v12831_v48  ;;  %v12903_v46 = vld [vmem:[%s18161_s1 + $0x4e4] ss:$20 sps:$4 sm:$0xff]   ;;  %v2219_v48 = vrot.slane %v2217_v40, 1 }
 0x101   : > { %3439 = vmatprep.mubr.bf16.mxu1 %v15160_v51  ;;  %v12937_v40 = vld [vmem:[%s18161_s1 + $0x38] ss:$20 sps:$4 sm:$0xff]  }
 0x103   : > { %3234 = vmatpush1.bf16.msra.mxu0 %v12826_v49  ;;  %3414 = vmatpush1.bf16.msra.mxu1 %v12829_v50 }
 0x104   : > { %3254 = vmatprep.subr.bf16.mxu0 %v12834_v52  ;;  %3415 = vmatprep.subr.bf16.mxu1 %v12837_v53  ;;  %v12898_v52 = vld [vmem:[%s18161_s1 + $0x438] ss:$20 sps:$4 sm:$0xff]  }
 0x106   : > { %3236 = vmatmul.mubr.bf16.vlgmr.msra.gmra.mrb[0].mxu0 %v15118_v36 }
 0x107   : > { %3255 = vmatpush1.bf16.msra.mxu0 %v12832_v54  ;;  %3416 = vmatpush1.bf16.msra.mxu1 %v12835_v55  ;;  %v12901_v55 = vld [vmem:[%s18161_s1 + $0x4e0] ss:$20 sps:$4 sm:$0xff]  }
 0x108   : > { %3256 = vmatprep.subr.bf16.mxu0 %v12840_v47  ;;  %3417 = vmatprep.subr.bf16.mxu1 %v12843_v32  ;;  %v2215_v47 = vor.u32 %v2214_v45, %v2210_v44  ;;  %v12938_v44 = vld [vmem:[%s18161_s1 + $0x550] ss:$20 sps:$4 sm:$0xff]   ;;  %v12942_v45 = vld [vmem:[%s18161_s1 + $0x60] ss:$20 sps:$4 sm:$0xff]  }
 0x109   : > { %3245 = vmatprep.mubr.bf16.mxu0 %v15092_v5 }
 0x10b   : > { %3257 = vmatpush1.bf16.msra.mxu0 %v12838_v56  ;;  %3418 = vmatpush1.bf16.msra.mxu1 %v12841_v57  ;;  %v12906_v57 = vld [vmem:[%s18161_s1 + $0x464] ss:$20 sps:$4 sm:$0xff]  }
 0x10c   : > { %3258 = vmatprep.subr.bf16.mxu0 %v12846_v58  ;;  %3419 = vmatprep.subr.bf16.mxu1 %v12849_v59  ;;  %v12909_v58 = vld [vmem:[%s18161_s1 + $0x50c] ss:$20 sps:$4 sm:$0xff]  }
 0x10e   : > { %3246 = vmatmul.mubr.bf16.gmra.mrb[28].mxu0 %v15109_v28 }
 0x10f   : > { %3259 = vmatpush1.bf16.msra.mxu0 %v12844_v60  ;;  %3420 = vmatpush1.bf16.msra.mxu1 %v12847_v61  ;;  %v12904_v61 = vld [vmem:[%s18161_s1 + $0x460] ss:$20 sps:$4 sm:$0xff]  }
 0x110   : > { %3260 = vmatprep.subr.bf16.mxu0 %v12852_v62  ;;  %3421 = vmatprep.subr.bf16.mxu1 %v12855_v63  ;;  %v15331_v62 = vsel %vm2184_vm1, %v2215_v47, %v2219_v48  ;;  %v12907_v63 = vld [vmem:[%s18161_s1 + $0x508] ss:$20 sps:$4 sm:$0xff]   ;;  %v12948_v47 = vld [vmem:[%s18161_s1 + $0x1f0] ss:$20 sps:$4 sm:$0xff]  }
 0x111   : > { %3286 = vmatprep.mubr.bf16.mxu0 %v15160_v51  ;;  %v12946_v48 = vld [vmem:[%s18161_s1 + $0x1c8] ss:$20 sps:$4 sm:$0xff]  }
 0x113   : > { %3261 = vmatpush1.bf16.msra.mxu0 %v12850_v0  ;;  %3422 = vmatpush1.bf16.msra.mxu1 %v12853_v1  ;;  %v12912_v0 = vld [vmem:[%s18161_s1 + $0x48c] ss:$20 sps:$4 sm:$0xff]   ;;  %v12915_v1 = vld [vmem:[%s18161_s1 + $0x534] ss:$20 sps:$4 sm:$0xff]  }
 0x114   : > { %3262 = vmatprep.subr.bf16.mxu0 %v12858_v2  ;;  %3423 = vmatprep.subr.bf16.mxu1 %v12861_v3  ;;  %v15343_v2 = vshrl.u32 %v14745_v17, 16  ;;  %v14228_v3 = vld [vmem:[%s14445_s20 + $0x10] ss:$20 sps:$4 sm:$0xff]  }
 0x117   : > { %3263 = vmatpush1.bf16.msra.mxu0 %v12856_v4  ;;  %3424 = vmatpush1.bf16.msra.mxu1 %v12859_v6  ;;  %v2235_v4 = vshll.u32 %v14228_v3, 16  ;;  %v12910_v6 = vld [vmem:[%s18161_s1 + $0x488] ss:$20 sps:$4 sm:$0xff]  }
 0x118   : > { %3264 = vmatprep.subr.bf16.mxu0 %v12864_v7  ;;  %3425 = vmatprep.subr.bf16.mxu1 %v12867_v8  ;;  %v12913_v7 = vld [vmem:[%s18161_s1 + $0x530] ss:$20 sps:$4 sm:$0xff]   ;;  %v12918_v8 = vld [vmem:[%s18161_s1 + $0x4b4] ss:$20 sps:$4 sm:$0xff]  }
 0x11b   : > { %3265 = vmatpush1.bf16.msra.mxu0 %v12862_v10  ;;  %3426 = vmatpush1.bf16.msra.mxu1 %v12865_v11  ;;  %v12921_v10 = vld [vmem:[%s18161_s1 + $0x55c] ss:$20 sps:$4 sm:$0xff]   ;;  %v15361_v11 = vshrl.u32 %v14760_v21, 16 }
 0x11c   : > { %3266 = vmatprep.subr.bf16.mxu0 %v12870_v12  ;;  %3427 = vmatprep.subr.bf16.mxu1 %v12873_v13  ;;  %v2233_v12 = vshrl.u32 %v14228_v3, 16  ;;  %v2237_v13 = vrot.slane %v2235_v4, 1  ;;  %v12959_v3 = vld [vmem:[%s18161_s1 + $0x2e0] ss:$20 sps:$4 sm:$0xff]   ;;  %v12960_v4 = vld [vmem:[%s18161_s1 + $0x268] ss:$20 sps:$4 sm:$0xff]  }
 0x11f   : > { %3267 = vmatpush1.bf16.msra.mxu0 %v12868_v14  ;;  %3428 = vmatpush1.bf16.msra.mxu1 %v12871_v9  ;;  %v12916_v14 = vld [vmem:[%s18161_s1 + $0x4b0] ss:$20 sps:$4 sm:$0xff]   ;;  %v12919_v9 = vld [vmem:[%s18161_s1 + $0x558] ss:$20 sps:$4 sm:$0xff]  }
 0x120   : > { %3268 = vmatprep.subr.bf16.mxu0 %v12876_v15  ;;  %3429 = vmatprep.subr.bf16.mxu1 %v12879_v16  ;;  %v14229_v15 = vld [vmem:[%s14445_s20 + $0x38] ss:$0 sps:$4 sm:$0x11]  }
 0x121   : > { %v15307_v49 = vpop.f32.mrb[4].mxu0  ;;  %v15309_v50 = vpop.f32.mrb[4].mxu1  ;;  %v2239_v16 = vshll.u32 %v14229_v15, 16 }
 0x122   : > { %v15314_v53 = vpop.f32.mrb[5].mxu0  ;;  %v15316_v54 = vpop.f32.mrb[5].mxu1 }
 0x123   : > { %3269 = vmatpush1.bf16.msra.mxu0 %v12874_v18  ;;  %3430 = vmatpush1.bf16.msra.mxu1 %v12877_v19  ;;  %v1782_v32 = vpop.f32.mrb[6].mxu0  ;;  %v1935_v56 = vpop.f32.mrb[6].mxu1  ;;  %v12924_v18 = vld [vmem:[%s18161_s1 + $0x4dc] ss:$20 sps:$4 sm:$0xff]   ;;  %v12927_v19 = vld [vmem:[%s18161_s1 + $0x584] ss:$20 sps:$4 sm:$0xff]  }
 0x124   : > { %3270 = vmatprep.subr.bf16.mxu0 %v12882_v20  ;;  %3431 = vmatprep.subr.bf16.mxu1 %v12885_v23  ;;  %v1783_v59 = vpop.f32.mrb[7].mxu0  ;;  %v1936_v60 = vpop.f32.mrb[7].mxu1  ;;  %v12922_v20 = vld [vmem:[%s18161_s1 + $0x4d8] ss:$20 sps:$4 sm:$0xff]   ;;  %v12925_v23 = vld [vmem:[%s18161_s1 + $0x580] ss:$20 sps:$4 sm:$0xff]  }
 0x125   : > { %v12949_v32 = vld [vmem:[%s18161_s1 + $0x3d0] ss:$20 sps:$4 sm:$0xff]   ;;  %v12953_v59 = vld [vmem:[%s18161_s1 + $0x3f8] ss:$20 sps:$4 sm:$0xff]  }
 0x126   : > { %v12950_v56 = vld [vmem:[%s18161_s1 + $0xb0] ss:$20 sps:$4 sm:$0xff]   ;;  %v12954_v60 = vld [vmem:[%s18161_s1 + $0xd8] ss:$20 sps:$4 sm:$0xff]  }
 0x127   : > { %3271 = vmatpush1.bf16.msra.mxu0 %v12880_v24  ;;  %3432 = vmatpush1.bf16.msra.mxu1 %v12883_v26  ;;  %v2238_v24 = vor.u32 %v2237_v13, %v2233_v12  ;;  %v2241_v26 = vrot.slane %v2239_v16, 1  ;;  %v12965_v12 = vld [vmem:[%s18161_s1 + $0x510] ss:$20 sps:$4 sm:$0xff]  }
 0x128   : > { %3272 = vmatprep.subr.bf16.mxu0 %v12888_v29  ;;  %3433 = vmatprep.subr.bf16.mxu1 %v12891_v30  ;;  %v12930_v29 = vld [vmem:[%s18161_s1 + $0x504] ss:$20 sps:$4 sm:$0xff]  }
 0x129   : > { %v12931_v30 = vld [vmem:[%s18161_s1 + $0x150] ss:$20 sps:$4 sm:$0xff]  }
 0x12b   : > { %3273 = vmatpush1.bf16.msra.mxu0 %v12886_v31  ;;  %3434 = vmatpush1.bf16.msra.mxu1 %v12889_v34  ;;  %v12928_v31 = vld [vmem:[%s18161_s1 + $0x500] ss:$20 sps:$4 sm:$0xff]   ;;  %v15394_v34 = vsel %vm2184_vm1, %v2238_v24, %v2241_v26  ;;  %v12966_v24 = vld [vmem:[%s18161_s1 + $0x330] ss:$20 sps:$4 sm:$0xff]  }
 0x12c   : > { %3274 = vmatprep.subr.bf16.mxu0 %v12894_v35  ;;  %3435 = vmatprep.subr.bf16.mxu1 %v12897_v39  ;;  %v12932_v35 = vld [vmem:[%s18161_s1 + $0x10] ss:$20 sps:$4 sm:$0xff]   ;;  %v12933_v39 = vld [vmem:[%s18161_s1 + $0x528] ss:$20 sps:$4 sm:$0xff]  }
 0x12f   : > { %3275 = vmatpush1.bf16.msra.mxu0 %v12892_v41  ;;  %3436 = vmatpush1.bf16.msra.mxu1 %v12895_v42  ;;  %v12940_v41 = vld [vmem:[%s18161_s1 + $0x554] ss:$20 sps:$4 sm:$0xff]  }
 0x130   : > { %3276 = vmatprep.subr.bf16.mxu0 %v12900_v43  ;;  %3437 = vmatprep.subr.bf16.mxu1 %v12903_v46  ;;  %v12941_v42 = vld [vmem:[%s18161_s1 + $0x1a0] ss:$20 sps:$4 sm:$0xff]   ;;  %v15422_v43 = vshrl.u32 %v14229_v15, 16  ;;  %v12945_v46 = vld [vmem:[%s18161_s1 + $0x57c] ss:$20 sps:$4 sm:$0xff]  }
 0x133   : > { %3277 = vmatpush1.bf16.msra.mxu0 %v12898_v52  ;;  %3438 = vmatpush1.bf16.msra.mxu1 %v12901_v55  ;;  %v12943_v52 = vld [vmem:[%s18161_s1 + $0x578] ss:$20 sps:$4 sm:$0xff]   ;;  %v12947_v55 = vld [vmem:[%s18161_s1 + $0x88] ss:$20 sps:$4 sm:$0xff]  }
 0x134   : > { %3278 = vmatprep.subr.bf16.mxu0 %v12906_v57  ;;  %3458 = vmatprep.subr.bf16.mxu1 %v12909_v58  ;;  %v12951_v57 = vld [vmem:[%s18161_s1 + $0x290] ss:$20 sps:$4 sm:$0xff]   ;;  %v12952_v58 = vld [vmem:[%s18161_s1 + $0x218] ss:$20 sps:$4 sm:$0xff]  }
 0x136   : > { %3440 = vmatmul.mubr.bf16.vlgmr.msra.gmra.mrb[0].mxu1 %v15331_v62 }
 0x137   : > { %3279 = vmatpush1.bf16.msra.mxu0 %v12904_v61  ;;  %3459 = vmatpush1.bf16.msra.mxu1 %v12907_v63  ;;  %v12955_v61 = vld [vmem:[%s18161_s1 + $0x2b8] ss:$20 sps:$4 sm:$0xff]   ;;  %v12956_v63 = vld [vmem:[%s18161_s1 + $0x240] ss:$20 sps:$4 sm:$0xff]  }
 0x138   : > { %3280 = vmatprep.subr.bf16.mxu0 %v12912_v0  ;;  %3460 = vmatprep.subr.bf16.mxu1 %v12915_v1  ;;  %v12957_v0 = vld [vmem:[%s18161_s1 + $0x420] ss:$20 sps:$4 sm:$0xff]  }
 0x139   : > { %3449 = vmatprep.mubr.bf16.mxu1 %v15343_v2  ;;  %v12958_v1 = vld [vmem:[%s18161_s1 + $0x100] ss:$20 sps:$4 sm:$0xff]  }
 0x13b   : > { %3281 = vmatpush1.bf16.msra.mxu0 %v12910_v6  ;;  %3461 = vmatpush1.bf16.msra.mxu1 %v12913_v7  ;;  %v12961_v6 = vld [vmem:[%s18161_s1 + $0x448] ss:$20 sps:$4 sm:$0xff]  }
 0x13c   : > { %3282 = vmatprep.subr.bf16.mxu0 %v12918_v8  ;;  %3462 = vmatprep.subr.bf16.mxu1 %v12921_v10  ;;  %v12962_v7 = vld [vmem:[%s18161_s1 + $0x128] ss:$20 sps:$4 sm:$0xff]   ;;  %v12964_v10 = vld [vmem:[%s18161_s1 + $0x470] ss:$20 sps:$4 sm:$0xff]  }
 0x13d   : > { %v12963_v8 = vld [vmem:[%s18161_s1 + $0x308] ss:$20 sps:$4 sm:$0xff]  }
 0x13e   : > { %3450 = vmatmul.mubr.bf16.gmra.mrb[28].mxu1 %v15361_v11 }
 0x13f   : > { %3283 = vmatpush1.bf16.msra.mxu0 %v12916_v14  ;;  %3463 = vmatpush1.bf16.msra.mxu1 %v12919_v9 }
 0x140   : > { %3284 = vmatprep.subr.bf16.mxu0 %v12924_v18  ;;  %3464 = vmatprep.subr.bf16.mxu1 %v12927_v19 }
 0x141   : > { %3490 = vmatprep.mubr.bf16.mxu1 %v14246_v33 }
 0x143   : > { %3285 = vmatpush1.bf16.msra.mxu0 %v12922_v20  ;;  %3465 = vmatpush1.bf16.msra.mxu1 %v12925_v23 }
 0x144   : > { %3305 = vmatprep.subr.bf16.mxu0 %v12930_v29  ;;  %11899 = vmatprep.subr.bf16.mxu1 %v12931_v30  ;;  %v12970_v30 = vld [vmem:[%s18161_s1 + $0x4c0] ss:$20 sps:$4 sm:$0xff]  }
 0x146   : > { %3287 = vmatmul.mubr.bf16.vlgmr.msra.gmra.mrb[0].mxu0 %v15331_v62  ;;  %10982 = vmatmul.mubr.msk.bf16.vlgmr.msra.gmra.mrb[0].mxu1 %vm1727_vm0, %v15394_v34 }
 0x147   : > { %3306 = vmatpush1.bf16.msra.mxu0 %v12928_v31  ;;  %11900 = vmatpush3.bf16.msra.mxu1 %v12932_v35  ;;  %v12971_v31 = vld [vmem:[%s18161_s1 + $0x560] ss:$20 sps:$4 sm:$0xff]  }
 0x148   : > { %3307 = vmatprep.subr.bf16.mxu0 %v12935_v37  ;;  %11901 = vmatprep.subr.bf16.mxu1 %v12936_v38  ;;  %v12972_v35 = vld [vmem:[%s18161_s1 + $0x380] ss:$20 sps:$4 sm:$0xff]   ;;  %v12973_v37 = vld [vmem:[%s18161_s1 + $0x4e8] ss:$20 sps:$4 sm:$0xff]  }
 0x149   : > { %3296 = vmatprep.mubr.bf16.mxu0 %v15343_v2  ;;  %3500 = vmatprep.mubr.bf16.mxu1 %v14246_v33  ;;  %v12974_v38 = vld [vmem:[%s18161_s1 + $0x588] ss:$20 sps:$4 sm:$0xff]  }
 0x14b   : > { %3308 = vmatpush1.bf16.msra.mxu0 %v12933_v39  ;;  %11902 = vmatpush3.bf16.msra.mxu1 %v12937_v40  ;;  %v12975_v39 = vld [vmem:[%s18161_s1 + $0x3a8] ss:$20 sps:$4 sm:$0xff]   ;;  %v12978_v40 = vld [vmem:[%s18164_s4 + $0x4] ss:$20 sps:$4 sm:$0xff]  }
 0x14c   : > { %3309 = vmatprep.subr.bf16.mxu0 %v12940_v41  ;;  %11903 = vmatprep.subr.bf16.mxu1 %v12941_v42  ;;  %v12981_v41 = vld [vmem:[%s18164_s4 + $0xc] ss:$20 sps:$4 sm:$0xff]  }
 0x14e   : > { %3297 = vmatmul.mubr.bf16.gmra.mrb[32].mxu0 %v15361_v11  ;;  %10983 = vmatmul.mubr.msk.bf16.gmra.mrb[32].mxu1 %vm1727_vm0, %v15422_v43 }
 0x14f   : > { %3310 = vmatpush1.bf16.msra.mxu0 %v12938_v44  ;;  %11904 = vmatpush3.bf16.msra.mxu1 %v12942_v45  ;;  %v12976_v45 = vld [vmem:[%s18164_s4] ss:$20 sps:$4 sm:$0xff]  }
 0x150   : > { %3311 = vmatprep.subr.bf16.mxu0 %v12945_v46  ;;  %11905 = vmatprep.subr.bf16.mxu1 %v12946_v48  ;;  %v12979_v46 = vld [vmem:[%s18164_s4 + $0x8] ss:$20 sps:$4 sm:$0xff]  }
 0x151   : > { %3337 = vmatprep.mubr.bf16.mxu0 %v14246_v33  ;;  %3541 = vmatprep.mubr.bf16.mxu1 %v14943_v22 }
 0x153   : > { %3312 = vmatpush1.bf16.msra.mxu0 %v12943_v52  ;;  %11906 = vmatpush3.bf16.msra.mxu1 %v12947_v55 }
 0x154   : > { %11907 = vmatprep.subr.bf16.mxu1 %v12948_v47  ;;  %11927 = vmatprep.subr.bf16.mxu0 %v12949_v32 }
 0x156   : > { %10980 = vmatmul.mubr.msk.bf16.vlgmr.msra.gmra.mrb[0].mxu0 %vm1727_vm0, %v15394_v34 }
 0x157   : > { %11908 = vmatpush3.bf16.msra.mxu1 %v12950_v56  ;;  %11928 = vmatpush3.bf16.msra.mxu0 %v12951_v57 }
 0x158   : > { %11909 = vmatprep.subr.bf16.mxu1 %v12952_v58  ;;  %11929 = vmatprep.subr.bf16.mxu0 %v12953_v59  ;;  %v12984_v59 = vld [vmem:[%s18164_s4 + $0x2c] ss:$20 sps:$4 sm:$0xff]  }
 0x159   : > { %3347 = vmatprep.mubr.bf16.mxu0 %v14246_v33 }
 0x15b   : > { %11910 = vmatpush3.bf16.msra.mxu1 %v12954_v60  ;;  %11930 = vmatpush3.bf16.msra.mxu0 %v12955_v61  ;;  %v12987_v60 = vld [vmem:[%s18164_s4 + $0x34] ss:$20 sps:$4 sm:$0xff]  }
 0x15c   : > { %11911 = vmatprep.subr.bf16.mxu1 %v12956_v63  ;;  %11931 = vmatprep.subr.bf16.mxu0 %v12957_v0  ;;  %v12982_v0 = vld [vmem:[%s18164_s4 + $0x28] ss:$20 sps:$4 sm:$0xff]  }
 0x15e   : > { %10981 = vmatmul.mubr.msk.bf16.gmra.mrb[36].mxu0 %vm1727_vm0, %v15422_v43 }
 0x15f   : > { %11912 = vmatpush3.bf16.msra.mxu1 %v12958_v1  ;;  %11932 = vmatpush3.bf16.msra.mxu0 %v12959_v3  ;;  %v12985_v1 = vld [vmem:[%s18164_s4 + $0x30] ss:$20 sps:$4 sm:$0xff]   ;;  %v12990_v3 = vld [vmem:[%s18164_s4 + $0x54] ss:$20 sps:$4 sm:$0xff]  }
 0x160   : > { %11913 = vmatprep.subr.bf16.mxu1 %v12960_v4  ;;  %11933 = vmatprep.subr.bf16.mxu0 %v12961_v6  ;;  %v12993_v4 = vld [vmem:[%s18164_s4 + $0x5c] ss:$20 sps:$4 sm:$0xff]  }
 0x161   : > { %v1829_v13 = vpop.f32.mrb[8].mxu0  ;;  %v1982_v14 = vpop.f32.mrb[8].mxu1  ;;  %3589 = vmatprep.mubr.bf16.mxu0 %v15160_v51  ;;  %v12988_v6 = vld [vmem:[%s18164_s4 + $0x50] ss:$20 sps:$4 sm:$0xff]  }
 0x162   : > { %v1830_v9 = vadd.f32 %v1829_v13, %v15307_v49  ;;  %v1983_v15 = vadd.f32 %v1982_v14, %v15309_v50  ;;  %v1831_v16 = vpop.f32.mrb[9].mxu0  ;;  %v1984_v18 = vpop.f32.mrb[9].mxu1  ;;  %v12967_v49 = vld [vmem:[%s18161_s1 + $0x498] ss:$20 sps:$4 sm:$0xff]   ;;  %v12997_v14 = vld [vmem:[%s18164_s4 + $0x80] ss:$20 sps:$4 sm:$0xff]  }
 0x163   : > { %v1832_v19 = vadd.f32 %v1831_v16, %v15314_v53  ;;  %v1985_v20 = vadd.f32 %v1984_v18, %v15316_v54  ;;  %v1833_v23 = vpop.f32.mrb[10].mxu0  ;;  %11914 = vmatpush3.bf16.msra.mxu1 %v12962_v7  ;;  %11934 = vmatpush3.bf16.msra.mxu0 %v12963_v8  ;;  %v1986_v26 = vpop.f32.mrb[10].mxu1  ;;  %v12968_v50 = vld [vmem:[%s18161_s1 + $0x538] ss:$20 sps:$4 sm:$0xff]   ;;  %v13000_v16 = vld [vmem:[%s18164_s4 + $0xa0] ss:$20 sps:$4 sm:$0xff]  }
 0x164   : > { %v1834_v29 = vpop.f32.mrb[11].mxu0  ;;  %11935 = vmatprep.subr.bf16.mxu0 %v12964_v10  ;;  %12221 = vmatprep.subr.bf16.mxu1 %v12965_v12  ;;  %v1987_v53 = vpop.f32.mrb[11].mxu1  ;;  %v12969_v54 = vld [vmem:[%s18161_s1 + $0x358] ss:$20 sps:$4 sm:$0xff]   ;;  %v12996_v10 = vld [vmem:[%s18164_s4 + $0x7c] ss:$20 sps:$4 sm:$0xff]  }
 0x165   : > { %v12991_v7 = vld [vmem:[%s18164_s4 + $0x58] ss:$20 sps:$4 sm:$0xff]   ;;  %v13003_v18 = vld [vmem:[%s18164_s4 + $0xa8] ss:$20 sps:$4 sm:$0xff]   ;;  %v13012_v53 = vld [vmem:[%s18164_s4 + $0xf0] ss:$20 sps:$4 sm:$0xff]  }
 0x166   : > { %3542 = vmatmul.mubr.bf16.vlgmr.msra.gmra.mrb[36].mxu1 %v15118_v36  ;;  %v14230_v8 = vld [vmem:[%s14445_s20 + $0x4] ss:$20 sps:$4 sm:$0xff]   ;;  %v13006_v23 = vld [vmem:[%s18164_s4 + $0xc8] ss:$20 sps:$4 sm:$0xff]  }
 0x167   : > { %11936 = vmatpush3.bf16.msra.mxu0 %v12966_v24  ;;  %12222 = vmatpush3.bf16.msra.mxu1 %v12965_v12  ;;  %v12999_v12 = vld [vmem:[%s18164_s4 + $0x84] ss:$20 sps:$4 sm:$0xff]   ;;  %v13014_v26 = vld [vmem:[%s18164_s4 + $0xf4] ss:$20 sps:$4 sm:$0xff]   ;;  %v13017_v29 = vld [vmem:[%s18164_s4 + $0xfc] ss:$20 sps:$4 sm:$0xff]  }
 0x168   : > { %11937 = vmatprep.subr.bf16.mxu0 %v12967_v49  ;;  %12223 = vmatprep.subr.bf16.mxu1 %v12968_v50  ;;  %v12994_v13 = vld [vmem:[%s18164_s4 + $0x78] ss:$20 sps:$4 sm:$0xff]   ;;  %v13009_v24 = vld [vmem:[%s18164_s4 + $0xd0] ss:$20 sps:$4 sm:$0xff]  }
 0x169   : > { %3549 = vmatprep.mubr.bf16.mxu1 %v15092_v5 }
 0x16b   : > { %11938 = vmatpush3.bf16.msra.mxu0 %v12969_v54  ;;  %12224 = vmatpush3.bf16.msra.mxu1 %v12968_v50  ;;  %v13015_v54 = vld [vmem:[%s18164_s4 + $0xf8] ss:$20 sps:$4 sm:$0xff]  }
 0x16c   : > { %11939 = vmatprep.subr.bf16.mxu0 %v12970_v30  ;;  %12225 = vmatprep.subr.bf16.mxu1 %v12971_v31 }
 0x16e   : > { %3550 = vmatmul.mubr.bf16.gmra.mrb[40].mxu1 %v15109_v28 }
 0x16f   : > { %11940 = vmatpush3.bf16.msra.mxu0 %v12972_v35  ;;  %12226 = vmatpush3.bf16.msra.mxu1 %v12971_v31 }
 0x170   : > { %11941 = vmatprep.subr.bf16.mxu0 %v12973_v37  ;;  %12227 = vmatprep.subr.bf16.mxu1 %v12974_v38 }
 0x171   : > { %v1880_v42 = vpop.f32.mrb[12].mxu0  ;;  %v2033_v44 = vpop.f32.mrb[12].mxu1  ;;  %12229 = vmatprep.mubr.msk.bf16.mxu1 %vm1727_vm0, %v15394_v34 }
 0x172   : > { %v15558_v48 = vadd.f32 %v1880_v42, %v1830_v9  ;;  %v15560_v52 = vadd.f32 %v2033_v44, %v1983_v15  ;;  %v1882_v55 = vpop.f32.mrb[13].mxu0  ;;  %v2035_v47 = vpop.f32.mrb[13].mxu1  ;;  %v13002_v9 = vld [vmem:[%s18164_s4 + $0xa4] ss:$20 sps:$4 sm:$0xff]   ;;  %v13005_v15 = vld [vmem:[%s18164_s4 + $0xac] ss:$20 sps:$4 sm:$0xff]  }
 0x173   : > { %v15562_v32 = vadd.f32 %v1882_v55, %v1832_v19  ;;  %v15564_v56 = vadd.f32 %v2035_v47, %v1985_v20  ;;  %11942 = vmatpush3.bf16.msra.mxu0 %v12975_v39  ;;  %12228 = vmatpush3.bf16.msra.mxu1 %v12974_v38  ;;  %v1884_v57 = vpop.f32.mrb[14].mxu0  ;;  %v2037_v58 = vpop.f32.mrb[14].mxu1  ;;  %v13008_v19 = vld [vmem:[%s18164_s4 + $0xcc] ss:$20 sps:$4 sm:$0xff]   ;;  %v13011_v20 = vld [vmem:[%s18164_s4 + $0xd4] ss:$20 sps:$4 sm:$0xff]  }
 0x174   : > { %5021 = vmatprep.subr.bf16.mxu0 %v12978_v40  ;;  %5174 = vmatprep.subr.bf16.mxu1 %v12981_v41  ;;  %v1885_v61 = vpop.f32.mrb[15].mxu0  ;;  %v2038_v63 = vpop.f32.mrb[15].mxu1  ;;  %v13020_v42 = vld [vmem:[%s18164_s4 + $0x11c] ss:$20 sps:$4 sm:$0xff]   ;;  %v13023_v44 = vld [vmem:[%s18164_s4 + $0x124] ss:$20 sps:$4 sm:$0xff]  }
 0x175   : > { %v13018_v55 = vld [vmem:[%s18164_s4 + $0x118] ss:$20 sps:$4 sm:$0xff]   ;;  %v13021_v47 = vld [vmem:[%s18164_s4 + $0x120] ss:$20 sps:$4 sm:$0xff]  }
 0x176   : > { %3590 = vmatmul.mubr.bf16.vlgmr.msra.gmra.mrb[40].mxu0 %v15331_v62  ;;  %12230 = vmatmul.mubr.msk.bf16.vlgmr.msra.gmra.mrb[44].mxu1 %vm1727_vm0, %v15422_v43 }
 0x177   : > { %5022 = vmatpush1.bf16.msra.mxu0 %v12976_v45  ;;  %5175 = vmatpush1.bf16.msra.mxu1 %v12979_v46 }
 0x178   : > { %5023 = vmatprep.subr.bf16.mxu0 %v12984_v59  ;;  %5176 = vmatprep.subr.bf16.mxu1 %v12987_v60  ;;  %v13026_v59 = vld [vmem:[%s18164_s4 + $0x144] ss:$20 sps:$4 sm:$0xff]   ;;  %v13029_v60 = vld [vmem:[%s18164_s4 + $0x14c] ss:$20 sps:$4 sm:$0xff]  }
 0x179   : > { %3597 = vmatprep.mubr.bf16.mxu0 %v15343_v2  ;;  %5206 = vmatprep.mubr.bf16.mxu1 %v14230_v8 }
 0x17b   : > { %5024 = vmatpush1.bf16.msra.mxu0 %v12982_v0  ;;  %5177 = vmatpush1.bf16.msra.mxu1 %v12985_v1  ;;  %v13024_v0 = vld [vmem:[%s18164_s4 + $0x140] ss:$20 sps:$4 sm:$0xff]  }
 0x17c   : > { %5025 = vmatprep.subr.bf16.mxu0 %v12990_v3  ;;  %5178 = vmatprep.subr.bf16.mxu1 %v12993_v4 }
 0x17e   : > { %3598 = vmatmul.mubr.bf16.gmra.mrb[44].mxu0 %v15361_v11 }
 0x17f   : > { %5026 = vmatpush1.bf16.msra.mxu0 %v12988_v6  ;;  %5179 = vmatpush1.bf16.msra.mxu1 %v12991_v7 }
 0x180   : > { %5027 = vmatprep.subr.bf16.mxu0 %v12996_v10  ;;  %5180 = vmatprep.subr.bf16.mxu1 %v12999_v12 }
 0x181   : > { %5053 = vmatprep.mubr.bf16.mxu0 %v14230_v8  ;;  %v13027_v8 = vld [vmem:[%s18164_s4 + $0x148] ss:$20 sps:$4 sm:$0xff]  }
 0x183   : > { %5028 = vmatpush1.bf16.msra.mxu0 %v12994_v13  ;;  %5181 = vmatpush1.bf16.msra.mxu1 %v12997_v14  ;;  %v13032_v13 = vld [vmem:[%s18164_s4 + $0x16c] ss:$20 sps:$4 sm:$0xff]   ;;  %v13035_v14 = vld [vmem:[%s18164_s4 + $0x174] ss:$20 sps:$4 sm:$0xff]  }
 0x184   : > { %5029 = vmatprep.subr.bf16.mxu0 %v13002_v9  ;;  %5182 = vmatprep.subr.bf16.mxu1 %v13005_v15 }
 0x187   : > { %5030 = vmatpush1.bf16.msra.mxu0 %v13000_v16  ;;  %5183 = vmatpush1.bf16.msra.mxu1 %v13003_v18  ;;  %v13030_v16 = vld [vmem:[%s18164_s4 + $0x168] ss:$20 sps:$4 sm:$0xff]   ;;  %v13033_v18 = vld [vmem:[%s18164_s4 + $0x170] ss:$20 sps:$4 sm:$0xff]  }
 0x188   : > { %5031 = vmatprep.subr.bf16.mxu0 %v13008_v19  ;;  %5184 = vmatprep.subr.bf16.mxu1 %v13011_v20  ;;  %v13038_v19 = vld [vmem:[%s18164_s4 + $0x194] ss:$20 sps:$4 sm:$0xff]   ;;  %v13041_v20 = vld [vmem:[%s18164_s4 + $0x19c] ss:$20 sps:$4 sm:$0xff]  }
 0x189   : > { %v11853_v49 = vpop.f32.mrb[16].mxu0  ;;  %v11881_v50 = vpop.f32.mrb[16].mxu1 }
 0x18a   : > { %v11854_v30 = vpop.f32.mrb[17].mxu0  ;;  %v11882_v31 = vpop.f32.mrb[17].mxu1 }
 0x18b   : > { %v11855_v35 = vadd.f32 %v11854_v30, %v11853_v49  ;;  %v11883_v37 = vadd.f32 %v11882_v31, %v11881_v50  ;;  %v11856_v38 = vpop.f32.mrb[18].mxu0  ;;  %v11884_v39 = vpop.f32.mrb[18].mxu1  ;;  %5032 = vmatpush1.bf16.msra.mxu0 %v13006_v23  ;;  %5185 = vmatpush1.bf16.msra.mxu1 %v13009_v24  ;;  %v13036_v24 = vld [vmem:[%s18164_s4 + $0x190] ss:$20 sps:$4 sm:$0xff]  }
 0x18c   : > { %v11857_v40 = vpop.f32.mrb[19].mxu0  ;;  %v11885_v41 = vpop.f32.mrb[19].mxu1  ;;  %5033 = vmatprep.subr.bf16.mxu0 %v13014_v26  ;;  %5186 = vmatprep.subr.bf16.mxu1 %v13017_v29  ;;  %v13039_v26 = vld [vmem:[%s18164_s4 + $0x198] ss:$20 sps:$4 sm:$0xff]   ;;  %v13044_v30 = vld [vmem:[%s18164_s4 + $0x1bc] ss:$20 sps:$4 sm:$0xff]  }
 0x18d   : > { %v11858_v45 = vadd.f32 %v11857_v40, %v11856_v38  ;;  %v11886_v46 = vadd.f32 %v11885_v41, %v11884_v39  ;;  %v2123_v57 = vadd.f32 %v11883_v37, %v11855_v35  ;;  %v13047_v31 = vld [vmem:[%s18164_s4 + $0x1c4] ss:$20 sps:$4 sm:$0xff]   ;;  %v13045_v38 = vld [vmem:[%s18164_s4 + $0x1c0] ss:$20 sps:$4 sm:$0xff]  }
 0x18e   : > { %v13042_v37 = vld [vmem:[%s18164_s4 + $0x1b8] ss:$20 sps:$4 sm:$0xff]   ;;  %v13048_v41 = vld [vmem:[%s18164_s4 + $0x1e0] ss:$20 sps:$4 sm:$0xff]  }
 0x18f   : > { %5034 = vmatpush1.bf16.msra.mxu0 %v13012_v53  ;;  %5187 = vmatpush1.bf16.msra.mxu1 %v13015_v54  ;;  %v2126_v58 = vadd.f32 %v11886_v46, %v11858_v45  ;;  %v13050_v39 = vld [vmem:[%s18164_s4 + $0x1e4] ss:$20 sps:$4 sm:$0xff]   ;;  %v13053_v40 = vld [vmem:[%s18164_s4 + $0x1ec] ss:$20 sps:$4 sm:$0xff]   ;;  %v13059_v45 = vld [vmem:[%s18164_s4 + $0x214] ss:$20 sps:$4 sm:$0xff]  }
 0x190   : > { %5035 = vmatprep.subr.bf16.mxu0 %v13020_v42  ;;  %5188 = vmatprep.subr.bf16.mxu1 %v13023_v44  ;;  %v13051_v42 = vld [vmem:[%s18164_s4 + $0x1e8] ss:$20 sps:$4 sm:$0xff]   ;;  %v13056_v44 = vld [vmem:[%s18164_s4 + $0x20c] ss:$20 sps:$4 sm:$0xff]  }
 0x191   : > { %v11859_v61 = vpop.f32.mrb[20].mxu0  ;;  %v11887_v63 = vpop.f32.mrb[20].mxu1  ;;  %v13054_v46 = vld [vmem:[%s18164_s4 + $0x208] ss:$20 sps:$4 sm:$0xff]  }
 0x192   : > { %v11860_v1 = vpop.f32.mrb[21].mxu0  ;;  %v11888_v3 = vpop.f32.mrb[21].mxu1 }
 0x193   : > { %v11861_v4 = vadd.f32 %v11860_v1, %v11859_v61  ;;  %v11889_v6 = vadd.f32 %v11888_v3, %v11887_v63  ;;  %v11862_v7 = vpop.f32.mrb[22].mxu0  ;;  %5036 = vmatpush1.bf16.msra.mxu0 %v13018_v55  ;;  %5189 = vmatpush1.bf16.msra.mxu1 %v13021_v47  ;;  %v11890_v10 = vpop.f32.mrb[22].mxu1  ;;  %v13057_v55 = vld [vmem:[%s18164_s4 + $0x210] ss:$20 sps:$4 sm:$0xff]   ;;  %v13062_v47 = vld [vmem:[%s18164_s4 + $0x234] ss:$20 sps:$4 sm:$0xff]  }
 0x194   : > { %v11863_v12 = vpop.f32.mrb[23].mxu0  ;;  %5037 = vmatprep.subr.bf16.mxu0 %v13026_v59  ;;  %5190 = vmatprep.subr.bf16.mxu1 %v13029_v60  ;;  %v11891_v9 = vpop.f32.mrb[23].mxu1  ;;  %v13063_v59 = vld [vmem:[%s18164_s4 + $0x238] ss:$20 sps:$4 sm:$0xff]   ;;  %v13068_v60 = vld [vmem:[%s18164_s4 + $0x25c] ss:$20 sps:$4 sm:$0xff]  }
 0x195   : > { %v2131_v15 = vadd.f32 %v11889_v6, %v11861_v4  ;;  %v13071_v61 = vld [vmem:[%s18164_s4 + $0x264] ss:$20 sps:$4 sm:$0xff]   ;;  %v13077_v3 = vld [vmem:[%s18164_s4 + $0x28c] ss:$20 sps:$4 sm:$0xff]   ;;  %v13075_v6 = vld [vmem:[%s18164_s4 + $0x288] ss:$20 sps:$4 sm:$0xff]  }
 0x196   : > { %v13066_v63 = vld [vmem:[%s18164_s4 + $0x258] ss:$20 sps:$4 sm:$0xff]   ;;  %v13072_v4 = vld [vmem:[%s18164_s4 + $0x280] ss:$20 sps:$4 sm:$0xff]   ;;  %v13078_v10 = vld [vmem:[%s18164_s4 + $0x2a8] ss:$20 sps:$4 sm:$0xff]  }
 0x197   : > { %5038 = vmatpush1.bf16.msra.mxu0 %v13024_v0  ;;  %5191 = vmatpush1.bf16.msra.mxu1 %v13027_v8  ;;  %v13069_v0 = vld [vmem:[%s18164_s4 + $0x260] ss:$20 sps:$4 sm:$0xff]   ;;  %v13074_v1 = vld [vmem:[%s18164_s4 + $0x284] ss:$20 sps:$4 sm:$0xff]   ;;  %v13089_v9 = vld [vmem:[%s18164_s4 + $0x2dc] ss:$20 sps:$4 sm:$0xff]  }
 0x198   : > { %5039 = vmatprep.subr.bf16.mxu0 %v13032_v13  ;;  %5192 = vmatprep.subr.bf16.mxu1 %v13035_v14  ;;  %v13080_v7 = vld [vmem:[%s18164_s4 + $0x2ac] ss:$20 sps:$4 sm:$0xff]   ;;  %v13083_v8 = vld [vmem:[%s18164_s4 + $0x2b4] ss:$20 sps:$4 sm:$0xff]   ;;  %v13081_v12 = vld [vmem:[%s18164_s4 + $0x2b0] ss:$20 sps:$4 sm:$0xff]  }
 0x199   : > { %v12219_v23 = vpop.f32.mrb[24].mxu0  ;;  %v14231_v13 = vld [vmem:[%s14445_s20] ss:$20 sps:$4 sm:$0xff]  }
 0x19a   : > { %v15692_v29 = vadd.f32 %v12219_v23, %v2131_v15  ;;  %v2170_v49 = vpop.f32.mrb[25].mxu0  ;;  %v13086_v14 = vld [vmem:[%s18164_s4 + $0x2d4] ss:$20 sps:$4 sm:$0xff]   ;;  %v13084_v15 = vld [vmem:[%s18164_s4 + $0x2d0] ss:$20 sps:$4 sm:$0xff]  }
 0x19b   : > { %v15694_v50 = vadd.f32 %v2170_v49, %v2123_v57  ;;  %v12220_v53 = vpop.f32.mrb[26].mxu0  ;;  %5040 = vmatpush1.bf16.msra.mxu0 %v13030_v16  ;;  %5193 = vmatpush1.bf16.msra.mxu1 %v13033_v18  ;;  %v13065_v57 = vld [vmem:[%s18164_s4 + $0x23c] ss:$20 sps:$4 sm:$0xff]   ;;  %v13087_v16 = vld [vmem:[%s18164_s4 + $0x2d8] ss:$20 sps:$4 sm:$0xff]  }
 0x19c   : > { %v2173_v54 = vpop.f32.mrb[27].mxu0  ;;  %5041 = vmatprep.subr.bf16.mxu0 %v13038_v19  ;;  %5194 = vmatprep.subr.bf16.mxu1 %v13041_v20  ;;  %v13092_v18 = vld [vmem:[%s18164_s4 + $0x2fc] ss:$20 sps:$4 sm:$0xff]   ;;  %v13095_v19 = vld [vmem:[%s18164_s4 + $0x304] ss:$20 sps:$4 sm:$0xff]  }
 0x19d   : > { %v15702_v35 = vadd.f32 %v2173_v54, %v2126_v58  ;;  %v13060_v58 = vld [vmem:[%s18164_s4 + $0x230] ss:$20 sps:$4 sm:$0xff]   ;;  %v13090_v20 = vld [vmem:[%s18164_s4 + $0x2f8] ss:$20 sps:$4 sm:$0xff]   ;;  %v13093_v23 = vld [vmem:[%s18164_s4 + $0x300] ss:$20 sps:$4 sm:$0xff]  }
 0x19e   : > { %v13096_v49 = vld [vmem:[%s18164_s4 + $0x320] ss:$20 sps:$4 sm:$0xff]   ;;  %v13099_v53 = vld [vmem:[%s18164_s4 + $0x328] ss:$20 sps:$4 sm:$0xff]  }
 0x19f   : > { %5042 = vmatpush1.bf16.msra.mxu0 %v13036_v24  ;;  %5195 = vmatpush1.bf16.msra.mxu1 %v13039_v26  ;;  %v13098_v24 = vld [vmem:[%s18164_s4 + $0x324] ss:$20 sps:$4 sm:$0xff]   ;;  %v13101_v26 = vld [vmem:[%s18164_s4 + $0x32c] ss:$20 sps:$4 sm:$0xff]  }
 0x1a0   : > { %5043 = vmatprep.subr.bf16.mxu0 %v13044_v30  ;;  %5196 = vmatprep.subr.bf16.mxu1 %v13047_v31  ;;  %v15824_v54 = vld [vmem:[%s14445_s20 + $0xc] ss:$20 sps:$4 sm:$0xff]   ;;  %v13107_v31 = vld [vmem:[%s18164_s4 + $0x354] ss:$20 sps:$4 sm:$0xff]  }
 0x1a1   : > { %v13104_v30 = vld [vmem:[%s18164_s4 + $0x34c] ss:$20 sps:$4 sm:$0xff]  }
 0x1a3   : > { %5044 = vmatpush1.bf16.msra.mxu0 %v13042_v37  ;;  %5197 = vmatpush1.bf16.msra.mxu1 %v13045_v38  ;;  %v13102_v37 = vld [vmem:[%s18164_s4 + $0x348] ss:$20 sps:$4 sm:$0xff]   ;;  %v13105_v38 = vld [vmem:[%s18164_s4 + $0x350] ss:$20 sps:$4 sm:$0xff]  }
 0x1a4   : > { %5045 = vmatprep.subr.bf16.mxu0 %v13050_v39  ;;  %5198 = vmatprep.subr.bf16.mxu1 %v13053_v40  ;;  %v13110_v39 = vld [vmem:[%s18164_s4 + $0x374] ss:$20 sps:$4 sm:$0xff]   ;;  %v13113_v40 = vld [vmem:[%s18164_s4 + $0x37c] ss:$20 sps:$4 sm:$0xff]  }
 0x1a7   : > { %5046 = vmatpush1.bf16.msra.mxu0 %v13048_v41  ;;  %5199 = vmatpush1.bf16.msra.mxu1 %v13051_v42  ;;  %v13108_v41 = vld [vmem:[%s18164_s4 + $0x370] ss:$20 sps:$4 sm:$0xff]   ;;  %v13111_v42 = vld [vmem:[%s18164_s4 + $0x378] ss:$20 sps:$4 sm:$0xff]  }
 0x1a8   : > { %5047 = vmatprep.subr.bf16.mxu0 %v13056_v44  ;;  %5200 = vmatprep.subr.bf16.mxu1 %v13059_v45  ;;  %v13116_v44 = vld [vmem:[%s18164_s4 + $0x39c] ss:$20 sps:$4 sm:$0xff]   ;;  %v13119_v45 = vld [vmem:[%s18164_s4 + $0x3a4] ss:$20 sps:$4 sm:$0xff]  }
 0x1ab   : > { %5048 = vmatpush1.bf16.msra.mxu0 %v13054_v46  ;;  %5201 = vmatpush1.bf16.msra.mxu1 %v13057_v55  ;;  %v13114_v46 = vld [vmem:[%s18164_s4 + $0x398] ss:$20 sps:$4 sm:$0xff]   ;;  %v13117_v55 = vld [vmem:[%s18164_s4 + $0x3a0] ss:$20 sps:$4 sm:$0xff]  }
 0x1ac   : > { %5049 = vmatprep.subr.bf16.mxu0 %v13062_v47  ;;  %5202 = vmatprep.subr.bf16.mxu1 %v13065_v57  ;;  %v13122_v47 = vld [vmem:[%s18164_s4 + $0x3c4] ss:$20 sps:$4 sm:$0xff]   ;;  %v13125_v57 = vld [vmem:[%s18164_s4 + $0x3cc] ss:$20 sps:$4 sm:$0xff]  }
 0x1af   : > { %5050 = vmatpush1.bf16.msra.mxu0 %v13060_v58  ;;  %5203 = vmatpush1.bf16.msra.mxu1 %v13063_v59  ;;  %v13120_v59 = vld [vmem:[%s18164_s4 + $0x3c0] ss:$20 sps:$4 sm:$0xff]  }
 0x1b0   : > { %5051 = vmatprep.subr.bf16.mxu0 %v13068_v60  ;;  %5204 = vmatprep.subr.bf16.mxu1 %v13071_v61  ;;  %v13123_v60 = vld [vmem:[%s18164_s4 + $0x3c8] ss:$20 sps:$4 sm:$0xff]  }
 0x1b3   : > { %5052 = vmatpush1.bf16.msra.mxu0 %v13066_v63  ;;  %5205 = vmatpush1.bf16.msra.mxu1 %v13069_v0  ;;  %v13128_v0 = vld [vmem:[%s18164_s4 + $0x3ec] ss:$20 sps:$4 sm:$0xff]  }
 0x1b4   : > { %5072 = vmatprep.subr.bf16.mxu0 %v13074_v1  ;;  %5225 = vmatprep.subr.bf16.mxu1 %v13077_v3  ;;  %v13131_v1 = vld [vmem:[%s18164_s4 + $0x3f4] ss:$20 sps:$4 sm:$0xff]  }
 0x1b6   : > { %5054 = vmatmul.mubr.bf16.vlgmr.msra.gmra.mrb[48].mxu0 %v14231_v13  ;;  %5207 = vmatmul.mubr.bf16.vlgmr.msra.gmra.mrb[48].mxu1 %v14231_v13  ;;  %v13140_v13 = vld [vmem:[%s18164_s4 + $0x43c] ss:$20 sps:$4 sm:$0xff]  }
 0x1b7   : > { %5073 = vmatpush1.bf16.msra.mxu0 %v13072_v4  ;;  %5226 = vmatpush1.bf16.msra.mxu1 %v13075_v6 }
 0x1b8   : > { %5074 = vmatprep.subr.bf16.mxu0 %v13080_v7  ;;  %5227 = vmatprep.subr.bf16.mxu1 %v13083_v8  ;;  %v13129_v7 = vld [vmem:[%s18164_s4 + $0x3f0] ss:$20 sps:$4 sm:$0xff]   ;;  %v13134_v8 = vld [vmem:[%s18164_s4 + $0x414] ss:$20 sps:$4 sm:$0xff]  }
 0x1b9   : > { %5063 = vmatprep.mubr.bf16.mxu0 %v14581_v25  ;;  %5216 = vmatprep.mubr.bf16.mxu1 %v14581_v25 }
 0x1bb   : > { %5075 = vmatpush1.bf16.msra.mxu0 %v13078_v10  ;;  %5228 = vmatpush1.bf16.msra.mxu1 %v13081_v12  ;;  %v13132_v10 = vld [vmem:[%s18164_s4 + $0x410] ss:$20 sps:$4 sm:$0xff]   ;;  %v13135_v12 = vld [vmem:[%s18164_s4 + $0x418] ss:$20 sps:$4 sm:$0xff]  }
 0x1bc   : > { %5076 = vmatprep.subr.bf16.mxu0 %v13086_v14  ;;  %5229 = vmatprep.subr.bf16.mxu1 %v13089_v9  ;;  %v13143_v14 = vld [vmem:[%s18164_s4 + $0x444] ss:$20 sps:$4 sm:$0xff]  }
 0x1bd   : > { %v13138_v9 = vld [vmem:[%s18164_s4 + $0x438] ss:$20 sps:$4 sm:$0xff]  }
 0x1be   : > { %5064 = vmatmul.mubr.bf16.gmra.mrb[52].mxu0 %v14586_v27  ;;  %5217 = vmatmul.mubr.bf16.gmra.mrb[52].mxu1 %v14586_v27 }
 0x1bf   : > { %5077 = vmatpush1.bf16.msra.mxu0 %v13084_v15  ;;  %5230 = vmatpush1.bf16.msra.mxu1 %v13087_v16  ;;  %v13141_v15 = vld [vmem:[%s18164_s4 + $0x440] ss:$20 sps:$4 sm:$0xff]   ;;  %v13146_v16 = vld [vmem:[%s18164_s4 + $0x464] ss:$20 sps:$4 sm:$0xff]  }
 0x1c0   : > { %5078 = vmatprep.subr.bf16.mxu0 %v13092_v18  ;;  %5231 = vmatprep.subr.bf16.mxu1 %v13095_v19  ;;  %v13149_v18 = vld [vmem:[%s18164_s4 + $0x46c] ss:$20 sps:$4 sm:$0xff]  }
 0x1c1   : > { %5104 = vmatprep.mubr.bf16.mxu0 %v15824_v54  ;;  %5257 = vmatprep.mubr.bf16.mxu1 %v15824_v54 }
 0x1c3   : > { %5079 = vmatpush1.bf16.msra.mxu0 %v13090_v20  ;;  %5232 = vmatpush1.bf16.msra.mxu1 %v13093_v23  ;;  %v13144_v20 = vld [vmem:[%s18164_s4 + $0x460] ss:$20 sps:$4 sm:$0xff]   ;;  %v13147_v23 = vld [vmem:[%s18164_s4 + $0x468] ss:$20 sps:$4 sm:$0xff]  }
 0x1c4   : > { %5080 = vmatprep.subr.bf16.mxu0 %v13098_v24  ;;  %5233 = vmatprep.subr.bf16.mxu1 %v13101_v26 }
 0x1c7   : > { %5081 = vmatpush1.bf16.msra.mxu0 %v13096_v49  ;;  %5234 = vmatpush1.bf16.msra.mxu1 %v13099_v53  ;;  %v13152_v49 = vld [vmem:[%s18164_s4 + $0x48c] ss:$20 sps:$4 sm:$0xff]   ;;  %v13155_v53 = vld [vmem:[%s18164_s4 + $0x494] ss:$20 sps:$4 sm:$0xff]  }
 0x1c8   : > { %5082 = vmatprep.subr.bf16.mxu0 %v13104_v30  ;;  %5235 = vmatprep.subr.bf16.mxu1 %v13107_v31 }
 0x1cb   : > { %5083 = vmatpush1.bf16.msra.mxu0 %v13102_v37  ;;  %5236 = vmatpush1.bf16.msra.mxu1 %v13105_v38  ;;  %v13153_v38 = vld [vmem:[%s18164_s4 + $0x490] ss:$20 sps:$4 sm:$0xff]  }
 0x1cc   : > { %5084 = vmatprep.subr.bf16.mxu0 %v13110_v39  ;;  %5237 = vmatprep.subr.bf16.mxu1 %v13113_v40  ;;  %v13158_v39 = vld [vmem:[%s18164_s4 + $0x4b4] ss:$20 sps:$4 sm:$0xff]   ;;  %v13156_v40 = vld [vmem:[%s18164_s4 + $0x4b0] ss:$20 sps:$4 sm:$0xff]  }
 0x1cf   : > { %5085 = vmatpush1.bf16.msra.mxu0 %v13108_v41  ;;  %5238 = vmatpush1.bf16.msra.mxu1 %v13111_v42  ;;  %v13159_v41 = vld [vmem:[%s18164_s4 + $0x4b8] ss:$20 sps:$4 sm:$0xff]   ;;  %v13164_v42 = vld [vmem:[%s18164_s4 + $0x4dc] ss:$20 sps:$4 sm:$0xff]  }
 0x1d0   : > { %5086 = vmatprep.subr.bf16.mxu0 %v13116_v44  ;;  %5239 = vmatprep.subr.bf16.mxu1 %v13119_v45  ;;  %v13167_v44 = vld [vmem:[%s18164_s4 + $0x4e4] ss:$20 sps:$4 sm:$0xff]  }
 0x1d1   : > { %v3400_v58 = vpop.f32.mrb[24].mxu1  ;;  %v13162_v45 = vld [vmem:[%s18164_s4 + $0x4d8] ss:$20 sps:$4 sm:$0xff]  }
 0x1d2   : > { %v15877_v61 = vadd.f32 %v3400_v58, %v15560_v52  ;;  %v3402_v63 = vpop.f32.mrb[25].mxu1  ;;  %v13126_v52 = vld [vmem:[%s18164_s4 + $0x3e8] ss:$20 sps:$4 sm:$0xff]  }
 0x1d3   : > { %v15886_v3 = vadd.f32 %v3402_v63, %v15564_v56  ;;  %5087 = vmatpush1.bf16.msra.mxu0 %v13114_v46  ;;  %5240 = vmatpush1.bf16.msra.mxu1 %v13117_v55  ;;  %v3404_v4 = vpop.f32.mrb[26].mxu1  ;;  %v13137_v56 = vld [vmem:[%s18164_s4 + $0x41c] ss:$20 sps:$4 sm:$0xff]   ;;  %v13165_v46 = vld [vmem:[%s18164_s4 + $0x4e0] ss:$20 sps:$4 sm:$0xff]  }
 0x1d4   : > { %5088 = vmatprep.subr.bf16.mxu0 %v13122_v47  ;;  %5241 = vmatprep.subr.bf16.mxu1 %v13125_v57  ;;  %v3405_v6 = vpop.f32.mrb[27].mxu1  ;;  %v13170_v55 = vld [vmem:[%s18164_s4 + $0x504] ss:$20 sps:$4 sm:$0xff]   ;;  %v13173_v47 = vld [vmem:[%s18164_s4 + $0x50c] ss:$20 sps:$4 sm:$0xff]  }
 0x1d5   : > { %v13168_v57 = vld [vmem:[%s18164_s4 + $0x500] ss:$20 sps:$4 sm:$0xff]   ;;  %v13171_v58 = vld [vmem:[%s18164_s4 + $0x508] ss:$20 sps:$4 sm:$0xff]  }
 0x1d6   : > { %v15991_v63 = vld [vmem:[%s14445_s20 + $0x8] ss:$20 sps:$4 sm:$0xff]  }
 0x1d7   : > { %5089 = vmatpush1.bf16.msra.mxu0 %v13120_v59  ;;  %5242 = vmatpush1.bf16.msra.mxu1 %v13123_v60  ;;  %v13176_v59 = vld [vmem:[%s18164_s4 + $0x52c] ss:$20 sps:$4 sm:$0xff]   ;;  %v13179_v60 = vld [vmem:[%s18164_s4 + $0x534] ss:$20 sps:$4 sm:$0xff]   ;;  %v13185_v6 = vld [vmem:[%s18164_s4 + $0x55c] ss:$20 sps:$4 sm:$0xff]  }
 0x1d8   : > { %5090 = vmatprep.subr.bf16.mxu0 %v13128_v0  ;;  %5243 = vmatprep.subr.bf16.mxu1 %v13131_v1  ;;  %v13174_v0 = vld [vmem:[%s18164_s4 + $0x528] ss:$20 sps:$4 sm:$0xff]   ;;  %v13177_v1 = vld [vmem:[%s18164_s4 + $0x530] ss:$20 sps:$4 sm:$0xff]  }
 0x1d9   : > { %v13182_v4 = vld [vmem:[%s18164_s4 + $0x554] ss:$20 sps:$4 sm:$0xff]  }
 0x1db   : > { %5091 = vmatpush1.bf16.msra.mxu0 %v13126_v52  ;;  %5244 = vmatpush1.bf16.msra.mxu1 %v13129_v7  ;;  %v13180_v52 = vld [vmem:[%s18164_s4 + $0x550] ss:$20 sps:$4 sm:$0xff]   ;;  %v13183_v7 = vld [vmem:[%s18164_s4 + $0x558] ss:$20 sps:$4 sm:$0xff]  }
 0x1dc   : > { %5092 = vmatprep.subr.bf16.mxu0 %v13134_v8  ;;  %5245 = vmatprep.subr.bf16.mxu1 %v13137_v56  ;;  %v13188_v8 = vld [vmem:[%s18164_s4 + $0x57c] ss:$20 sps:$4 sm:$0xff]   ;;  %v13191_v56 = vld [vmem:[%s18164_s4 + $0x584] ss:$20 sps:$4 sm:$0xff]  }
 0x1df   : > { %5093 = vmatpush1.bf16.msra.mxu0 %v13132_v10  ;;  %5246 = vmatpush1.bf16.msra.mxu1 %v13135_v12  ;;  %v13186_v10 = vld [vmem:[%s18164_s4 + $0x578] ss:$20 sps:$4 sm:$0xff]   ;;  %v13189_v12 = vld [vmem:[%s18164_s4 + $0x580] ss:$20 sps:$4 sm:$0xff]  }
 0x1e0   : > { %5094 = vmatprep.subr.bf16.mxu0 %v13140_v13  ;;  %5247 = vmatprep.subr.bf16.mxu1 %v13143_v14  ;;  %v13192_v13 = vld [vmem:[%s18164_s4 + $0x150] ss:$20 sps:$4 sm:$0xff]  }
 0x1e1   : > { %v3247_v19 = vpop.f32.mrb[28].mxu0  ;;  %v13193_v14 = vld [vmem:[%s18164_s4 + $0x3d0] ss:$20 sps:$4 sm:$0xff]  }
 0x1e2   : > { %v15931_v24 = vadd.f32 %v3247_v19, %v15558_v48  ;;  %v3249_v26 = vpop.f32.mrb[29].mxu0  ;;  %v13150_v48 = vld [vmem:[%s18164_s4 + $0x488] ss:$20 sps:$4 sm:$0xff]   ;;  %v16050_v19 = vld [vmem:[%s14445_s20 + $0x10] ss:$20 sps:$4 sm:$0xff]  }
 0x1e3   : > { %v15940_v30 = vadd.f32 %v3249_v26, %v15562_v32  ;;  %5095 = vmatpush1.bf16.msra.mxu0 %v13138_v9  ;;  %5248 = vmatpush1.bf16.msra.mxu1 %v13141_v15  ;;  %v3251_v31 = vpop.f32.mrb[30].mxu0  ;;  %v13161_v32 = vld [vmem:[%s18164_s4 + $0x4bc] ss:$20 sps:$4 sm:$0xff]   ;;  %v13200_v26 = vld [vmem:[%s18164_s4 + $0x1a0] ss:$20 sps:$4 sm:$0xff]  }
 0x1e4   : > { %5096 = vmatprep.subr.bf16.mxu0 %v13146_v16  ;;  %5249 = vmatprep.subr.bf16.mxu1 %v13149_v18  ;;  %v3252_v37 = vpop.f32.mrb[31].mxu0  ;;  %v13194_v9 = vld [vmem:[%s18164_s4 + $0x10] ss:$20 sps:$4 sm:$0xff]   ;;  %v13196_v16 = vld [vmem:[%s18164_s4 + $0x178] ss:$20 sps:$4 sm:$0xff]  }
 0x1e5   : > { %v13195_v15 = vld [vmem:[%s18164_s4 + $0x290] ss:$20 sps:$4 sm:$0xff]   ;;  %v13197_v18 = vld [vmem:[%s18164_s4 + $0x3f8] ss:$20 sps:$4 sm:$0xff]   ;;  %v13202_v31 = vld [vmem:[%s18164_s4 + $0x60] ss:$20 sps:$4 sm:$0xff]  }
 0x1e6   : > { %v13203_v37 = vld [vmem:[%s18164_s4 + $0x2e0] ss:$20 sps:$4 sm:$0xff]  }
 0x1e7   : > { %5097 = vmatpush1.bf16.msra.mxu0 %v13144_v20  ;;  %5250 = vmatpush1.bf16.msra.mxu1 %v13147_v23  ;;  %v13198_v20 = vld [vmem:[%s18164_s4 + $0x38] ss:$20 sps:$4 sm:$0xff]  }
 0x1e8   : > { %5098 = vmatprep.subr.bf16.mxu0 %v13152_v49  ;;  %5251 = vmatprep.subr.bf16.mxu1 %v13155_v53  ;;  %v13199_v23 = vld [vmem:[%s18164_s4 + $0x2b8] ss:$20 sps:$4 sm:$0xff]   ;;  %v13201_v49 = vld [vmem:[%s18164_s4 + $0x420] ss:$20 sps:$4 sm:$0xff]   ;;  %v7290_v53 = vlaneseq }
 0x1eb   : > { %5099 = vmatpush1.bf16.msra.mxu0 %v13150_v48  ;;  %5252 = vmatpush1.bf16.msra.mxu1 %v13153_v38  ;;  %v13204_v48 = vld [vmem:[%s18164_s4 + $0x1c8] ss:$20 sps:$4 sm:$0xff]  }
 0x1ec   : > { %5100 = vmatprep.subr.bf16.mxu0 %v13158_v39  ;;  %5253 = vmatprep.subr.bf16.mxu1 %v13161_v32  ;;  %v13205_v38 = vld [vmem:[%s18164_s4 + $0x448] ss:$20 sps:$4 sm:$0xff]   ;;  %v16083_v39 = vld [vmem:[%s14445_s20 + $0x38] ss:$0 sps:$4 sm:$0x11]   ;;  %v16089_v32 = vshrl.u32 %v7290_v53, 7 }
 0x1ed   : > { %v13221_v53 = vld [vmem:[%s18164_s4 + $0x4e8] ss:$20 sps:$4 sm:$0xff]  }
 0x1ef   : > { %5101 = vmatpush1.bf16.msra.mxu0 %v13156_v40  ;;  %5254 = vmatpush1.bf16.msra.mxu1 %v13159_v41  ;;  %v13206_v40 = vld [vmem:[%s18164_s4 + $0x88] ss:$20 sps:$4 sm:$0xff]  }
 0x1f0   : > { %5102 = vmatprep.subr.bf16.mxu0 %v13164_v42  ;;  %5255 = vmatprep.subr.bf16.mxu1 %v13167_v44  ;;  %v13207_v41 = vld [vmem:[%s18164_s4 + $0x308] ss:$20 sps:$4 sm:$0xff]   ;;  %v13208_v42 = vld [vmem:[%s18164_s4 + $0x1f0] ss:$20 sps:$4 sm:$0xff]  }
 0x1f1   : > { %v13209_v44 = vld [vmem:[%s18164_s4 + $0x470] ss:$20 sps:$4 sm:$0xff]  }
 0x1f3   : > { %5103 = vmatpush1.bf16.msra.mxu0 %v13162_v45  ;;  %5256 = vmatpush1.bf16.msra.mxu1 %v13165_v46  ;;  %v13210_v46 = vld [vmem:[%s18164_s4 + $0xb0] ss:$20 sps:$4 sm:$0xff]  }
 0x1f4   : > { %5123 = vmatprep.subr.bf16.mxu0 %v13170_v55  ;;  %5276 = vmatprep.subr.bf16.mxu1 %v13173_v47  ;;  %v13211_v55 = vld [vmem:[%s18164_s4 + $0x330] ss:$20 sps:$4 sm:$0xff]  }
 0x1f5   : > { %v14236_v47 = vld [vmem:[%s14445_s20 + $0x4] ss:$20 sps:$4 sm:$0xff]  }
 0x1f6   : > { %5105 = vmatmul.mubr.bf16.vlgmr.msra.gmra.mrb[48].mxu0 %v15991_v63  ;;  %5258 = vmatmul.mubr.bf16.vlgmr.msra.gmra.mrb[48].mxu1 %v15991_v63 }
 0x1f7   : > { %5124 = vmatpush1.bf16.msra.mxu0 %v13168_v57  ;;  %5277 = vmatpush1.bf16.msra.mxu1 %v13171_v58 }
 0x1f8   : > { %5125 = vmatprep.subr.bf16.mxu0 %v13176_v59  ;;  %5278 = vmatprep.subr.bf16.mxu1 %v13179_v60  ;;  %v7300_v59 = vsub.s32 2, %v16089_v32 }
 0x1f9   : > { %5114 = vmatprep.mubr.bf16.mxu0 %v14745_v17  ;;  %5267 = vmatprep.mubr.bf16.mxu1 %v14745_v17 }
 0x1fb   : > { %5126 = vmatpush1.bf16.msra.mxu0 %v13174_v0  ;;  %5279 = vmatpush1.bf16.msra.mxu1 %v13177_v1  ;;  %v16119_v1 = vld [vmem:[%s18167_s7] sm:$0x1f] }
 0x1fc   : > { %5127 = vmatprep.subr.bf16.mxu0 %v13182_v4  ;;  %5280 = vmatprep.subr.bf16.mxu1 %v13185_v6  ;;  %v7304_v4 = vsub.s32 3, %v16089_v32  ;;  %v16129_v6 = vrot.slane %v16119_v1, %v7300_v59 }
 0x1fe   : > { %5115 = vmatmul.mubr.bf16.gmra.mrb[56].mxu0 %v14760_v21  ;;  %5268 = vmatmul.mubr.bf16.gmra.mrb[56].mxu1 %v14760_v21 }
 0x1ff   : > { %5128 = vmatpush1.bf16.msra.mxu0 %v13180_v52  ;;  %5281 = vmatpush1.bf16.msra.mxu1 %v13183_v7  ;;  %v16132_v52 = vrot.slane %v16119_v1, %v7304_v4  ;;  %v13214_v7 = vld [vmem:[%s18164_s4 + $0xd8] ss:$20 sps:$4 sm:$0xff]  }
 0x200   : > { %5129 = vmatprep.subr.bf16.mxu0 %v13188_v8  ;;  %5282 = vmatprep.subr.bf16.mxu1 %v13191_v56  ;;  %v13215_v8 = vld [vmem:[%s18164_s4 + $0x358] ss:$20 sps:$4 sm:$0xff]   ;;  %v13216_v56 = vld [vmem:[%s18164_s4 + $0x240] ss:$20 sps:$4 sm:$0xff]  }
 0x201   : > { %5155 = vmatprep.mubr.bf16.mxu0 %v14246_v33  ;;  %5308 = vmatprep.mubr.bf16.mxu1 %v14246_v33 }
 0x203   : > { %5130 = vmatpush1.bf16.msra.mxu0 %v13186_v10  ;;  %5283 = vmatpush1.bf16.msra.mxu1 %v13189_v12  ;;  %v13217_v10 = vld [vmem:[%s18164_s4 + $0x4c0] ss:$20 sps:$4 sm:$0xff]  }
 0x204   : > { %11961 = vmatprep.subr.bf16.mxu0 %v13192_v13  ;;  %11989 = vmatprep.subr.bf16.mxu1 %v13193_v14  ;;  %v13218_v13 = vld [vmem:[%s18164_s4 + $0x100] ss:$20 sps:$4 sm:$0xff]  }
 0x206   : > { %11166 = vmatmul.mubr.msk.bf16.vlgmr.msra.gmra.mrb[48].mxu0 %vm1727_vm0, %v16050_v19  ;;  %11168 = vmatmul.mubr.msk.bf16.vlgmr.msra.gmra.mrb[48].mxu1 %vm1727_vm0, %v16050_v19 }
 0x207   : > { %11962 = vmatpush3.bf16.msra.mxu0 %v13194_v9  ;;  %11990 = vmatpush3.bf16.msra.mxu1 %v13195_v15 }
 0x208   : > { %11963 = vmatprep.subr.bf16.mxu0 %v13196_v16  ;;  %11991 = vmatprep.subr.bf16.mxu1 %v13197_v18  ;;  %v13219_v18 = vld [vmem:[%s18164_s4 + $0x380] ss:$20 sps:$4 sm:$0xff]  }
 0x209   : > { %5165 = vmatprep.mubr.bf16.mxu0 %v14246_v33  ;;  %5318 = vmatprep.mubr.bf16.mxu1 %v14246_v33 }
 0x20b   : > { %11964 = vmatpush3.bf16.msra.mxu0 %v13198_v20  ;;  %11992 = vmatpush3.bf16.msra.mxu1 %v13199_v23  ;;  %v13220_v20 = vld [vmem:[%s18164_s4 + $0x268] ss:$20 sps:$4 sm:$0xff]  }
 0x20c   : > { %11965 = vmatprep.subr.bf16.mxu0 %v13200_v26  ;;  %11993 = vmatprep.subr.bf16.mxu1 %v13201_v49 }
 0x20e   : > { %11167 = vmatmul.mubr.msk.bf16.gmra.mrb[60].mxu0 %vm1727_vm0, %v16083_v39  ;;  %11169 = vmatmul.mubr.msk.bf16.gmra.mrb[60].mxu1 %vm1727_vm0, %v16083_v39 }
 0x20f   : > { %11966 = vmatpush3.bf16.msra.mxu0 %v13202_v31  ;;  %11994 = vmatpush3.bf16.msra.mxu1 %v13203_v37 }
 0x210   : > { %11967 = vmatprep.subr.bf16.mxu0 %v13204_v48  ;;  %11995 = vmatprep.subr.bf16.mxu1 %v13205_v38 }
 0x211   : > { %v3451_v45 = vpop.f32.mrb[28].mxu1  ;;  %5359 = vmatprep.mubr.bf16.mxu0 %v14236_v47  ;;  %5407 = vmatprep.mubr.bf16.mxu1 %v15824_v54  ;;  %v7292_v47 = vsub.s32 0, %v16089_v32 }
 0x212   : > { %v3452_v57 = vadd.f32 %v3451_v45, %v15877_v61  ;;  %v3453_v58 = vpop.f32.mrb[29].mxu1  ;;  %v13212_v61 = vld [vmem:[%s18164_s4 + $0x218] ss:$20 sps:$4 sm:$0xff]  }
 0x213   : > { %v16114_v60 = vadd.f32 %v3453_v58, %v15886_v3  ;;  %11968 = vmatpush3.bf16.msra.mxu0 %v13206_v40  ;;  %11996 = vmatpush3.bf16.msra.mxu1 %v13207_v41  ;;  %v3455_v0 = vpop.f32.mrb[30].mxu1  ;;  %v13213_v3 = vld [vmem:[%s18164_s4 + $0x498] ss:$20 sps:$4 sm:$0xff]   ;;  %v13222_v40 = vld [vmem:[%s18164_s4 + $0x128] ss:$20 sps:$4 sm:$0xff]  }
 0x214   : > { %11969 = vmatprep.subr.bf16.mxu0 %v13208_v42  ;;  %11997 = vmatprep.subr.bf16.mxu1 %v13209_v44  ;;  %v3456_v54 = vpop.f32.mrb[31].mxu1  ;;  %v13223_v41 = vld [vmem:[%s18164_s4 + $0x3a8] ss:$20 sps:$4 sm:$0xff]   ;;  %v13224_v42 = vld [vmem:[%s18164_s4 + $0x510] ss:$20 sps:$4 sm:$0xff]  }
 0x215   : > { %v13227_v44 = vld [vmem:[%s18163_s3 + $0xc] ss:$20 sps:$4 sm:$0xff]   ;;  %v7296_v54 = vsub.s32 1, %v16089_v32 }
 0x217   : > { %11970 = vmatpush3.bf16.msra.mxu0 %v13210_v46  ;;  %11998 = vmatpush3.bf16.msra.mxu1 %v13211_v55  ;;  %v13225_v55 = vld [vmem:[%s18163_s3 + $0x8] ss:$20 sps:$4 sm:$0xff]  }
 0x218   : > { %11971 = vmatprep.subr.bf16.mxu0 %v13212_v61  ;;  %11999 = vmatprep.subr.bf16.mxu1 %v13213_v3 }
 0x219   : > { %v3492_v12 = vpop.f32.mrb[0].mxu1 }
 0x21a   : > { %v7317_v14 = vadd.f32 %v16129_v6, %v3492_v12  ;;  %v3494_v9 = vpop.f32.mrb[1].mxu1 }
 0x21b   : > { %v7318_v15 = vadd.f32 %v16132_v52, %v3494_v9  ;;  %v3496_v16 = vpop.f32.mrb[2].mxu1  ;;  %11972 = vmatpush3.bf16.msra.mxu0 %v13214_v7  ;;  %12000 = vmatpush3.bf16.msra.mxu1 %v13215_v8  ;;  %v13228_v8 = vld [vmem:[%s18164_s4 + $0x538] ss:$20 sps:$4 sm:$0xff]  }
 0x21c   : > { %v11360_v23 = vmul.f32 -1.442695, %v7317_v14  ;;  %v7322_v26 = vadd.f32 %v16129_v6, %v3496_v16  ;;  %v3498_v49 = vpop.f32.mrb[3].mxu1  ;;  %11973 = vmatprep.subr.bf16.mxu0 %v13216_v56  ;;  %12001 = vmatprep.subr.bf16.mxu1 %v13217_v10  ;;  %v16197_v14 = vrot.slane %v16119_v1, %v7292_v47  ;;  %v13229_v16 = vld [vmem:[%s18163_s3 + $0x30] ss:$20 sps:$4 sm:$0xff]  }
 0x21d   : > { %v11361_v31 = vmul.f32 -1.442695, %v7318_v15  ;;  %v7323_v37 = vadd.f32 %v16132_v52, %v3498_v49  ;;  %v16200_v15 = vrot.slane %v16119_v1, %v7296_v54 }
 0x21e   : > { %13984 = vpow2.f32 %v11360_v23  ;;  %v11365_v48 = vmul.f32 -1.442695, %v7322_v26 }
 0x21f   : > { %13986 = vpow2.f32 %v11361_v31  ;;  %v11366_v38 = vmul.f32 -1.442695, %v7323_v37  ;;  %11974 = vmatpush3.bf16.msra.mxu0 %v13218_v13  ;;  %12002 = vmatpush3.bf16.msra.mxu1 %v13219_v18  ;;  %v14237_v13 = vld [vmem:[%s14445_s20] ss:$20 sps:$4 sm:$0xff]  }
 0x220   : > { %13988 = vpow2.f32 %v11365_v48  ;;  %11975 = vmatprep.subr.bf16.mxu0 %v13220_v20  ;;  %12003 = vmatprep.subr.bf16.mxu1 %v13221_v53  ;;  %v13235_v20 = vld [vmem:[%s18163_s3 + $0x5c] ss:$20 sps:$4 sm:$0xff]   ;;  %v13233_v53 = vld [vmem:[%s18163_s3 + $0x58] ss:$20 sps:$4 sm:$0xff]  }
 0x221   : > { %13990 = vpow2.f32 %v11366_v38  ;;  %v3298_v45 = vpop.f32.mrb[32].mxu0  ;;  %v3502_v46 = vpop.f32.mrb[32].mxu1 }
 0x222   : > { %v16179_v58 = vadd.f32 %v3298_v45, %v15931_v24  ;;  %v3503_v59 = vadd.f32 %v3502_v46, %v3452_v57  ;;  %v3300_v0 = vpop.f32.mrb[33].mxu0  ;;  %v3504_v4 = vpop.f32.mrb[33].mxu1  ;;  %v13231_v24 = vld [vmem:[%s18163_s3 + $0x34] ss:$20 sps:$4 sm:$0xff]  }
 0x223   : > { %v16183_v61 = vadd.f32 %v3300_v0, %v15940_v30  ;;  %v3505_v3 = vadd.f32 %v3504_v4, %v16114_v60  ;;  %v3302_v7 = vpop.f32.mrb[34].mxu0  ;;  %11976 = vmatpush3.bf16.msra.mxu0 %v13222_v40  ;;  %12004 = vmatpush3.bf16.msra.mxu1 %v13223_v41  ;;  %v3506_v57 = vpop.f32.mrb[34].mxu1 }
 0x224   : > { %v7327_v56 = vadd.f32 %v16129_v6, %v3503_v59  ;;  %v3303_v10 = vpop.f32.mrb[35].mxu0  ;;  %12233 = vmatprep.subr.bf16.mxu0 %v13224_v42  ;;  %6560 = vmatprep.subr.bf16.mxu1 %v13227_v44  ;;  %v3507_v30 = vpop.f32.mrb[35].mxu1  ;;  %v13242_v7 = vld [vmem:[%s18163_s3 + $0x4] ss:$20 sps:$4 sm:$0xff]  }
 0x225   : > { %v7328_v60 = vadd.f32 %v16132_v52, %v3505_v3  ;;  %v13237_v3 = vld [vmem:[%s18163_s3 + $0x80] ss:$20 sps:$4 sm:$0xff]  }
 0x226   : > { %v11370_v12 = vmul.f32 -1.442695, %v7327_v56  ;;  %5360 = vmatmul.mubr.bf16.vlgmr.msra.gmra.mrb[64].mxu0 %v14237_v13  ;;  %5408 = vmatmul.mubr.bf16.vlgmr.msra.gmra.mrb[64].mxu1 %v15991_v63  ;;  %v13232_v63 = vld [vmem:[%s18164_s4 + $0x560] ss:$20 sps:$4 sm:$0xff]  }
 0x227   : > { %v11371_v9 = vmul.f32 -1.442695, %v7328_v60  ;;  %12234 = vmatpush3.bf16.msra.mxu0 %v13224_v42  ;;  %6561 = vmatpush1.bf16.msra.mxu1 %v13225_v55  ;;  %v13248_v30 = vld [vmem:[%s18163_s3 + $0x2c] ss:$20 sps:$4 sm:$0xff]  }
 0x228   : > { %v13985_v18 = vpop.eup %13984  ;;  %13992 = vpow2.f32 %v11370_v12  ;;  %12235 = vmatprep.subr.bf16.mxu0 %v13228_v8  ;;  %6562 = vmatprep.subr.bf16.mxu1 %v13231_v24  ;;  %v13243_v24 = vld [vmem:[%s18163_s3 + $0xa8] ss:$20 sps:$4 sm:$0xff]  }
 0x229   : > { %v13987_v23 = vpop.eup %13986  ;;  %v7377_v26 = vadd.f32 1.0, %v13985_v18  ;;  %13994 = vpow2.f32 %v11371_v9  ;;  %v3339_v49 = vpop.f32.mrb[0].mxu0  ;;  %5367 = vmatprep.mubr.bf16.mxu0 %v14581_v25  ;;  %5415 = vmatprep.mubr.bf16.mxu1 %v14745_v17  ;;  %v13236_v25 = vld [vmem:[%s18164_s4 + $0x588] ss:$20 sps:$4 sm:$0xff]   ;;  %v13239_v17 = vld [vmem:[%s18163_s3 + $0x84] ss:$20 sps:$4 sm:$0xff]  }
 0x22a   : > { %v13989_v31 = vpop.eup %13988  ;;  %v7378_v37 = vadd.f32 1.0, %v13987_v23  ;;  %v7315_v48 = vadd.f32 %v16197_v14, %v3339_v49  ;;  %v3341_v38 = vpop.f32.mrb[1].mxu0 }
 0x22b   : > { %v13991_v40 = vpop.eup %13990  ;;  %13996 = vrcp.f32 %v7377_v26  ;;  %v7382_v41 = vadd.f32 1.0, %v13989_v31  ;;  %v7316_v42 = vadd.f32 %v16200_v15, %v3341_v38  ;;  %v3343_v44 = vpop.f32.mrb[2].mxu0  ;;  %12236 = vmatpush3.bf16.msra.mxu0 %v13228_v8  ;;  %6563 = vmatpush1.bf16.msra.mxu1 %v13229_v16  ;;  %v13240_v8 = vld [vmem:[%s18163_s3] ss:$20 sps:$4 sm:$0xff]   ;;  %v13249_v31 = vld [vmem:[%s18163_s3 + $0xd0] ss:$20 sps:$4 sm:$0xff]  }
 0x22c   : > { %13998 = vrcp.f32 %v7378_v37  ;;  %v7383_v45 = vadd.f32 1.0, %v13991_v40  ;;  %v11358_v46 = vmul.f32 -1.442695, %v7315_v48  ;;  %v7320_v55 = vadd.f32 %v16197_v14, %v3343_v44  ;;  %v3345_v47 = vpop.f32.mrb[3].mxu0  ;;  %12237 = vmatprep.subr.bf16.mxu0 %v13232_v63  ;;  %6564 = vmatprep.subr.bf16.mxu1 %v13235_v20  ;;  %v13254_v37 = vld [vmem:[%s18163_s3 + $0x54] ss:$20 sps:$4 sm:$0xff]  }
 0x22d   : > { %14000 = vrcp.f32 %v7382_v41  ;;  %v11359_v59 = vmul.f32 -1.442695, %v7316_v42  ;;  %v7321_v0 = vadd.f32 %v16200_v15, %v3345_v47  ;;  %v13252_v41 = vld [vmem:[%s18163_s3 + $0x50] ss:$20 sps:$4 sm:$0xff]   ;;  %v13255_v42 = vld [vmem:[%s18163_s3 + $0xf8] ss:$20 sps:$4 sm:$0xff]  }
 0x22e   : > { %14002 = vrcp.f32 %v7383_v45  ;;  %v11363_v4 = vmul.f32 -1.442695, %v7320_v55  ;;  %5368 = vmatmul.mubr.bf16.gmra.mrb[68].mxu0 %v14586_v27  ;;  %5416 = vmatmul.mubr.bf16.gmra.mrb[68].mxu1 %v14760_v21  ;;  %v13245_v27 = vld [vmem:[%s18163_s3 + $0xac] ss:$20 sps:$4 sm:$0xff]   ;;  %v13260_v45 = vld [vmem:[%s18163_s3 + $0x7c] ss:$20 sps:$4 sm:$0xff]  }
 0x22f   : > { %14004 = vpow2.f32 %v11358_v46  ;;  %v11364_v54 = vmul.f32 -1.442695, %v7321_v0  ;;  %12238 = vmatpush3.bf16.msra.mxu0 %v13232_v63  ;;  %6565 = vmatpush1.bf16.msra.mxu1 %v13233_v53  ;;  %v13263_v46 = vld [vmem:[%s18163_s3 + $0x124] ss:$20 sps:$4 sm:$0xff]  }
 0x230   : > { %14006 = vpow2.f32 %v11359_v59  ;;  %12239 = vmatprep.subr.bf16.mxu0 %v13236_v25  ;;  %6566 = vmatprep.subr.bf16.mxu1 %v13239_v17 }
 0x231   : > { %14008 = vpow2.f32 %v11363_v4  ;;  %v3349_v21 = vpop.f32.mrb[36].mxu0  ;;  %12241 = vmatprep.mubr.msk.bf16.mxu0 %vm1727_vm0, %v16050_v19  ;;  %6592 = vmatprep.mubr.bf16.mxu1 %v14943_v22  ;;  %v13251_v19 = vld [vmem:[%s18163_s3 + $0xd4] ss:$20 sps:$4 sm:$0xff]  }
 0x232   : > { %v13993_v57 = vpop.eup %13992  ;;  %14010 = vpow2.f32 %v11364_v54  ;;  %v3350_v56 = vadd.f32 %v3349_v21, %v16179_v58  ;;  %v3351_v10 = vpop.f32.mrb[37].mxu0 }
 0x233   : > { %v13995_v60 = vpop.eup %13994  ;;  %v7387_v12 = vadd.f32 1.0, %v13993_v57  ;;  %v3352_v13 = vadd.f32 %v3351_v10, %v16183_v61  ;;  %12240 = vmatpush3.bf16.msra.mxu0 %v13236_v25  ;;  %6567 = vmatpush1.bf16.msra.mxu1 %v13237_v3  ;;  %v3353_v58 = vpop.f32.mrb[38].mxu0  ;;  %v13246_v61 = vld [vmem:[%s18163_s3 + $0x28] ss:$20 sps:$4 sm:$0xff]  }
 0x234   : > { %v7388_v9 = vadd.f32 1.0, %v13995_v60  ;;  %v7325_v16 = vadd.f32 %v16197_v14, %v3350_v56  ;;  %6407 = vmatprep.subr.bf16.mxu0 %v13242_v7  ;;  %6568 = vmatprep.subr.bf16.mxu1 %v13245_v27  ;;  %v3354_v18 = vpop.f32.mrb[39].mxu0  ;;  %v13261_v56 = vld [vmem:[%s18163_s3 + $0x120] ss:$20 sps:$4 sm:$0xff]   ;;  %v13267_v60 = vld [vmem:[%s18163_s3 + $0x148] ss:$20 sps:$4 sm:$0xff]  }
 0x235   : > { %v13997_v63 = vpop.eup %13996  ;;  %14012 = vrcp.f32 %v7387_v12  ;;  %v7326_v20 = vadd.f32 %v16200_v15, %v3352_v13  ;;  %v13272_v58 = vld [vmem:[%s18163_s3 + $0xcc] ss:$20 sps:$4 sm:$0xff]  }
 0x236   : > { %v13999_v23 = vpop.eup %13998  ;;  %7422 = vst [vmem:[%s16257_s14 + $0x10] sm:$0xff] %v13997_v63  ;;  %14014 = vrcp.f32 %v7388_v9  ;;  %v11368_v26 = vmul.f32 -1.442695, %v7325_v16  ;;  %12242 = vmatmul.mubr.msk.bf16.vlgmr.msra.gmra.mrb[72].mxu0 %vm1727_vm0, %v16083_v39  ;;  %v13257_v39 = vld [vmem:[%s18163_s3 + $0xfc] ss:$20 sps:$4 sm:$0xff]  }
 0x237   : > { %v14001_v49 = vpop.eup %14000  ;;  %7423 = vst [vmem:[%s16257_s14 + $0x18] sm:$0xff] %v13999_v23  ;;  %v11369_v53 = vmul.f32 -1.442695, %v7326_v20  ;;  %6408 = vmatpush1.bf16.msra.mxu0 %v13240_v8  ;;  %6569 = vmatpush1.bf16.msra.mxu1 %v13243_v24  ;;  %v13258_v8 = vld [vmem:[%s18163_s3 + $0x78] ss:$20 sps:$4 sm:$0xff]  }
 0x238   : > { %v14003_v48 = vpop.eup %14002  ;;  %7428 = vst [vmem:[%s16257_s14 + $0x38] sm:$0xff] %v14001_v49  ;;  %14016 = vpow2.f32 %v11368_v26  ;;  %6409 = vmatprep.subr.bf16.mxu0 %v13248_v30  ;;  %6570 = vmatprep.subr.bf16.mxu1 %v13251_v19  ;;  %v13269_v30 = vld [vmem:[%s18163_s3 + $0x14c] ss:$20 sps:$4 sm:$0xff]   ;;  %v13275_v9 = vld [vmem:[%s18163_s3 + $0x174] ss:$20 sps:$4 sm:$0xff]  }
 0x239   : > { %v14005_v38 = vpop.eup %14004  ;;  %7429 = vst [vmem:[%s16257_s14 + $0x40] sm:$0xff] %v14003_v48  ;;  %14018 = vpow2.f32 %v11369_v53  ;;  %v11915_v40 = vpop.f32.mrb[36].mxu1  ;;  %6439 = vmatprep.mubr.bf16.mxu0 %v14943_v22  ;;  %v13264_v19 = vld [vmem:[%s18163_s3 + $0xa0] ss:$20 sps:$4 sm:$0xff]   ;;  %v13270_v53 = vld [vmem:[%s18163_s3 + $0xc8] ss:$20 sps:$4 sm:$0xff]  }
 0x23a   : > { %v14007_v44 = vpop.eup %14006  ;;  %v7375_v25 = vadd.f32 1.0, %v14005_v38  ;;  %v11916_v17 = vpop.f32.mrb[37].mxu1 }
 0x23b   : > { %v14009_v55 = vpop.eup %14008  ;;  %v7376_v47 = vadd.f32 1.0, %v14007_v44  ;;  %v11917_v59 = vadd.f32 %v11916_v17, %v11915_v40  ;;  %v11918_v0 = vpop.f32.mrb[38].mxu1  ;;  %6410 = vmatpush1.bf16.msra.mxu0 %v13246_v61  ;;  %6571 = vmatpush1.bf16.msra.mxu1 %v13249_v31  ;;  %v13276_v44 = vld [vmem:[%s18163_s3 + $0xf0] ss:$20 sps:$4 sm:$0xff]  }
 0x23c   : > { %v14011_v4 = vpop.eup %14010  ;;  %14020 = vrcp.f32 %v7375_v25  ;;  %v7380_v54 = vadd.f32 1.0, %v14009_v55  ;;  %v11919_v3 = vpop.f32.mrb[39].mxu1  ;;  %6411 = vmatprep.subr.bf16.mxu0 %v13254_v37  ;;  %6572 = vmatprep.subr.bf16.mxu1 %v13257_v39  ;;  %v13273_v37 = vld [vmem:[%s18163_s3 + $0x170] ss:$20 sps:$4 sm:$0xff]   ;;  %v13279_v25 = vld [vmem:[%s18163_s3 + $0x198] ss:$20 sps:$4 sm:$0xff]  }
 0x23d   : > { %14022 = vrcp.f32 %v7376_v47  ;;  %v7381_v7 = vadd.f32 1.0, %v14011_v4  ;;  %v16294_v27 = vadd.f32 %v11917_v59, %v15694_v50  ;;  %v11920_v21 = vadd.f32 %v11919_v3, %v11918_v0  ;;  %v13266_v50 = vld [vmem:[%s18163_s3 + $0xa4] ss:$20 sps:$4 sm:$0xff]   ;;  %v13281_v39 = vld [vmem:[%s18163_s3 + $0x19c] ss:$20 sps:$4 sm:$0xff]  }
 0x23e   : > { %14024 = vrcp.f32 %v7380_v54  ;;  %v13287_v55 = vld [vmem:[%s18163_s3 + $0x1c4] ss:$20 sps:$4 sm:$0xff]  }
 0x23f   : > { %v14013_v24 = vpop.eup %14012  ;;  %14026 = vrcp.f32 %v7381_v7  ;;  %v16300_v57 = vadd.f32 %v11920_v21, %v15702_v35  ;;  %6412 = vmatpush1.bf16.msra.mxu0 %v13252_v41  ;;  %6573 = vmatpush1.bf16.msra.mxu1 %v13255_v42  ;;  %v7308_v42 = vsub.s32 4, %v16089_v32  ;;  %v13282_v21 = vld [vmem:[%s18163_s3 + $0x118] ss:$20 sps:$4 sm:$0xff]  }
 0x240   : > { %v14015_v10 = vpop.eup %14014  ;;  %7433 = vst [vmem:[%s16257_s14 + $0x60] sm:$0x1] %v14013_v24  ;;  %6413 = vmatprep.subr.bf16.mxu0 %v13260_v45  ;;  %6574 = vmatprep.subr.bf16.mxu1 %v13263_v46  ;;  %v13284_v46 = vld [vmem:[%s18163_s3 + $0x11c] ss:$20 sps:$4 sm:$0xff]   ;;  %v13290_v24 = vld [vmem:[%s18163_s3 + $0x144] ss:$20 sps:$4 sm:$0xff]  }
 0x241   : > { %7434 = vst [vmem:[%s16257_s14 + $0x68] sm:$0x1] %v14015_v10  ;;  %v11921_v35 = vpop.f32.mrb[40].mxu1  ;;  %v16359_v7 = vrot.slane %v16119_v1, %v7308_v42  ;;  %v13306_v42 = vld [vmem:[%s18163_s3 + $0x1b8] ss:$20 sps:$4 sm:$0xff]  }
 0x242   : > { %v14017_v12 = vpop.eup %14016  ;;  %v11922_v13 = vpop.f32.mrb[41].mxu1 }
 0x243   : > { %v14019_v16 = vpop.eup %14018  ;;  %v7385_v18 = vadd.f32 1.0, %v14017_v12  ;;  %v11923_v63 = vadd.f32 %v11922_v13, %v11921_v35  ;;  %6414 = vmatpush1.bf16.msra.mxu0 %v13258_v8  ;;  %6575 = vmatpush1.bf16.msra.mxu1 %v13261_v56  ;;  %v11924_v20 = vpop.f32.mrb[42].mxu1  ;;  %v13285_v8 = vld [vmem:[%s18163_s3 + $0x1c0] ss:$20 sps:$4 sm:$0xff]   ;;  %v13291_v12 = vld [vmem:[%s18163_s3 + $0x1e8] ss:$20 sps:$4 sm:$0xff]  }
 0x244   : > { %v7386_v23 = vadd.f32 1.0, %v14019_v16  ;;  %6415 = vmatprep.subr.bf16.mxu0 %v13266_v50  ;;  %6576 = vmatprep.subr.bf16.mxu1 %v13269_v30  ;;  %v11925_v26 = vpop.f32.mrb[43].mxu1  ;;  %v13293_v56 = vld [vmem:[%s18163_s3 + $0x1ec] ss:$20 sps:$4 sm:$0xff]  }
 0x245   : > { %14028 = vrcp.f32 %v7385_v18  ;;  %v16326_v61 = vadd.f32 %v11923_v63, %v15692_v29  ;;  %v13278_v29 = vld [vmem:[%s18163_s3 + $0xf4] ss:$20 sps:$4 sm:$0xff]  }
 0x246   : > { %v14021_v49 = vpop.eup %14020  ;;  %14030 = vrcp.f32 %v7386_v23 }
 0x247   : > { %v14023_v31 = vpop.eup %14022  ;;  %7420 = vst [vmem:[%s16257_s14] sm:$0xff] %v14021_v49  ;;  %6416 = vmatpush1.bf16.msra.mxu0 %v13264_v19  ;;  %6577 = vmatpush1.bf16.msra.mxu1 %v13267_v60  ;;  %v13288_v60 = vld [vmem:[%s18163_s3 + $0x140] ss:$20 sps:$4 sm:$0xff]   ;;  %v13294_v49 = vld [vmem:[%s18163_s3 + $0x168] ss:$20 sps:$4 sm:$0xff]  }
 0x248   : > { %v14025_v48 = vpop.eup %14024  ;;  %7421 = vst [vmem:[%s16257_s14 + $0x8] sm:$0xff] %v14023_v31  ;;  %6417 = vmatprep.subr.bf16.mxu0 %v13272_v58  ;;  %6578 = vmatprep.subr.bf16.mxu1 %v13275_v9  ;;  %v13299_v58 = vld [vmem:[%s18163_s3 + $0x214] ss:$20 sps:$4 sm:$0xff]   ;;  %v13297_v31 = vld [vmem:[%s18163_s3 + $0x210] ss:$20 sps:$4 sm:$0xff]  }
 0x249   : > { %v14027_v38 = vpop.eup %14026  ;;  %7426 = vst [vmem:[%s16257_s14 + $0x28] sm:$0xff] %v14025_v48  ;;  %v11943_v40 = vpop.f32.mrb[40].mxu0 }
 0x24a   : > { %v12231_v41 = vpop.f32.mrb[44].mxu1  ;;  %7427 = vst [vmem:[%s16257_s14 + $0x30] sm:$0xff] %v14027_v38  ;;  %v11944_v17 = vpop.f32.mrb[41].mxu0  ;;  %v13308_v38 = vld [vmem:[%s18163_s3 + $0x1bc] ss:$20 sps:$4 sm:$0xff]  }
 0x24b   : > { %v3639_v45 = vpop.f32.mrb[45].mxu1  ;;  %v11945_v32 = vadd.f32 %v11944_v17, %v11943_v40  ;;  %v11946_v47 = vpop.f32.mrb[42].mxu0  ;;  %6418 = vmatpush1.bf16.msra.mxu0 %v13270_v53  ;;  %6579 = vmatpush1.bf16.msra.mxu1 %v13273_v37  ;;  %v13302_v37 = vld [vmem:[%s18163_s3 + $0x194] ss:$20 sps:$4 sm:$0xff]   ;;  %v13311_v40 = vld [vmem:[%s18163_s3 + $0x264] ss:$20 sps:$4 sm:$0xff]  }
 0x24c   : > { %v12232_v59 = vpop.f32.mrb[46].mxu1  ;;  %v11947_v0 = vpop.f32.mrb[43].mxu0  ;;  %6419 = vmatprep.subr.bf16.mxu0 %v13278_v29  ;;  %6580 = vmatprep.subr.bf16.mxu1 %v13281_v39  ;;  %v13300_v29 = vld [vmem:[%s18163_s3 + $0x190] ss:$20 sps:$4 sm:$0xff]   ;;  %v13303_v39 = vld [vmem:[%s18163_s3 + $0x238] ss:$20 sps:$4 sm:$0xff]  }
 0x24d   : > { %v3642_v4 = vpop.f32.mrb[47].mxu1  ;;  %v11948_v54 = vadd.f32 %v11947_v0, %v11946_v47  ;;  %v3592_v3 = vadd.f32 %v11945_v32, %v16294_v27  ;;  %v13317_v17 = vld [vmem:[%s18163_s3 + $0x28c] ss:$20 sps:$4 sm:$0xff]   ;;  %v13315_v47 = vld [vmem:[%s18163_s3 + $0x288] ss:$20 sps:$4 sm:$0xff]  }
 0x24e   : > { %v13312_v32 = vld [vmem:[%s18163_s3 + $0x1e0] ss:$20 sps:$4 sm:$0xff]  }
 0x24f   : > { %v14029_v27 = vpop.eup %14028  ;;  %v3640_v50 = vadd.f32 %v3639_v45, %v3592_v3  ;;  %6420 = vmatpush1.bf16.msra.mxu0 %v13276_v44  ;;  %6581 = vmatpush1.bf16.msra.mxu1 %v13279_v25  ;;  %v3595_v1 = vadd.f32 %v11948_v54, %v16300_v57  ;;  %v13296_v57 = vld [vmem:[%s18163_s3 + $0x16c] ss:$20 sps:$4 sm:$0xff]   ;;  %v13314_v25 = vld [vmem:[%s18163_s3 + $0x1e4] ss:$20 sps:$4 sm:$0xff]   ;;  %v13318_v3 = vld [vmem:[%s18163_s3 + $0x208] ss:$20 sps:$4 sm:$0xff]  }
 0x250   : > { %v14031_v10 = vpop.eup %14030  ;;  %7431 = vst [vmem:[%s16257_s14 + $0x50] sm:$0x1] %v14029_v27  ;;  %6421 = vmatprep.subr.bf16.mxu0 %v13284_v46  ;;  %6582 = vmatprep.subr.bf16.mxu1 %v13287_v55  ;;  %v13309_v44 = vld [vmem:[%s18163_s3 + $0x260] ss:$20 sps:$4 sm:$0xff]   ;;  %v13324_v27 = vld [vmem:[%s18163_s3 + $0x230] ss:$20 sps:$4 sm:$0xff]  }
 0x251   : > { %7432 = vst [vmem:[%s16257_s14 + $0x58] sm:$0x1] %v14031_v10  ;;  %v7319_v30 = vadd.f32 %v16359_v7, %v3640_v50  ;;  %v3643_v35 = vadd.f32 %v3642_v4, %v3595_v1  ;;  %v11949_v19 = vpop.f32.mrb[44].mxu0  ;;  %v13320_v0 = vld [vmem:[%s18163_s3 + $0x20c] ss:$20 sps:$4 sm:$0xff]  }
 0x252   : > { %v11950_v13 = vpop.f32.mrb[45].mxu0  ;;  %v13323_v4 = vld [vmem:[%s18163_s3 + $0x2b4] ss:$20 sps:$4 sm:$0xff]   ;;  %v13327_v50 = vld [vmem:[%s18163_s3 + $0x2d8] ss:$20 sps:$4 sm:$0xff]  }
 0x253   : > { %v11362_v9 = vmul.f32 -1.442695, %v7319_v30  ;;  %v7324_v16 = vadd.f32 %v16359_v7, %v3643_v35  ;;  %v11951_v18 = vadd.f32 %v11950_v13, %v11949_v19  ;;  %6422 = vmatpush1.bf16.msra.mxu0 %v13282_v21  ;;  %6583 = vmatpush1.bf16.msra.mxu1 %v13285_v8  ;;  %v11952_v63 = vpop.f32.mrb[46].mxu0  ;;  %v13321_v21 = vld [vmem:[%s18163_s3 + $0x2b0] ss:$20 sps:$4 sm:$0xff]  }
 0x254   : > { %6423 = vmatprep.subr.bf16.mxu0 %v13290_v24  ;;  %6584 = vmatprep.subr.bf16.mxu1 %v13293_v56  ;;  %v11953_v20 = vpop.f32.mrb[47].mxu0  ;;  %v13326_v24 = vld [vmem:[%s18163_s3 + $0x234] ss:$20 sps:$4 sm:$0xff]   ;;  %v13329_v56 = vld [vmem:[%s18163_s3 + $0x2dc] ss:$20 sps:$4 sm:$0xff]  }
 0x255   : > { %14032 = vpow2.f32 %v11362_v9  ;;  %v11367_v23 = vmul.f32 -1.442695, %v7324_v16  ;;  %v3600_v26 = vadd.f32 %v11951_v18, %v16326_v61  ;;  %v13305_v61 = vld [vmem:[%s18163_s3 + $0x23c] ss:$20 sps:$4 sm:$0xff]   ;;  %v13335_v10 = vld [vmem:[%s18163_s3 + $0x304] ss:$20 sps:$4 sm:$0xff]  }
 0x256   : > { %v13332_v1 = vld [vmem:[%s18163_s3 + $0x25c] ss:$20 sps:$4 sm:$0xff]   ;;  %v13330_v19 = vld [vmem:[%s18163_s3 + $0x258] ss:$20 sps:$4 sm:$0xff]   ;;  %v13347_v18 = vld [vmem:[%s18163_s3 + $0x354] ss:$20 sps:$4 sm:$0xff]  }
 0x257   : > { %14034 = vpow2.f32 %v11367_v23  ;;  %v3648_v53 = vadd.f32 %v12231_v41, %v3600_v26  ;;  %6424 = vmatpush1.bf16.msra.mxu0 %v13288_v60  ;;  %6585 = vmatpush1.bf16.msra.mxu1 %v13291_v12  ;;  %v13333_v60 = vld [vmem:[%s18163_s3 + $0x300] ss:$20 sps:$4 sm:$0xff]   ;;  %v13338_v12 = vld [vmem:[%s18163_s3 + $0x284] ss:$20 sps:$4 sm:$0xff]   ;;  %v13342_v63 = vld [vmem:[%s18163_s3 + $0x2a8] ss:$20 sps:$4 sm:$0xff]  }
 0x258   : > { %6425 = vmatprep.subr.bf16.mxu0 %v13296_v57  ;;  %6586 = vmatprep.subr.bf16.mxu1 %v13299_v58  ;;  %v13341_v13 = vld [vmem:[%s18163_s3 + $0x32c] ss:$20 sps:$4 sm:$0xff]   ;;  %v13339_v58 = vld [vmem:[%s18163_s3 + $0x328] ss:$20 sps:$4 sm:$0xff]   ;;  %v13345_v20 = vld [vmem:[%s18163_s3 + $0x350] ss:$20 sps:$4 sm:$0xff]  }
 0x259   : > { %v7329_v48 = vadd.f32 %v16359_v7, %v3648_v53  ;;  %v13336_v57 = vld [vmem:[%s18163_s3 + $0x280] ss:$20 sps:$4 sm:$0xff]   ;;  %v13353_v26 = vld [vmem:[%s18163_s3 + $0x37c] ss:$20 sps:$4 sm:$0xff]   ;;  %v13351_v53 = vld [vmem:[%s18163_s3 + $0x378] ss:$20 sps:$4 sm:$0xff]  }
 0x25a   : > { %v13344_v16 = vld [vmem:[%s18163_s3 + $0x2ac] ss:$20 sps:$4 sm:$0xff]   ;;  %v13350_v23 = vld [vmem:[%s18163_s3 + $0x2d4] ss:$20 sps:$4 sm:$0xff]  }
 0x25b   : > { %v11372_v41 = vmul.f32 -1.442695, %v7329_v48  ;;  %6426 = vmatpush1.bf16.msra.mxu0 %v13294_v49  ;;  %6587 = vmatpush1.bf16.msra.mxu1 %v13297_v31  ;;  %v13348_v49 = vld [vmem:[%s18163_s3 + $0x2d0] ss:$20 sps:$4 sm:$0xff]   ;;  %v13357_v48 = vld [vmem:[%s18163_s3 + $0x3a0] ss:$20 sps:$4 sm:$0xff]  }
 0x25c   : > { %6427 = vmatprep.subr.bf16.mxu0 %v13302_v37  ;;  %6588 = vmatprep.subr.bf16.mxu1 %v13305_v61  ;;  %v13356_v31 = vld [vmem:[%s18163_s3 + $0x2fc] ss:$20 sps:$4 sm:$0xff]   ;;  %v13359_v37 = vld [vmem:[%s18163_s3 + $0x3a4] ss:$20 sps:$4 sm:$0xff]  }
 0x25d   : > { %14036 = vpow2.f32 %v11372_v41  ;;  %v13354_v61 = vld [vmem:[%s18163_s3 + $0x2f8] ss:$20 sps:$4 sm:$0xff]  }
 0x25e   : > { %v13368_v41 = vld [vmem:[%s18163_s3 + $0x34c] ss:$20 sps:$4 sm:$0xff]  }
 0x25f   : > { %v14033_v45 = vpop.eup %14032  ;;  %6428 = vmatpush1.bf16.msra.mxu0 %v13300_v29  ;;  %6589 = vmatpush1.bf16.msra.mxu1 %v13303_v39  ;;  %v13362_v29 = vld [vmem:[%s18163_s3 + $0x324] ss:$20 sps:$4 sm:$0xff]   ;;  %v13365_v39 = vld [vmem:[%s18163_s3 + $0x3cc] ss:$20 sps:$4 sm:$0xff]  }
 0x260   : > { %v7379_v46 = vadd.f32 1.0, %v14033_v45  ;;  %6429 = vmatprep.subr.bf16.mxu0 %v13308_v38  ;;  %6590 = vmatprep.subr.bf16.mxu1 %v13311_v40  ;;  %v13360_v38 = vld [vmem:[%s18163_s3 + $0x320] ss:$20 sps:$4 sm:$0xff]   ;;  %v13363_v40 = vld [vmem:[%s18163_s3 + $0x3c8] ss:$20 sps:$4 sm:$0xff]  }
 0x261   : > { %v14035_v55 = vpop.eup %14034  ;;  %v13377_v45 = vld [vmem:[%s18163_s3 + $0x41c] ss:$20 sps:$4 sm:$0xff]  }
 0x262   : > { %14038 = vrcp.f32 %v7379_v46  ;;  %v7384_v59 = vadd.f32 1.0, %v14035_v55  ;;  %v13372_v46 = vld [vmem:[%s18163_s3 + $0x370] ss:$20 sps:$4 sm:$0xff]   ;;  %v13375_v55 = vld [vmem:[%s18163_s3 + $0x418] ss:$20 sps:$4 sm:$0xff]  }
 0x263   : > { %6430 = vmatpush1.bf16.msra.mxu0 %v13306_v42  ;;  %6591 = vmatpush1.bf16.msra.mxu1 %v13309_v44  ;;  %v13371_v42 = vld [vmem:[%s18163_s3 + $0x3f4] ss:$20 sps:$4 sm:$0xff]  }
 0x264   : > { %14040 = vrcp.f32 %v7384_v59  ;;  %6431 = vmatprep.subr.bf16.mxu0 %v13314_v25  ;;  %6611 = vmatprep.subr.bf16.mxu1 %v13317_v17  ;;  %v13366_v44 = vld [vmem:[%s18163_s3 + $0x348] ss:$20 sps:$4 sm:$0xff]   ;;  %v13369_v25 = vld [vmem:[%s18163_s3 + $0x3f0] ss:$20 sps:$4 sm:$0xff]   ;;  %v13378_v59 = vld [vmem:[%s18163_s3 + $0x398] ss:$20 sps:$4 sm:$0xff]  }
 0x265   : > { %v13374_v17 = vld [vmem:[%s18163_s3 + $0x374] ss:$20 sps:$4 sm:$0xff]  }
 0x266   : > { %6593 = vmatmul.mubr.bf16.vlgmr.msra.gmra.mrb[48].mxu1 %v15118_v36 }
 0x267   : > { %v14037_v54 = vpop.eup %14036  ;;  %6432 = vmatpush1.bf16.msra.mxu0 %v13312_v32  ;;  %6612 = vmatpush1.bf16.msra.mxu1 %v13315_v47  ;;  %v13380_v32 = vld [vmem:[%s18163_s3 + $0x39c] ss:$20 sps:$4 sm:$0xff]   ;;  %v13383_v47 = vld [vmem:[%s18163_s3 + $0x444] ss:$20 sps:$4 sm:$0xff]  }
 0x268   : > { %v7389_v8 = vadd.f32 1.0, %v14037_v54  ;;  %6433 = vmatprep.subr.bf16.mxu0 %v13320_v0  ;;  %6613 = vmatprep.subr.bf16.mxu1 %v13323_v4  ;;  %v13381_v0 = vld [vmem:[%s18163_s3 + $0x440] ss:$20 sps:$4 sm:$0xff]   ;;  %v13386_v4 = vld [vmem:[%s18163_s3 + $0x3c4] ss:$20 sps:$4 sm:$0xff]  }
 0x269   : > { %6602 = vmatprep.mubr.bf16.mxu1 %v15092_v5  ;;  %v13389_v54 = vld [vmem:[%s18163_s3 + $0x46c] ss:$20 sps:$4 sm:$0xff]  }
 0x26a   : > { %14042 = vrcp.f32 %v7389_v8 }
 0x26b   : > { %6434 = vmatpush1.bf16.msra.mxu0 %v13318_v3  ;;  %6614 = vmatpush1.bf16.msra.mxu1 %v13321_v21 }
 0x26c   : > { %v14039_v30 = vpop.eup %14038  ;;  %6435 = vmatprep.subr.bf16.mxu0 %v13326_v24  ;;  %6615 = vmatprep.subr.bf16.mxu1 %v13329_v56  ;;  %v13384_v56 = vld [vmem:[%s18163_s3 + $0x3c0] ss:$20 sps:$4 sm:$0xff]  }
 0x26d   : > { %7425 = vst.msk [vmem:[%s16257_s14 + $0x20] sm:$0xff] %vm7424_vm2, %v14039_v30  ;;  %v13395_v30 = vld [vmem:[%s18163_s3 + $0x494] ss:$20 sps:$4 sm:$0xff]  }
 0x26e   : > { %v14041_v35 = vpop.eup %14040  ;;  %6603 = vmatmul.mubr.bf16.gmra.mrb[72].mxu1 %v15109_v28 }
 0x26f   : > { %7430 = vst.msk [vmem:[%s16257_s14 + $0x48] sm:$0xff] %vm7424_vm2, %v14041_v35  ;;  %6436 = vmatpush1.bf16.msra.mxu0 %v13324_v27  ;;  %6616 = vmatpush1.bf16.msra.mxu1 %v13327_v50  ;;  %v13387_v27 = vld [vmem:[%s18163_s3 + $0x468] ss:$20 sps:$4 sm:$0xff]  }
 0x270   : > { %6437 = vmatprep.subr.bf16.mxu0 %v13332_v1  ;;  %6617 = vmatprep.subr.bf16.mxu1 %v13335_v10  ;;  %v13392_v10 = vld [vmem:[%s18163_s3 + $0x3ec] ss:$20 sps:$4 sm:$0xff]  }
 0x271   : > { %6643 = vmatprep.mubr.bf16.mxu1 %v15160_v51 }
 0x273   : > { %6438 = vmatpush1.bf16.msra.mxu0 %v13330_v19  ;;  %6618 = vmatpush1.bf16.msra.mxu1 %v13333_v60  ;;  %v13390_v60 = vld [vmem:[%s18163_s3 + $0x3e8] ss:$20 sps:$4 sm:$0xff]  }
 0x274   : > { %v14043_v9 = vpop.eup %14042  ;;  %6458 = vmatprep.subr.bf16.mxu0 %v13338_v12  ;;  %6619 = vmatprep.subr.bf16.mxu1 %v13341_v13  ;;  %v13393_v12 = vld [vmem:[%s18163_s3 + $0x490] ss:$20 sps:$4 sm:$0xff]   ;;  %v13398_v13 = vld [vmem:[%s18163_s3 + $0x414] ss:$20 sps:$4 sm:$0xff]  }
 0x275   : > { %7436 = vst.msk [vmem:[%s16257_s14 + $0x70] sm:$0x1] %vm7435_vm3, %v14043_v9  ;;  %v13399_v9 = vld [vmem:[%s18163_s3 + $0x4b8] ss:$20 sps:$4 sm:$0xff]  }
 0x276   : > { %6440 = vmatmul.mubr.bf16.vlgmr.msra.gmra.mrb[48].mxu0 %v15118_v36 }
 0x277   : > { %6459 = vmatpush1.bf16.msra.mxu0 %v13336_v57  ;;  %6620 = vmatpush1.bf16.msra.mxu1 %v13339_v58  ;;  %v13401_v57 = vld [vmem:[%s18163_s3 + $0x4bc] ss:$20 sps:$4 sm:$0xff]  }
 0x278   : > { %6460 = vmatprep.subr.bf16.mxu0 %v13344_v16  ;;  %6621 = vmatprep.subr.bf16.mxu1 %v13347_v18  ;;  %v13396_v58 = vld [vmem:[%s18163_s3 + $0x410] ss:$20 sps:$4 sm:$0xff]  }
 0x279   : > { %6449 = vmatprep.mubr.bf16.mxu0 %v15092_v5  ;;  %v13404_v16 = vld [vmem:[%s18163_s3 + $0x43c] ss:$20 sps:$4 sm:$0xff]   ;;  %v13407_v18 = vld [vmem:[%s18163_s3 + $0x4e4] ss:$20 sps:$4 sm:$0xff]  }
 0x27b   : > { %6461 = vmatpush1.bf16.msra.mxu0 %v13342_v63  ;;  %6622 = vmatpush1.bf16.msra.mxu1 %v13345_v20  ;;  %v13402_v63 = vld [vmem:[%s18163_s3 + $0x438] ss:$20 sps:$4 sm:$0xff]   ;;  %v13405_v20 = vld [vmem:[%s18163_s3 + $0x4e0] ss:$20 sps:$4 sm:$0xff]  }
 0x27c   : > { %6462 = vmatprep.subr.bf16.mxu0 %v13350_v23  ;;  %6623 = vmatprep.subr.bf16.mxu1 %v13353_v26  ;;  %v13410_v23 = vld [vmem:[%s18163_s3 + $0x464] ss:$20 sps:$4 sm:$0xff]   ;;  %v13413_v26 = vld [vmem:[%s18163_s3 + $0x50c] ss:$20 sps:$4 sm:$0xff]  }
 0x27e   : > { %6450 = vmatmul.mubr.bf16.gmra.mrb[76].mxu0 %v15109_v28 }
 0x27f   : > { %6463 = vmatpush1.bf16.msra.mxu0 %v13348_v49  ;;  %6624 = vmatpush1.bf16.msra.mxu1 %v13351_v53  ;;  %v13408_v49 = vld [vmem:[%s18163_s3 + $0x460] ss:$20 sps:$4 sm:$0xff]   ;;  %v13411_v53 = vld [vmem:[%s18163_s3 + $0x508] ss:$20 sps:$4 sm:$0xff]  }
 0x280   : > { %6464 = vmatprep.subr.bf16.mxu0 %v13356_v31  ;;  %6625 = vmatprep.subr.bf16.mxu1 %v13359_v37  ;;  %v13416_v31 = vld [vmem:[%s18163_s3 + $0x48c] ss:$20 sps:$4 sm:$0xff]   ;;  %v13419_v37 = vld [vmem:[%s18163_s3 + $0x534] ss:$20 sps:$4 sm:$0xff]  }
 0x281   : > { %6490 = vmatprep.mubr.bf16.mxu0 %v15160_v51 }
 0x283   : > { %6465 = vmatpush1.bf16.msra.mxu0 %v13354_v61  ;;  %6626 = vmatpush1.bf16.msra.mxu1 %v13357_v48  ;;  %v13414_v61 = vld [vmem:[%s18163_s3 + $0x488] ss:$20 sps:$4 sm:$0xff]   ;;  %v13417_v48 = vld [vmem:[%s18163_s3 + $0x530] ss:$20 sps:$4 sm:$0xff]  }
 0x284   : > { %6466 = vmatprep.subr.bf16.mxu0 %v13362_v29  ;;  %6627 = vmatprep.subr.bf16.mxu1 %v13365_v39  ;;  %v13422_v29 = vld [vmem:[%s18163_s3 + $0x4b4] ss:$20 sps:$4 sm:$0xff]   ;;  %v13425_v39 = vld [vmem:[%s18163_s3 + $0x55c] ss:$20 sps:$4 sm:$0xff]  }
 0x287   : > { %6467 = vmatpush1.bf16.msra.mxu0 %v13360_v38  ;;  %6628 = vmatpush1.bf16.msra.mxu1 %v13363_v40  ;;  %v13420_v38 = vld [vmem:[%s18163_s3 + $0x4b0] ss:$20 sps:$4 sm:$0xff]   ;;  %v13423_v40 = vld [vmem:[%s18163_s3 + $0x558] ss:$20 sps:$4 sm:$0xff]  }
 0x288   : > { %6468 = vmatprep.subr.bf16.mxu0 %v13368_v41  ;;  %6629 = vmatprep.subr.bf16.mxu1 %v13371_v42  ;;  %v13428_v41 = vld [vmem:[%s18163_s3 + $0x4dc] ss:$20 sps:$4 sm:$0xff]   ;;  %v13431_v42 = vld [vmem:[%s18163_s3 + $0x584] ss:$20 sps:$4 sm:$0xff]  }
 0x28b   : > { %6469 = vmatpush1.bf16.msra.mxu0 %v13366_v44  ;;  %6630 = vmatpush1.bf16.msra.mxu1 %v13369_v25  ;;  %v13426_v44 = vld [vmem:[%s18163_s3 + $0x4d8] ss:$20 sps:$4 sm:$0xff]   ;;  %v13429_v25 = vld [vmem:[%s18163_s3 + $0x580] ss:$20 sps:$4 sm:$0xff]  }
 0x28c   : > { %6470 = vmatprep.subr.bf16.mxu0 %v13374_v17  ;;  %6631 = vmatprep.subr.bf16.mxu1 %v13377_v45  ;;  %v13434_v17 = vld [vmem:[%s18163_s3 + $0x504] ss:$20 sps:$4 sm:$0xff]  }
 0x28d   : > { %v13435_v45 = vld [vmem:[%s18163_s3 + $0x150] ss:$20 sps:$4 sm:$0xff]  }
 0x28f   : > { %6471 = vmatpush1.bf16.msra.mxu0 %v13372_v46  ;;  %6632 = vmatpush1.bf16.msra.mxu1 %v13375_v55  ;;  %v13432_v46 = vld [vmem:[%s18163_s3 + $0x500] ss:$20 sps:$4 sm:$0xff]   ;;  %v13436_v55 = vld [vmem:[%s18163_s3 + $0x10] ss:$20 sps:$4 sm:$0xff]  }
 0x290   : > { %6472 = vmatprep.subr.bf16.mxu0 %v13380_v32  ;;  %6633 = vmatprep.subr.bf16.mxu1 %v13383_v47  ;;  %v13439_v32 = vld [vmem:[%s18163_s3 + $0x52c] ss:$20 sps:$4 sm:$0xff]  }
 0x291   : > { %v16586_v3 = vpop.f32.mrb[52].mxu0  ;;  %v16588_v21 = vpop.f32.mrb[52].mxu1  ;;  %v13440_v47 = vld [vmem:[%s18163_s3 + $0x178] ss:$20 sps:$4 sm:$0xff]  }
 0x292   : > { %v16590_v8 = vpop.f32.mrb[53].mxu0  ;;  %v16592_v24 = vpop.f32.mrb[53].mxu1 }
 0x293   : > { %6473 = vmatpush1.bf16.msra.mxu0 %v13378_v59  ;;  %6634 = vmatpush1.bf16.msra.mxu1 %v13381_v0  ;;  %v5069_v50 = vpop.f32.mrb[54].mxu0  ;;  %v5222_v1 = vpop.f32.mrb[54].mxu1  ;;  %v13437_v59 = vld [vmem:[%s18163_s3 + $0x528] ss:$20 sps:$4 sm:$0xff]   ;;  %v13441_v0 = vld [vmem:[%s18163_s3 + $0x38] ss:$20 sps:$4 sm:$0xff]  }
 0x294   : > { %6474 = vmatprep.subr.bf16.mxu0 %v13386_v4  ;;  %6635 = vmatprep.subr.bf16.mxu1 %v13389_v54  ;;  %v5070_v35 = vpop.f32.mrb[55].mxu0  ;;  %v5223_v19 = vpop.f32.mrb[55].mxu1  ;;  %v13444_v4 = vld [vmem:[%s18163_s3 + $0x554] ss:$20 sps:$4 sm:$0xff]   ;;  %v13449_v50 = vld [vmem:[%s18163_s3 + $0x57c] ss:$20 sps:$4 sm:$0xff]  }
 0x295   : > { %v13445_v54 = vld [vmem:[%s18163_s3 + $0x1a0] ss:$20 sps:$4 sm:$0xff]   ;;  %v13450_v1 = vld [vmem:[%s18163_s3 + $0x1c8] ss:$20 sps:$4 sm:$0xff]   ;;  %v13452_v35 = vld [vmem:[%s18163_s3 + $0x1f0] ss:$20 sps:$4 sm:$0xff]  }
 0x296   : > { %v13453_v19 = vld [vmem:[%s18163_s3 + $0x3d0] ss:$20 sps:$4 sm:$0xff]  }
 0x297   : > { %6475 = vmatpush1.bf16.msra.mxu0 %v13384_v56  ;;  %6636 = vmatpush1.bf16.msra.mxu1 %v13387_v27  ;;  %v13442_v56 = vld [vmem:[%s18163_s3 + $0x550] ss:$20 sps:$4 sm:$0xff]   ;;  %v13446_v27 = vld [vmem:[%s18163_s3 + $0x60] ss:$20 sps:$4 sm:$0xff]  }
 0x298   : > { %6476 = vmatprep.subr.bf16.mxu0 %v13392_v10  ;;  %6637 = vmatprep.subr.bf16.mxu1 %v13395_v30  ;;  %v13447_v10 = vld [vmem:[%s18163_s3 + $0x578] ss:$20 sps:$4 sm:$0xff]   ;;  %v13451_v30 = vld [vmem:[%s18163_s3 + $0x88] ss:$20 sps:$4 sm:$0xff]  }
 0x29b   : > { %6477 = vmatpush1.bf16.msra.mxu0 %v13390_v60  ;;  %6638 = vmatpush1.bf16.msra.mxu1 %v13393_v12  ;;  %v13454_v60 = vld [vmem:[%s18163_s3 + $0xb0] ss:$20 sps:$4 sm:$0xff]  }
 0x29c   : > { %6478 = vmatprep.subr.bf16.mxu0 %v13398_v13  ;;  %6639 = vmatprep.subr.bf16.mxu1 %v13401_v57  ;;  %v13455_v12 = vld [vmem:[%s18163_s3 + $0x290] ss:$20 sps:$4 sm:$0xff]   ;;  %v13456_v13 = vld [vmem:[%s18163_s3 + $0x218] ss:$20 sps:$4 sm:$0xff]  }
 0x29d   : > { %v13457_v57 = vld [vmem:[%s18163_s3 + $0x3f8] ss:$20 sps:$4 sm:$0xff]  }
 0x29f   : > { %6479 = vmatpush1.bf16.msra.mxu0 %v13396_v58  ;;  %6640 = vmatpush1.bf16.msra.mxu1 %v13399_v9  ;;  %v13458_v58 = vld [vmem:[%s18163_s3 + $0xd8] ss:$20 sps:$4 sm:$0xff]  }
 0x2a0   : > { %6480 = vmatprep.subr.bf16.mxu0 %v13404_v16  ;;  %6641 = vmatprep.subr.bf16.mxu1 %v13407_v18  ;;  %v13459_v9 = vld [vmem:[%s18163_s3 + $0x2b8] ss:$20 sps:$4 sm:$0xff]   ;;  %v13460_v16 = vld [vmem:[%s18163_s3 + $0x240] ss:$20 sps:$4 sm:$0xff]  }
 0x2a1   : > { %v13461_v18 = vld [vmem:[%s18163_s3 + $0x420] ss:$20 sps:$4 sm:$0xff]  }
 0x2a3   : > { %6481 = vmatpush1.bf16.msra.mxu0 %v13402_v63  ;;  %6642 = vmatpush1.bf16.msra.mxu1 %v13405_v20  ;;  %v13462_v63 = vld [vmem:[%s18163_s3 + $0x100] ss:$20 sps:$4 sm:$0xff]  }
 0x2a4   : > { %6482 = vmatprep.subr.bf16.mxu0 %v13410_v23  ;;  %6662 = vmatprep.subr.bf16.mxu1 %v13413_v26  ;;  %v13463_v20 = vld [vmem:[%s18163_s3 + $0x2e0] ss:$20 sps:$4 sm:$0xff]   ;;  %v13464_v23 = vld [vmem:[%s18163_s3 + $0x268] ss:$20 sps:$4 sm:$0xff]  }
 0x2a5   : > { %v13465_v26 = vld [vmem:[%s18163_s3 + $0x448] ss:$20 sps:$4 sm:$0xff]  }
 0x2a6   : > { %6644 = vmatmul.mubr.bf16.vlgmr.msra.gmra.mrb[48].mxu1 %v15331_v62 }
 0x2a7   : > { %6483 = vmatpush1.bf16.msra.mxu0 %v13408_v49  ;;  %6663 = vmatpush1.bf16.msra.mxu1 %v13411_v53  ;;  %v13466_v49 = vld [vmem:[%s18163_s3 + $0x128] ss:$20 sps:$4 sm:$0xff]  }
 0x2a8   : > { %6484 = vmatprep.subr.bf16.mxu0 %v13416_v31  ;;  %6664 = vmatprep.subr.bf16.mxu1 %v13419_v37  ;;  %v13467_v53 = vld [vmem:[%s18163_s3 + $0x308] ss:$20 sps:$4 sm:$0xff]   ;;  %v13468_v31 = vld [vmem:[%s18163_s3 + $0x470] ss:$20 sps:$4 sm:$0xff]  }
 0x2a9   : > { %6653 = vmatprep.mubr.bf16.mxu1 %v15343_v2  ;;  %v13469_v37 = vld [vmem:[%s18163_s3 + $0x510] ss:$20 sps:$4 sm:$0xff]  }
 0x2ab   : > { %6485 = vmatpush1.bf16.msra.mxu0 %v13414_v61  ;;  %6665 = vmatpush1.bf16.msra.mxu1 %v13417_v48 }
 0x2ac   : > { %6486 = vmatprep.subr.bf16.mxu0 %v13422_v29  ;;  %6666 = vmatprep.subr.bf16.mxu1 %v13425_v39 }
 0x2ae   : > { %6654 = vmatmul.mubr.bf16.gmra.mrb[76].mxu1 %v15361_v11 }
 0x2af   : > { %6487 = vmatpush1.bf16.msra.mxu0 %v13420_v38  ;;  %6667 = vmatpush1.bf16.msra.mxu1 %v13423_v40 }
 0x2b0   : > { %6488 = vmatprep.subr.bf16.mxu0 %v13428_v41  ;;  %6668 = vmatprep.subr.bf16.mxu1 %v13431_v42 }
 0x2b1   : > { %6694 = vmatprep.mubr.bf16.mxu1 %v14246_v33 }
 0x2b3   : > { %6489 = vmatpush1.bf16.msra.mxu0 %v13426_v44  ;;  %6669 = vmatpush1.bf16.msra.mxu1 %v13429_v25  ;;  %v13470_v25 = vld [vmem:[%s18163_s3 + $0x330] ss:$20 sps:$4 sm:$0xff]  }
 0x2b4   : > { %6509 = vmatprep.subr.bf16.mxu0 %v13434_v17  ;;  %12023 = vmatprep.subr.bf16.mxu1 %v13435_v45 }
 0x2b6   : > { %6491 = vmatmul.mubr.bf16.vlgmr.msra.gmra.mrb[48].mxu0 %v15331_v62  ;;  %11354 = vmatmul.mubr.msk.bf16.vlgmr.msra.gmra.mrb[48].mxu1 %vm1727_vm0, %v15394_v34 }
 0x2b7   : > { %6510 = vmatpush1.bf16.msra.mxu0 %v13432_v46  ;;  %12024 = vmatpush3.bf16.msra.mxu1 %v13436_v55  ;;  %v13474_v46 = vld [vmem:[%s18163_s3 + $0x4c0] ss:$20 sps:$4 sm:$0xff]  }
 0x2b8   : > { %6511 = vmatprep.subr.bf16.mxu0 %v13439_v32  ;;  %12025 = vmatprep.subr.bf16.mxu1 %v13440_v47  ;;  %v13475_v55 = vld [vmem:[%s18163_s3 + $0x560] ss:$20 sps:$4 sm:$0xff]   ;;  %v13477_v47 = vld [vmem:[%s18163_s3 + $0x4e8] ss:$20 sps:$4 sm:$0xff]  }
 0x2b9   : > { %6500 = vmatprep.mubr.bf16.mxu0 %v15343_v2  ;;  %6704 = vmatprep.mubr.bf16.mxu1 %v14246_v33  ;;  %v13476_v32 = vld [vmem:[%s18163_s3 + $0x380] ss:$20 sps:$4 sm:$0xff]  }
 0x2bb   : > { %6512 = vmatpush1.bf16.msra.mxu0 %v13437_v59  ;;  %12026 = vmatpush3.bf16.msra.mxu1 %v13441_v0  ;;  %v13478_v59 = vld [vmem:[%s18163_s3 + $0x588] ss:$20 sps:$4 sm:$0xff]  }
 0x2bc   : > { %6513 = vmatprep.subr.bf16.mxu0 %v13444_v4  ;;  %12027 = vmatprep.subr.bf16.mxu1 %v13445_v54  ;;  %v13479_v0 = vld [vmem:[%s18163_s3 + $0x3a8] ss:$20 sps:$4 sm:$0xff]   ;;  %v13482_v4 = vld [vmem:[%s18165_s5 + $0x4] ss:$20 sps:$4 sm:$0xff]   ;;  %v13485_v54 = vld [vmem:[%s18165_s5 + $0xc] ss:$20 sps:$4 sm:$0xff]  }
 0x2be   : > { %6501 = vmatmul.mubr.bf16.gmra.mrb[80].mxu0 %v15361_v11  ;;  %11355 = vmatmul.mubr.msk.bf16.gmra.mrb[80].mxu1 %vm1727_vm0, %v15422_v43 }
 0x2bf   : > { %6514 = vmatpush1.bf16.msra.mxu0 %v13442_v56  ;;  %12028 = vmatpush3.bf16.msra.mxu1 %v13446_v27 }
 0x2c0   : > { %6515 = vmatprep.subr.bf16.mxu0 %v13449_v50  ;;  %12029 = vmatprep.subr.bf16.mxu1 %v13450_v1 }
 0x2c1   : > { %6541 = vmatprep.mubr.bf16.mxu0 %v14246_v33  ;;  %6745 = vmatprep.mubr.bf16.mxu1 %v14943_v22 }
 0x2c3   : > { %6516 = vmatpush1.bf16.msra.mxu0 %v13447_v10  ;;  %12030 = vmatpush3.bf16.msra.mxu1 %v13451_v30 }
 0x2c4   : > { %12031 = vmatprep.subr.bf16.mxu1 %v13452_v35  ;;  %12051 = vmatprep.subr.bf16.mxu0 %v13453_v19 }
 0x2c6   : > { %11352 = vmatmul.mubr.msk.bf16.vlgmr.msra.gmra.mrb[48].mxu0 %vm1727_vm0, %v15394_v34 }
 0x2c7   : > { %12032 = vmatpush3.bf16.msra.mxu1 %v13454_v60  ;;  %12052 = vmatpush3.bf16.msra.mxu0 %v13455_v12  ;;  %v13480_v60 = vld [vmem:[%s18165_s5] ss:$20 sps:$4 sm:$0xff]   ;;  %v13483_v12 = vld [vmem:[%s18165_s5 + $0x8] ss:$20 sps:$4 sm:$0xff]  }
 0x2c8   : > { %12033 = vmatprep.subr.bf16.mxu1 %v13456_v13  ;;  %12053 = vmatprep.subr.bf16.mxu0 %v13457_v57 }
 0x2c9   : > { %6551 = vmatprep.mubr.bf16.mxu0 %v14246_v33 }
 0x2cb   : > { %12034 = vmatpush3.bf16.msra.mxu1 %v13458_v58  ;;  %12054 = vmatpush3.bf16.msra.mxu0 %v13459_v9  ;;  %v13488_v58 = vld [vmem:[%s18165_s5 + $0x2c] ss:$20 sps:$4 sm:$0xff]   ;;  %v13491_v9 = vld [vmem:[%s18165_s5 + $0x34] ss:$20 sps:$4 sm:$0xff]  }
 0x2cc   : > { %12035 = vmatprep.subr.bf16.mxu1 %v13460_v16  ;;  %12055 = vmatprep.subr.bf16.mxu0 %v13461_v18 }
 0x2ce   : > { %11353 = vmatmul.mubr.msk.bf16.gmra.mrb[84].mxu0 %vm1727_vm0, %v15422_v43 }
 0x2cf   : > { %12036 = vmatpush3.bf16.msra.mxu1 %v13462_v63  ;;  %12056 = vmatpush3.bf16.msra.mxu0 %v13463_v20  ;;  %v13486_v63 = vld [vmem:[%s18165_s5 + $0x28] ss:$20 sps:$4 sm:$0xff]   ;;  %v13489_v20 = vld [vmem:[%s18165_s5 + $0x30] ss:$20 sps:$4 sm:$0xff]  }
 0x2d0   : > { %12037 = vmatprep.subr.bf16.mxu1 %v13464_v23  ;;  %12057 = vmatprep.subr.bf16.mxu0 %v13465_v26  ;;  %v13494_v23 = vld [vmem:[%s18165_s5 + $0x54] ss:$20 sps:$4 sm:$0xff]   ;;  %v13497_v26 = vld [vmem:[%s18165_s5 + $0x5c] ss:$20 sps:$4 sm:$0xff]  }
 0x2d1   : > { %v5116_v61 = vpop.f32.mrb[56].mxu0  ;;  %v5269_v48 = vpop.f32.mrb[56].mxu1  ;;  %6793 = vmatprep.mubr.bf16.mxu0 %v15160_v51 }
 0x2d2   : > { %v5117_v29 = vadd.f32 %v5116_v61, %v16586_v3  ;;  %v5270_v39 = vadd.f32 %v5269_v48, %v16588_v21  ;;  %v5118_v38 = vpop.f32.mrb[57].mxu0  ;;  %v5271_v40 = vpop.f32.mrb[57].mxu1  ;;  %v13471_v3 = vld [vmem:[%s18163_s3 + $0x498] ss:$20 sps:$4 sm:$0xff]   ;;  %v13501_v48 = vld [vmem:[%s18165_s5 + $0x80] ss:$20 sps:$4 sm:$0xff]  }
 0x2d3   : > { %v5119_v41 = vadd.f32 %v5118_v38, %v16590_v8  ;;  %v5272_v42 = vadd.f32 %v5271_v40, %v16592_v24  ;;  %v5120_v44 = vpop.f32.mrb[58].mxu0  ;;  %12038 = vmatpush3.bf16.msra.mxu1 %v13466_v49  ;;  %12058 = vmatpush3.bf16.msra.mxu0 %v13467_v53  ;;  %v5273_v17 = vpop.f32.mrb[58].mxu1  ;;  %v13472_v21 = vld [vmem:[%s18163_s3 + $0x538] ss:$20 sps:$4 sm:$0xff]   ;;  %v13492_v49 = vld [vmem:[%s18165_s5 + $0x50] ss:$20 sps:$4 sm:$0xff]  }
 0x2d4   : > { %v5121_v45 = vpop.f32.mrb[59].mxu0  ;;  %12059 = vmatprep.subr.bf16.mxu0 %v13468_v31  ;;  %12245 = vmatprep.subr.bf16.mxu1 %v13469_v37  ;;  %v5274_v8 = vpop.f32.mrb[59].mxu1  ;;  %v13473_v24 = vld [vmem:[%s18163_s3 + $0x358] ss:$20 sps:$4 sm:$0xff]   ;;  %v13500_v31 = vld [vmem:[%s18165_s5 + $0x7c] ss:$20 sps:$4 sm:$0xff]  }
 0x2d5   : > { %v13495_v53 = vld [vmem:[%s18165_s5 + $0x58] ss:$20 sps:$4 sm:$0xff]   ;;  %v13504_v38 = vld [vmem:[%s18165_s5 + $0xa0] ss:$20 sps:$4 sm:$0xff]   ;;  %v13507_v40 = vld [vmem:[%s18165_s5 + $0xa8] ss:$20 sps:$4 sm:$0xff]  }
 0x2d6   : > { %6746 = vmatmul.mubr.bf16.vlgmr.msra.gmra.mrb[84].mxu1 %v15118_v36  ;;  %v13498_v61 = vld [vmem:[%s18165_s5 + $0x78] ss:$20 sps:$4 sm:$0xff]   ;;  %v13510_v44 = vld [vmem:[%s18165_s5 + $0xc8] ss:$20 sps:$4 sm:$0xff]  }
 0x2d7   : > { %12060 = vmatpush3.bf16.msra.mxu0 %v13470_v25  ;;  %12246 = vmatpush3.bf16.msra.mxu1 %v13469_v37  ;;  %v13503_v37 = vld [vmem:[%s18165_s5 + $0x84] ss:$20 sps:$4 sm:$0xff]   ;;  %v13518_v17 = vld [vmem:[%s18165_s5 + $0xf4] ss:$20 sps:$4 sm:$0xff]   ;;  %v13521_v45 = vld [vmem:[%s18165_s5 + $0xfc] ss:$20 sps:$4 sm:$0xff]  }
 0x2d8   : > { %12061 = vmatprep.subr.bf16.mxu0 %v13471_v3  ;;  %12247 = vmatprep.subr.bf16.mxu1 %v13472_v21  ;;  %v13513_v25 = vld [vmem:[%s18165_s5 + $0xd0] ss:$20 sps:$4 sm:$0xff]  }
 0x2d9   : > { %6753 = vmatprep.mubr.bf16.mxu1 %v15092_v5 }
 0x2db   : > { %12062 = vmatpush3.bf16.msra.mxu0 %v13473_v24  ;;  %12248 = vmatpush3.bf16.msra.mxu1 %v13472_v21 }
 0x2dc   : > { %12063 = vmatprep.subr.bf16.mxu0 %v13474_v46  ;;  %12249 = vmatprep.subr.bf16.mxu1 %v13475_v55 }
 0x2de   : > { %6754 = vmatmul.mubr.bf16.gmra.mrb[88].mxu1 %v15109_v28 }
 0x2df   : > { %12064 = vmatpush3.bf16.msra.mxu0 %v13476_v32  ;;  %12250 = vmatpush3.bf16.msra.mxu1 %v13475_v55 }
 0x2e0   : > { %12065 = vmatprep.subr.bf16.mxu0 %v13477_v47  ;;  %12251 = vmatprep.subr.bf16.mxu1 %v13478_v59 }
 0x2e1   : > { %v5167_v56 = vpop.f32.mrb[60].mxu0  ;;  %v5320_v27 = vpop.f32.mrb[60].mxu1  ;;  %12253 = vmatprep.mubr.msk.bf16.mxu1 %vm1727_vm0, %v15394_v34 }
 0x2e2   : > { %v16851_v50 = vadd.f32 %v5167_v56, %v5117_v29  ;;  %v16853_v1 = vadd.f32 %v5320_v27, %v5270_v39  ;;  %v5169_v10 = vpop.f32.mrb[61].mxu0  ;;  %v5322_v30 = vpop.f32.mrb[61].mxu1  ;;  %v13506_v29 = vld [vmem:[%s18165_s5 + $0xa4] ss:$20 sps:$4 sm:$0xff]   ;;  %v13509_v39 = vld [vmem:[%s18165_s5 + $0xac] ss:$20 sps:$4 sm:$0xff]  }
 0x2e3   : > { %v16855_v35 = vadd.f32 %v5169_v10, %v5119_v41  ;;  %v16857_v19 = vadd.f32 %v5322_v30, %v5272_v42  ;;  %12066 = vmatpush3.bf16.msra.mxu0 %v13479_v0  ;;  %12252 = vmatpush3.bf16.msra.mxu1 %v13478_v59  ;;  %v5171_v13 = vpop.f32.mrb[62].mxu0  ;;  %v5324_v57 = vpop.f32.mrb[62].mxu1  ;;  %v13512_v41 = vld [vmem:[%s18165_s5 + $0xcc] ss:$20 sps:$4 sm:$0xff]   ;;  %v13515_v42 = vld [vmem:[%s18165_s5 + $0xd4] ss:$20 sps:$4 sm:$0xff]  }
 0x2e4   : > { %8494 = vmatprep.subr.bf16.mxu0 %v13482_v4  ;;  %8647 = vmatprep.subr.bf16.mxu1 %v13485_v54  ;;  %v5172_v16 = vpop.f32.mrb[63].mxu0  ;;  %v5325_v18 = vpop.f32.mrb[63].mxu1  ;;  %v13516_v59 = vld [vmem:[%s18165_s5 + $0xf0] ss:$20 sps:$4 sm:$0xff]   ;;  %v13519_v0 = vld [vmem:[%s18165_s5 + $0xf8] ss:$20 sps:$4 sm:$0xff]  }
 0x2e5   : > { %v13524_v56 = vld [vmem:[%s18165_s5 + $0x11c] ss:$20 sps:$4 sm:$0xff]   ;;  %v13527_v27 = vld [vmem:[%s18165_s5 + $0x124] ss:$20 sps:$4 sm:$0xff]   ;;  %v13525_v13 = vld [vmem:[%s18165_s5 + $0x120] ss:$20 sps:$4 sm:$0xff]  }
 0x2e6   : > { %6794 = vmatmul.mubr.bf16.vlgmr.msra.gmra.mrb[88].mxu0 %v15331_v62  ;;  %12254 = vmatmul.mubr.msk.bf16.vlgmr.msra.gmra.mrb[92].mxu1 %vm1727_vm0, %v15422_v43 }
 0x2e7   : > { %8495 = vmatpush1.bf16.msra.mxu0 %v13480_v60  ;;  %8648 = vmatpush1.bf16.msra.mxu1 %v13483_v12  ;;  %v13522_v12 = vld [vmem:[%s18165_s5 + $0x118] ss:$20 sps:$4 sm:$0xff]  }
 0x2e8   : > { %8496 = vmatprep.subr.bf16.mxu0 %v13488_v58  ;;  %8649 = vmatprep.subr.bf16.mxu1 %v13491_v9  ;;  %v13530_v58 = vld [vmem:[%s18165_s5 + $0x144] ss:$20 sps:$4 sm:$0xff]   ;;  %v13533_v9 = vld [vmem:[%s18165_s5 + $0x14c] ss:$20 sps:$4 sm:$0xff]  }
 0x2e9   : > { %6801 = vmatprep.mubr.bf16.mxu0 %v15343_v2  ;;  %8679 = vmatprep.mubr.bf16.mxu1 %v14943_v22 }
 0x2eb   : > { %8497 = vmatpush1.bf16.msra.mxu0 %v13486_v63  ;;  %8650 = vmatpush1.bf16.msra.mxu1 %v13489_v20 }
 0x2ec   : > { %8498 = vmatprep.subr.bf16.mxu0 %v13494_v23  ;;  %8651 = vmatprep.subr.bf16.mxu1 %v13497_v26 }
 0x2ee   : > { %6802 = vmatmul.mubr.bf16.gmra.mrb[92].mxu0 %v15361_v11 }
 0x2ef   : > { %8499 = vmatpush1.bf16.msra.mxu0 %v13492_v49  ;;  %8652 = vmatpush1.bf16.msra.mxu1 %v13495_v53  ;;  %v13528_v53 = vld [vmem:[%s18165_s5 + $0x140] ss:$20 sps:$4 sm:$0xff]  }
 0x2f0   : > { %8500 = vmatprep.subr.bf16.mxu0 %v13500_v31  ;;  %8653 = vmatprep.subr.bf16.mxu1 %v13503_v37  ;;  %v13531_v31 = vld [vmem:[%s18165_s5 + $0x148] ss:$20 sps:$4 sm:$0xff]  }
 0x2f1   : > { %8526 = vmatprep.mubr.bf16.mxu0 %v14943_v22 }
 0x2f3   : > { %8501 = vmatpush1.bf16.msra.mxu0 %v13498_v61  ;;  %8654 = vmatpush1.bf16.msra.mxu1 %v13501_v48  ;;  %v13536_v48 = vld [vmem:[%s18165_s5 + $0x16c] ss:$20 sps:$4 sm:$0xff]  }
 0x2f4   : > { %8502 = vmatprep.subr.bf16.mxu0 %v13506_v29  ;;  %8655 = vmatprep.subr.bf16.mxu1 %v13509_v39  ;;  %v13539_v29 = vld [vmem:[%s18165_s5 + $0x174] ss:$20 sps:$4 sm:$0xff]  }
 0x2f7   : > { %8503 = vmatpush1.bf16.msra.mxu0 %v13504_v38  ;;  %8656 = vmatpush1.bf16.msra.mxu1 %v13507_v40  ;;  %v13534_v40 = vld [vmem:[%s18165_s5 + $0x168] ss:$20 sps:$4 sm:$0xff]  }
 0x2f8   : > { %8504 = vmatprep.subr.bf16.mxu0 %v13512_v41  ;;  %8657 = vmatprep.subr.bf16.mxu1 %v13515_v42  ;;  %v13537_v41 = vld [vmem:[%s18165_s5 + $0x170] ss:$20 sps:$4 sm:$0xff]   ;;  %v13542_v42 = vld [vmem:[%s18165_s5 + $0x194] ss:$20 sps:$4 sm:$0xff]  }
 0x2f9   : > { %v11977_v3 = vpop.f32.mrb[64].mxu0  ;;  %v12005_v21 = vpop.f32.mrb[64].mxu1 }
 0x2fa   : > { %v11978_v8 = vpop.f32.mrb[65].mxu0  ;;  %v12006_v24 = vpop.f32.mrb[65].mxu1 }
 0x2fb   : > { %v11979_v46 = vadd.f32 %v11978_v8, %v11977_v3  ;;  %v12007_v55 = vadd.f32 %v12006_v24, %v12005_v21  ;;  %v11980_v32 = vpop.f32.mrb[66].mxu0  ;;  %v12008_v47 = vpop.f32.mrb[66].mxu1  ;;  %8505 = vmatpush1.bf16.msra.mxu0 %v13510_v44  ;;  %8658 = vmatpush1.bf16.msra.mxu1 %v13513_v25  ;;  %v13545_v44 = vld [vmem:[%s18165_s5 + $0x19c] ss:$20 sps:$4 sm:$0xff]   ;;  %v13543_v24 = vld [vmem:[%s18165_s5 + $0x198] ss:$20 sps:$4 sm:$0xff]  }
 0x2fc   : > { %v11981_v4 = vpop.f32.mrb[67].mxu0  ;;  %v12009_v54 = vpop.f32.mrb[67].mxu1  ;;  %8506 = vmatprep.subr.bf16.mxu0 %v13518_v17  ;;  %8659 = vmatprep.subr.bf16.mxu1 %v13521_v45  ;;  %v13540_v8 = vld [vmem:[%s18165_s5 + $0x190] ss:$20 sps:$4 sm:$0xff]  }
 0x2fd   : > { %v11982_v10 = vadd.f32 %v11981_v4, %v11980_v32  ;;  %v12010_v30 = vadd.f32 %v12009_v54, %v12008_v47  ;;  %v5410_v60 = vadd.f32 %v12007_v55, %v11979_v46  ;;  %v13548_v55 = vld [vmem:[%s18165_s5 + $0x1bc] ss:$20 sps:$4 sm:$0xff]   ;;  %v13551_v32 = vld [vmem:[%s18165_s5 + $0x1c4] ss:$20 sps:$4 sm:$0xff]   ;;  %v13557_v54 = vld [vmem:[%s18165_s5 + $0x1ec] ss:$20 sps:$4 sm:$0xff]  }
 0x2fe   : > { %v13554_v4 = vld [vmem:[%s18165_s5 + $0x1e4] ss:$20 sps:$4 sm:$0xff]  }
 0x2ff   : > { %8507 = vmatpush1.bf16.msra.mxu0 %v13516_v59  ;;  %8660 = vmatpush1.bf16.msra.mxu1 %v13519_v0  ;;  %v5413_v57 = vadd.f32 %v12010_v30, %v11982_v10  ;;  %v13546_v59 = vld [vmem:[%s18165_s5 + $0x1b8] ss:$20 sps:$4 sm:$0xff]   ;;  %v13549_v0 = vld [vmem:[%s18165_s5 + $0x1c0] ss:$20 sps:$4 sm:$0xff]  }
 0x300   : > { %8508 = vmatprep.subr.bf16.mxu0 %v13524_v56  ;;  %8661 = vmatprep.subr.bf16.mxu1 %v13527_v27  ;;  %v13552_v56 = vld [vmem:[%s18165_s5 + $0x1e0] ss:$20 sps:$4 sm:$0xff]   ;;  %v13555_v27 = vld [vmem:[%s18165_s5 + $0x1e8] ss:$20 sps:$4 sm:$0xff]  }
 0x301   : > { %v11983_v16 = vpop.f32.mrb[68].mxu0  ;;  %v12011_v18 = vpop.f32.mrb[68].mxu1  ;;  %v13560_v10 = vld [vmem:[%s18165_s5 + $0x20c] ss:$20 sps:$4 sm:$0xff]   ;;  %v13563_v30 = vld [vmem:[%s18165_s5 + $0x214] ss:$20 sps:$4 sm:$0xff]  }
 0x302   : > { %v11984_v63 = vpop.f32.mrb[69].mxu0  ;;  %v12012_v20 = vpop.f32.mrb[69].mxu1 }
 0x303   : > { %v11985_v23 = vadd.f32 %v11984_v63, %v11983_v16  ;;  %v12013_v26 = vadd.f32 %v12012_v20, %v12011_v18  ;;  %v11986_v49 = vpop.f32.mrb[70].mxu0  ;;  %8509 = vmatpush1.bf16.msra.mxu0 %v13522_v12  ;;  %8662 = vmatpush1.bf16.msra.mxu1 %v13525_v13  ;;  %v12014_v37 = vpop.f32.mrb[70].mxu1  ;;  %v13561_v12 = vld [vmem:[%s18165_s5 + $0x210] ss:$20 sps:$4 sm:$0xff]   ;;  %v13566_v13 = vld [vmem:[%s18165_s5 + $0x234] ss:$20 sps:$4 sm:$0xff]  }
 0x304   : > { %v11987_v61 = vpop.f32.mrb[71].mxu0  ;;  %8510 = vmatprep.subr.bf16.mxu0 %v13530_v58  ;;  %8663 = vmatprep.subr.bf16.mxu1 %v13533_v9  ;;  %v12015_v39 = vpop.f32.mrb[71].mxu1  ;;  %v13564_v58 = vld [vmem:[%s18165_s5 + $0x230] ss:$20 sps:$4 sm:$0xff]   ;;  %v13567_v9 = vld [vmem:[%s18165_s5 + $0x238] ss:$20 sps:$4 sm:$0xff]  }
 0x305   : > { %v5418_v38 = vadd.f32 %v12013_v26, %v11985_v23  ;;  %v13572_v16 = vld [vmem:[%s18165_s5 + $0x25c] ss:$20 sps:$4 sm:$0xff]   ;;  %v13575_v18 = vld [vmem:[%s18165_s5 + $0x264] ss:$20 sps:$4 sm:$0xff]   ;;  %v13573_v20 = vld [vmem:[%s18165_s5 + $0x260] ss:$20 sps:$4 sm:$0xff]  }
 0x306   : > { %v13570_v63 = vld [vmem:[%s18165_s5 + $0x258] ss:$20 sps:$4 sm:$0xff]   ;;  %v13576_v49 = vld [vmem:[%s18165_s5 + $0x280] ss:$20 sps:$4 sm:$0xff]   ;;  %v13582_v61 = vld [vmem:[%s18165_s5 + $0x2a8] ss:$20 sps:$4 sm:$0xff]  }
 0x307   : > { %8511 = vmatpush1.bf16.msra.mxu0 %v13528_v53  ;;  %8664 = vmatpush1.bf16.msra.mxu1 %v13531_v31  ;;  %v13578_v23 = vld [vmem:[%s18165_s5 + $0x284] ss:$20 sps:$4 sm:$0xff]   ;;  %v13581_v26 = vld [vmem:[%s18165_s5 + $0x28c] ss:$20 sps:$4 sm:$0xff]   ;;  %v13579_v53 = vld [vmem:[%s18165_s5 + $0x288] ss:$20 sps:$4 sm:$0xff]  }
 0x308   : > { %8512 = vmatprep.subr.bf16.mxu0 %v13536_v48  ;;  %8665 = vmatprep.subr.bf16.mxu1 %v13539_v29  ;;  %v13584_v31 = vld [vmem:[%s18165_s5 + $0x2ac] ss:$20 sps:$4 sm:$0xff]   ;;  %v13587_v37 = vld [vmem:[%s18165_s5 + $0x2b4] ss:$20 sps:$4 sm:$0xff]   ;;  %v13585_v48 = vld [vmem:[%s18165_s5 + $0x2b0] ss:$20 sps:$4 sm:$0xff]  }
 0x309   : > { %v12243_v25 = vpop.f32.mrb[72].mxu0  ;;  %v13590_v29 = vld [vmem:[%s18165_s5 + $0x2d4] ss:$20 sps:$4 sm:$0xff]   ;;  %v13593_v39 = vld [vmem:[%s18165_s5 + $0x2dc] ss:$20 sps:$4 sm:$0xff]  }
 0x30a   : > { %v16986_v17 = vadd.f32 %v12243_v25, %v5418_v38  ;;  %v5457_v45 = vpop.f32.mrb[73].mxu0  ;;  %v13588_v38 = vld [vmem:[%s18165_s5 + $0x2d0] ss:$20 sps:$4 sm:$0xff]   ;;  %v13597_v25 = vld [vmem:[%s18165_s5 + $0x300] ss:$20 sps:$4 sm:$0xff]  }
 0x30b   : > { %v16988_v3 = vadd.f32 %v5457_v45, %v5410_v60  ;;  %v12244_v21 = vpop.f32.mrb[74].mxu0  ;;  %8513 = vmatpush1.bf16.msra.mxu0 %v13534_v40  ;;  %8666 = vmatpush1.bf16.msra.mxu1 %v13537_v41  ;;  %v13558_v60 = vld [vmem:[%s18165_s5 + $0x208] ss:$20 sps:$4 sm:$0xff]   ;;  %v13591_v40 = vld [vmem:[%s18165_s5 + $0x2d8] ss:$20 sps:$4 sm:$0xff]  }
 0x30c   : > { %v5460_v46 = vpop.f32.mrb[75].mxu0  ;;  %8514 = vmatprep.subr.bf16.mxu0 %v13542_v42  ;;  %8667 = vmatprep.subr.bf16.mxu1 %v13545_v44  ;;  %v13596_v41 = vld [vmem:[%s18165_s5 + $0x2fc] ss:$20 sps:$4 sm:$0xff]   ;;  %v13599_v42 = vld [vmem:[%s18165_s5 + $0x304] ss:$20 sps:$4 sm:$0xff]  }
 0x30d   : > { %v17002_v47 = vadd.f32 %v5460_v46, %v5413_v57  ;;  %v13569_v57 = vld [vmem:[%s18165_s5 + $0x23c] ss:$20 sps:$4 sm:$0xff]   ;;  %v13594_v44 = vld [vmem:[%s18165_s5 + $0x2f8] ss:$20 sps:$4 sm:$0xff]  }
 0x30e   : > { %v13602_v45 = vld [vmem:[%s18165_s5 + $0x324] ss:$20 sps:$4 sm:$0xff]   ;;  %v13605_v21 = vld [vmem:[%s18165_s5 + $0x32c] ss:$20 sps:$4 sm:$0xff]  }
 0x30f   : > { %8515 = vmatpush1.bf16.msra.mxu0 %v13540_v8  ;;  %8668 = vmatpush1.bf16.msra.mxu1 %v13543_v24  ;;  %v13600_v8 = vld [vmem:[%s18165_s5 + $0x320] ss:$20 sps:$4 sm:$0xff]   ;;  %v13603_v24 = vld [vmem:[%s18165_s5 + $0x328] ss:$20 sps:$4 sm:$0xff]  }
 0x310   : > { %8516 = vmatprep.subr.bf16.mxu0 %v13548_v55  ;;  %8669 = vmatprep.subr.bf16.mxu1 %v13551_v32  ;;  %v13608_v46 = vld [vmem:[%s18165_s5 + $0x34c] ss:$20 sps:$4 sm:$0xff]   ;;  %v13611_v55 = vld [vmem:[%s18165_s5 + $0x354] ss:$20 sps:$4 sm:$0xff]  }
 0x311   : > { %v13606_v32 = vld [vmem:[%s18165_s5 + $0x348] ss:$20 sps:$4 sm:$0xff]  }
 0x313   : > { %8517 = vmatpush1.bf16.msra.mxu0 %v13546_v59  ;;  %8670 = vmatpush1.bf16.msra.mxu1 %v13549_v0  ;;  %v13609_v59 = vld [vmem:[%s18165_s5 + $0x350] ss:$20 sps:$4 sm:$0xff]   ;;  %v13614_v0 = vld [vmem:[%s18165_s5 + $0x374] ss:$20 sps:$4 sm:$0xff]  }
 0x314   : > { %8518 = vmatprep.subr.bf16.mxu0 %v13554_v4  ;;  %8671 = vmatprep.subr.bf16.mxu1 %v13557_v54  ;;  %v13617_v4 = vld [vmem:[%s18165_s5 + $0x37c] ss:$20 sps:$4 sm:$0xff]  }
 0x315   : > { %v13612_v54 = vld [vmem:[%s18165_s5 + $0x370] ss:$20 sps:$4 sm:$0xff]  }
 0x317   : > { %8519 = vmatpush1.bf16.msra.mxu0 %v13552_v56  ;;  %8672 = vmatpush1.bf16.msra.mxu1 %v13555_v27  ;;  %v13615_v56 = vld [vmem:[%s18165_s5 + $0x378] ss:$20 sps:$4 sm:$0xff]   ;;  %v13620_v27 = vld [vmem:[%s18165_s5 + $0x39c] ss:$20 sps:$4 sm:$0xff]  }
 0x318   : > { %8520 = vmatprep.subr.bf16.mxu0 %v13560_v10  ;;  %8673 = vmatprep.subr.bf16.mxu1 %v13563_v30  ;;  %v13623_v10 = vld [vmem:[%s18165_s5 + $0x3a4] ss:$20 sps:$4 sm:$0xff]  }
 0x319   : > { %v13618_v30 = vld [vmem:[%s18165_s5 + $0x398] ss:$20 sps:$4 sm:$0xff]  }
 0x31b   : > { %8521 = vmatpush1.bf16.msra.mxu0 %v13558_v60  ;;  %8674 = vmatpush1.bf16.msra.mxu1 %v13561_v12  ;;  %v13621_v60 = vld [vmem:[%s18165_s5 + $0x3a0] ss:$20 sps:$4 sm:$0xff]   ;;  %v13626_v12 = vld [vmem:[%s18165_s5 + $0x3c4] ss:$20 sps:$4 sm:$0xff]  }
 0x31c   : > { %8522 = vmatprep.subr.bf16.mxu0 %v13566_v13  ;;  %8675 = vmatprep.subr.bf16.mxu1 %v13569_v57  ;;  %v13629_v13 = vld [vmem:[%s18165_s5 + $0x3cc] ss:$20 sps:$4 sm:$0xff]  }
 0x31f   : > { %8523 = vmatpush1.bf16.msra.mxu0 %v13564_v58  ;;  %8676 = vmatpush1.bf16.msra.mxu1 %v13567_v9 }
 0x320   : > { %8524 = vmatprep.subr.bf16.mxu0 %v13572_v16  ;;  %8677 = vmatprep.subr.bf16.mxu1 %v13575_v18  ;;  %v13624_v18 = vld [vmem:[%s18165_s5 + $0x3c0] ss:$20 sps:$4 sm:$0xff]  }
 0x323   : > { %8525 = vmatpush1.bf16.msra.mxu0 %v13570_v63  ;;  %8678 = vmatpush1.bf16.msra.mxu1 %v13573_v20  ;;  %v13627_v63 = vld [vmem:[%s18165_s5 + $0x3c8] ss:$20 sps:$4 sm:$0xff]  }
 0x324   : > { %8545 = vmatprep.subr.bf16.mxu0 %v13578_v23  ;;  %8698 = vmatprep.subr.bf16.mxu1 %v13581_v26  ;;  %v13630_v26 = vld [vmem:[%s18165_s5 + $0x3e8] ss:$20 sps:$4 sm:$0xff]  }
 0x326   : > { %8527 = vmatmul.mubr.bf16.vlgmr.msra.gmra.mrb[96].mxu0 %v15118_v36  ;;  %8680 = vmatmul.mubr.bf16.vlgmr.msra.gmra.mrb[96].mxu1 %v15118_v36 }
 0x327   : > { %8546 = vmatpush1.bf16.msra.mxu0 %v13576_v49  ;;  %8699 = vmatpush1.bf16.msra.mxu1 %v13579_v53  ;;  %v13633_v49 = vld [vmem:[%s18165_s5 + $0x3f0] ss:$20 sps:$4 sm:$0xff]   ;;  %v13638_v53 = vld [vmem:[%s18165_s5 + $0x414] ss:$20 sps:$4 sm:$0xff]  }
 0x328   : > { %8547 = vmatprep.subr.bf16.mxu0 %v13584_v31  ;;  %8700 = vmatprep.subr.bf16.mxu1 %v13587_v37  ;;  %v13641_v31 = vld [vmem:[%s18165_s5 + $0x41c] ss:$20 sps:$4 sm:$0xff]  }
 0x329   : > { %8536 = vmatprep.mubr.bf16.mxu0 %v15092_v5  ;;  %8689 = vmatprep.mubr.bf16.mxu1 %v15092_v5  ;;  %v13636_v37 = vld [vmem:[%s18165_s5 + $0x410] ss:$20 sps:$4 sm:$0xff]  }
 0x32b   : > { %8548 = vmatpush1.bf16.msra.mxu0 %v13582_v61  ;;  %8701 = vmatpush1.bf16.msra.mxu1 %v13585_v48  ;;  %v13639_v61 = vld [vmem:[%s18165_s5 + $0x418] ss:$20 sps:$4 sm:$0xff]   ;;  %v13644_v48 = vld [vmem:[%s18165_s5 + $0x43c] ss:$20 sps:$4 sm:$0xff]  }
 0x32c   : > { %8549 = vmatprep.subr.bf16.mxu0 %v13590_v29  ;;  %8702 = vmatprep.subr.bf16.mxu1 %v13593_v39  ;;  %v13647_v29 = vld [vmem:[%s18165_s5 + $0x444] ss:$20 sps:$4 sm:$0xff]  }
 0x32d   : > { %v13642_v39 = vld [vmem:[%s18165_s5 + $0x438] ss:$20 sps:$4 sm:$0xff]  }
 0x32e   : > { %8537 = vmatmul.mubr.bf16.gmra.mrb[100].mxu0 %v15109_v28  ;;  %8690 = vmatmul.mubr.bf16.gmra.mrb[100].mxu1 %v15109_v28 }
 0x32f   : > { %8550 = vmatpush1.bf16.msra.mxu0 %v13588_v38  ;;  %8703 = vmatpush1.bf16.msra.mxu1 %v13591_v40  ;;  %v13645_v38 = vld [vmem:[%s18165_s5 + $0x440] ss:$20 sps:$4 sm:$0xff]   ;;  %v13650_v40 = vld [vmem:[%s18165_s5 + $0x464] ss:$20 sps:$4 sm:$0xff]  }
 0x330   : > { %8551 = vmatprep.subr.bf16.mxu0 %v13596_v41  ;;  %8704 = vmatprep.subr.bf16.mxu1 %v13599_v42  ;;  %v13653_v41 = vld [vmem:[%s18165_s5 + $0x46c] ss:$20 sps:$4 sm:$0xff]  }
 0x331   : > { %8577 = vmatprep.mubr.bf16.mxu0 %v15160_v51  ;;  %8730 = vmatprep.mubr.bf16.mxu1 %v15160_v51 }
 0x333   : > { %8552 = vmatpush1.bf16.msra.mxu0 %v13594_v44  ;;  %8705 = vmatpush1.bf16.msra.mxu1 %v13597_v25 }
 0x334   : > { %8553 = vmatprep.subr.bf16.mxu0 %v13602_v45  ;;  %8706 = vmatprep.subr.bf16.mxu1 %v13605_v21  ;;  %v13648_v21 = vld [vmem:[%s18165_s5 + $0x460] ss:$20 sps:$4 sm:$0xff]  }
 0x337   : > { %8554 = vmatpush1.bf16.msra.mxu0 %v13600_v8  ;;  %8707 = vmatpush1.bf16.msra.mxu1 %v13603_v24  ;;  %v13651_v8 = vld [vmem:[%s18165_s5 + $0x468] ss:$20 sps:$4 sm:$0xff]  }
 0x338   : > { %8555 = vmatprep.subr.bf16.mxu0 %v13608_v46  ;;  %8708 = vmatprep.subr.bf16.mxu1 %v13611_v55  ;;  %v13654_v55 = vld [vmem:[%s18165_s5 + $0x488] ss:$20 sps:$4 sm:$0xff]  }
 0x33b   : > { %8556 = vmatpush1.bf16.msra.mxu0 %v13606_v32  ;;  %8709 = vmatpush1.bf16.msra.mxu1 %v13609_v59  ;;  %v13657_v32 = vld [vmem:[%s18165_s5 + $0x490] ss:$20 sps:$4 sm:$0xff]   ;;  %v13662_v59 = vld [vmem:[%s18165_s5 + $0x4b4] ss:$20 sps:$4 sm:$0xff]  }
 0x33c   : > { %8557 = vmatprep.subr.bf16.mxu0 %v13614_v0  ;;  %8710 = vmatprep.subr.bf16.mxu1 %v13617_v4  ;;  %v13665_v0 = vld [vmem:[%s18165_s5 + $0x4bc] ss:$20 sps:$4 sm:$0xff]  }
 0x33d   : > { %v13660_v4 = vld [vmem:[%s18165_s5 + $0x4b0] ss:$20 sps:$4 sm:$0xff]  }
 0x33f   : > { %8558 = vmatpush1.bf16.msra.mxu0 %v13612_v54  ;;  %8711 = vmatpush1.bf16.msra.mxu1 %v13615_v56  ;;  %v13663_v54 = vld [vmem:[%s18165_s5 + $0x4b8] ss:$20 sps:$4 sm:$0xff]   ;;  %v13668_v56 = vld [vmem:[%s18165_s5 + $0x4dc] ss:$20 sps:$4 sm:$0xff]  }
 0x340   : > { %8559 = vmatprep.subr.bf16.mxu0 %v13620_v27  ;;  %8712 = vmatprep.subr.bf16.mxu1 %v13623_v10  ;;  %v13671_v27 = vld [vmem:[%s18165_s5 + $0x4e4] ss:$20 sps:$4 sm:$0xff]  }
 0x341   : > { %v6604_v57 = vpop.f32.mrb[72].mxu1  ;;  %v13666_v10 = vld [vmem:[%s18165_s5 + $0x4d8] ss:$20 sps:$4 sm:$0xff]  }
 0x342   : > { %v17169_v58 = vadd.f32 %v6604_v57, %v16853_v1  ;;  %v6606_v9 = vpop.f32.mrb[73].mxu1  ;;  %v13632_v1 = vld [vmem:[%s18165_s5 + $0x3ec] ss:$20 sps:$4 sm:$0xff]   ;;  %v13675_v57 = vld [vmem:[%s18165_s5 + $0x508] ss:$20 sps:$4 sm:$0xff]  }
 0x343   : > { %v17172_v16 = vadd.f32 %v6606_v9, %v16857_v19  ;;  %8560 = vmatpush1.bf16.msra.mxu0 %v13618_v30  ;;  %8713 = vmatpush1.bf16.msra.mxu1 %v13621_v60  ;;  %v6608_v20 = vpop.f32.mrb[74].mxu1  ;;  %v13635_v19 = vld [vmem:[%s18165_s5 + $0x3f4] ss:$20 sps:$4 sm:$0xff]   ;;  %v13674_v60 = vld [vmem:[%s18165_s5 + $0x504] ss:$20 sps:$4 sm:$0xff]  }
 0x344   : > { %8561 = vmatprep.subr.bf16.mxu0 %v13626_v12  ;;  %8714 = vmatprep.subr.bf16.mxu1 %v13629_v13  ;;  %v6609_v23 = vpop.f32.mrb[75].mxu1  ;;  %v13669_v30 = vld [vmem:[%s18165_s5 + $0x4e0] ss:$20 sps:$4 sm:$0xff]   ;;  %v13681_v20 = vld [vmem:[%s18165_s5 + $0x530] ss:$20 sps:$4 sm:$0xff]  }
 0x345   : > { %v13677_v12 = vld [vmem:[%s18165_s5 + $0x50c] ss:$20 sps:$4 sm:$0xff]   ;;  %v13684_v23 = vld [vmem:[%s18165_s5 + $0x550] ss:$20 sps:$4 sm:$0xff]  }
 0x346   : > { %v13672_v13 = vld [vmem:[%s18165_s5 + $0x500] ss:$20 sps:$4 sm:$0xff]  }
 0x347   : > { %8562 = vmatpush1.bf16.msra.mxu0 %v13624_v18  ;;  %8715 = vmatpush1.bf16.msra.mxu1 %v13627_v63  ;;  %v13680_v9 = vld [vmem:[%s18165_s5 + $0x52c] ss:$20 sps:$4 sm:$0xff]   ;;  %v13683_v18 = vld [vmem:[%s18165_s5 + $0x534] ss:$20 sps:$4 sm:$0xff]  }
 0x348   : > { %8563 = vmatprep.subr.bf16.mxu0 %v13632_v1  ;;  %8716 = vmatprep.subr.bf16.mxu1 %v13635_v19  ;;  %v13678_v63 = vld [vmem:[%s18165_s5 + $0x528] ss:$20 sps:$4 sm:$0xff]  }
 0x349   : > { %v13686_v1 = vld [vmem:[%s18165_s5 + $0x554] ss:$20 sps:$4 sm:$0xff]   ;;  %v13689_v19 = vld [vmem:[%s18165_s5 + $0x55c] ss:$20 sps:$4 sm:$0xff]  }
 0x34b   : > { %8564 = vmatpush1.bf16.msra.mxu0 %v13630_v26  ;;  %8717 = vmatpush1.bf16.msra.mxu1 %v13633_v49  ;;  %v13687_v26 = vld [vmem:[%s18165_s5 + $0x558] ss:$20 sps:$4 sm:$0xff]   ;;  %v13692_v49 = vld [vmem:[%s18165_s5 + $0x57c] ss:$20 sps:$4 sm:$0xff]  }
 0x34c   : > { %8565 = vmatprep.subr.bf16.mxu0 %v13638_v53  ;;  %8718 = vmatprep.subr.bf16.mxu1 %v13641_v31  ;;  %v13695_v53 = vld [vmem:[%s18165_s5 + $0x584] ss:$20 sps:$4 sm:$0xff]  }
 0x34d   : > { %v13690_v31 = vld [vmem:[%s18165_s5 + $0x578] ss:$20 sps:$4 sm:$0xff]  }
 0x34f   : > { %8566 = vmatpush1.bf16.msra.mxu0 %v13636_v37  ;;  %8719 = vmatpush1.bf16.msra.mxu1 %v13639_v61  ;;  %v13693_v37 = vld [vmem:[%s18165_s5 + $0x580] ss:$20 sps:$4 sm:$0xff]   ;;  %v13696_v61 = vld [vmem:[%s18165_s5 + $0x150] ss:$20 sps:$4 sm:$0xff]  }
 0x350   : > { %8567 = vmatprep.subr.bf16.mxu0 %v13644_v48  ;;  %8720 = vmatprep.subr.bf16.mxu1 %v13647_v29  ;;  %v13697_v48 = vld [vmem:[%s18165_s5 + $0x3d0] ss:$20 sps:$4 sm:$0xff]  }
 0x351   : > { %v6451_v42 = vpop.f32.mrb[76].mxu0  ;;  %v13698_v29 = vld [vmem:[%s18165_s5 + $0x10] ss:$20 sps:$4 sm:$0xff]  }
 0x352   : > { %v17223_v44 = vadd.f32 %v6451_v42, %v16851_v50  ;;  %v6453_v25 = vpop.f32.mrb[77].mxu0  ;;  %v13656_v50 = vld [vmem:[%s18165_s5 + $0x48c] ss:$20 sps:$4 sm:$0xff]  }
 0x353   : > { %v17226_v45 = vadd.f32 %v6453_v25, %v16855_v35  ;;  %8568 = vmatpush1.bf16.msra.mxu0 %v13642_v39  ;;  %8721 = vmatpush1.bf16.msra.mxu1 %v13645_v38  ;;  %v6455_v24 = vpop.f32.mrb[78].mxu0  ;;  %v13659_v35 = vld [vmem:[%s18165_s5 + $0x494] ss:$20 sps:$4 sm:$0xff]   ;;  %v13699_v39 = vld [vmem:[%s18165_s5 + $0x290] ss:$20 sps:$4 sm:$0xff]  }
 0x354   : > { %8569 = vmatprep.subr.bf16.mxu0 %v13650_v40  ;;  %8722 = vmatprep.subr.bf16.mxu1 %v13653_v41  ;;  %v6456_v46 = vpop.f32.mrb[79].mxu0  ;;  %v13700_v38 = vld [vmem:[%s18165_s5 + $0x178] ss:$20 sps:$4 sm:$0xff]   ;;  %v13704_v25 = vld [vmem:[%s18165_s5 + $0x1a0] ss:$20 sps:$4 sm:$0xff]  }
 0x355   : > { %v13701_v40 = vld [vmem:[%s18165_s5 + $0x3f8] ss:$20 sps:$4 sm:$0xff]   ;;  %v13707_v24 = vld [vmem:[%s18165_s5 + $0x2e0] ss:$20 sps:$4 sm:$0xff]   ;;  %v13710_v46 = vld [vmem:[%s18165_s5 + $0x88] ss:$20 sps:$4 sm:$0xff]  }
 0x356   : > { %v13702_v41 = vld [vmem:[%s18165_s5 + $0x38] ss:$20 sps:$4 sm:$0xff]  }
 0x357   : > { %8570 = vmatpush1.bf16.msra.mxu0 %v13648_v21  ;;  %8723 = vmatpush1.bf16.msra.mxu1 %v13651_v8  ;;  %v13703_v42 = vld [vmem:[%s18165_s5 + $0x2b8] ss:$20 sps:$4 sm:$0xff]   ;;  %v13705_v21 = vld [vmem:[%s18165_s5 + $0x420] ss:$20 sps:$4 sm:$0xff]  }
 0x358   : > { %8571 = vmatprep.subr.bf16.mxu0 %v13656_v50  ;;  %8724 = vmatprep.subr.bf16.mxu1 %v13659_v35  ;;  %v13706_v8 = vld [vmem:[%s18165_s5 + $0x60] ss:$20 sps:$4 sm:$0xff]   ;;  %v13708_v50 = vld [vmem:[%s18165_s5 + $0x1c8] ss:$20 sps:$4 sm:$0xff]  }
 0x359   : > { %v13709_v35 = vld [vmem:[%s18165_s5 + $0x448] ss:$20 sps:$4 sm:$0xff]  }
 0x35b   : > { %8572 = vmatpush1.bf16.msra.mxu0 %v13654_v55  ;;  %8725 = vmatpush1.bf16.msra.mxu1 %v13657_v32  ;;  %v13711_v55 = vld [vmem:[%s18165_s5 + $0x308] ss:$20 sps:$4 sm:$0xff]   ;;  %v13712_v32 = vld [vmem:[%s18165_s5 + $0x1f0] ss:$20 sps:$4 sm:$0xff]  }
 0x35c   : > { %8573 = vmatprep.subr.bf16.mxu0 %v13662_v59  ;;  %8726 = vmatprep.subr.bf16.mxu1 %v13665_v0  ;;  %v13713_v59 = vld [vmem:[%s18165_s5 + $0x470] ss:$20 sps:$4 sm:$0xff]  }
 0x35f   : > { %8574 = vmatpush1.bf16.msra.mxu0 %v13660_v4  ;;  %8727 = vmatpush1.bf16.msra.mxu1 %v13663_v54 }
 0x360   : > { %8575 = vmatprep.subr.bf16.mxu0 %v13668_v56  ;;  %8728 = vmatprep.subr.bf16.mxu1 %v13671_v27 }
 0x363   : > { %8576 = vmatpush1.bf16.msra.mxu0 %v13666_v10  ;;  %8729 = vmatpush1.bf16.msra.mxu1 %v13669_v30  ;;  %v13714_v10 = vld [vmem:[%s18165_s5 + $0xb0] ss:$20 sps:$4 sm:$0xff]  }
 0x364   : > { %8596 = vmatprep.subr.bf16.mxu0 %v13674_v60  ;;  %8749 = vmatprep.subr.bf16.mxu1 %v13677_v12  ;;  %v13715_v30 = vld [vmem:[%s18165_s5 + $0x330] ss:$20 sps:$4 sm:$0xff]   ;;  %v13718_v12 = vld [vmem:[%s18165_s5 + $0xd8] ss:$20 sps:$4 sm:$0xff]  }
 0x366   : > { %8578 = vmatmul.mubr.bf16.vlgmr.msra.gmra.mrb[96].mxu0 %v15331_v62  ;;  %8731 = vmatmul.mubr.bf16.vlgmr.msra.gmra.mrb[96].mxu1 %v15331_v62 }
 0x367   : > { %8597 = vmatpush1.bf16.msra.mxu0 %v13672_v13  ;;  %8750 = vmatpush1.bf16.msra.mxu1 %v13675_v57  ;;  %v13719_v13 = vld [vmem:[%s18165_s5 + $0x358] ss:$20 sps:$4 sm:$0xff]   ;;  %v13720_v57 = vld [vmem:[%s18165_s5 + $0x240] ss:$20 sps:$4 sm:$0xff]  }
 0x368   : > { %8598 = vmatprep.subr.bf16.mxu0 %v13680_v9  ;;  %8751 = vmatprep.subr.bf16.mxu1 %v13683_v18  ;;  %v13721_v9 = vld [vmem:[%s18165_s5 + $0x4c0] ss:$20 sps:$4 sm:$0xff]  }
 0x369   : > { %8587 = vmatprep.mubr.bf16.mxu0 %v15343_v2  ;;  %8740 = vmatprep.mubr.bf16.mxu1 %v15343_v2 }
 0x36b   : > { %8599 = vmatpush1.bf16.msra.mxu0 %v13678_v63  ;;  %8752 = vmatpush1.bf16.msra.mxu1 %v13681_v20 }
 0x36c   : > { %8600 = vmatprep.subr.bf16.mxu0 %v13686_v1  ;;  %8753 = vmatprep.subr.bf16.mxu1 %v13689_v19  ;;  %v13722_v1 = vld [vmem:[%s18165_s5 + $0x100] ss:$20 sps:$4 sm:$0xff]  }
 0x36e   : > { %8588 = vmatmul.mubr.bf16.gmra.mrb[100].mxu0 %v15361_v11  ;;  %8741 = vmatmul.mubr.bf16.gmra.mrb[100].mxu1 %v15361_v11 }
 0x36f   : > { %8601 = vmatpush1.bf16.msra.mxu0 %v13684_v23  ;;  %8754 = vmatpush1.bf16.msra.mxu1 %v13687_v26  ;;  %v13723_v26 = vld [vmem:[%s18165_s5 + $0x380] ss:$20 sps:$4 sm:$0xff]  }
 0x370   : > { %8602 = vmatprep.subr.bf16.mxu0 %v13692_v49  ;;  %8755 = vmatprep.subr.bf16.mxu1 %v13695_v53  ;;  %v13724_v49 = vld [vmem:[%s18165_s5 + $0x268] ss:$20 sps:$4 sm:$0xff]  }
 0x371   : > { %8628 = vmatprep.mubr.bf16.mxu0 %v14246_v33  ;;  %8781 = vmatprep.mubr.bf16.mxu1 %v14246_v33 }
 0x373   : > { %8603 = vmatpush1.bf16.msra.mxu0 %v13690_v31  ;;  %8756 = vmatpush1.bf16.msra.mxu1 %v13693_v37 }
 0x374   : > { %12085 = vmatprep.subr.bf16.mxu0 %v13696_v61  ;;  %12113 = vmatprep.subr.bf16.mxu1 %v13697_v48  ;;  %v13725_v61 = vld [vmem:[%s18165_s5 + $0x4e8] ss:$20 sps:$4 sm:$0xff]  }
 0x376   : > { %11583 = vmatmul.mubr.msk.bf16.vlgmr.msra.gmra.mrb[96].mxu0 %vm1727_vm0, %v15394_v34  ;;  %11585 = vmatmul.mubr.msk.bf16.vlgmr.msra.gmra.mrb[96].mxu1 %vm1727_vm0, %v15394_v34 }
 0x377   : > { %12086 = vmatpush3.bf16.msra.mxu0 %v13698_v29  ;;  %12114 = vmatpush3.bf16.msra.mxu1 %v13699_v39 }
 0x378   : > { %12087 = vmatprep.subr.bf16.mxu0 %v13700_v38  ;;  %12115 = vmatprep.subr.bf16.mxu1 %v13701_v40  ;;  %v13726_v40 = vld [vmem:[%s18165_s5 + $0x128] ss:$20 sps:$4 sm:$0xff]  }
 0x379   : > { %8638 = vmatprep.mubr.bf16.mxu0 %v14246_v33  ;;  %8791 = vmatprep.mubr.bf16.mxu1 %v14246_v33 }
 0x37b   : > { %12088 = vmatpush3.bf16.msra.mxu0 %v13702_v41  ;;  %12116 = vmatpush3.bf16.msra.mxu1 %v13703_v42  ;;  %v13727_v41 = vld [vmem:[%s18165_s5 + $0x3a8] ss:$20 sps:$4 sm:$0xff]   ;;  %v13728_v42 = vld [vmem:[%s18165_s5 + $0x510] ss:$20 sps:$4 sm:$0xff]  }
 0x37c   : > { %12089 = vmatprep.subr.bf16.mxu0 %v13704_v25  ;;  %12117 = vmatprep.subr.bf16.mxu1 %v13705_v21  ;;  %v13731_v25 = vld [vmem:[%s18166_s6 + $0x4] ss:$20 sps:$4 sm:$0xff]  }
 0x37e   : > { %11584 = vmatmul.mubr.msk.bf16.gmra.mrb[100].mxu0 %vm1727_vm0, %v15422_v43  ;;  %11586 = vmatmul.mubr.msk.bf16.gmra.mrb[100].mxu1 %vm1727_vm0, %v15422_v43 }
 0x37f   : > { %12090 = vmatpush3.bf16.msra.mxu0 %v13706_v8  ;;  %12118 = vmatpush3.bf16.msra.mxu1 %v13707_v24 }
 0x380   : > { %12091 = vmatprep.subr.bf16.mxu0 %v13708_v50  ;;  %12119 = vmatprep.subr.bf16.mxu1 %v13709_v35 }
 0x381   : > { %v6655_v0 = vpop.f32.mrb[76].mxu1  ;;  %8832 = vmatprep.mubr.bf16.mxu0 %v14943_v22  ;;  %8880 = vmatprep.mubr.bf16.mxu1 %v15160_v51 }
 0x382   : > { %v6656_v4 = vadd.f32 %v6655_v0, %v17169_v58  ;;  %v6657_v54 = vpop.f32.mrb[77].mxu1  ;;  %v13716_v58 = vld [vmem:[%s18165_s5 + $0x218] ss:$20 sps:$4 sm:$0xff]   ;;  %v13729_v0 = vld [vmem:[%s18166_s6] ss:$20 sps:$4 sm:$0xff]  }
 0x383   : > { %v6658_v56 = vadd.f32 %v6657_v54, %v17172_v16  ;;  %12092 = vmatpush3.bf16.msra.mxu0 %v13710_v46  ;;  %12120 = vmatpush3.bf16.msra.mxu1 %v13711_v55  ;;  %v6659_v27 = vpop.f32.mrb[78].mxu1  ;;  %v13717_v16 = vld [vmem:[%s18165_s5 + $0x498] ss:$20 sps:$4 sm:$0xff]  }
 0x384   : > { %12093 = vmatprep.subr.bf16.mxu0 %v13712_v32  ;;  %12121 = vmatprep.subr.bf16.mxu1 %v13713_v59  ;;  %v6660_v60 = vpop.f32.mrb[79].mxu1 }
 0x387   : > { %12094 = vmatpush3.bf16.msra.mxu0 %v13714_v10  ;;  %12122 = vmatpush3.bf16.msra.mxu1 %v13715_v30 }
 0x388   : > { %12095 = vmatprep.subr.bf16.mxu0 %v13716_v58  ;;  %12123 = vmatprep.subr.bf16.mxu1 %v13717_v16  ;;  %v13733_v58 = vld [vmem:[%s18166_s6 + $0x28] ss:$20 sps:$4 sm:$0xff]  }
 0x389   : > { %v6696_v18 = vpop.f32.mrb[48].mxu1 }
 0x38a   : > { %v7439_v63 = vadd.f32 %v16129_v6, %v6696_v18  ;;  %v6698_v20 = vpop.f32.mrb[49].mxu1 }
 0x38b   : > { %v7440_v19 = vadd.f32 %v16132_v52, %v6698_v20  ;;  %v6700_v23 = vpop.f32.mrb[50].mxu1  ;;  %12096 = vmatpush3.bf16.msra.mxu0 %v13718_v12  ;;  %12124 = vmatpush3.bf16.msra.mxu1 %v13719_v13  ;;  %v13736_v12 = vld [vmem:[%s18165_s5 + $0x560] ss:$20 sps:$4 sm:$0xff]  }
 0x38c   : > { %v11375_v53 = vmul.f32 -1.442695, %v7439_v63  ;;  %v7444_v31 = vadd.f32 %v16129_v6, %v6700_v23  ;;  %v6702_v37 = vpop.f32.mrb[51].mxu1  ;;  %12097 = vmatprep.subr.bf16.mxu0 %v13720_v57  ;;  %12125 = vmatprep.subr.bf16.mxu1 %v13721_v9  ;;  %v13739_v13 = vld [vmem:[%s18166_s6 + $0x54] ss:$20 sps:$4 sm:$0xff]  }
 0x38d   : > { %v11376_v48 = vmul.f32 -1.442695, %v7440_v19  ;;  %v7445_v29 = vadd.f32 %v16132_v52, %v6702_v37  ;;  %v13740_v37 = vld [vmem:[%s18165_s5 + $0x588] ss:$20 sps:$4 sm:$0xff]  }
 0x38e   : > { %14044 = vpow2.f32 %v11375_v53  ;;  %v11380_v39 = vmul.f32 -1.442695, %v7444_v31  ;;  %v13737_v31 = vld [vmem:[%s18166_s6 + $0x50] ss:$20 sps:$4 sm:$0xff]  }
 0x38f   : > { %14046 = vpow2.f32 %v11376_v48  ;;  %v11381_v38 = vmul.f32 -1.442695, %v7445_v29  ;;  %12098 = vmatpush3.bf16.msra.mxu0 %v13722_v1  ;;  %12126 = vmatpush3.bf16.msra.mxu1 %v13723_v26 }
 0x390   : > { %14048 = vpow2.f32 %v11380_v39  ;;  %12099 = vmatprep.subr.bf16.mxu0 %v13724_v49  ;;  %12127 = vmatprep.subr.bf16.mxu1 %v13725_v61 }
 0x391   : > { %14050 = vpow2.f32 %v11381_v38  ;;  %v6502_v21 = vpop.f32.mrb[80].mxu0  ;;  %v6706_v8 = vpop.f32.mrb[80].mxu1  ;;  %v13743_v38 = vld [vmem:[%s18166_s6 + $0x7c] ss:$20 sps:$4 sm:$0xff]  }
 0x392   : > { %v17447_v24 = vadd.f32 %v6502_v21, %v17223_v44  ;;  %v6707_v50 = vadd.f32 %v6706_v8, %v6656_v4  ;;  %v6504_v35 = vpop.f32.mrb[81].mxu0  ;;  %v6708_v46 = vpop.f32.mrb[81].mxu1  ;;  %v13732_v44 = vld [vmem:[%s18165_s5 + $0x538] ss:$20 sps:$4 sm:$0xff]  }
 0x393   : > { %v17450_v55 = vadd.f32 %v6504_v35, %v17226_v45  ;;  %v6709_v32 = vadd.f32 %v6708_v46, %v6658_v56  ;;  %v6506_v59 = vpop.f32.mrb[82].mxu0  ;;  %12100 = vmatpush3.bf16.msra.mxu0 %v13726_v40  ;;  %12128 = vmatpush3.bf16.msra.mxu1 %v13727_v41  ;;  %v6710_v54 = vpop.f32.mrb[82].mxu1  ;;  %v13735_v45 = vld [vmem:[%s18166_s6 + $0x2c] ss:$20 sps:$4 sm:$0xff]   ;;  %v13746_v8 = vld [vmem:[%s18166_s6 + $0xa4] ss:$20 sps:$4 sm:$0xff]  }
 0x394   : > { %v7449_v27 = vadd.f32 %v16129_v6, %v6707_v50  ;;  %v6507_v10 = vpop.f32.mrb[83].mxu0  ;;  %12257 = vmatprep.subr.bf16.mxu0 %v13728_v42  ;;  %9986 = vmatprep.subr.bf16.mxu1 %v13731_v25  ;;  %v6711_v4 = vpop.f32.mrb[83].mxu1  ;;  %v13741_v21 = vld [vmem:[%s18166_s6 + $0x78] ss:$20 sps:$4 sm:$0xff]  }
 0x395   : > { %v7450_v56 = vadd.f32 %v16132_v52, %v6709_v32  ;;  %v13749_v50 = vld [vmem:[%s18166_s6 + $0xc] ss:$20 sps:$4 sm:$0xff]  }
 0x396   : > { %v11385_v30 = vmul.f32 -1.442695, %v7449_v27  ;;  %8833 = vmatmul.mubr.bf16.vlgmr.msra.gmra.mrb[104].mxu0 %v15118_v36  ;;  %8881 = vmatmul.mubr.bf16.vlgmr.msra.gmra.mrb[104].mxu1 %v15331_v62  ;;  %v13744_v10 = vld [vmem:[%s18166_s6 + $0xa0] ss:$20 sps:$4 sm:$0xff]  }
 0x397   : > { %v11386_v60 = vmul.f32 -1.442695, %v7450_v56  ;;  %12258 = vmatpush3.bf16.msra.mxu0 %v13728_v42  ;;  %9987 = vmatpush1.bf16.msra.mxu1 %v13729_v0  ;;  %v13755_v56 = vld [vmem:[%s18166_s6 + $0x34] ss:$20 sps:$4 sm:$0xff]  }
 0x398   : > { %v14045_v16 = vpop.eup %14044  ;;  %14052 = vpow2.f32 %v11385_v30  ;;  %12259 = vmatprep.subr.bf16.mxu0 %v13732_v44  ;;  %9988 = vmatprep.subr.bf16.mxu1 %v13735_v45 }
 0x399   : > { %v14047_v57 = vpop.eup %14046  ;;  %v7499_v9 = vadd.f32 1.0, %v14045_v16  ;;  %14054 = vpow2.f32 %v11386_v60  ;;  %v6543_v18 = vpop.f32.mrb[48].mxu0  ;;  %8840 = vmatprep.mubr.bf16.mxu0 %v15092_v5  ;;  %8888 = vmatprep.mubr.bf16.mxu1 %v15343_v2 }
 0x39a   : > { %v14049_v63 = vpop.eup %14048  ;;  %v7500_v20 = vadd.f32 1.0, %v14047_v57  ;;  %v7437_v1 = vadd.f32 %v16197_v14, %v6543_v18  ;;  %v6545_v19 = vpop.f32.mrb[49].mxu0  ;;  %v13753_v18 = vld [vmem:[%s18166_s6 + $0x30] ss:$20 sps:$4 sm:$0xff]  }
 0x39b   : > { %v14051_v23 = vpop.eup %14050  ;;  %14056 = vrcp.f32 %v7499_v9  ;;  %v7504_v26 = vadd.f32 1.0, %v14049_v63  ;;  %v7438_v49 = vadd.f32 %v16200_v15, %v6545_v19  ;;  %v6547_v53 = vpop.f32.mrb[50].mxu0  ;;  %12260 = vmatpush3.bf16.msra.mxu0 %v13732_v44  ;;  %9989 = vmatpush1.bf16.msra.mxu1 %v13733_v58  ;;  %v13747_v44 = vld [vmem:[%s18166_s6 + $0x8] ss:$20 sps:$4 sm:$0xff]  }
 0x39c   : > { %14058 = vrcp.f32 %v7500_v20  ;;  %v7505_v61 = vadd.f32 1.0, %v14051_v23  ;;  %v11373_v48 = vmul.f32 -1.442695, %v7437_v1  ;;  %v7442_v29 = vadd.f32 %v16197_v14, %v6547_v53  ;;  %v6549_v39 = vpop.f32.mrb[51].mxu0  ;;  %12261 = vmatprep.subr.bf16.mxu0 %v13736_v12  ;;  %9990 = vmatprep.subr.bf16.mxu1 %v13739_v13  ;;  %v13750_v9 = vld [vmem:[%s18166_s6 + $0xc8] ss:$20 sps:$4 sm:$0xff]  }
 0x39d   : > { %14060 = vrcp.f32 %v7504_v26  ;;  %v11374_v40 = vmul.f32 -1.442695, %v7438_v49  ;;  %v7443_v41 = vadd.f32 %v16200_v15, %v6549_v39  ;;  %v13758_v20 = vld [vmem:[%s18166_s6 + $0xf4] ss:$20 sps:$4 sm:$0xff]   ;;  %v13761_v1 = vld [vmem:[%s18166_s6 + $0x5c] ss:$20 sps:$4 sm:$0xff]  }
 0x39e   : > { %14062 = vrcp.f32 %v7505_v61  ;;  %v11378_v42 = vmul.f32 -1.442695, %v7442_v29  ;;  %8841 = vmatmul.mubr.bf16.gmra.mrb[108].mxu0 %v15109_v28  ;;  %8889 = vmatmul.mubr.bf16.gmra.mrb[108].mxu1 %v15361_v11  ;;  %v13756_v29 = vld [vmem:[%s18166_s6 + $0xf0] ss:$20 sps:$4 sm:$0xff]   ;;  %v13759_v39 = vld [vmem:[%s18166_s6 + $0x58] ss:$20 sps:$4 sm:$0xff]  }
 0x39f   : > { %14064 = vpow2.f32 %v11373_v48  ;;  %v11379_v25 = vmul.f32 -1.442695, %v7443_v41  ;;  %12262 = vmatpush3.bf16.msra.mxu0 %v13736_v12  ;;  %9991 = vmatpush1.bf16.msra.mxu1 %v13737_v31 }
 0x3a0   : > { %14066 = vpow2.f32 %v11374_v40  ;;  %12263 = vmatprep.subr.bf16.mxu0 %v13740_v37  ;;  %9992 = vmatprep.subr.bf16.mxu1 %v13743_v38 }
 0x3a1   : > { %14068 = vpow2.f32 %v11378_v42  ;;  %v6553_v35 = vpop.f32.mrb[84].mxu0  ;;  %12265 = vmatprep.mubr.msk.bf16.mxu0 %vm1727_vm0, %v15394_v34  ;;  %10018 = vmatprep.mubr.bf16.mxu1 %v14943_v22  ;;  %v13764_v42 = vld [vmem:[%s18166_s6 + $0x11c] ss:$20 sps:$4 sm:$0xff]  }
 0x3a2   : > { %v14053_v46 = vpop.eup %14052  ;;  %14070 = vpow2.f32 %v11379_v25  ;;  %v6554_v32 = vadd.f32 %v6553_v35, %v17447_v24  ;;  %v6555_v59 = vpop.f32.mrb[85].mxu0  ;;  %v13767_v25 = vld [vmem:[%s18166_s6 + $0x84] ss:$20 sps:$4 sm:$0xff]  }
 0x3a3   : > { %v14055_v0 = vpop.eup %14054  ;;  %v7509_v54 = vadd.f32 1.0, %v14053_v46  ;;  %v6556_v27 = vadd.f32 %v6555_v59, %v17450_v55  ;;  %12264 = vmatpush3.bf16.msra.mxu0 %v13740_v37  ;;  %9993 = vmatpush1.bf16.msra.mxu1 %v13741_v21  ;;  %v6557_v45 = vpop.f32.mrb[86].mxu0  ;;  %v13752_v55 = vld [vmem:[%s18166_s6 + $0xcc] ss:$20 sps:$4 sm:$0xff]  }
 0x3a4   : > { %v7510_v4 = vadd.f32 1.0, %v14055_v0  ;;  %v7447_v24 = vadd.f32 %v16197_v14, %v6554_v32  ;;  %9994 = vmatprep.subr.bf16.mxu1 %v13746_v8  ;;  %10139 = vmatprep.subr.bf16.mxu0 %v13749_v50  ;;  %v6558_v30 = vpop.f32.mrb[87].mxu0  ;;  %v13762_v32 = vld [vmem:[%s18166_s6 + $0x118] ss:$20 sps:$4 sm:$0xff]   ;;  %v13765_v59 = vld [vmem:[%s18166_s6 + $0x80] ss:$20 sps:$4 sm:$0xff]  }
 0x3a5   : > { %v14057_v60 = vpop.eup %14056  ;;  %14072 = vrcp.f32 %v7509_v54  ;;  %v7448_v58 = vadd.f32 %v16200_v15, %v6556_v27  ;;  %v13770_v0 = vld [vmem:[%s18166_s6 + $0x144] ss:$20 sps:$4 sm:$0xff]  }
 0x3a6   : > { %v14059_v16 = vpop.eup %14058  ;;  %11390 = vst [vmem:[%s16257_s14 + $0x88] sm:$0xff] %v14057_v60  ;;  %14074 = vrcp.f32 %v7510_v4  ;;  %v11383_v12 = vmul.f32 -1.442695, %v7447_v24  ;;  %12266 = vmatmul.mubr.msk.bf16.vlgmr.msra.gmra.mrb[112].mxu0 %vm1727_vm0, %v15422_v43  ;;  %v13768_v24 = vld [vmem:[%s18166_s6 + $0x140] ss:$20 sps:$4 sm:$0xff]  }
 0x3a7   : > { %v14061_v13 = vpop.eup %14060  ;;  %11391 = vst [vmem:[%s16257_s14 + $0x90] sm:$0xff] %v14059_v16  ;;  %v11384_v57 = vmul.f32 -1.442695, %v7448_v58  ;;  %9995 = vmatpush1.bf16.msra.mxu1 %v13744_v10  ;;  %10140 = vmatpush1.bf16.msra.mxu0 %v13747_v44  ;;  %v13776_v60 = vld [vmem:[%s18166_s6 + $0x16c] ss:$20 sps:$4 sm:$0xff]  }
 0x3a8   : > { %v14063_v63 = vpop.eup %14062  ;;  %11395 = vst [vmem:[%s16257_s14 + $0xb0] sm:$0xff] %v14061_v13  ;;  %14076 = vpow2.f32 %v11383_v12  ;;  %9996 = vmatprep.subr.bf16.mxu1 %v13752_v55  ;;  %10141 = vmatprep.subr.bf16.mxu0 %v13755_v56  ;;  %v13771_v55 = vld [vmem:[%s18166_s6 + $0xa8] ss:$20 sps:$4 sm:$0xff]  }
 0x3a9   : > { %v14065_v19 = vpop.eup %14064  ;;  %11396 = vst [vmem:[%s16257_s14 + $0xb8] sm:$0xff] %v14063_v63  ;;  %14078 = vpow2.f32 %v11384_v57  ;;  %v12039_v23 = vpop.f32.mrb[84].mxu1  ;;  %10171 = vmatprep.mubr.bf16.mxu0 %v14943_v22  ;;  %v13779_v58 = vld [vmem:[%s18166_s6 + $0xd4] ss:$20 sps:$4 sm:$0xff]  }
 0x3aa   : > { %v14067_v26 = vpop.eup %14066  ;;  %v7497_v49 = vadd.f32 1.0, %v14065_v19  ;;  %v12040_v53 = vpop.f32.mrb[85].mxu1 }
 0x3ab   : > { %v14069_v31 = vpop.eup %14068  ;;  %v7498_v37 = vadd.f32 1.0, %v14067_v26  ;;  %v12041_v61 = vadd.f32 %v12040_v53, %v12039_v23  ;;  %v12042_v48 = vpop.f32.mrb[86].mxu1  ;;  %9997 = vmatpush1.bf16.msra.mxu1 %v13750_v9  ;;  %10142 = vmatpush1.bf16.msra.mxu0 %v13753_v18  ;;  %v13774_v9 = vld [vmem:[%s18166_s6 + $0x168] ss:$20 sps:$4 sm:$0xff]   ;;  %v13777_v18 = vld [vmem:[%s18166_s6 + $0xd0] ss:$20 sps:$4 sm:$0xff]  }
 0x3ac   : > { %v14071_v38 = vpop.eup %14070  ;;  %14080 = vrcp.f32 %v7497_v49  ;;  %v7502_v40 = vadd.f32 1.0, %v14069_v31  ;;  %v12043_v41 = vpop.f32.mrb[87].mxu1  ;;  %9998 = vmatprep.subr.bf16.mxu1 %v13758_v20  ;;  %10143 = vmatprep.subr.bf16.mxu0 %v13761_v1  ;;  %v13785_v20 = vld [vmem:[%s18166_s6 + $0xfc] ss:$20 sps:$4 sm:$0xff]  }
 0x3ad   : > { %14082 = vrcp.f32 %v7498_v37  ;;  %v7503_v21 = vadd.f32 1.0, %v14071_v38  ;;  %v17551_v8 = vadd.f32 %v12041_v61, %v16988_v3  ;;  %v12044_v50 = vadd.f32 %v12043_v41, %v12042_v48  ;;  %v13780_v37 = vld [vmem:[%s18166_s6 + $0x190] ss:$20 sps:$4 sm:$0xff]   ;;  %v13783_v61 = vld [vmem:[%s18166_s6 + $0xf8] ss:$20 sps:$4 sm:$0xff]  }
 0x3ae   : > { %14084 = vrcp.f32 %v7502_v40  ;;  %v13788_v38 = vld [vmem:[%s18166_s6 + $0x1bc] ss:$20 sps:$4 sm:$0xff]   ;;  %v13791_v40 = vld [vmem:[%s18166_s6 + $0x124] ss:$20 sps:$4 sm:$0xff]  }
 0x3af   : > { %v14073_v35 = vpop.eup %14072  ;;  %14086 = vrcp.f32 %v7503_v21  ;;  %v17554_v46 = vadd.f32 %v12044_v50, %v17002_v47  ;;  %9999 = vmatpush1.bf16.msra.mxu1 %v13756_v29  ;;  %10144 = vmatpush1.bf16.msra.mxu0 %v13759_v39  ;;  %v13773_v47 = vld [vmem:[%s18166_s6 + $0xac] ss:$20 sps:$4 sm:$0xff]  }
 0x3b0   : > { %v14075_v3 = vpop.eup %14074  ;;  %11400 = vst [vmem:[%s16257_s14 + $0xd8] sm:$0x1] %v14073_v35  ;;  %10000 = vmatprep.subr.bf16.mxu1 %v13764_v42  ;;  %10145 = vmatprep.subr.bf16.mxu0 %v13767_v25  ;;  %v13786_v35 = vld [vmem:[%s18166_s6 + $0x1b8] ss:$20 sps:$4 sm:$0xff]  }
 0x3b1   : > { %11401 = vst [vmem:[%s16257_s14 + $0xe0] sm:$0x1] %v14075_v3  ;;  %v12045_v54 = vpop.f32.mrb[88].mxu1 }
 0x3b2   : > { %v14077_v27 = vpop.eup %14076  ;;  %v12046_v10 = vpop.f32.mrb[89].mxu1 }
 0x3b3   : > { %v14079_v44 = vpop.eup %14078  ;;  %v7507_v45 = vadd.f32 1.0, %v14077_v27  ;;  %v12047_v4 = vadd.f32 %v12046_v10, %v12045_v54  ;;  %10001 = vmatpush1.bf16.msra.mxu1 %v13762_v32  ;;  %10146 = vmatpush1.bf16.msra.mxu0 %v13765_v59  ;;  %v12048_v56 = vpop.f32.mrb[90].mxu1  ;;  %v13789_v32 = vld [vmem:[%s18166_s6 + $0x120] ss:$20 sps:$4 sm:$0xff]  }
 0x3b4   : > { %v7508_v30 = vadd.f32 1.0, %v14079_v44  ;;  %10002 = vmatprep.subr.bf16.mxu1 %v13770_v0  ;;  %10147 = vmatprep.subr.bf16.mxu0 %v13773_v47  ;;  %v12049_v16 = vpop.f32.mrb[91].mxu1  ;;  %v13792_v27 = vld [vmem:[%s18166_s6 + $0x1e0] ss:$20 sps:$4 sm:$0xff]  }
 0x3b5   : > { %14088 = vrcp.f32 %v7507_v45  ;;  %v17583_v12 = vadd.f32 %v12047_v4, %v16986_v17  ;;  %v13782_v17 = vld [vmem:[%s18166_s6 + $0x194] ss:$20 sps:$4 sm:$0xff]  }
 0x3b6   : > { %v14081_v13 = vpop.eup %14080  ;;  %14090 = vrcp.f32 %v7508_v30  ;;  %v13795_v4 = vld [vmem:[%s18166_s6 + $0x148] ss:$20 sps:$4 sm:$0xff]  }
 0x3b7   : > { %v14083_v57 = vpop.eup %14082  ;;  %11388 = vst [vmem:[%s16257_s14 + $0x78] sm:$0xff] %v14081_v13  ;;  %10003 = vmatpush1.bf16.msra.mxu1 %v13768_v24  ;;  %10148 = vmatpush1.bf16.msra.mxu0 %v13771_v55  ;;  %v13800_v55 = vld [vmem:[%s18166_s6 + $0x20c] ss:$20 sps:$4 sm:$0xff]   ;;  %v13803_v56 = vld [vmem:[%s18166_s6 + $0x174] ss:$20 sps:$4 sm:$0xff]  }
 0x3b8   : > { %v14085_v63 = vpop.eup %14084  ;;  %11389 = vst [vmem:[%s16257_s14 + $0x80] sm:$0xff] %v14083_v57  ;;  %10004 = vmatprep.subr.bf16.mxu1 %v13776_v60  ;;  %10149 = vmatprep.subr.bf16.mxu0 %v13779_v58  ;;  %v13798_v13 = vld [vmem:[%s18166_s6 + $0x208] ss:$20 sps:$4 sm:$0xff]   ;;  %v13801_v57 = vld [vmem:[%s18166_s6 + $0x170] ss:$20 sps:$4 sm:$0xff]  }
 0x3b9   : > { %v14087_v1 = vpop.eup %14086  ;;  %11393 = vst [vmem:[%s16257_s14 + $0xa0] sm:$0xff] %v14085_v63  ;;  %v12067_v19 = vpop.f32.mrb[88].mxu0 }
 0x3ba   : > { %v12255_v23 = vpop.f32.mrb[92].mxu1  ;;  %11394 = vst [vmem:[%s16257_s14 + $0xa8] sm:$0xff] %v14087_v1  ;;  %v12068_v26 = vpop.f32.mrb[89].mxu0  ;;  %v13812_v1 = vld [vmem:[%s18166_s6 + $0x25c] ss:$20 sps:$4 sm:$0xff]  }
 0x3bb   : > { %v6843_v49 = vpop.f32.mrb[93].mxu1  ;;  %v12069_v53 = vadd.f32 %v12068_v26, %v12067_v19  ;;  %v12070_v31 = vpop.f32.mrb[90].mxu0  ;;  %10005 = vmatpush1.bf16.msra.mxu1 %v13774_v9  ;;  %10150 = vmatpush1.bf16.msra.mxu0 %v13777_v18  ;;  %v13806_v9 = vld [vmem:[%s18166_s6 + $0x234] ss:$20 sps:$4 sm:$0xff]   ;;  %v13815_v19 = vld [vmem:[%s18166_s6 + $0x1c4] ss:$20 sps:$4 sm:$0xff]  }
 0x3bc   : > { %v12256_v48 = vpop.f32.mrb[94].mxu1  ;;  %v12071_v29 = vpop.f32.mrb[91].mxu0  ;;  %10006 = vmatprep.subr.bf16.mxu1 %v13782_v17  ;;  %10151 = vmatprep.subr.bf16.mxu0 %v13785_v20  ;;  %v13804_v17 = vld [vmem:[%s18166_s6 + $0x230] ss:$20 sps:$4 sm:$0xff]   ;;  %v13807_v20 = vld [vmem:[%s18166_s6 + $0x198] ss:$20 sps:$4 sm:$0xff]  }
 0x3bd   : > { %v6846_v39 = vpop.f32.mrb[95].mxu1  ;;  %v12072_v41 = vadd.f32 %v12071_v29, %v12070_v31  ;;  %v6796_v42 = vadd.f32 %v12069_v53, %v17551_v8  ;;  %v13794_v8 = vld [vmem:[%s18166_s6 + $0x1e4] ss:$20 sps:$4 sm:$0xff]   ;;  %v13816_v29 = vld [vmem:[%s18166_s6 + $0x280] ss:$20 sps:$4 sm:$0xff]  }
 0x3be   : > { %v13810_v26 = vld [vmem:[%s18166_s6 + $0x258] ss:$20 sps:$4 sm:$0xff]  }
 0x3bf   : > { %v14089_v25 = vpop.eup %14088  ;;  %v6844_v21 = vadd.f32 %v6843_v49, %v6796_v42  ;;  %10007 = vmatpush1.bf16.msra.mxu1 %v13780_v37  ;;  %10152 = vmatpush1.bf16.msra.mxu0 %v13783_v61  ;;  %v6799_v50 = vadd.f32 %v12072_v41, %v17554_v46  ;;  %v13797_v46 = vld [vmem:[%s18166_s6 + $0x14c] ss:$20 sps:$4 sm:$0xff]   ;;  %v13818_v31 = vld [vmem:[%s18166_s6 + $0x284] ss:$20 sps:$4 sm:$0xff]   ;;  %v13822_v42 = vld [vmem:[%s18166_s6 + $0x2a8] ss:$20 sps:$4 sm:$0xff]  }
 0x3c0   : > { %v14091_v59 = vpop.eup %14090  ;;  %11398 = vst [vmem:[%s16257_s14 + $0xc8] sm:$0x1] %v14089_v25  ;;  %10008 = vmatprep.subr.bf16.mxu1 %v13788_v38  ;;  %10153 = vmatprep.subr.bf16.mxu0 %v13791_v40  ;;  %v13813_v49 = vld [vmem:[%s18166_s6 + $0x1c0] ss:$20 sps:$4 sm:$0xff]   ;;  %v13825_v25 = vld [vmem:[%s18166_s6 + $0x210] ss:$20 sps:$4 sm:$0xff]  }
 0x3c1   : > { %11399 = vst [vmem:[%s16257_s14 + $0xd0] sm:$0x1] %v14091_v59  ;;  %v7441_v3 = vadd.f32 %v16359_v7, %v6844_v21  ;;  %v6847_v0 = vadd.f32 %v6846_v39, %v6799_v50  ;;  %v12073_v47 = vpop.f32.mrb[92].mxu0  ;;  %v13821_v37 = vld [vmem:[%s18166_s6 + $0x1ec] ss:$20 sps:$4 sm:$0xff]  }
 0x3c2   : > { %v12074_v54 = vpop.f32.mrb[93].mxu0  ;;  %v13819_v39 = vld [vmem:[%s18166_s6 + $0x1e8] ss:$20 sps:$4 sm:$0xff]   ;;  %v13824_v38 = vld [vmem:[%s18166_s6 + $0x2ac] ss:$20 sps:$4 sm:$0xff]  }
 0x3c3   : > { %v11377_v10 = vmul.f32 -1.442695, %v7441_v3  ;;  %v7446_v44 = vadd.f32 %v16359_v7, %v6847_v0  ;;  %v12075_v45 = vadd.f32 %v12074_v54, %v12073_v47  ;;  %10009 = vmatpush1.bf16.msra.mxu1 %v13786_v35  ;;  %10154 = vmatpush1.bf16.msra.mxu0 %v13789_v32  ;;  %v12076_v24 = vpop.f32.mrb[94].mxu0  ;;  %v13827_v40 = vld [vmem:[%s18166_s6 + $0x214] ss:$20 sps:$4 sm:$0xff]  }
 0x3c4   : > { %10010 = vmatprep.subr.bf16.mxu1 %v13794_v8  ;;  %10155 = vmatprep.subr.bf16.mxu0 %v13797_v46  ;;  %v12077_v30 = vpop.f32.mrb[95].mxu0  ;;  %v13830_v50 = vld [vmem:[%s18166_s6 + $0x2d4] ss:$20 sps:$4 sm:$0xff]   ;;  %v13833_v35 = vld [vmem:[%s18166_s6 + $0x23c] ss:$20 sps:$4 sm:$0xff]  }
 0x3c5   : > { %14092 = vpow2.f32 %v11377_v10  ;;  %v11382_v60 = vmul.f32 -1.442695, %v7446_v44  ;;  %v6804_v58 = vadd.f32 %v12075_v45, %v17583_v12  ;;  %v13809_v12 = vld [vmem:[%s18166_s6 + $0x19c] ss:$20 sps:$4 sm:$0xff]   ;;  %v13831_v59 = vld [vmem:[%s18166_s6 + $0x238] ss:$20 sps:$4 sm:$0xff]  }
 0x3c6   : > { %v13828_v32 = vld [vmem:[%s18166_s6 + $0x2d0] ss:$20 sps:$4 sm:$0xff]   ;;  %v13834_v47 = vld [vmem:[%s18166_s6 + $0x2f8] ss:$20 sps:$4 sm:$0xff]   ;;  %v13837_v54 = vld [vmem:[%s18166_s6 + $0x260] ss:$20 sps:$4 sm:$0xff]  }
 0x3c7   : > { %14094 = vpow2.f32 %v11382_v60  ;;  %v6852_v16 = vadd.f32 %v12255_v23, %v6804_v58  ;;  %10011 = vmatpush1.bf16.msra.mxu1 %v13792_v27  ;;  %10156 = vmatpush1.bf16.msra.mxu0 %v13795_v4  ;;  %v13836_v46 = vld [vmem:[%s18166_s6 + $0x2fc] ss:$20 sps:$4 sm:$0xff]   ;;  %v13839_v3 = vld [vmem:[%s18166_s6 + $0x264] ss:$20 sps:$4 sm:$0xff]   ;;  %v13845_v10 = vld [vmem:[%s18166_s6 + $0x28c] ss:$20 sps:$4 sm:$0xff]  }
 0x3c8   : > { %10012 = vmatprep.subr.bf16.mxu1 %v13800_v55  ;;  %10157 = vmatprep.subr.bf16.mxu0 %v13803_v56  ;;  %v13842_v27 = vld [vmem:[%s18166_s6 + $0x324] ss:$20 sps:$4 sm:$0xff]   ;;  %v13840_v44 = vld [vmem:[%s18166_s6 + $0x320] ss:$20 sps:$4 sm:$0xff]   ;;  %v13843_v45 = vld [vmem:[%s18166_s6 + $0x288] ss:$20 sps:$4 sm:$0xff]  }
 0x3c9   : > { %v7451_v18 = vadd.f32 %v16359_v7, %v6852_v16  ;;  %v13848_v24 = vld [vmem:[%s18166_s6 + $0x34c] ss:$20 sps:$4 sm:$0xff]   ;;  %v13851_v55 = vld [vmem:[%s18166_s6 + $0x2b4] ss:$20 sps:$4 sm:$0xff]   ;;  %v13849_v30 = vld [vmem:[%s18166_s6 + $0x2b0] ss:$20 sps:$4 sm:$0xff]  }
 0x3ca   : > { %v13846_v56 = vld [vmem:[%s18166_s6 + $0x348] ss:$20 sps:$4 sm:$0xff]   ;;  %v13852_v16 = vld [vmem:[%s18166_s6 + $0x370] ss:$20 sps:$4 sm:$0xff]  }
 0x3cb   : > { %v11387_v63 = vmul.f32 -1.442695, %v7451_v18  ;;  %10013 = vmatpush1.bf16.msra.mxu1 %v13798_v13  ;;  %10158 = vmatpush1.bf16.msra.mxu0 %v13801_v57  ;;  %v13854_v60 = vld [vmem:[%s18166_s6 + $0x374] ss:$20 sps:$4 sm:$0xff]   ;;  %v13857_v58 = vld [vmem:[%s18166_s6 + $0x2dc] ss:$20 sps:$4 sm:$0xff]  }
 0x3cc   : > { %10014 = vmatprep.subr.bf16.mxu1 %v13806_v9  ;;  %10159 = vmatprep.subr.bf16.mxu0 %v13809_v12  ;;  %v13855_v13 = vld [vmem:[%s18166_s6 + $0x2d8] ss:$20 sps:$4 sm:$0xff]   ;;  %v13860_v57 = vld [vmem:[%s18166_s6 + $0x39c] ss:$20 sps:$4 sm:$0xff]   ;;  %v13861_v18 = vld [vmem:[%s18166_s6 + $0x300] ss:$20 sps:$4 sm:$0xff]  }
 0x3cd   : > { %14096 = vpow2.f32 %v11387_v63  ;;  %v13863_v9 = vld [vmem:[%s18166_s6 + $0x304] ss:$20 sps:$4 sm:$0xff]  }
 0x3ce   : > { %v13858_v12 = vld [vmem:[%s18166_s6 + $0x398] ss:$20 sps:$4 sm:$0xff]  }
 0x3cf   : > { %v14093_v23 = vpop.eup %14092  ;;  %10015 = vmatpush1.bf16.msra.mxu1 %v13804_v17  ;;  %10160 = vmatpush1.bf16.msra.mxu0 %v13807_v20  ;;  %v13866_v63 = vld [vmem:[%s18166_s6 + $0x3c4] ss:$20 sps:$4 sm:$0xff]   ;;  %v13869_v17 = vld [vmem:[%s18166_s6 + $0x32c] ss:$20 sps:$4 sm:$0xff]  }
 0x3d0   : > { %v7501_v53 = vadd.f32 1.0, %v14093_v23  ;;  %10016 = vmatprep.subr.bf16.mxu1 %v13812_v1  ;;  %10161 = vmatprep.subr.bf16.mxu0 %v13815_v19  ;;  %v13864_v20 = vld [vmem:[%s18166_s6 + $0x3c0] ss:$20 sps:$4 sm:$0xff]   ;;  %v13867_v1 = vld [vmem:[%s18166_s6 + $0x328] ss:$20 sps:$4 sm:$0xff]  }
 0x3d1   : > { %v14095_v61 = vpop.eup %14094  ;;  %v13872_v19 = vld [vmem:[%s18166_s6 + $0x3ec] ss:$20 sps:$4 sm:$0xff]   ;;  %v13875_v23 = vld [vmem:[%s18166_s6 + $0x354] ss:$20 sps:$4 sm:$0xff]  }
 0x3d2   : > { %14098 = vrcp.f32 %v7501_v53  ;;  %v7506_v48 = vadd.f32 1.0, %v14095_v61  ;;  %v13878_v53 = vld [vmem:[%s18166_s6 + $0x414] ss:$20 sps:$4 sm:$0xff]   ;;  %v13879_v61 = vld [vmem:[%s18166_s6 + $0x378] ss:$20 sps:$4 sm:$0xff]  }
 0x3d3   : > { %10017 = vmatpush1.bf16.msra.mxu1 %v13810_v26  ;;  %10162 = vmatpush1.bf16.msra.mxu0 %v13813_v49  ;;  %v13870_v26 = vld [vmem:[%s18166_s6 + $0x3e8] ss:$20 sps:$4 sm:$0xff]   ;;  %v13873_v49 = vld [vmem:[%s18166_s6 + $0x350] ss:$20 sps:$4 sm:$0xff]  }
 0x3d4   : > { %14100 = vrcp.f32 %v7506_v48  ;;  %10037 = vmatprep.subr.bf16.mxu1 %v13818_v31  ;;  %10163 = vmatprep.subr.bf16.mxu0 %v13821_v37  ;;  %v13881_v31 = vld [vmem:[%s18166_s6 + $0x37c] ss:$20 sps:$4 sm:$0xff]  }
 0x3d5   : > { %v13876_v37 = vld [vmem:[%s18166_s6 + $0x410] ss:$20 sps:$4 sm:$0xff]  }
 0x3d6   : > { %10019 = vmatmul.mubr.bf16.vlgmr.msra.gmra.mrb[112].mxu1 %v15118_v36  ;;  %v13884_v48 = vld [vmem:[%s18166_s6 + $0x43c] ss:$20 sps:$4 sm:$0xff]  }
 0x3d7   : > { %v14097_v41 = vpop.eup %14096  ;;  %10038 = vmatpush1.bf16.msra.mxu1 %v13816_v29  ;;  %10164 = vmatpush1.bf16.msra.mxu0 %v13819_v39  ;;  %v13887_v29 = vld [vmem:[%s18166_s6 + $0x3a4] ss:$20 sps:$4 sm:$0xff]  }
 0x3d8   : > { %v7511_v21 = vadd.f32 1.0, %v14097_v41  ;;  %10039 = vmatprep.subr.bf16.mxu1 %v13824_v38  ;;  %10165 = vmatprep.subr.bf16.mxu0 %v13827_v40  ;;  %v13882_v39 = vld [vmem:[%s18166_s6 + $0x438] ss:$20 sps:$4 sm:$0xff]   ;;  %v13885_v38 = vld [vmem:[%s18166_s6 + $0x3a0] ss:$20 sps:$4 sm:$0xff]  }
 0x3d9   : > { %10028 = vmatprep.mubr.bf16.mxu1 %v15092_v5  ;;  %v13890_v40 = vld [vmem:[%s18166_s6 + $0x464] ss:$20 sps:$4 sm:$0xff]   ;;  %v13893_v41 = vld [vmem:[%s18166_s6 + $0x3cc] ss:$20 sps:$4 sm:$0xff]  }
 0x3da   : > { %14102 = vrcp.f32 %v7511_v21  ;;  %v13896_v21 = vld [vmem:[%s18166_s6 + $0x48c] ss:$20 sps:$4 sm:$0xff]  }
 0x3db   : > { %10040 = vmatpush1.bf16.msra.mxu1 %v13822_v42  ;;  %10166 = vmatpush1.bf16.msra.mxu0 %v13825_v25  ;;  %v13888_v42 = vld [vmem:[%s18166_s6 + $0x460] ss:$20 sps:$4 sm:$0xff]   ;;  %v13891_v25 = vld [vmem:[%s18166_s6 + $0x3c8] ss:$20 sps:$4 sm:$0xff]  }
 0x3dc   : > { %v14099_v8 = vpop.eup %14098  ;;  %10041 = vmatprep.subr.bf16.mxu1 %v13830_v50  ;;  %10167 = vmatprep.subr.bf16.mxu0 %v13833_v35  ;;  %v13899_v50 = vld [vmem:[%s18166_s6 + $0x3f4] ss:$20 sps:$4 sm:$0xff]  }
 0x3dd   : > { %11392 = vst.msk [vmem:[%s16257_s14 + $0x98] sm:$0xff] %vm7424_vm2, %v14099_v8  ;;  %v13894_v35 = vld [vmem:[%s18166_s6 + $0x488] ss:$20 sps:$4 sm:$0xff]  }
 0x3de   : > { %v14101_v0 = vpop.eup %14100  ;;  %10029 = vmatmul.mubr.bf16.gmra.mrb[116].mxu1 %v15109_v28  ;;  %v13905_v8 = vld [vmem:[%s18166_s6 + $0x41c] ss:$20 sps:$4 sm:$0xff]  }
 0x3df   : > { %11397 = vst.msk [vmem:[%s16257_s14 + $0xc0] sm:$0xff] %vm7424_vm2, %v14101_v0  ;;  %10042 = vmatpush1.bf16.msra.mxu1 %v13828_v32  ;;  %10168 = vmatpush1.bf16.msra.mxu0 %v13831_v59  ;;  %v13897_v32 = vld [vmem:[%s18166_s6 + $0x3f0] ss:$20 sps:$4 sm:$0xff]   ;;  %v13902_v59 = vld [vmem:[%s18166_s6 + $0x4b4] ss:$20 sps:$4 sm:$0xff]  }
 0x3e0   : > { %10043 = vmatprep.subr.bf16.mxu1 %v13836_v46  ;;  %10169 = vmatprep.subr.bf16.mxu0 %v13839_v3  ;;  %v13900_v46 = vld [vmem:[%s18166_s6 + $0x4b0] ss:$20 sps:$4 sm:$0xff]   ;;  %v13903_v3 = vld [vmem:[%s18166_s6 + $0x418] ss:$20 sps:$4 sm:$0xff]  }
 0x3e1   : > { %10069 = vmatprep.mubr.bf16.mxu1 %v15160_v51  ;;  %v13908_v0 = vld [vmem:[%s18166_s6 + $0x4dc] ss:$20 sps:$4 sm:$0xff]  }
 0x3e3   : > { %10044 = vmatpush1.bf16.msra.mxu1 %v13834_v47  ;;  %10170 = vmatpush1.bf16.msra.mxu0 %v13837_v54  ;;  %v13911_v47 = vld [vmem:[%s18166_s6 + $0x444] ss:$20 sps:$4 sm:$0xff]  }
 0x3e4   : > { %v14103_v4 = vpop.eup %14102  ;;  %10045 = vmatprep.subr.bf16.mxu1 %v13842_v27  ;;  %10190 = vmatprep.subr.bf16.mxu0 %v13845_v10  ;;  %v13906_v54 = vld [vmem:[%s18166_s6 + $0x4d8] ss:$20 sps:$4 sm:$0xff]   ;;  %v13909_v27 = vld [vmem:[%s18166_s6 + $0x440] ss:$20 sps:$4 sm:$0xff]  }
 0x3e5   : > { %11402 = vst.msk [vmem:[%s16257_s14 + $0xe8] sm:$0x1] %vm7435_vm3, %v14103_v4  ;;  %v13914_v10 = vld [vmem:[%s18166_s6 + $0x504] ss:$20 sps:$4 sm:$0xff]   ;;  %v13915_v4 = vld [vmem:[%s18166_s6 + $0x468] ss:$20 sps:$4 sm:$0xff]  }
 0x3e6   : > { %10172 = vmatmul.mubr.bf16.vlgmr.msra.gmra.mrb[116].mxu0 %v15118_v36 }
 0x3e7   : > { %10046 = vmatpush1.bf16.msra.mxu1 %v13840_v44  ;;  %10191 = vmatpush1.bf16.msra.mxu0 %v13843_v45  ;;  %v13917_v44 = vld [vmem:[%s18166_s6 + $0x46c] ss:$20 sps:$4 sm:$0xff]  }
 0x3e8   : > { %10047 = vmatprep.subr.bf16.mxu1 %v13848_v24  ;;  %10192 = vmatprep.subr.bf16.mxu0 %v13851_v55  ;;  %v13912_v45 = vld [vmem:[%s18166_s6 + $0x500] ss:$20 sps:$4 sm:$0xff]  }
 0x3e9   : > { %10181 = vmatprep.mubr.bf16.mxu0 %v15092_v5  ;;  %v13920_v24 = vld [vmem:[%s18166_s6 + $0x52c] ss:$20 sps:$4 sm:$0xff]   ;;  %v13923_v55 = vld [vmem:[%s18166_s6 + $0x494] ss:$20 sps:$4 sm:$0xff]  }
 0x3eb   : > { %10048 = vmatpush1.bf16.msra.mxu1 %v13846_v56  ;;  %10193 = vmatpush1.bf16.msra.mxu0 %v13849_v30  ;;  %v13918_v56 = vld [vmem:[%s18166_s6 + $0x528] ss:$20 sps:$4 sm:$0xff]   ;;  %v13921_v30 = vld [vmem:[%s18166_s6 + $0x490] ss:$20 sps:$4 sm:$0xff]  }
 0x3ec   : > { %10049 = vmatprep.subr.bf16.mxu1 %v13854_v60  ;;  %10194 = vmatprep.subr.bf16.mxu0 %v13857_v58  ;;  %v13926_v60 = vld [vmem:[%s18166_s6 + $0x554] ss:$20 sps:$4 sm:$0xff]   ;;  %v13929_v58 = vld [vmem:[%s18166_s6 + $0x4bc] ss:$20 sps:$4 sm:$0xff]  }
 0x3ee   : > { %10182 = vmatmul.mubr.bf16.gmra.mrb[120].mxu0 %v15109_v28 }
 0x3ef   : > { %10050 = vmatpush1.bf16.msra.mxu1 %v13852_v16  ;;  %10195 = vmatpush1.bf16.msra.mxu0 %v13855_v13  ;;  %v13924_v16 = vld [vmem:[%s18166_s6 + $0x550] ss:$20 sps:$4 sm:$0xff]   ;;  %v13927_v13 = vld [vmem:[%s18166_s6 + $0x4b8] ss:$20 sps:$4 sm:$0xff]  }
 0x3f0   : > { %10051 = vmatprep.subr.bf16.mxu1 %v13860_v57  ;;  %10196 = vmatprep.subr.bf16.mxu0 %v13863_v9  ;;  %v13932_v57 = vld [vmem:[%s18166_s6 + $0x57c] ss:$20 sps:$4 sm:$0xff]   ;;  %v13935_v9 = vld [vmem:[%s18166_s6 + $0x4e4] ss:$20 sps:$4 sm:$0xff]  }
 0x3f1   : > { %10222 = vmatprep.mubr.bf16.mxu0 %v15160_v51 }
 0x3f3   : > { %10052 = vmatpush1.bf16.msra.mxu1 %v13858_v12  ;;  %10197 = vmatpush1.bf16.msra.mxu0 %v13861_v18  ;;  %v13930_v12 = vld [vmem:[%s18166_s6 + $0x578] ss:$20 sps:$4 sm:$0xff]   ;;  %v13933_v18 = vld [vmem:[%s18166_s6 + $0x4e0] ss:$20 sps:$4 sm:$0xff]  }
 0x3f4   : > { %10053 = vmatprep.subr.bf16.mxu1 %v13866_v63  ;;  %10198 = vmatprep.subr.bf16.mxu0 %v13869_v17  ;;  %v13938_v63 = vld [vmem:[%s18166_s6 + $0x50c] ss:$20 sps:$4 sm:$0xff]   ;;  %v13942_v17 = vld [vmem:[%s18166_s6 + $0x150] ss:$20 sps:$4 sm:$0xff]  }
 0x3f7   : > { %10054 = vmatpush1.bf16.msra.mxu1 %v13864_v20  ;;  %10199 = vmatpush1.bf16.msra.mxu0 %v13867_v1  ;;  %v13936_v20 = vld [vmem:[%s18166_s6 + $0x508] ss:$20 sps:$4 sm:$0xff]   ;;  %v13943_v1 = vld [vmem:[%s18166_s6 + $0x10] ss:$20 sps:$4 sm:$0xff]  }
 0x3f8   : > { %10055 = vmatprep.subr.bf16.mxu1 %v13872_v19  ;;  %10200 = vmatprep.subr.bf16.mxu0 %v13875_v23  ;;  %v13941_v19 = vld [vmem:[%s18166_s6 + $0x534] ss:$20 sps:$4 sm:$0xff]   ;;  %v13947_v23 = vld [vmem:[%s18166_s6 + $0x178] ss:$20 sps:$4 sm:$0xff]  }
 0x3fb   : > { %10056 = vmatpush1.bf16.msra.mxu1 %v13870_v26  ;;  %10201 = vmatpush1.bf16.msra.mxu0 %v13873_v49  ;;  %v13939_v26 = vld [vmem:[%s18166_s6 + $0x530] ss:$20 sps:$4 sm:$0xff]   ;;  %v13948_v49 = vld [vmem:[%s18166_s6 + $0x38] ss:$20 sps:$4 sm:$0xff]  }
 0x3fc   : > { %10057 = vmatprep.subr.bf16.mxu1 %v13878_v53  ;;  %10202 = vmatprep.subr.bf16.mxu0 %v13881_v31  ;;  %v13946_v53 = vld [vmem:[%s18166_s6 + $0x55c] ss:$20 sps:$4 sm:$0xff]   ;;  %v13952_v31 = vld [vmem:[%s18166_s6 + $0x1a0] ss:$20 sps:$4 sm:$0xff]  }
 0x3ff   : > { %10058 = vmatpush1.bf16.msra.mxu1 %v13876_v37  ;;  %10203 = vmatpush1.bf16.msra.mxu0 %v13879_v61  ;;  %v13944_v37 = vld [vmem:[%s18166_s6 + $0x558] ss:$20 sps:$4 sm:$0xff]   ;;  %v13953_v61 = vld [vmem:[%s18166_s6 + $0x60] ss:$20 sps:$4 sm:$0xff]  }
 0x400   : > { %10059 = vmatprep.subr.bf16.mxu1 %v13884_v48  ;;  %10204 = vmatprep.subr.bf16.mxu0 %v13887_v29  ;;  %v13951_v48 = vld [vmem:[%s18166_s6 + $0x584] ss:$20 sps:$4 sm:$0xff]   ;;  %v13954_v29 = vld [vmem:[%s18166_s6 + $0x1c8] ss:$20 sps:$4 sm:$0xff]  }
 0x403   : > { %10060 = vmatpush1.bf16.msra.mxu1 %v13882_v39  ;;  %10205 = vmatpush1.bf16.msra.mxu0 %v13885_v38  ;;  %v13949_v39 = vld [vmem:[%s18166_s6 + $0x580] ss:$20 sps:$4 sm:$0xff]   ;;  %v13956_v38 = vld [vmem:[%s18166_s6 + $0x88] ss:$20 sps:$4 sm:$0xff]  }
 0x404   : > { %10061 = vmatprep.subr.bf16.mxu1 %v13890_v40  ;;  %10206 = vmatprep.subr.bf16.mxu0 %v13893_v41  ;;  %v13955_v40 = vld [vmem:[%s18166_s6 + $0x3d0] ss:$20 sps:$4 sm:$0xff]  }
 0x405   : > { %v13958_v41 = vld [vmem:[%s18166_s6 + $0x1f0] ss:$20 sps:$4 sm:$0xff]  }
 0x407   : > { %10062 = vmatpush1.bf16.msra.mxu1 %v13888_v42  ;;  %10207 = vmatpush1.bf16.msra.mxu0 %v13891_v25  ;;  %v13957_v42 = vld [vmem:[%s18166_s6 + $0x290] ss:$20 sps:$4 sm:$0xff]  }
 0x408   : > { %10063 = vmatprep.subr.bf16.mxu1 %v13896_v21  ;;  %10208 = vmatprep.subr.bf16.mxu0 %v13899_v50  ;;  %v13960_v25 = vld [vmem:[%s18166_s6 + $0xb0] ss:$20 sps:$4 sm:$0xff]   ;;  %v13959_v21 = vld [vmem:[%s18166_s6 + $0x3f8] ss:$20 sps:$4 sm:$0xff]  }
 0x409   : > { %v13961_v50 = vld [vmem:[%s18166_s6 + $0x2b8] ss:$20 sps:$4 sm:$0xff]  }
 0x40b   : > { %10064 = vmatpush1.bf16.msra.mxu1 %v13894_v35  ;;  %10209 = vmatpush1.bf16.msra.mxu0 %v13897_v32  ;;  %v13964_v35 = vld [vmem:[%s18166_s6 + $0xd8] ss:$20 sps:$4 sm:$0xff]   ;;  %v13963_v32 = vld [vmem:[%s18166_s6 + $0x420] ss:$20 sps:$4 sm:$0xff]  }
 0x40c   : > { %10065 = vmatprep.subr.bf16.mxu1 %v13902_v59  ;;  %10210 = vmatprep.subr.bf16.mxu0 %v13905_v8  ;;  %v13966_v59 = vld [vmem:[%s18166_s6 + $0x240] ss:$20 sps:$4 sm:$0xff]  }
 0x40d   : > { %v13965_v8 = vld [vmem:[%s18166_s6 + $0x2e0] ss:$20 sps:$4 sm:$0xff]  }
 0x40f   : > { %10066 = vmatpush1.bf16.msra.mxu1 %v13900_v46  ;;  %10211 = vmatpush1.bf16.msra.mxu0 %v13903_v3  ;;  %v13968_v46 = vld [vmem:[%s18166_s6 + $0x100] ss:$20 sps:$4 sm:$0xff]   ;;  %v13970_v3 = vld [vmem:[%s18166_s6 + $0x268] ss:$20 sps:$4 sm:$0xff]  }
 0x410   : > { %10067 = vmatprep.subr.bf16.mxu1 %v13908_v0  ;;  %10212 = vmatprep.subr.bf16.mxu0 %v13911_v47  ;;  %v13969_v0 = vld [vmem:[%s18166_s6 + $0x308] ss:$20 sps:$4 sm:$0xff]  }
 0x411   : > { %v13972_v47 = vld [vmem:[%s18166_s6 + $0x128] ss:$20 sps:$4 sm:$0xff]  }
 0x413   : > { %10068 = vmatpush1.bf16.msra.mxu1 %v13906_v54  ;;  %10213 = vmatpush1.bf16.msra.mxu0 %v13909_v27  ;;  %v13971_v54 = vld [vmem:[%s18166_s6 + $0x470] ss:$20 sps:$4 sm:$0xff]  }
 0x414   : > { %10088 = vmatprep.subr.bf16.mxu1 %v13914_v10  ;;  %10214 = vmatprep.subr.bf16.mxu0 %v13917_v44  ;;  %v13975_v27 = vld [vmem:[%s18166_s6 + $0x510] ss:$20 sps:$4 sm:$0xff]   ;;  %v13974_v44 = vld [vmem:[%s18166_s6 + $0x498] ss:$20 sps:$4 sm:$0xff]  }
 0x415   : > { %v13973_v10 = vld [vmem:[%s18166_s6 + $0x330] ss:$20 sps:$4 sm:$0xff]  }
 0x416   : > { %10070 = vmatmul.mubr.bf16.vlgmr.msra.gmra.mrb[112].mxu1 %v15331_v62 }
 0x417   : > { %10089 = vmatpush1.bf16.msra.mxu1 %v13912_v45  ;;  %10215 = vmatpush1.bf16.msra.mxu0 %v13915_v4  ;;  %v13978_v45 = vld [vmem:[%s18166_s6 + $0x538] ss:$20 sps:$4 sm:$0xff]   ;;  %v13977_v4 = vld [vmem:[%s18166_s6 + $0x4c0] ss:$20 sps:$4 sm:$0xff]  }
 0x418   : > { %10090 = vmatprep.subr.bf16.mxu1 %v13920_v24  ;;  %10216 = vmatprep.subr.bf16.mxu0 %v13923_v55  ;;  %v13981_v24 = vld [vmem:[%s18166_s6 + $0x560] ss:$20 sps:$4 sm:$0xff]  }
 0x419   : > { %10079 = vmatprep.mubr.bf16.mxu1 %v15343_v2 }
 0x41b   : > { %10091 = vmatpush1.bf16.msra.mxu1 %v13918_v56  ;;  %10217 = vmatpush1.bf16.msra.mxu0 %v13921_v30 }
 0x41c   : > { %10092 = vmatprep.subr.bf16.mxu1 %v13926_v60  ;;  %10218 = vmatprep.subr.bf16.mxu0 %v13929_v58 }
 0x41e   : > { %10080 = vmatmul.mubr.bf16.gmra.mrb[116].mxu1 %v15361_v11 }
 0x41f   : > { %10093 = vmatpush1.bf16.msra.mxu1 %v13924_v16  ;;  %10219 = vmatpush1.bf16.msra.mxu0 %v13927_v13  ;;  %v13979_v16 = vld [vmem:[%s18166_s6 + $0x380] ss:$20 sps:$4 sm:$0xff]  }
 0x420   : > { %10094 = vmatprep.subr.bf16.mxu1 %v13932_v57  ;;  %10220 = vmatprep.subr.bf16.mxu0 %v13935_v9 }
 0x421   : > { %10120 = vmatprep.mubr.bf16.mxu1 %v14246_v33 }
 0x423   : > { %10095 = vmatpush1.bf16.msra.mxu1 %v13930_v12  ;;  %10221 = vmatpush1.bf16.msra.mxu0 %v13933_v18  ;;  %v13983_v18 = vld [vmem:[%s18166_s6 + $0x588] ss:$20 sps:$4 sm:$0xff]  }
 0x424   : > { %10241 = vmatprep.subr.bf16.mxu0 %v13938_v63  ;;  %12147 = vmatprep.subr.bf16.mxu1 %v13942_v17 }
 0x426   : > { %11799 = vmatmul.mubr.msk.bf16.vlgmr.msra.gmra.mrb[112].mxu1 %vm1727_vm0, %v15394_v34  ;;  %10223 = vmatmul.mubr.bf16.vlgmr.msra.gmra.mrb[116].mxu0 %v15331_v62 }
 0x427   : > { %10242 = vmatpush1.bf16.msra.mxu0 %v13936_v20  ;;  %12148 = vmatpush3.bf16.msra.mxu1 %v13943_v1 }
 0x428   : > { %10243 = vmatprep.subr.bf16.mxu0 %v13941_v19  ;;  %10130 = vmatprep.mubr.bf16.mxu1 %v14246_v33 }
 0x429   : > { %10232 = vmatprep.mubr.bf16.mxu0 %v15343_v2  ;;  %12149 = vmatprep.subr.bf16.mxu1 %v13947_v23 }
 0x42b   : > { %10244 = vmatpush1.bf16.msra.mxu0 %v13939_v26  ;;  %12150 = vmatpush3.bf16.msra.mxu1 %v13948_v49 }
 0x42c   : > { %10245 = vmatprep.subr.bf16.mxu0 %v13946_v53  ;;  %12151 = vmatprep.subr.bf16.mxu1 %v13952_v31 }
 0x42e   : > { %11800 = vmatmul.mubr.msk.bf16.gmra.mrb[116].mxu1 %vm1727_vm0, %v15422_v43  ;;  %10233 = vmatmul.mubr.bf16.gmra.mrb[120].mxu0 %v15361_v11 }
 0x42f   : > { %10246 = vmatpush1.bf16.msra.mxu0 %v13944_v37  ;;  %12152 = vmatpush3.bf16.msra.mxu1 %v13953_v61 }
 0x430   : > { %10247 = vmatprep.subr.bf16.mxu0 %v13951_v48  ;;  %10273 = vmatprep.mubr.bf16.mxu0 %v14246_v33  ;;  %v13982_v48 = vld [vmem:[%s18166_s6 + $0x3a8] ss:$20 sps:$4 sm:$0xff]  }
 0x431   : > { %12153 = vmatprep.subr.bf16.mxu1 %v13954_v29  ;;  %10324 = vmatprep.mubr.bf16.mxu1 %v14943_v22  ;;  %v13962_v22 = vld [vmem:[%s18166_s6 + $0x218] ss:$20 sps:$4 sm:$0xff]  }
 0x433   : > { %10248 = vmatpush1.bf16.msra.mxu0 %v13949_v39  ;;  %12154 = vmatpush3.bf16.msra.mxu1 %v13956_v38 }
 0x434   : > { %12175 = vmatprep.subr.bf16.mxu0 %v13955_v40  ;;  %12155 = vmatprep.subr.bf16.mxu1 %v13958_v41 }
 0x436   : > { %11801 = vmatmul.mubr.msk.bf16.vlgmr.msra.gmra.mrb[116].mxu0 %vm1727_vm0, %v15394_v34 }
 0x437   : > { %12176 = vmatpush3.bf16.msra.mxu0 %v13957_v42  ;;  %12156 = vmatpush3.bf16.msra.mxu1 %v13960_v25 }
 0x438   : > { %12177 = vmatprep.subr.bf16.mxu0 %v13959_v21  ;;  %10283 = vmatprep.mubr.bf16.mxu0 %v14246_v33  ;;  %v13967_v33 = vld [vmem:[%s18166_s6 + $0x448] ss:$20 sps:$4 sm:$0xff]  }
 0x439   : > { %12157 = vmatprep.subr.bf16.mxu1 %v13962_v22 }
 0x43b   : > { %12178 = vmatpush3.bf16.msra.mxu0 %v13961_v50  ;;  %12158 = vmatpush3.bf16.msra.mxu1 %v13964_v35 }
 0x43c   : > { %12179 = vmatprep.subr.bf16.mxu0 %v13963_v32  ;;  %12159 = vmatprep.subr.bf16.mxu1 %v13966_v59 }
 0x43e   : > { %11802 = vmatmul.mubr.msk.bf16.gmra.mrb[120].mxu0 %vm1727_vm0, %v15422_v43 }
 0x43f   : > { %12180 = vmatpush3.bf16.msra.mxu0 %v13965_v8  ;;  %12160 = vmatpush3.bf16.msra.mxu1 %v13968_v46 }
 0x440   : > { %12181 = vmatprep.subr.bf16.mxu0 %v13967_v33  ;;  %12161 = vmatprep.subr.bf16.mxu1 %v13970_v3 }
 0x441   : > { %10372 = vmatprep.mubr.bf16.mxu0 %v15160_v51  ;;  %v13976_v51 = vld [vmem:[%s18166_s6 + $0x358] ss:$20 sps:$4 sm:$0xff]  }
 0x443   : > { %12182 = vmatpush3.bf16.msra.mxu0 %v13969_v0  ;;  %12162 = vmatpush3.bf16.msra.mxu1 %v13972_v47 }
 0x444   : > { %12183 = vmatprep.subr.bf16.mxu0 %v13971_v54  ;;  %12269 = vmatprep.subr.bf16.mxu1 %v13975_v27 }
 0x446   : > { %10325 = vmatmul.mubr.bf16.vlgmr.msra.gmra.mrb[120].mxu1 %v15118_v36 }
 0x447   : > { %12184 = vmatpush3.bf16.msra.mxu0 %v13973_v10  ;;  %12270 = vmatpush3.bf16.msra.mxu1 %v13975_v27 }
 0x448   : > { %12185 = vmatprep.subr.bf16.mxu0 %v13974_v44  ;;  %12271 = vmatprep.subr.bf16.mxu1 %v13978_v45 }
 0x449   : > { %v8630_v55 = vpop.f32.mrb[96].mxu0  ;;  %v8783_v56 = vpop.f32.mrb[96].mxu1  ;;  %10332 = vmatprep.mubr.bf16.mxu1 %v15092_v5  ;;  %v13980_v5 = vld [vmem:[%s18166_s6 + $0x4e8] ss:$20 sps:$4 sm:$0xff]  }
 0x44a   : > { %v12281_v36 = vadd.f32 %v8630_v55, %v16197_v14  ;;  %v12287_v30 = vadd.f32 %v8783_v56, %v16129_v6  ;;  %v8632_v60 = vpop.f32.mrb[97].mxu0  ;;  %v8785_v58 = vpop.f32.mrb[97].mxu1 }
 0x44b   : > { %v12282_v13 = vadd.f32 %v8632_v60, %v16200_v15  ;;  %v12288_v57 = vadd.f32 %v8785_v58, %v16132_v52  ;;  %v8634_v9 = vpop.f32.mrb[98].mxu0  ;;  %v8787_v12 = vpop.f32.mrb[98].mxu1  ;;  %12186 = vmatpush3.bf16.msra.mxu0 %v13976_v51  ;;  %12272 = vmatpush3.bf16.msra.mxu1 %v13978_v45 }
 0x44c   : > { %v11589_v63 = vmul.f32 -1.442695, %v12281_v36  ;;  %v11591_v17 = vmul.f32 -1.442695, %v12287_v30  ;;  %v12283_v20 = vadd.f32 %v8634_v9, %v16197_v14  ;;  %v12289_v1 = vadd.f32 %v8787_v12, %v16129_v6  ;;  %v8636_v19 = vpop.f32.mrb[99].mxu0  ;;  %v8789_v23 = vpop.f32.mrb[99].mxu1  ;;  %12187 = vmatprep.subr.bf16.mxu0 %v13977_v4  ;;  %12273 = vmatprep.subr.bf16.mxu1 %v13981_v24 }
 0x44d   : > { %v11590_v26 = vmul.f32 -1.442695, %v12282_v13  ;;  %v11592_v49 = vmul.f32 -1.442695, %v12288_v57  ;;  %v12284_v53 = vadd.f32 %v8636_v19, %v16200_v15  ;;  %v12290_v31 = vadd.f32 %v8789_v23, %v16132_v52 }
 0x44e   : > { %14104 = vpow2.f32 %v11589_v63  ;;  %v11594_v37 = vmul.f32 -1.442695, %v12283_v20  ;;  %10333 = vmatmul.mubr.bf16.gmra.mrb[124].mxu1 %v15109_v28  ;;  %v11596_v61 = vmul.f32 -1.442695, %v12289_v1 }
 0x44f   : > { %14106 = vpow2.f32 %v11591_v17  ;;  %12188 = vmatpush3.bf16.msra.mxu0 %v13979_v16  ;;  %12274 = vmatpush3.bf16.msra.mxu1 %v13981_v24  ;;  %v11595_v29 = vmul.f32 -1.442695, %v12284_v53  ;;  %v11597_v39 = vmul.f32 -1.442695, %v12290_v31 }
 0x450   : > { %14108 = vpow2.f32 %v11590_v26  ;;  %12189 = vmatprep.subr.bf16.mxu0 %v13980_v5  ;;  %12275 = vmatprep.subr.bf16.mxu1 %v13983_v18 }
 0x451   : > { %14110 = vpow2.f32 %v11592_v49  ;;  %v8640_v38 = vpop.f32.mrb[100].mxu0  ;;  %v8793_v40 = vpop.f32.mrb[100].mxu1  ;;  %12277 = vmatprep.mubr.msk.bf16.mxu1 %vm1727_vm0, %v15394_v34 }
 0x452   : > { %14112 = vpow2.f32 %v11594_v37  ;;  %v12285_v28 = vadd.f32 %v8640_v38, %v16197_v14  ;;  %v12291_v41 = vadd.f32 %v8793_v40, %v16129_v6  ;;  %v8642_v42 = vpop.f32.mrb[101].mxu0  ;;  %v8795_v25 = vpop.f32.mrb[101].mxu1 }
 0x453   : > { %14114 = vpow2.f32 %v11596_v61  ;;  %v12286_v21 = vadd.f32 %v8642_v42, %v16200_v15  ;;  %v12292_v22 = vadd.f32 %v8795_v25, %v16132_v52  ;;  %v8644_v50 = vpop.f32.mrb[102].mxu0  ;;  %v8797_v35 = vpop.f32.mrb[102].mxu1  ;;  %12190 = vmatpush3.bf16.msra.mxu0 %v13982_v48  ;;  %12276 = vmatpush3.bf16.msra.mxu1 %v13983_v18 }
 0x454   : > { %14116 = vpow2.f32 %v11595_v29  ;;  %v11599_v32 = vmul.f32 -1.442695, %v12285_v28  ;;  %v11601_v59 = vmul.f32 -1.442695, %v12291_v41  ;;  %v8645_v34 = vpop.f32.mrb[103].mxu0  ;;  %v8798_v8 = vpop.f32.mrb[103].mxu1 }
 0x455   : > { %14118 = vpow2.f32 %v11597_v39  ;;  %v11600_v46 = vmul.f32 -1.442695, %v12286_v21  ;;  %v11602_v33 = vmul.f32 -1.442695, %v12292_v22 }
 0x456   : > { %14120 = vpow2.f32 %v11599_v32  ;;  %10373 = vmatmul.mubr.bf16.vlgmr.msra.gmra.mrb[124].mxu0 %v15331_v62  ;;  %12278 = vmatmul.mubr.msk.bf16.vlgmr.msra.gmra.mrb[128].mxu1 %vm1727_vm0, %v15422_v43 }
 0x457   : > { %14122 = vpow2.f32 %v11601_v59  ;;  %10380 = vmatprep.mubr.bf16.mxu0 %v15343_v2 }
 0x458   : > { %v14105_v3 = vpop.eup %14104  ;;  %14124 = vpow2.f32 %v11600_v46 }
 0x459   : > { %v14107_v0 = vpop.eup %14106  ;;  %v8989_v47 = vadd.f32 1.0, %v14105_v3  ;;  %14126 = vpow2.f32 %v11602_v33 }
 0x45a   : > { %v14109_v54 = vpop.eup %14108  ;;  %v8991_v27 = vadd.f32 1.0, %v14107_v0 }
 0x45b   : > { %v14111_v10 = vpop.eup %14110  ;;  %14128 = vrcp.f32 %v8989_v47  ;;  %v8990_v44 = vadd.f32 1.0, %v14109_v54 }
 0x45c   : > { %v14113_v45 = vpop.eup %14112  ;;  %14130 = vrcp.f32 %v8991_v27  ;;  %v8992_v51 = vadd.f32 1.0, %v14111_v10 }
 0x45d   : > { %v14115_v62 = vpop.eup %14114  ;;  %14132 = vrcp.f32 %v8990_v44  ;;  %v8994_v4 = vadd.f32 1.0, %v14113_v45 }
 0x45e   : > { %v14117_v43 = vpop.eup %14116  ;;  %14134 = vrcp.f32 %v8992_v51  ;;  %v8996_v24 = vadd.f32 1.0, %v14115_v62  ;;  %10381 = vmatmul.mubr.bf16.gmra.mrb[128].mxu0 %v15361_v11 }
 0x45f   : > { %v14119_v2 = vpop.eup %14118  ;;  %14136 = vrcp.f32 %v8994_v4  ;;  %v8995_v55 = vadd.f32 1.0, %v14117_v43 }
 0x460   : > { %v14121_v56 = vpop.eup %14120  ;;  %14138 = vrcp.f32 %v8996_v24  ;;  %v8997_v36 = vadd.f32 1.0, %v14119_v2 }
 0x461   : > { %v14123_v30 = vpop.eup %14122  ;;  %14140 = vrcp.f32 %v8995_v55  ;;  %v8999_v60 = vadd.f32 1.0, %v14121_v56 }
 0x462   : > { %v14125_v58 = vpop.eup %14124  ;;  %14142 = vrcp.f32 %v8997_v36  ;;  %v9001_v16 = vadd.f32 1.0, %v14123_v30 }
 0x463   : > { %v14127_v13 = vpop.eup %14126  ;;  %14144 = vrcp.f32 %v8999_v60  ;;  %v9000_v57 = vadd.f32 1.0, %v14125_v58 }
 0x464   : > { %14146 = vrcp.f32 %v9001_v16  ;;  %v9002_v11 = vadd.f32 1.0, %v14127_v13 }
 0x465   : > { %v14129_v9 = vpop.eup %14128  ;;  %14148 = vrcp.f32 %v9000_v57 }
 0x466   : > { %v14131_v12 = vpop.eup %14130  ;;  %11604 = vst [vmem:[%s16257_s14 + $0xf0] sm:$0xff] %v14129_v9  ;;  %14150 = vrcp.f32 %v9002_v11 }
 0x467   : > { %v14133_v5 = vpop.eup %14132  ;;  %11606 = vst [vmem:[%s16257_s14 + $0x100] sm:$0xff] %v14131_v12 }
 0x468   : > { %v14135_v18 = vpop.eup %14134  ;;  %11605 = vst [vmem:[%s16257_s14 + $0xf8] sm:$0xff] %v14133_v5 }
 0x469   : > { %v14137_v63 = vpop.eup %14136  ;;  %11607 = vst [vmem:[%s16257_s14 + $0x108] sm:$0xff] %v14135_v18  ;;  %v12101_v17 = vpop.f32.mrb[104].mxu0 }
 0x46a   : > { %v12129_v20 = vpop.f32.mrb[104].mxu1  ;;  %v14139_v1 = vpop.eup %14138  ;;  %11609 = vst [vmem:[%s16257_s14 + $0x118] sm:$0xff] %v14137_v63 }
 0x46b   : > { %v12102_v19 = vpop.f32.mrb[105].mxu0  ;;  %v12130_v23 = vpop.f32.mrb[105].mxu1  ;;  %11611 = vst [vmem:[%s16257_s14 + $0x128] sm:$0xff] %v14139_v1 }
 0x46c   : > { %v14141_v26 = vpop.eup %14140  ;;  %v12103_v49 = vadd.f32 %v12102_v19, %v12101_v17  ;;  %v12104_v53 = vpop.f32.mrb[106].mxu0  ;;  %v12131_v31 = vadd.f32 %v12130_v23, %v12129_v20 }
 0x46d   : > { %v12132_v37 = vpop.f32.mrb[106].mxu1  ;;  %v14143_v61 = vpop.eup %14142  ;;  %11610 = vst [vmem:[%s16257_s14 + $0x120] sm:$0xff] %v14141_v26 }
 0x46e   : > { %v12105_v48 = vpop.f32.mrb[107].mxu0  ;;  %v12133_v29 = vpop.f32.mrb[107].mxu1  ;;  %11612 = vst [vmem:[%s16257_s14 + $0x130] sm:$0xff] %v14143_v61  ;;  %v8835_v38 = vadd.f32 %v12103_v49, %v16359_v7 }
 0x46f   : > { %v14145_v39 = vpop.eup %14144  ;;  %v12106_v40 = vadd.f32 %v12105_v48, %v12104_v53  ;;  %v12134_v28 = vadd.f32 %v12133_v29, %v12132_v37 }
 0x470   : > { %v14147_v41 = vpop.eup %14146  ;;  %11614 = vst [vmem:[%s16257_s14 + $0x140] sm:$0x1] %v14145_v39  ;;  %v8883_v21 = vadd.f32 %v12131_v31, %v8835_v38 }
 0x471   : > { %v14149_v42 = vpop.eup %14148  ;;  %11616 = vst [vmem:[%s16257_s14 + $0x150] sm:$0x1] %v14147_v41  ;;  %v8838_v25 = vadd.f32 %v12106_v40, %v16359_v7  ;;  %v12107_v50 = vpop.f32.mrb[108].mxu0 }
 0x472   : > { %v14151_v22 = vpop.eup %14150  ;;  %11615 = vst [vmem:[%s16257_s14 + $0x148] sm:$0x1] %v14149_v42  ;;  %v12135_v35 = vpop.f32.mrb[108].mxu1 }
 0x473   : > { %11617 = vst [vmem:[%s16257_s14 + $0x158] sm:$0x1] %v14151_v22  ;;  %v8886_v32 = vadd.f32 %v12134_v28, %v8838_v25  ;;  %v12108_v59 = vpop.f32.mrb[109].mxu0  ;;  %v12136_v34 = vpop.f32.mrb[109].mxu1 }
 0x474   : > { %v12109_v8 = vadd.f32 %v12108_v59, %v12107_v50  ;;  %v12110_v46 = vpop.f32.mrb[110].mxu0  ;;  %v12137_v33 = vadd.f32 %v12136_v34, %v12135_v35  ;;  %v12138_v3 = vpop.f32.mrb[110].mxu1 }
 0x475   : > { %v12111_v0 = vpop.f32.mrb[111].mxu0  ;;  %v12139_v47 = vpop.f32.mrb[111].mxu1 }
 0x476   : > { %v8843_v54 = vadd.f32 %v12109_v8, %v16359_v7 }
 0x478   : > { %v8891_v27 = vadd.f32 %v12137_v33, %v8843_v54 }
 0x479   : > { %v12267_v10 = vpop.f32.mrb[112].mxu0 }
 0x47a   : > { %v8939_v44 = vadd.f32 %v12267_v10, %v8891_v27  ;;  %v8930_v45 = vpop.f32.mrb[113].mxu0 }
 0x47b   : > { %v8931_v51 = vadd.f32 %v8930_v45, %v8883_v21  ;;  %v12268_v62 = vpop.f32.mrb[114].mxu0 }
 0x47c   : > { %v11603_v4 = vmul.f32 -1.442695, %v8939_v44  ;;  %v8933_v43 = vpop.f32.mrb[115].mxu0 }
 0x47d   : > { %v11593_v24 = vmul.f32 -1.442695, %v8931_v51  ;;  %v8934_v2 = vadd.f32 %v8933_v43, %v8886_v32 }
 0x47e   : > { %14152 = vpow2.f32 %v11603_v4 }
 0x47f   : > { %14154 = vpow2.f32 %v11593_v24  ;;  %v11598_v55 = vmul.f32 -1.442695, %v8934_v2 }
 0x481   : > { %14156 = vpow2.f32 %v11598_v55 }
 0x488   : > { %v14153_v56 = vpop.eup %14152 }
 0x489   : > { %v14155_v36 = vpop.eup %14154  ;;  %v9003_v30 = vadd.f32 1.0, %v14153_v56 }
 0x48a   : > { %v8993_v60 = vadd.f32 1.0, %v14155_v36 }
 0x48b   : > { %v14157_v58 = vpop.eup %14156  ;;  %14158 = vrcp.f32 %v9003_v30 }
 0x48c   : > { %14160 = vrcp.f32 %v8993_v60  ;;  %v8998_v16 = vadd.f32 1.0, %v14157_v58 }
 0x48e   : > { %14162 = vrcp.f32 %v8998_v16 }
 0x495   : > { %v14159_v13 = vpop.eup %14158 }
 0x496   : > { %v14161_v57 = vpop.eup %14160  ;;  %11618 = vst.msk [vmem:[%s16257_s14 + $0x160] sm:$0x1] %vm7435_vm3, %v14159_v13 }
 0x497   : > { %11608 = vst.msk [vmem:[%s16257_s14 + $0x110] sm:$0xff] %vm7424_vm2, %v14161_v57 }
 0x498   : > { %v14163_v11 = vpop.eup %14162 }
 0x499   : > { %11613 = vst.msk [vmem:[%s16257_s14 + $0x138] sm:$0xff] %vm7424_vm2, %v14163_v11 }
 0x4f9   : > { %v10122_v9 = vpop.f32.mrb[112].mxu1 }
 0x4fa   : > { %v12293_v12 = vadd.f32 %v10122_v9, %v16197_v14  ;;  %v10124_v5 = vpop.f32.mrb[113].mxu1 }
 0x4fb   : > { %v12294_v18 = vadd.f32 %v10124_v5, %v16200_v15  ;;  %v10126_v63 = vpop.f32.mrb[114].mxu1 }
 0x4fc   : > { %v11805_v17 = vmul.f32 -1.442695, %v12293_v12  ;;  %v12295_v20 = vadd.f32 %v10126_v63, %v16197_v14  ;;  %v10128_v1 = vpop.f32.mrb[115].mxu1 }
 0x4fd   : > { %v11806_v19 = vmul.f32 -1.442695, %v12294_v18  ;;  %v12296_v23 = vadd.f32 %v10128_v1, %v16200_v15 }
 0x4fe   : > { %14164 = vpow2.f32 %v11805_v17  ;;  %v11810_v26 = vmul.f32 -1.442695, %v12295_v20 }
 0x4ff   : > { %14166 = vpow2.f32 %v11806_v19  ;;  %v11811_v49 = vmul.f32 -1.442695, %v12296_v23 }
 0x500   : > { %14168 = vpow2.f32 %v11810_v26 }
 0x501   : > { %14170 = vpow2.f32 %v11811_v49  ;;  %v10132_v53 = vpop.f32.mrb[116].mxu1 }
 0x502   : > { %v12297_v31 = vadd.f32 %v10132_v53, %v16197_v14  ;;  %v10134_v37 = vpop.f32.mrb[117].mxu1 }
 0x503   : > { %v12298_v61 = vadd.f32 %v10134_v37, %v16200_v15  ;;  %v10136_v48 = vpop.f32.mrb[118].mxu1 }
 0x504   : > { %v11815_v29 = vmul.f32 -1.442695, %v12297_v31  ;;  %v10137_v39 = vpop.f32.mrb[119].mxu1 }
 0x505   : > { %v11816_v38 = vmul.f32 -1.442695, %v12298_v61 }
 0x506   : > { %14172 = vpow2.f32 %v11815_v29 }
 0x507   : > { %14174 = vpow2.f32 %v11816_v38 }
 0x508   : > { %v14165_v40 = vpop.eup %14164 }
 0x509   : > { %v14167_v28 = vpop.eup %14166  ;;  %v10481_v41 = vadd.f32 1.0, %v14165_v40  ;;  %v10275_v42 = vpop.f32.mrb[116].mxu0 }
 0x50a   : > { %v14169_v25 = vpop.eup %14168  ;;  %v10482_v21 = vadd.f32 1.0, %v14167_v28  ;;  %v12299_v22 = vadd.f32 %v10275_v42, %v16129_v6  ;;  %v10277_v50 = vpop.f32.mrb[117].mxu0 }
 0x50b   : > { %v14171_v35 = vpop.eup %14170  ;;  %14176 = vrcp.f32 %v10481_v41  ;;  %v10486_v14 = vadd.f32 1.0, %v14169_v25  ;;  %v12300_v15 = vadd.f32 %v10277_v50, %v16132_v52  ;;  %v10279_v32 = vpop.f32.mrb[118].mxu0 }
 0x50c   : > { %14178 = vrcp.f32 %v10482_v21  ;;  %v10487_v59 = vadd.f32 1.0, %v14171_v35  ;;  %v11807_v34 = vmul.f32 -1.442695, %v12299_v22  ;;  %v12301_v8 = vadd.f32 %v10279_v32, %v16129_v6  ;;  %v10281_v46 = vpop.f32.mrb[119].mxu0 }
 0x50d   : > { %14180 = vrcp.f32 %v10486_v14  ;;  %v11808_v33 = vmul.f32 -1.442695, %v12300_v15  ;;  %v12302_v3 = vadd.f32 %v10281_v46, %v16132_v52 }
 0x50e   : > { %14182 = vrcp.f32 %v10487_v59  ;;  %v11812_v0 = vmul.f32 -1.442695, %v12301_v8 }
 0x50f   : > { %14184 = vpow2.f32 %v11807_v34  ;;  %v11813_v47 = vmul.f32 -1.442695, %v12302_v3 }
 0x510   : > { %v14173_v54 = vpop.eup %14172  ;;  %14186 = vpow2.f32 %v11808_v33 }
 0x511   : > { %v14175_v27 = vpop.eup %14174  ;;  %v10491_v10 = vadd.f32 1.0, %v14173_v54  ;;  %14188 = vpow2.f32 %v11812_v0  ;;  %v10285_v44 = vpop.f32.mrb[120].mxu0 }
 0x512   : > { %v10492_v45 = vadd.f32 1.0, %v14175_v27  ;;  %14190 = vpow2.f32 %v11813_v47  ;;  %v12303_v51 = vadd.f32 %v10285_v44, %v16129_v6  ;;  %v10287_v62 = vpop.f32.mrb[121].mxu0 }
 0x513   : > { %14192 = vrcp.f32 %v10491_v10  ;;  %v12304_v4 = vadd.f32 %v10287_v62, %v16132_v52  ;;  %v10289_v43 = vpop.f32.mrb[122].mxu0 }
 0x514   : > { %14194 = vrcp.f32 %v10492_v45  ;;  %v11817_v24 = vmul.f32 -1.442695, %v12303_v51  ;;  %v10290_v2 = vpop.f32.mrb[123].mxu0 }
 0x515   : > { %v14177_v55 = vpop.eup %14176  ;;  %v11818_v56 = vmul.f32 -1.442695, %v12304_v4 }
 0x516   : > { %v14179_v36 = vpop.eup %14178  ;;  %11820 = vst [vmem:[%s16257_s14 + $0x168] sm:$0xff] %v14177_v55  ;;  %14196 = vpow2.f32 %v11817_v24 }
 0x517   : > { %v14181_v30 = vpop.eup %14180  ;;  %11821 = vst [vmem:[%s16257_s14 + $0x170] sm:$0xff] %v14179_v36  ;;  %14198 = vpow2.f32 %v11818_v56 }
 0x518   : > { %v14183_v60 = vpop.eup %14182  ;;  %11825 = vst [vmem:[%s16257_s14 + $0x190] sm:$0xff] %v14181_v30 }
 0x519   : > { %v14185_v6 = vpop.eup %14184  ;;  %11826 = vst [vmem:[%s16257_s14 + $0x198] sm:$0xff] %v14183_v60  ;;  %v12163_v58 = vpop.f32.mrb[120].mxu1 }
 0x51a   : > { %v14187_v16 = vpop.eup %14186  ;;  %v10483_v52 = vadd.f32 1.0, %v14185_v6  ;;  %v12164_v13 = vpop.f32.mrb[121].mxu1 }
 0x51b   : > { %v14189_v57 = vpop.eup %14188  ;;  %v10484_v11 = vadd.f32 1.0, %v14187_v16  ;;  %v12165_v9 = vadd.f32 %v12164_v13, %v12163_v58  ;;  %v12166_v12 = vpop.f32.mrb[122].mxu1 }
 0x51c   : > { %v14191_v5 = vpop.eup %14190  ;;  %14200 = vrcp.f32 %v10483_v52  ;;  %v10488_v18 = vadd.f32 1.0, %v14189_v57  ;;  %v12167_v63 = vpop.f32.mrb[123].mxu1 }
 0x51d   : > { %v14193_v17 = vpop.eup %14192  ;;  %14202 = vrcp.f32 %v10484_v11  ;;  %v10489_v20 = vadd.f32 1.0, %v14191_v5  ;;  %v12168_v1 = vadd.f32 %v12167_v63, %v12166_v12  ;;  %v10327_v22 = vadd.f32 %v12165_v9, %v16359_v7 }
 0x51e   : > { %v14195_v19 = vpop.eup %14194  ;;  %11830 = vst [vmem:[%s16257_s14 + $0x1b8] sm:$0x1] %v14193_v17  ;;  %14204 = vrcp.f32 %v10488_v18 }
 0x51f   : > { %11831 = vst [vmem:[%s16257_s14 + $0x1c0] sm:$0x1] %v14195_v19  ;;  %14206 = vrcp.f32 %v10489_v20  ;;  %v10330_v34 = vadd.f32 %v12168_v1, %v16359_v7 }
 0x520   : > { %v14197_v23 = vpop.eup %14196 }
 0x521   : > { %v14199_v26 = vpop.eup %14198  ;;  %v10493_v49 = vadd.f32 1.0, %v14197_v23  ;;  %v12169_v53 = vpop.f32.mrb[124].mxu1 }
 0x522   : > { %v10494_v31 = vadd.f32 1.0, %v14199_v26  ;;  %v12170_v37 = vpop.f32.mrb[125].mxu1 }
 0x523   : > { %14208 = vrcp.f32 %v10493_v49  ;;  %v12171_v61 = vadd.f32 %v12170_v37, %v12169_v53  ;;  %v12172_v48 = vpop.f32.mrb[126].mxu1 }
 0x524   : > { %14210 = vrcp.f32 %v10494_v31  ;;  %v12173_v29 = vpop.f32.mrb[127].mxu1 }
 0x525   : > { %v10335_v44 = vadd.f32 %v12171_v61, %v16359_v7 }
 0x526   : > { %v14201_v39 = vpop.eup %14200 }
 0x527   : > { %v14203_v38 = vpop.eup %14202  ;;  %11822 = vst [vmem:[%s16257_s14 + $0x178] sm:$0xff] %v14201_v39 }
 0x528   : > { %v14205_v40 = vpop.eup %14204  ;;  %11823 = vst [vmem:[%s16257_s14 + $0x180] sm:$0xff] %v14203_v38 }
 0x529   : > { %v14207_v28 = vpop.eup %14206  ;;  %11827 = vst [vmem:[%s16257_s14 + $0x1a0] sm:$0xff] %v14205_v40  ;;  %v12191_v41 = vpop.f32.mrb[124].mxu0 }
 0x52a   : > { %v12279_v42 = vpop.f32.mrb[128].mxu1  ;;  %11828 = vst [vmem:[%s16257_s14 + $0x1a8] sm:$0xff] %v14207_v28  ;;  %v12192_v25 = vpop.f32.mrb[125].mxu0 }
 0x52b   : > { %v10422_v21 = vpop.f32.mrb[129].mxu1  ;;  %v12193_v50 = vadd.f32 %v12192_v25, %v12191_v41  ;;  %v12194_v35 = vpop.f32.mrb[126].mxu0 }
 0x52c   : > { %v12280_v14 = vpop.f32.mrb[130].mxu1  ;;  %v12195_v15 = vpop.f32.mrb[127].mxu0 }
 0x52d   : > { %v10425_v32 = vpop.f32.mrb[131].mxu1  ;;  %v14209_v59 = vpop.eup %14208  ;;  %v12196_v8 = vadd.f32 %v12195_v15, %v12194_v35  ;;  %v10375_v46 = vadd.f32 %v12193_v50, %v10327_v22 }
 0x52e   : > { %v14211_v33 = vpop.eup %14210  ;;  %11832 = vst [vmem:[%s16257_s14 + $0x1c8] sm:$0x1] %v14209_v59 }
 0x52f   : > { %11833 = vst [vmem:[%s16257_s14 + $0x1d0] sm:$0x1] %v14211_v33  ;;  %v10423_v3 = vadd.f32 %v10422_v21, %v10375_v46  ;;  %v10378_v0 = vadd.f32 %v12196_v8, %v10330_v34 }
 0x531   : > { %v11809_v47 = vmul.f32 -1.442695, %v10423_v3  ;;  %v10426_v54 = vadd.f32 %v10425_v32, %v10378_v0  ;;  %v12197_v27 = vpop.f32.mrb[128].mxu0 }
 0x532   : > { %v12198_v10 = vpop.f32.mrb[129].mxu0 }
 0x533   : > { %14212 = vpow2.f32 %v11809_v47  ;;  %v11814_v45 = vmul.f32 -1.442695, %v10426_v54  ;;  %v12199_v51 = vadd.f32 %v12198_v10, %v12197_v27  ;;  %v12200_v62 = vpop.f32.mrb[130].mxu0 }
 0x534   : > { %v12201_v4 = vpop.f32.mrb[131].mxu0 }
 0x535   : > { %14214 = vpow2.f32 %v11814_v45  ;;  %v10383_v43 = vadd.f32 %v12199_v51, %v10335_v44 }
 0x537   : > { %v10431_v24 = vadd.f32 %v12279_v42, %v10383_v43 }
 0x539   : > { %v11819_v2 = vmul.f32 -1.442695, %v10431_v24 }
 0x53b   : > { %14216 = vpow2.f32 %v11819_v2 }
 0x53d   : > { %v14213_v55 = vpop.eup %14212 }
 0x53e   : > { %v10485_v56 = vadd.f32 1.0, %v14213_v55 }
 0x53f   : > { %v14215_v36 = vpop.eup %14214 }
 0x540   : > { %14218 = vrcp.f32 %v10485_v56  ;;  %v10490_v30 = vadd.f32 1.0, %v14215_v36 }
 0x542   : > { %14220 = vrcp.f32 %v10490_v30 }
 0x545   : > { %v14217_v7 = vpop.eup %14216 }
 0x546   : > { %v10495_v60 = vadd.f32 1.0, %v14217_v7 }
 0x548   : > { %14222 = vrcp.f32 %v10495_v60 }
 0x54a   : > { %v14219_v6 = vpop.eup %14218 }
 0x54b   : > { %11824 = vst.msk [vmem:[%s16257_s14 + $0x188] sm:$0xff] %vm7424_vm2, %v14219_v6 }
 0x54c   : > { %v14221_v58 = vpop.eup %14220 }
 0x54d   : > { %11829 = vst.msk [vmem:[%s16257_s14 + $0x1b0] sm:$0xff] %vm7424_vm2, %v14221_v58 }
 0x552   : > { %v14223_v16 = vpop.eup %14222 }
 0x553   : > { %11834 = vst.msk [vmem:[%s16257_s14 + $0x1d8] sm:$0x1] %vm7435_vm3, %v14223_v16 }
 0x554 PF: > { %s18_s27 = sadd.s32 1, %s14244_s27  }
 0x555   : > { %p15_p4 = scmp.ge.s32.totalorder %s18_s27, 4  }
 0x557   :  { %17 = sbr.rel (!%p15_p4) target bundleno = 1 (0x1), region = 85 }

</bundles_post_ra>
